<compile_context>
chip_gen: v5e
topology: v5e:2x2
jax: 0.10.0
libtpu: 0.0.40
codegen_flags: <defaults>
</compile_context>

<pallas_src>
import jax
import jax.numpy as jnp
from jax.experimental import pallas as pl
from jax.experimental.pallas import tpu as pltpu

IN_K = 256     # fused input width: 200 board + 16 piece + 40 zero pad
OUT_N = 128    # fc5 output lane-padded 2 -> 128 (dense stores)


def _leaky(v):
    # LeakyReLU(0.1): for 0 < slope < 1, max(v, slope*v) == leaky_relu(v).
    return jnp.maximum(v, 0.1 * v)


def _b16(v):
    return v.astype(jnp.bfloat16)


def _dot(a, w):
    # bf16 x bf16 -> f32 accumulation on the MXU.
    return jnp.dot(a, w, preferred_element_type=jnp.float32)


def tetris_net_kernel(
    x_ref,
    # board branch (BN folded; bw1 K-padded to 256 with zero rows 200..255)
    bw1, bb1, bw2, bb2,
    # piece branch (pw1 lifted to [256,48]: only rows 200..215 nonzero)
    pw1, pb1, pw2, pb2,
    # trunk; board Linear(192,144) folded into w1h/b1, fc1 split board/piece
    w1h, w1p, b1, w2, b2, w3, b3, w4, b4,
    # fc5, N-padded to 128 lanes
    w5, b5,
    out_ref,
):
    xin = x_ref[...]                                       # [TB, 256] bf16

    # board_features: Linear(200,256)+BN+LReLU, Linear(256,192)+BN+LReLU
    # (the trailing Linear(192,144) is folded into fc1 below)
    h = _leaky(_dot(xin, bw1[...]) + bb1[...])             # [TB, 256] f32
    h = _leaky(_dot(_b16(h), bw2[...]) + bb2[...])         # [TB, 192] f32

    # piece_features: Linear(16,48)+BN+LReLU, Linear(48,24)+BN+LReLU
    p = _leaky(_dot(xin, pw1[...]) + pb1[...])             # [TB, 48]  f32
    pf = _leaky(_dot(_b16(p), pw2[...]) + pb2[...])        # [TB, 24]  f32

    # fc1 + bn1 + leaky: concat([h@bw3+bb3, pf]) @ w1 + b1 expressed as
    # h @ (bw3@w1[:144]) + pf @ w1[144:] + (b1 + bb3@w1[:144]).
    x1 = _leaky(_dot(_b16(h), w1h[...])
                + _dot(_b16(pf), w1p[...]) + b1[...])      # [TB, 128] f32
    # fc2 + bn2 + leaky, residual add (dropout = identity in eval)
    x2 = _leaky(_dot(_b16(x1), w2[...]) + b2[...]) + x1
    # fc3 / fc4 / fc5 (fc5 output lane-padded to 128, padded cols are zero)
    x3 = _leaky(_dot(_b16(x2), w3[...]) + b3[...])
    x4 = _leaky(_dot(_b16(x3), w4[...]) + b4[...])
    out_ref[...] = _dot(_b16(x4), w5[...]) + b5[...]


def _pick_tile(batch):
    # Largest batch tile that still leaves >= 2 full grid steps (keeps the
    # grid split across both v7x TensorCores); fallback 256 for small batches.
    for tb in (1024, 512, 256):
        if batch >= 2 * tb:
            return tb
    return 256


def _cost_estimate(b_padded, flat_params):
    per_row_flops = 2 * (IN_K * 256 + 256 * 192          # board branch
                         + IN_K * 48 + 48 * 24            # piece branch
                         + 192 * 128 + 24 * 128           # fc1 (folded split)
                         + 128 * 128 + 128 * 64 + 64 * 32 # fc2..fc4
                         + 32 * OUT_N)                    # fc5 (lane-padded)
    flops = b_padded * per_row_flops
    w_bytes = sum(int(p.nbytes) for p in flat_params)
    bytes_accessed = b_padded * IN_K * 2 + b_padded * OUT_N * 4 + w_bytes
    return pl.CostEstimate(flops=flops, transcendentals=0,
                           bytes_accessed=bytes_accessed)


def tetris_net_forward(x, params):
    """x: [B, 216] f32 (200 board + 16 piece features) -> [B, 2] f32."""
    B, F = x.shape
    flat = list(params)

    tb = _pick_tile(B)
    n_tiles = pl.cdiv(B, tb)
    b_padded = n_tiles * tb

    # Single fused input: pad features 216->256 and batch to the tile multiple,
    # cast once to bf16.  No separate board/piece streams.
    xin = jnp.pad(x, ((0, b_padded - B), (0, IN_K - F))).astype(jnp.bfloat16)

    # Weights/biases: constant block index -> DMA'd once, VMEM-resident
    # across grid steps (~0.4 MB total).
    weight_specs = [pl.BlockSpec(p.shape, lambda i: (0, 0)) for p in flat]

    out = pl.pallas_call(
        tetris_net_kernel,
        out_shape=jax.ShapeDtypeStruct((b_padded, OUT_N), jnp.float32),
        grid=(n_tiles,),
        in_specs=[pl.BlockSpec((tb, IN_K), lambda i: (i, 0))] + weight_specs,
        out_specs=pl.BlockSpec((tb, OUT_N), lambda i: (i, 0)),
        compiler_params=pltpu.CompilerParams(
            dimension_semantics=("parallel",)),
        cost_estimate=_cost_estimate(b_padded, flat),
    )(xin, *flat)
    return out[:B, :2]


# ---------------- parameter construction (plain JAX glue) ----------------

def _linear(key, fan_in, fan_out):
    kw, kb = jax.random.split(key)
    bound = 1.0 / jnp.sqrt(fan_in)
    W = jax.random.uniform(kw, (fan_in, fan_out), jnp.float32, -bound, bound)
    b = jax.random.uniform(kb, (1, fan_out), jnp.float32, -bound, bound)
    return W, b


def _bn_params(key, n):
    k1, k2, k3, k4 = jax.random.split(key, 4)
    gamma = 1.0 + 0.1 * jax.random.normal(k1, (n,), jnp.float32)
    beta = 0.1 * jax.random.normal(k2, (n,), jnp.float32)
    mean = 0.1 * jax.random.normal(k3, (n,), jnp.float32)
    var = jnp.abs(1.0 + 0.1 * jax.random.normal(k4, (n,), jnp.float32))
    return gamma, beta, mean, var


def _fold_bn(W, b, bn, eps=1e-5):
    gamma, beta, mean, var = bn
    scale = gamma / jnp.sqrt(var + eps)
    return W * scale[None, :], (b - mean[None, :]) * scale[None, :] + beta[None, :]


def make_params(key):
    keys = jax.random.split(key, 20)
    ki = iter(keys)

    def w16(w):   # weights stored bf16 for the MXU; biases stay f32
        return w.astype(jnp.bfloat16)

    # board branch
    bw1, bb1 = _fold_bn(*_linear(next(ki), 200, 256), _bn_params(next(ki), 256))
    bw1 = jnp.pad(bw1, ((0, IN_K - 200), (0, 0)))   # zero rows 200..255
    bw2, bb2 = _fold_bn(*_linear(next(ki), 256, 192), _bn_params(next(ki), 192))
    bw3, bb3 = _linear(next(ki), 192, 144)          # no BN / activation -> foldable

    # piece branch, lifted onto the fused [*,256] input (rows 200..215 = piece)
    pw1, pb1 = _fold_bn(*_linear(next(ki), 16, 48), _bn_params(next(ki), 48))
    pw1 = jnp.pad(pw1, ((200, IN_K - 216), (0, 0)))
    pw2, pb2 = _fold_bn(*_linear(next(ki), 48, 24), _bn_params(next(ki), 24))

    # trunk
    w1, b1 = _fold_bn(*_linear(next(ki), 168, 128), _bn_params(next(ki), 128))
    w2, b2 = _fold_bn(*_linear(next(ki), 128, 128), _bn_params(next(ki), 128))
    w3, b3 = _fold_bn(*_linear(next(ki), 128, 64), _bn_params(next(ki), 64))
    w4, b4 = _fold_bn(*_linear(next(ki), 64, 32), _bn_params(next(ki), 32))
    w5, b5 = _linear(next(ki), 32, 2)               # fc5: no BN
    w5 = jnp.pad(w5, ((0, 0), (0, OUT_N - 2)))      # lane-dense output
    b5 = jnp.pad(b5, ((0, 0), (0, OUT_N - 2)))

    # Fold the activation-free board Linear(192,144) into fc1's board half
    # (f32 product, cast to bf16 once):
    #   concat([h@bw3+bb3, pf]) @ w1 + b1
    #     == h @ (bw3@w1[:144]) + pf @ w1[144:] + (b1 + bb3@w1[:144])
    w1b, w1p = w1[:144, :], w1[144:, :]
    w1h = bw3 @ w1b
    b1 = b1 + bb3 @ w1b

    return (w16(bw1), bb1, w16(bw2), bb2,
            w16(pw1), pb1, w16(pw2), pb2,
            w16(w1h), w16(w1p), b1,
            w16(w2), b2, w16(w3), b3, w16(w4), b4,
            w16(w5), b5)


def reference_forward(x, params):
    """Pure-JAX reference on the same (folded, padded) params and the same
    bf16-in / f32-accumulate matmul pattern as the kernel."""
    (bw1, bb1, bw2, bb2, pw1, pb1, pw2, pb2,
     w1h, w1p, b1, w2, b2, w3, b3, w4, b4, w5, b5) = params

    def lk(v):
        return jnp.maximum(v, 0.1 * v)

    def dot(a, w):
        return jnp.dot(a.astype(jnp.bfloat16), w, preferred_element_type=jnp.float32)

    xin = jnp.pad(x, ((0, 0), (0, IN_K - x.shape[1]))).astype(jnp.bfloat16)
    h = lk(dot(xin, bw1) + bb1)
    h = lk(dot(h, bw2) + bb2)
    p = lk(dot(xin, pw1) + pb1)
    pf = lk(dot(p, pw2) + pb2)
    x1 = lk(dot(h, w1h) + dot(pf, w1p) + b1)
    x2 = lk(dot(x1, w2) + b2) + x1
    x3 = lk(dot(x2, w3) + b3)
    x4 = lk(dot(x3, w4) + b4)
    return (dot(x4, w5) + b5)[:, :2]


if __name__ == "__main__":
    key = jax.random.PRNGKey(0)
    kx, kp = jax.random.split(key)

    B = 1100                                            # tile=512 -> 3 grid steps + batch padding
    x = jax.random.normal(kx, (B, 216), jnp.float32)    # 200 board + 16 piece features
    params = make_params(kp)

    out = tetris_net_forward(x, params)
    out = jax.block_until_ready(out)

    ref = reference_forward(x, params)
    assert out.shape == (B, 2)
    assert jnp.allclose(out, ref, atol=5e-3, rtol=5e-3), "mismatch vs JAX reference"

    print("KERNEL_OK")
</pallas_src>

<mosaic_0001>
module attributes {stable_mosaic.version = 11 : i64} {
  func.func @tetris_net_kernel(%arg0: i32, %arg1: memref<512x256xbf16, #tpu.memory_space<vmem>>, %arg2: memref<256x256xbf16, #tpu.memory_space<vmem>>, %arg3: memref<1x256xf32, #tpu.memory_space<vmem>>, %arg4: memref<256x192xbf16, #tpu.memory_space<vmem>>, %arg5: memref<1x192xf32, #tpu.memory_space<vmem>>, %arg6: memref<256x48xbf16, #tpu.memory_space<vmem>>, %arg7: memref<1x48xf32, #tpu.memory_space<vmem>>, %arg8: memref<48x24xbf16, #tpu.memory_space<vmem>>, %arg9: memref<1x24xf32, #tpu.memory_space<vmem>>, %arg10: memref<192x128xbf16, #tpu.memory_space<vmem>>, %arg11: memref<24x128xbf16, #tpu.memory_space<vmem>>, %arg12: memref<1x128xf32, #tpu.memory_space<vmem>>, %arg13: memref<128x128xbf16, #tpu.memory_space<vmem>>, %arg14: memref<1x128xf32, #tpu.memory_space<vmem>>, %arg15: memref<128x64xbf16, #tpu.memory_space<vmem>>, %arg16: memref<1x64xf32, #tpu.memory_space<vmem>>, %arg17: memref<64x32xbf16, #tpu.memory_space<vmem>>, %arg18: memref<1x32xf32, #tpu.memory_space<vmem>>, %arg19: memref<32x128xbf16, #tpu.memory_space<vmem>>, %arg20: memref<1x128xf32, #tpu.memory_space<vmem>>, %arg21: memref<512x128xf32, #tpu.memory_space<vmem>>) attributes {dimension_semantics = [#tpu.dimension_semantics<parallel>], iteration_bounds = array<i64: 3>, scalar_prefetch = 0 : i64, scratch_operands = 0 : i64, tpu.core_type = #tpu.core_type<tc>, window_params = [{transform_indices = @transform_0, window_bounds = array<i64: 512, 256>}, {pipeline_mode = #tpu.pipeline_mode<synchronous>, transform_indices = @transform_1, window_bounds = array<i64: 256, 256>}, {pipeline_mode = #tpu.pipeline_mode<synchronous>, transform_indices = @transform_2, window_bounds = array<i64: 1, 256>}, {pipeline_mode = #tpu.pipeline_mode<synchronous>, transform_indices = @transform_3, window_bounds = array<i64: 256, 192>}, {pipeline_mode = #tpu.pipeline_mode<synchronous>, transform_indices = @transform_4, window_bounds = array<i64: 1, 192>}, {pipeline_mode = #tpu.pipeline_mode<synchronous>, transform_indices = @transform_5, window_bounds = array<i64: 256, 48>}, {pipeline_mode = #tpu.pipeline_mode<synchronous>, transform_indices = @transform_6, window_bounds = array<i64: 1, 48>}, {pipeline_mode = #tpu.pipeline_mode<synchronous>, transform_indices = @transform_7, window_bounds = array<i64: 48, 24>}, {pipeline_mode = #tpu.pipeline_mode<synchronous>, transform_indices = @transform_8, window_bounds = array<i64: 1, 24>}, {pipeline_mode = #tpu.pipeline_mode<synchronous>, transform_indices = @transform_9, window_bounds = array<i64: 192, 128>}, {pipeline_mode = #tpu.pipeline_mode<synchronous>, transform_indices = @transform_10, window_bounds = array<i64: 24, 128>}, {pipeline_mode = #tpu.pipeline_mode<synchronous>, transform_indices = @transform_11, window_bounds = array<i64: 1, 128>}, {pipeline_mode = #tpu.pipeline_mode<synchronous>, transform_indices = @transform_12, window_bounds = array<i64: 128, 128>}, {pipeline_mode = #tpu.pipeline_mode<synchronous>, transform_indices = @transform_13, window_bounds = array<i64: 1, 128>}, {pipeline_mode = #tpu.pipeline_mode<synchronous>, transform_indices = @transform_14, window_bounds = array<i64: 128, 64>}, {pipeline_mode = #tpu.pipeline_mode<synchronous>, transform_indices = @transform_15, window_bounds = array<i64: 1, 64>}, {pipeline_mode = #tpu.pipeline_mode<synchronous>, transform_indices = @transform_16, window_bounds = array<i64: 64, 32>}, {pipeline_mode = #tpu.pipeline_mode<synchronous>, transform_indices = @transform_17, window_bounds = array<i64: 1, 32>}, {pipeline_mode = #tpu.pipeline_mode<synchronous>, transform_indices = @transform_18, window_bounds = array<i64: 32, 128>}, {pipeline_mode = #tpu.pipeline_mode<synchronous>, transform_indices = @transform_19, window_bounds = array<i64: 1, 128>}, {transform_indices = @transform_20, window_bounds = array<i64: 512, 128>}]} {
    %c0 = arith.constant 0 : index
    %c0_0 = arith.constant 0 : index
    %0 = vector.load %arg1[%c0, %c0_0] : memref<512x256xbf16, #tpu.memory_space<vmem>>, vector<512x256xbf16>
    %c0_1 = arith.constant 0 : index
    %c0_2 = arith.constant 0 : index
    %1 = vector.load %arg2[%c0_1, %c0_2] : memref<256x256xbf16, #tpu.memory_space<vmem>>, vector<256x256xbf16>
    %cst = arith.constant dense<0.000000e+00> : vector<512x256xf32>
    %2 = tpu.matmul %0, %1, %cst {dimension_numbers = #tpu.dot_dimension_numbers<[1], [0], [0], [1], [0, 0, 1, 1], [], []>} : vector<512x256xbf16>, vector<256x256xbf16>, vector<512x256xf32> -> vector<512x256xf32>
    %c0_3 = arith.constant 0 : index
    %c0_4 = arith.constant 0 : index
    %3 = vector.load %arg3[%c0_3, %c0_4] : memref<1x256xf32, #tpu.memory_space<vmem>>, vector<1x256xf32>
    %4 = vector.broadcast %3 : vector<1x256xf32> to vector<512x256xf32>
    %5 = arith.addf %2, %4 : vector<512x256xf32>
    %cst_5 = arith.constant 1.000000e-01 : f32
    %6 = vector.broadcast %cst_5 : f32 to vector<512x256xf32>
    %7 = arith.mulf %6, %5 : vector<512x256xf32>
    %8 = arith.maximumf %5, %7 : vector<512x256xf32>
    %9 = arith.truncf %8 : vector<512x256xf32> to vector<512x256xbf16>
    %c0_6 = arith.constant 0 : index
    %c0_7 = arith.constant 0 : index
    %10 = vector.load %arg4[%c0_6, %c0_7] : memref<256x192xbf16, #tpu.memory_space<vmem>>, vector<256x192xbf16>
    %cst_8 = arith.constant dense<0.000000e+00> : vector<512x192xf32>
    %11 = tpu.matmul %9, %10, %cst_8 {dimension_numbers = #tpu.dot_dimension_numbers<[1], [0], [0], [1], [0, 0, 1, 1], [], []>} : vector<512x256xbf16>, vector<256x192xbf16>, vector<512x192xf32> -> vector<512x192xf32>
    %c0_9 = arith.constant 0 : index
    %c0_10 = arith.constant 0 : index
    %12 = vector.load %arg5[%c0_9, %c0_10] : memref<1x192xf32, #tpu.memory_space<vmem>>, vector<1x192xf32>
    %13 = vector.broadcast %12 : vector<1x192xf32> to vector<512x192xf32>
    %14 = arith.addf %11, %13 : vector<512x192xf32>
    %cst_11 = arith.constant 1.000000e-01 : f32
    %15 = vector.broadcast %cst_11 : f32 to vector<512x192xf32>
    %16 = arith.mulf %15, %14 : vector<512x192xf32>
    %17 = arith.maximumf %14, %16 : vector<512x192xf32>
    %c0_12 = arith.constant 0 : index
    %c0_13 = arith.constant 0 : index
    %18 = vector.load %arg6[%c0_12, %c0_13] : memref<256x48xbf16, #tpu.memory_space<vmem>>, vector<256x48xbf16>
    %cst_14 = arith.constant dense<0.000000e+00> : vector<512x48xf32>
    %19 = tpu.matmul %0, %18, %cst_14 {dimension_numbers = #tpu.dot_dimension_numbers<[1], [0], [0], [1], [0, 0, 1, 1], [], []>} : vector<512x256xbf16>, vector<256x48xbf16>, vector<512x48xf32> -> vector<512x48xf32>
    %c0_15 = arith.constant 0 : index
    %c0_16 = arith.constant 0 : index
    %20 = vector.load %arg7[%c0_15, %c0_16] : memref<1x48xf32, #tpu.memory_space<vmem>>, vector<1x48xf32>
    %21 = vector.broadcast %20 : vector<1x48xf32> to vector<512x48xf32>
    %22 = arith.addf %19, %21 : vector<512x48xf32>
    %cst_17 = arith.constant 1.000000e-01 : f32
    %23 = vector.broadcast %cst_17 : f32 to vector<512x48xf32>
    %24 = arith.mulf %23, %22 : vector<512x48xf32>
    %25 = arith.maximumf %22, %24 : vector<512x48xf32>
    %26 = arith.truncf %25 : vector<512x48xf32> to vector<512x48xbf16>
    %c0_18 = arith.constant 0 : index
    %c0_19 = arith.constant 0 : index
    %27 = vector.load %arg8[%c0_18, %c0_19] : memref<48x24xbf16, #tpu.memory_space<vmem>>, vector<48x24xbf16>
    %cst_20 = arith.constant dense<0.000000e+00> : vector<512x24xf32>
    %28 = tpu.matmul %26, %27, %cst_20 {dimension_numbers = #tpu.dot_dimension_numbers<[1], [0], [0], [1], [0, 0, 1, 1], [], []>} : vector<512x48xbf16>, vector<48x24xbf16>, vector<512x24xf32> -> vector<512x24xf32>
    %c0_21 = arith.constant 0 : index
    %c0_22 = arith.constant 0 : index
    %29 = vector.load %arg9[%c0_21, %c0_22] : memref<1x24xf32, #tpu.memory_space<vmem>>, vector<1x24xf32>
    %30 = vector.broadcast %29 : vector<1x24xf32> to vector<512x24xf32>
    %31 = arith.addf %28, %30 : vector<512x24xf32>
    %cst_23 = arith.constant 1.000000e-01 : f32
    %32 = vector.broadcast %cst_23 : f32 to vector<512x24xf32>
    %33 = arith.mulf %32, %31 : vector<512x24xf32>
    %34 = arith.maximumf %31, %33 : vector<512x24xf32>
    %35 = arith.truncf %17 : vector<512x192xf32> to vector<512x192xbf16>
    %c0_24 = arith.constant 0 : index
    %c0_25 = arith.constant 0 : index
    %36 = vector.load %arg10[%c0_24, %c0_25] : memref<192x128xbf16, #tpu.memory_space<vmem>>, vector<192x128xbf16>
    %cst_26 = arith.constant dense<0.000000e+00> : vector<512x128xf32>
    %37 = tpu.matmul %35, %36, %cst_26 {dimension_numbers = #tpu.dot_dimension_numbers<[1], [0], [0], [1], [0, 0, 1, 1], [], []>} : vector<512x192xbf16>, vector<192x128xbf16>, vector<512x128xf32> -> vector<512x128xf32>
    %38 = arith.truncf %34 : vector<512x24xf32> to vector<512x24xbf16>
    %c0_27 = arith.constant 0 : index
    %c0_28 = arith.constant 0 : index
    %39 = vector.load %arg11[%c0_27, %c0_28] : memref<24x128xbf16, #tpu.memory_space<vmem>>, vector<24x128xbf16>
    %cst_29 = arith.constant dense<0.000000e+00> : vector<512x128xf32>
    %40 = tpu.matmul %38, %39, %cst_29 {dimension_numbers = #tpu.dot_dimension_numbers<[1], [0], [0], [1], [0, 0, 1, 1], [], []>} : vector<512x24xbf16>, vector<24x128xbf16>, vector<512x128xf32> -> vector<512x128xf32>
    %41 = arith.addf %37, %40 : vector<512x128xf32>
    %c0_30 = arith.constant 0 : index
    %c0_31 = arith.constant 0 : index
    %42 = vector.load %arg12[%c0_30, %c0_31] : memref<1x128xf32, #tpu.memory_space<vmem>>, vector<1x128xf32>
    %43 = vector.broadcast %42 : vector<1x128xf32> to vector<512x128xf32>
    %44 = arith.addf %41, %43 : vector<512x128xf32>
    %cst_32 = arith.constant 1.000000e-01 : f32
    %45 = vector.broadcast %cst_32 : f32 to vector<512x128xf32>
    %46 = arith.mulf %45, %44 : vector<512x128xf32>
    %47 = arith.maximumf %44, %46 : vector<512x128xf32>
    %48 = arith.truncf %47 : vector<512x128xf32> to vector<512x128xbf16>
    %c0_33 = arith.constant 0 : index
    %c0_34 = arith.constant 0 : index
    %49 = vector.load %arg13[%c0_33, %c0_34] : memref<128x128xbf16, #tpu.memory_space<vmem>>, vector<128x128xbf16>
    %cst_35 = arith.constant dense<0.000000e+00> : vector<512x128xf32>
    %50 = tpu.matmul %48, %49, %cst_35 {dimension_numbers = #tpu.dot_dimension_numbers<[1], [0], [0], [1], [0, 0, 1, 1], [], []>} : vector<512x128xbf16>, vector<128x128xbf16>, vector<512x128xf32> -> vector<512x128xf32>
    %c0_36 = arith.constant 0 : index
    %c0_37 = arith.constant 0 : index
    %51 = vector.load %arg14[%c0_36, %c0_37] : memref<1x128xf32, #tpu.memory_space<vmem>>, vector<1x128xf32>
    %52 = vector.broadcast %51 : vector<1x128xf32> to vector<512x128xf32>
    %53 = arith.addf %50, %52 : vector<512x128xf32>
    %cst_38 = arith.constant 1.000000e-01 : f32
    %54 = vector.broadcast %cst_38 : f32 to vector<512x128xf32>
    %55 = arith.mulf %54, %53 : vector<512x128xf32>
    %56 = arith.maximumf %53, %55 : vector<512x128xf32>
    %57 = arith.addf %56, %47 : vector<512x128xf32>
    %58 = arith.truncf %57 : vector<512x128xf32> to vector<512x128xbf16>
    %c0_39 = arith.constant 0 : index
    %c0_40 = arith.constant 0 : index
    %59 = vector.load %arg15[%c0_39, %c0_40] : memref<128x64xbf16, #tpu.memory_space<vmem>>, vector<128x64xbf16>
    %cst_41 = arith.constant dense<0.000000e+00> : vector<512x64xf32>
    %60 = tpu.matmul %58, %59, %cst_41 {dimension_numbers = #tpu.dot_dimension_numbers<[1], [0], [0], [1], [0, 0, 1, 1], [], []>} : vector<512x128xbf16>, vector<128x64xbf16>, vector<512x64xf32> -> vector<512x64xf32>
    %c0_42 = arith.constant 0 : index
    %c0_43 = arith.constant 0 : index
    %61 = vector.load %arg16[%c0_42, %c0_43] : memref<1x64xf32, #tpu.memory_space<vmem>>, vector<1x64xf32>
    %62 = vector.broadcast %61 : vector<1x64xf32> to vector<512x64xf32>
    %63 = arith.addf %60, %62 : vector<512x64xf32>
    %cst_44 = arith.constant 1.000000e-01 : f32
    %64 = vector.broadcast %cst_44 : f32 to vector<512x64xf32>
    %65 = arith.mulf %64, %63 : vector<512x64xf32>
    %66 = arith.maximumf %63, %65 : vector<512x64xf32>
    %67 = arith.truncf %66 : vector<512x64xf32> to vector<512x64xbf16>
    %c0_45 = arith.constant 0 : index
    %c0_46 = arith.constant 0 : index
    %68 = vector.load %arg17[%c0_45, %c0_46] : memref<64x32xbf16, #tpu.memory_space<vmem>>, vector<64x32xbf16>
    %cst_47 = arith.constant dense<0.000000e+00> : vector<512x32xf32>
    %69 = tpu.matmul %67, %68, %cst_47 {dimension_numbers = #tpu.dot_dimension_numbers<[1], [0], [0], [1], [0, 0, 1, 1], [], []>} : vector<512x64xbf16>, vector<64x32xbf16>, vector<512x32xf32> -> vector<512x32xf32>
    %c0_48 = arith.constant 0 : index
    %c0_49 = arith.constant 0 : index
    %70 = vector.load %arg18[%c0_48, %c0_49] : memref<1x32xf32, #tpu.memory_space<vmem>>, vector<1x32xf32>
    %71 = vector.broadcast %70 : vector<1x32xf32> to vector<512x32xf32>
    %72 = arith.addf %69, %71 : vector<512x32xf32>
    %cst_50 = arith.constant 1.000000e-01 : f32
    %73 = vector.broadcast %cst_50 : f32 to vector<512x32xf32>
    %74 = arith.mulf %73, %72 : vector<512x32xf32>
    %75 = arith.maximumf %72, %74 : vector<512x32xf32>
    %76 = arith.truncf %75 : vector<512x32xf32> to vector<512x32xbf16>
    %c0_51 = arith.constant 0 : index
    %c0_52 = arith.constant 0 : index
    %77 = vector.load %arg19[%c0_51, %c0_52] : memref<32x128xbf16, #tpu.memory_space<vmem>>, vector<32x128xbf16>
    %cst_53 = arith.constant dense<0.000000e+00> : vector<512x128xf32>
    %78 = tpu.matmul %76, %77, %cst_53 {dimension_numbers = #tpu.dot_dimension_numbers<[1], [0], [0], [1], [0, 0, 1, 1], [], []>} : vector<512x32xbf16>, vector<32x128xbf16>, vector<512x128xf32> -> vector<512x128xf32>
    %c0_54 = arith.constant 0 : index
    %c0_55 = arith.constant 0 : index
    %79 = vector.load %arg20[%c0_54, %c0_55] : memref<1x128xf32, #tpu.memory_space<vmem>>, vector<1x128xf32>
    %80 = vector.broadcast %79 : vector<1x128xf32> to vector<512x128xf32>
    %81 = arith.addf %78, %80 : vector<512x128xf32>
    %c0_56 = arith.constant 0 : index
    %c0_57 = arith.constant 0 : index
    %82 = vector.load %arg21[%c0_56, %c0_57] : memref<512x128xf32, #tpu.memory_space<vmem>>, vector<512x128xf32>
    tpu.vector_store %arg21[%c0_56, %c0_57], %81 {strides = array<i32>} : memref<512x128xf32, #tpu.memory_space<vmem>>, vector<512x128xf32>,
    return
  }
  func.func @transform_0(%arg0: i32) -> (i32, i32) {
    %c0_i32 = arith.constant 0 : i32
    %c0_i32_0 = arith.constant 0 : i32
    return %arg0, %c0_i32 : i32, i32
  }
  func.func @transform_1(%arg0: i32) -> (i32, i32) {
    %c0_i32 = arith.constant 0 : i32
    %c0_i32_0 = arith.constant 0 : i32
    %c0_i32_1 = arith.constant 0 : i32
    return %c0_i32, %c0_i32_0 : i32, i32
  }
  func.func @transform_2(%arg0: i32) -> (i32, i32) {
    %c0_i32 = arith.constant 0 : i32
    %c0_i32_0 = arith.constant 0 : i32
    %c0_i32_1 = arith.constant 0 : i32
    return %c0_i32, %c0_i32_0 : i32, i32
  }
  func.func @transform_3(%arg0: i32) -> (i32, i32) {
    %c0_i32 = arith.constant 0 : i32
    %c0_i32_0 = arith.constant 0 : i32
    %c0_i32_1 = arith.constant 0 : i32
    return %c0_i32, %c0_i32_0 : i32, i32
  }
  func.func @transform_4(%arg0: i32) -> (i32, i32) {
    %c0_i32 = arith.constant 0 : i32
    %c0_i32_0 = arith.constant 0 : i32
    %c0_i32_1 = arith.constant 0 : i32
    return %c0_i32, %c0_i32_0 : i32, i32
  }
  func.func @transform_5(%arg0: i32) -> (i32, i32) {
    %c0_i32 = arith.constant 0 : i32
    %c0_i32_0 = arith.constant 0 : i32
    %c0_i32_1 = arith.constant 0 : i32
    return %c0_i32, %c0_i32_0 : i32, i32
  }
  func.func @transform_6(%arg0: i32) -> (i32, i32) {
    %c0_i32 = arith.constant 0 : i32
    %c0_i32_0 = arith.constant 0 : i32
    %c0_i32_1 = arith.constant 0 : i32
    return %c0_i32, %c0_i32_0 : i32, i32
  }
  func.func @transform_7(%arg0: i32) -> (i32, i32) {
    %c0_i32 = arith.constant 0 : i32
    %c0_i32_0 = arith.constant 0 : i32
    %c0_i32_1 = arith.constant 0 : i32
    return %c0_i32, %c0_i32_0 : i32, i32
  }
  func.func @transform_8(%arg0: i32) -> (i32, i32) {
    %c0_i32 = arith.constant 0 : i32
    %c0_i32_0 = arith.constant 0 : i32
    %c0_i32_1 = arith.constant 0 : i32
    return %c0_i32, %c0_i32_0 : i32, i32
  }
  func.func @transform_9(%arg0: i32) -> (i32, i32) {
    %c0_i32 = arith.constant 0 : i32
    %c0_i32_0 = arith.constant 0 : i32
    %c0_i32_1 = arith.constant 0 : i32
    return %c0_i32, %c0_i32_0 : i32, i32
  }
  func.func @transform_10(%arg0: i32) -> (i32, i32) {
    %c0_i32 = arith.constant 0 : i32
    %c0_i32_0 = arith.constant 0 : i32
    %c0_i32_1 = arith.constant 0 : i32
    return %c0_i32, %c0_i32_0 : i32, i32
  }
  func.func @transform_11(%arg0: i32) -> (i32, i32) {
    %c0_i32 = arith.constant 0 : i32
    %c0_i32_0 = arith.constant 0 : i32
    %c0_i32_1 = arith.constant 0 : i32
    return %c0_i32, %c0_i32_0 : i32, i32
  }
  func.func @transform_12(%arg0: i32) -> (i32, i32) {
    %c0_i32 = arith.constant 0 : i32
    %c0_i32_0 = arith.constant 0 : i32
    %c0_i32_1 = arith.constant 0 : i32
    return %c0_i32, %c0_i32_0 : i32, i32
  }
  func.func @transform_13(%arg0: i32) -> (i32, i32) {
    %c0_i32 = arith.constant 0 : i32
    %c0_i32_0 = arith.constant 0 : i32
    %c0_i32_1 = arith.constant 0 : i32
    return %c0_i32, %c0_i32_0 : i32, i32
  }
  func.func @transform_14(%arg0: i32) -> (i32, i32) {
    %c0_i32 = arith.constant 0 : i32
    %c0_i32_0 = arith.constant 0 : i32
    %c0_i32_1 = arith.constant 0 : i32
    return %c0_i32, %c0_i32_0 : i32, i32
  }
  func.func @transform_15(%arg0: i32) -> (i32, i32) {
    %c0_i32 = arith.constant 0 : i32
    %c0_i32_0 = arith.constant 0 : i32
    %c0_i32_1 = arith.constant 0 : i32
    return %c0_i32, %c0_i32_0 : i32, i32
  }
  func.func @transform_16(%arg0: i32) -> (i32, i32) {
    %c0_i32 = arith.constant 0 : i32
    %c0_i32_0 = arith.constant 0 : i32
    %c0_i32_1 = arith.constant 0 : i32
    return %c0_i32, %c0_i32_0 : i32, i32
  }
  func.func @transform_17(%arg0: i32) -> (i32, i32) {
    %c0_i32 = arith.constant 0 : i32
    %c0_i32_0 = arith.constant 0 : i32
    %c0_i32_1 = arith.constant 0 : i32
    return %c0_i32, %c0_i32_0 : i32, i32
  }
  func.func @transform_18(%arg0: i32) -> (i32, i32) {
    %c0_i32 = arith.constant 0 : i32
    %c0_i32_0 = arith.constant 0 : i32
    %c0_i32_1 = arith.constant 0 : i32
    return %c0_i32, %c0_i32_0 : i32, i32
  }
  func.func @transform_19(%arg0: i32) -> (i32, i32) {
    %c0_i32 = arith.constant 0 : i32
    %c0_i32_0 = arith.constant 0 : i32
    %c0_i32_1 = arith.constant 0 : i32
    return %c0_i32, %c0_i32_0 : i32, i32
  }
  func.func @transform_20(%arg0: i32) -> (i32, i32) {
    %c0_i32 = arith.constant 0 : i32
    %c0_i32_0 = arith.constant 0 : i32
    return %arg0, %c0_i32 : i32, i32
  }
}

</mosaic_0001>

<bundles_post_ra>
// kernel: tpu_custom_call.1
= control target key start
LH: loop header
LB: loop body
LE: loop exit
PB: predicated region body
PF: predicated region fallthrough
CT: control target
= control target key end

     0   :  { %s12539_s0 = inlined_call_operand.hbm [shape: bf16[1536,256], index: 0, kind: input, shape index: {}]   ;;  %s12540_s1 = inlined_call_operand.vmem [shape: bf16[256,256], index: 1, kind: input, shape index: {}]   ;;  %s12541_s2 = inlined_call_operand.vmem [shape: f32[1,256], index: 2, kind: input, shape index: {}]   ;;  %s12542_s3 = inlined_call_operand.vmem [shape: bf16[256,192], index: 3, kind: input, shape index: {}]   ;;  %s12543_s4 = inlined_call_operand.vmem [shape: f32[1,192], index: 4, kind: input, shape index: {}]   ;;  %s12544_s5 = inlined_call_operand.vmem [shape: bf16[256,48], index: 5, kind: input, shape index: {}]   ;;  %s12545_s6 = inlined_call_operand.vmem [shape: f32[1,48], index: 6, kind: input, shape index: {}]   ;;  %s12546_s7 = inlined_call_operand.vmem [shape: bf16[48,24], index: 7, kind: input, shape index: {}]   ;;  %s12547_s8 = inlined_call_operand.vmem [shape: f32[1,24], index: 8, kind: input, shape index: {}]   ;;  %s12548_s9 = inlined_call_operand.vmem [shape: bf16[192,128], index: 9, kind: input, shape index: {}]   ;;  %s12549_s10 = inlined_call_operand.vmem [shape: bf16[24,128], index: 10, kind: input, shape index: {}]   ;;  %s12550_s11 = inlined_call_operand.vmem [shape: f32[1,128], index: 11, kind: input, shape index: {}]   ;;  %s12551_s12 = inlined_call_operand.vmem [shape: bf16[128,128], index: 12, kind: input, shape index: {}]   ;;  %s12552_s13 = inlined_call_operand.vmem [shape: f32[1,128], index: 13, kind: input, shape index: {}]   ;;  %s12553_s14 = inlined_call_operand.vmem [shape: bf16[128,64], index: 14, kind: input, shape index: {}]   ;;  %s12554_s15 = inlined_call_operand.vmem [shape: f32[1,64], index: 15, kind: input, shape index: {}]   ;;  %s12555_s16 = inlined_call_operand.vmem [shape: bf16[64,32], index: 16, kind: input, shape index: {}]   ;;  %s12556_s17 = inlined_call_operand.vmem [shape: f32[1,32], index: 17, kind: input, shape index: {}]   ;;  %s12557_s18 = inlined_call_operand.vmem [shape: bf16[32,128], index: 18, kind: input, shape index: {}]   ;;  %s12558_s19 = inlined_call_operand.vmem [shape: f32[1,128], index: 19, kind: input, shape index: {}]   ;;  %s12559_s20 = inlined_call_operand.hbm [shape: f32[1536,128], index: 20, kind: output, shape index: {}]  }
   0x1   :  { %12708 = sst [smem:[#allocation126_spill]] %s12539_s0 }
   0x2   :  { %12709 = sst [smem:[#allocation127_spill]] %s12540_s1 }
   0x3   :  { %12710 = sst [smem:[#allocation128_spill]] %s12541_s2 }
   0x4   :  { %12711 = sst [smem:[#allocation129_spill]] %s12542_s3 }
   0x5   :  { %12712 = sst [smem:[#allocation130_spill]] %s12543_s4 }
   0x6   :  { %12713 = sst [smem:[#allocation131_spill]] %s12544_s5 }
   0x7   :  { %12714 = sst [smem:[#allocation132_spill]] %s12545_s6 }
   0x8   :  { %12715 = sst [smem:[#allocation133_spill]] %s12546_s7 }
   0x9   :  { %12716 = sst [smem:[#allocation134_spill]] %s12547_s8 }
   0xa   :  { %12717 = sst [smem:[#allocation135_spill]] %s12548_s9 }
   0xb   :  { %12718 = sst [smem:[#allocation136_spill]] %s12549_s10 }
   0xc   :  { %12719 = sst [smem:[#allocation137_spill]] %s12554_s15 }
   0xd   :  { %12720 = sst [smem:[#allocation138_spill]] %s12556_s17 }
   0xe   :  { %12721 = sst [smem:[#allocation139_spill]] %s12558_s19 }
   0xf   :  { %12722 = sst [smem:[#allocation140_spill]] %s12559_s20 }
  0x10   :  { %25 = vsyncpa [#allocation3], 0 }
  0x11   :  { %27 = vsyncpa [#allocation3 + $0x1], 0 }
  0x12   :  { %28 = vsyncpa [#allocation4], 0 }
  0x13   :  { %30 = vsyncpa [#allocation4 + $0x1], 0  ;;  %s8688_s1 = smov 0   ;;  %s8690_s22 = smov 0  }
  0x14   :  { %s8692_s23 = smov 0   ;;  %s8694_s24 = smov 0  }
  0x15 LB: > { %12723 = sst [smem:[#allocation8_spill]] %s8565_s1  ;;  %s8709_s2 = sadd.s32 4294967295, %s8577_s24   ;;  %s8577_s24 = sphi %s8694_s24, %s13135_s24   ;;  %s8573_s23 = sphi %s8692_s23, %s13137_s23   ;;  %s8569_s22 = sphi %s8690_s22, %s13139_s22   ;;  %s8565_s1 = sphi %s8688_s1, %s13138_s1  }
  0x16   : > { %12724 = sst [smem:[#allocation9_spill]] %s8573_s23  ;;  %s7309_s25 = sadd.s32 4294967294, %s8577_s24  }
  0x17   : > { %12725 = sst [smem:[#allocation10_spill]] %s8709_s2  ;;  %s8713_s3 = sadd.s32 1, %s8577_s24  }
  0x18   : > { %12726 = sst [smem:[#allocation11_spill]] %s8713_s3  ;;  %s43_s26 = sadd.s32 1, %s8573_s23 }
  0x19   : > { %s40_s27 = ssub.s32 %s8577_s24, %s8713_s3  ;;  %p50_p0 = scmp.ne.s32.totalorder %s8573_s23, %s8569_s22 }
  0x1a   : > { %p41_p1 = scmp.eq.s32.totalorder %s40_s27, 0  ;;  %p51_p2 = scmp.eq.s32.totalorder %s8577_s24, 0 }
  0x1b   : > { %p56_p3 = scmp.ne.s32.totalorder %s8569_s22, %s8565_s1  ;;  %p57_p4 = scmp.eq.s32.totalorder %s8709_s2, 0 }
  0x1c   : > { %s8725_s28 = scalar_select %p41_p1, %s8573_s23, %s43_s26  }
  0x1d   : > { %p8727_p5 = por %p51_p2, %p50_p0  ;;  %p8731_p6 = por %p57_p4, %p56_p3 }
  0x1e   : > { %12727 = sst [smem:[#allocation12_spill]] %s8725_s28  ;;  %p479_p7 = scmp.eq.s32.totalorder %s8709_s2, 2 }
  0x1f   : > { %p485_p8 = scmp.eq.s32.totalorder %s7309_s25, 2  ;;  %p8425_p9 = scmp.lt.s32.totalorder %s8577_s24, 3 }
  0x20   : > { %p8737_p10 = por %p479_p7, %p50_p0  ;;  %s562_s21 = sand.u32 1, %s8573_s23  }
  0x21   : > { %p8741_p11 = por %p485_p8, %p56_p3  ;;  %s8213_s26 = sshll.u32 %s8577_s24, 9 }
  0x22   : > { %s12730_s30 = scalar_select %p8737_p10, 1, 0 }
  0x23   : > { %s12732_s0 = scalar_select %p8741_p11, 1, 0 }
  0x24   : > { %12731 = sst [smem:[#allocation13_spill]] %s12730_s30  ;;  %s7312_s27 = sshll.u32 %s562_s21, 9 }
  0x25   : > { %12733 = sst [smem:[#allocation14_spill]] %s12732_s0  ;;  %s566_s2 = scalar_lea.vmem [#allocation2], %s7312_s27 }
  0x26   : > { %s12734_s1 = sld [smem:[#allocation126_spill]]  ;;  %s575_s15 = sshll.u32 %s566_s2, 4  ;;  %s576_s15 = int_to_ptr.vmem [resolvable:$true] %s575_s15 }
  0x27   : > { %p8752_p12 = pnand %p8425_p9, %p8727_p5  ;;  %p7316_p13 = scmp.ge.s32.totalorder %s8577_s24, 1 }
  0x28   : > { %p583_p0 = scmp.lt.s32.totalorder %s8577_s24, 4  ;;  %s563_s23 = scalar_lea.sflag [#allocation3], %s562_s21 }
  0x29   : > { %p8485_p2 = pneg %p8752_p12 }
  0x2c   : > { %s12735_s20 = smov %s12734_s1  ;;  %s572_s19 = scalar_lea.hbm %s12734_s1, %s8213_s26 }
  0x2d   : > { %s573_s17 = sshll.u32 %s572_s19, 4  ;;  %s8488_s2 = scalar_lea.hbm %s12735_s20, 1536  ;;  %s574_s17 = int_to_ptr.hbm [resolvable:$true] %s573_s17 }
  0x2e   : > { %s8481_s0 = sshra.s32 %s574_s17, 4  ;;  %s8482_s0 = int_to_ptr.hbm [resolvable:$true] %s8481_s0 }
  0x2f   : > { %s8483_s30 = scalar_lea.hbm %s8482_s0, 512  ;;  %p8489_p5 = scmp.lt.s32.totalorder %s8482_s0, %s12735_s20 }
  0x30   : > { %p8484_p1 = scmp.ne.s32.totalorder %s8482_s0, %s8483_s30  ;;  %p8490_p7 = scmp.lt.s32.totalorder %s8488_s2, %s8483_s30 }
  0x32   : > { %p8486_p3 = pnand %p8485_p2, %p8484_p1  ;;  %p8491_p8 = por %p8490_p7, %p8489_p5 }
  0x34   : > { %p8487_p4 = pneg %p8486_p3 }
  0x36   : > { %p8492_p9 = pnand %p8491_p8, %p8487_p4 }
  0x38   : > { %8495 = shalt.err (!%p8492_p9)
}
  0x39   : > { %s8579_s4 = smov 128   ;;  %s8580_s21 = smov 8  }
  0x3a   : > { %8420 = dma.hbm_to_vmem [thread:$0]  (!%p8752_p12), %s574_s17, 8192, %s576_s15, %s563_s23, %s8579_s4, %s8579_s4, %s8580_s21  }
  0x3b   : > { %p584_p1 = pnand %p7316_p13, %p583_p0 }
  0x3d   : > { %587 = sbr.rel (%p584_p1) target bundleno = 2979 (0xba3), region = 100 }
  0x42   : > { %s8773_s26 = sand.u32 1, %s8569_s22  }
  0x43   : > { %s7317_s30 = sshll.u32 %s8773_s26, 9  ;;  %s590_s0 = scalar_lea.sflag [#allocation3], %s8773_s26 }
  0x44   : > { %s8779_s27 = scalar_lea.vmem [#allocation2], %s7317_s30 }
  0x45   : > { %8556 = dma.done.wait (%p8731_p6), %s590_s0, 8192  }
  0x46   : > { %8558 = vsyncadd (%p8731_p6), %s590_s0, 4294959104  ;;  %s12737_s23 = sld [smem:[#allocation127_spill]]  ;;  %v7321_v48 = vld [vmem:[%s8779_s27] sm:$0xf]  ;;  %v8215_v50 = vld [vmem:[%s8779_s27 + $0x4] sm:$0xf0] }
  0x47   : > { %v7449_v51 = vld [vmem:[%s8779_s27 + $0x100] sm:$0xf]  ;;  %v8247_v52 = vld [vmem:[%s8779_s27 + $0x104] sm:$0xf0]  ;;  %v8246_v54 = vld [vmem:[%s8779_s27 + $0x104] sm:$0xf]  ;;  %v8893_v57 = vor.u32 %v8215_v50, %v7321_v48 }
  0x48   : > { %v7451_v55 = vld [vmem:[%s8779_s27 + $0x108] sm:$0xf0]  ;;  %v8895_v58 = vor.u32 %v8247_v52, %v7449_v51  ;;  %v7329_v63 = vld [vmem:[%s8779_s27 + $0x10] sm:$0xf]  ;;  %v8214_v50 = vld [vmem:[%s8779_s27 + $0x4] sm:$0xf] }
  0x49   : > { %12739 = vst [vmem:[#allocation15_spill] sm:$0xff] %v8893_v57  ;;  %v8897_v59 = vor.u32 %v8246_v54, %v7451_v55  ;;  %v7323_v51 = vld [vmem:[%s8779_s27 + $0x8] sm:$0xf0]  ;;  %v8227_v54 = vld [vmem:[%s8779_s27 + $0x64] sm:$0xf0]  ;;  %s12767_s28 = sld [smem:[#allocation128_spill]] }
  0x4a   : > { %12740 = vst [vmem:[#allocation16_spill] sm:$0xff] %v8895_v58  ;;  %v8997_v52 = vor.u32 %v8214_v50, %v7323_v51  ;;  %v7497_v55 = vld [vmem:[%s8779_s27 + $0x160] sm:$0xf]  ;;  %v7347_v50 = vld [vmem:[%s8779_s27 + $0x38] sm:$0xf0]  ;;  %s12788_s19 = sld [smem:[#allocation129_spill]] }
  0x4b   : > { %12741 = vst [vmem:[#allocation17_spill] sm:$0xff] %v8897_v59  ;;  %s12838_s0 = sld [smem:[#allocation130_spill]]  ;;  %vm4643_vm0 = vcmask 1043456   ;;  %vm4020_vm1 = vcmask 392192   ;;  %vm4546_vm2 = vcmask 195584   ;;  %vm4888_vm3 = vcmask 523264  }
  0x4c   : > { %s12738_s25 = smov %s12737_s23  ;;  %v7633_v0 = vld [vmem:[%s12737_s23 + $0x70] sm:$0xf]  ;;  %12756 = vst [vmem:[#allocation32_spill] sm:$0xff] %v8997_v52  ;;  %s12839_s5 = sld [smem:[#allocation131_spill]]  ;;  %vm6890_vm4 = vcmask 261120  }
  0x4d   : > { %v8293_v1 = vld [vmem:[%s12738_s25 + $0x74] sm:$0xf0]  ;;  %v7697_v2 = vld [vmem:[%s12738_s25 + $0xf0] sm:$0xf]  ;;  %v7625_v5 = vld [vmem:[%s12738_s25 + $0x60] sm:$0xf] }
  0x4e   : > { %v7634_v3 = vor.u32 %v8293_v1, %v7633_v0  ;;  %v8309_v4 = vld [vmem:[%s12738_s25 + $0xf4] sm:$0xf0]  ;;  %v8291_v6 = vld [vmem:[%s12738_s25 + $0x64] sm:$0xf0]  ;;  %v7689_v8 = vld [vmem:[%s12738_s25 + $0xe0] sm:$0xf] }
  0x4f   : > { %v7698_v7 = vor.u32 %v8309_v4, %v7697_v2  ;;  %v8307_v9 = vld [vmem:[%s12738_s25 + $0xe4] sm:$0xf0]  ;;  %v7626_v10 = vor.u32 %v8291_v6, %v7625_v5  ;;  %v7617_v12 = vld [vmem:[%s12738_s25 + $0x50] sm:$0xf]  ;;  %v8289_v13 = vld [vmem:[%s12738_s25 + $0x54] sm:$0xf0] }
  0x50   : > { %1236 = vmatpush.bf16.msra.mxu0 %v7634_v3  ;;  %8397 = vmatpush.bf16.msra.mxu2 %v7634_v3  ;;  %v7690_v11 = vor.u32 %v8307_v9, %v7689_v8  ;;  %v7681_v14 = vld [vmem:[%s12738_s25 + $0xd0] sm:$0xf]  ;;  %v8305_v15 = vld [vmem:[%s12738_s25 + $0xd4] sm:$0xf0]  ;;  %v7618_v16 = vor.u32 %v8289_v13, %v7617_v12  ;;  %v7609_v18 = vld [vmem:[%s12738_s25 + $0x40] sm:$0xf] }
  0x51   : > { %8405 = vmatpush.bf16.msra.mxu3 %v7698_v7  ;;  %1405 = vmatpush.bf16.msra.mxu1 %v7698_v7  ;;  %v7682_v17 = vor.u32 %v8305_v15, %v7681_v14  ;;  %v8287_v19 = vld [vmem:[%s12738_s25 + $0x44] sm:$0xf0]  ;;  %v7673_v20 = vld [vmem:[%s12738_s25 + $0xc0] sm:$0xf]  ;;  %v7601_v24 = vld [vmem:[%s12738_s25 + $0x30] sm:$0xf] }
  0x52   : > { %v8303_v21 = vld [vmem:[%s12738_s25 + $0xc4] sm:$0xf0]  ;;  %v7610_v22 = vor.u32 %v8287_v19, %v7609_v18  ;;  %v8285_v25 = vld [vmem:[%s12738_s25 + $0x34] sm:$0xf0]  ;;  %v7665_v26 = vld [vmem:[%s12738_s25 + $0xb0] sm:$0xf] }
  0x53   : > { %v7674_v23 = vor.u32 %v8303_v21, %v7673_v20  ;;  %v8301_v27 = vld [vmem:[%s12738_s25 + $0xb4] sm:$0xf0]  ;;  %v7602_v28 = vor.u32 %v8285_v25, %v7601_v24  ;;  %v7593_v30 = vld [vmem:[%s12738_s25 + $0x20] sm:$0xf]  ;;  %v8283_v31 = vld [vmem:[%s12738_s25 + $0x24] sm:$0xf0] }
  0x54   : > { %1237 = vmatpush.bf16.msra.mxu0 %v7626_v10  ;;  %8398 = vmatpush.bf16.msra.mxu2 %v7626_v10  ;;  %v7666_v29 = vor.u32 %v8301_v27, %v7665_v26  ;;  %v7657_v32 = vld [vmem:[%s12738_s25 + $0xa0] sm:$0xf]  ;;  %v8299_v33 = vld [vmem:[%s12738_s25 + $0xa4] sm:$0xf0]  ;;  %v7594_v34 = vor.u32 %v8283_v31, %v7593_v30  ;;  %v7585_v36 = vld [vmem:[%s12738_s25 + $0x10] sm:$0xf] }
  0x55   : > { %8406 = vmatpush.bf16.msra.mxu3 %v7690_v11  ;;  %1406 = vmatpush.bf16.msra.mxu1 %v7690_v11  ;;  %v7658_v35 = vor.u32 %v8299_v33, %v7657_v32  ;;  %v8281_v37 = vld [vmem:[%s12738_s25 + $0x14] sm:$0xf0]  ;;  %v7649_v38 = vld [vmem:[%s12738_s25 + $0x90] sm:$0xf]  ;;  %v7577_v42 = vld [vmem:[%s12738_s25] sm:$0xf] }
  0x56   : > { %v8297_v39 = vld [vmem:[%s12738_s25 + $0x94] sm:$0xf0]  ;;  %v7586_v40 = vor.u32 %v8281_v37, %v7585_v36  ;;  %v8279_v43 = vld [vmem:[%s12738_s25 + $0x4] sm:$0xf0]  ;;  %v7641_v44 = vld [vmem:[%s12738_s25 + $0x80] sm:$0xf] }
  0x57   : > { %v7650_v41 = vor.u32 %v8297_v39, %v7649_v38  ;;  %v8295_v45 = vld [vmem:[%s12738_s25 + $0x84] sm:$0xf0]  ;;  %v8292_v46 = vld [vmem:[%s12738_s25 + $0x74] sm:$0xf]  ;;  %v7635_v47 = vld [vmem:[%s12738_s25 + $0x78] sm:$0xf0]  ;;  %v7578_v49 = vor.u32 %v8279_v43, %v7577_v42 }
  0x58   : > { %1238 = vmatpush.bf16.msra.mxu0 %v7618_v16  ;;  %8399 = vmatpush.bf16.msra.mxu2 %v7618_v16  ;;  %v7642_v53 = vor.u32 %v8295_v45, %v7641_v44  ;;  %v7638_v56 = vor.u32 %v8292_v46, %v7635_v47  ;;  %v8290_v60 = vld [vmem:[%s12738_s25 + $0x64] sm:$0xf]  ;;  %v7627_v61 = vld [vmem:[%s12738_s25 + $0x68] sm:$0xf0]  ;;  %v8217_v0 = vld [vmem:[%s8779_s27 + $0x14] sm:$0xf0] }
  0x59   : > { %8407 = vmatpush.bf16.msra.mxu3 %v7682_v17  ;;  %1407 = vmatpush.bf16.msra.mxu1 %v7682_v17  ;;  %v7630_v62 = vor.u32 %v8290_v60, %v7627_v61  ;;  %v7457_v1 = vld [vmem:[%s8779_s27 + $0x110] sm:$0xf]  ;;  %v8249_v2 = vld [vmem:[%s8779_s27 + $0x114] sm:$0xf0]  ;;  %v8248_v3 = vld [vmem:[%s8779_s27 + $0x114] sm:$0xf]  ;;  %v8914_v5 = vor.u32 %v8217_v0, %v7329_v63 }
  0x5a   : > { %v7459_v4 = vld [vmem:[%s8779_s27 + $0x118] sm:$0xf0]  ;;  %v8916_v6 = vor.u32 %v8249_v2, %v7457_v1  ;;  %v7337_v8 = vld [vmem:[%s8779_s27 + $0x20] sm:$0xf]  ;;  %v8219_v9 = vld [vmem:[%s8779_s27 + $0x24] sm:$0xf0] }
  0x5b   : > { %12742 = vst [vmem:[#allocation18_spill] sm:$0xff] %v8914_v5  ;;  %v8918_v7 = vor.u32 %v8248_v3, %v7459_v4  ;;  %v7465_v10 = vld [vmem:[%s8779_s27 + $0x120] sm:$0xf]  ;;  %v8251_v11 = vld [vmem:[%s8779_s27 + $0x124] sm:$0xf0]  ;;  %v8929_v14 = vor.u32 %v8219_v9, %v7337_v8  ;;  %s12889_s7 = sld [smem:[#allocation133_spill]] }
  0x5c   : > { %1239 = vmatpush.bf16.msra.mxu0 %v7610_v22  ;;  %8400 = vmatpush.bf16.msra.mxu2 %v7610_v22  ;;  %12743 = vst [vmem:[#allocation19_spill] sm:$0xff] %v8916_v6  ;;  %v8250_v12 = vld [vmem:[%s8779_s27 + $0x124] sm:$0xf]  ;;  %v7467_v13 = vld [vmem:[%s8779_s27 + $0x128] sm:$0xf0]  ;;  %v8931_v15 = vor.u32 %v8251_v11, %v7465_v10  ;;  %s12915_s10 = sld [smem:[#allocation136_spill]] }
  0x5d   : > { %8408 = vmatpush.bf16.msra.mxu3 %v7674_v23  ;;  %1408 = vmatpush.bf16.msra.mxu1 %v7674_v23  ;;  %12744 = vst [vmem:[#allocation20_spill] sm:$0xff] %v8918_v7  ;;  %v8933_v16 = vor.u32 %v8250_v12, %v7467_v13  ;;  %v8288_v17 = vld [vmem:[%s12738_s25 + $0x54] sm:$0xf]  ;;  %v7619_v18 = vld [vmem:[%s12738_s25 + $0x58] sm:$0xf0]  ;;  %s12956_s9 = sld [smem:[#allocation135_spill]] }
  0x5e   : > { %12745 = vst [vmem:[#allocation21_spill] sm:$0xff] %v8929_v14  ;;  %v7622_v19 = vor.u32 %v8288_v17, %v7619_v18  ;;  %v7345_v20 = vld [vmem:[%s8779_s27 + $0x30] sm:$0xf]  ;;  %v8221_v21 = vld [vmem:[%s8779_s27 + $0x34] sm:$0xf0]  ;;  %s12957_s6 = sld [smem:[#allocation132_spill]] }
  0x5f   : > { %12746 = vst [vmem:[#allocation22_spill] sm:$0xff] %v8931_v15  ;;  %v7473_v22 = vld [vmem:[%s8779_s27 + $0x130] sm:$0xf]  ;;  %v8253_v23 = vld [vmem:[%s8779_s27 + $0x134] sm:$0xf0]  ;;  %v8950_v26 = vor.u32 %v8221_v21, %v7345_v20  ;;  %s13041_s8 = sld [smem:[#allocation134_spill]] }
  0x60   : > { %1240 = vmatpush.bf16.msra.mxu0 %v7602_v28  ;;  %8401 = vmatpush.bf16.msra.mxu2 %v7602_v28  ;;  %12747 = vst [vmem:[#allocation23_spill] sm:$0xff] %v8933_v16  ;;  %v8252_v24 = vld [vmem:[%s8779_s27 + $0x134] sm:$0xf]  ;;  %v7475_v25 = vld [vmem:[%s8779_s27 + $0x138] sm:$0xf0]  ;;  %v8952_v27 = vor.u32 %v8253_v23, %v7473_v22  ;;  %s13107_s21 = sld [smem:[#allocation137_spill]] }
  0x61   : > { %8409 = vmatpush.bf16.msra.mxu3 %v7666_v29  ;;  %1409 = vmatpush.bf16.msra.mxu1 %v7666_v29  ;;  %12748 = vst [vmem:[#allocation24_spill] sm:$0xff] %v8950_v26  ;;  %v8954_v28 = vor.u32 %v8252_v24, %v7475_v25  ;;  %v7353_v29 = vld [vmem:[%s8779_s27 + $0x40] sm:$0xf]  ;;  %v8223_v30 = vld [vmem:[%s8779_s27 + $0x44] sm:$0xf0]  ;;  %s13129_s17 = sld [smem:[#allocation139_spill]] }
  0x62   : > { %12749 = vst [vmem:[#allocation25_spill] sm:$0xff] %v8952_v27  ;;  %v7481_v31 = vld [vmem:[%s8779_s27 + $0x140] sm:$0xf]  ;;  %v8255_v32 = vld [vmem:[%s8779_s27 + $0x144] sm:$0xf0]  ;;  %s12233_s23 = scalar_lea.vmem [#allocation5], %s7317_s30 }
  0x63   : > { %12750 = vst [vmem:[#allocation26_spill] sm:$0xff] %v8954_v28  ;;  %v8254_v33 = vld [vmem:[%s8779_s27 + $0x144] sm:$0xf]  ;;  %v8967_v36 = vor.u32 %v8255_v32, %v7481_v31  ;;  %v7611_v39 = vld [vmem:[%s12738_s25 + $0x48] sm:$0xf0]  ;;  %s13130_s1 = sld [smem:[#allocation10_spill]] }
  0x64   : > { %1241 = vmatpush.bf16.msra.mxu0 %v7594_v34  ;;  %8402 = vmatpush.bf16.msra.mxu2 %v7594_v34  ;;  %v7483_v34 = vld [vmem:[%s8779_s27 + $0x148] sm:$0xf0]  ;;  %v8286_v38 = vld [vmem:[%s12738_s25 + $0x44] sm:$0xf]  ;;  %v8225_v42 = vld [vmem:[%s8779_s27 + $0x54] sm:$0xf0] }
  0x65   : > { %8410 = vmatpush.bf16.msra.mxu3 %v7658_v35  ;;  %1410 = vmatpush.bf16.msra.mxu1 %v7658_v35  ;;  %v8965_v35 = vor.u32 %v8223_v30, %v7353_v29  ;;  %12752 = vst [vmem:[#allocation28_spill] sm:$0xff] %v8967_v36  ;;  %v8969_v37 = vor.u32 %v8254_v33, %v7483_v34  ;;  %v7489_v43 = vld [vmem:[%s8779_s27 + $0x150] sm:$0xf]  ;;  %v8257_v44 = vld [vmem:[%s8779_s27 + $0x154] sm:$0xf0]  ;;  %s13132_s15 = sld [smem:[#allocation140_spill]] }
  0x66   : > { %v8256_v45 = vld [vmem:[%s8779_s27 + $0x154] sm:$0xf]  ;;  %v7491_v46 = vld [vmem:[%s8779_s27 + $0x158] sm:$0xf0]  ;;  %v8988_v48 = vor.u32 %v8257_v44, %v7489_v43  ;;  %v8258_v60 = vld [vmem:[%s8779_s27 + $0x164] sm:$0xf] }
  0x67   : > { %12751 = vst [vmem:[#allocation27_spill] sm:$0xff] %v8965_v35  ;;  %v7499_v61 = vld [vmem:[%s8779_s27 + $0x168] sm:$0xf0]  ;;  %v8216_v1 = vld [vmem:[%s8779_s27 + $0x14] sm:$0xf] }
  0x68   : > { %1242 = vmatpush.bf16.msra.mxu0 %v7586_v40  ;;  %8403 = vmatpush.bf16.msra.mxu2 %v7586_v40  ;;  %12753 = vst [vmem:[#allocation29_spill] sm:$0xff] %v8969_v37  ;;  %v7614_v40 = vor.u32 %v8286_v38, %v7611_v39  ;;  %v9010_v0 = vor.u32 %v8258_v60, %v7499_v61  ;;  %v7331_v2 = vld [vmem:[%s8779_s27 + $0x18] sm:$0xf0]  ;;  %v8284_v3 = vld [vmem:[%s12738_s25 + $0x34] sm:$0xf] }
  0x69   : > { %8411 = vmatpush.bf16.msra.mxu3 %v7650_v41  ;;  %1411 = vmatpush.bf16.msra.mxu1 %v7650_v41  ;;  %v7361_v41 = vld [vmem:[%s8779_s27 + $0x50] sm:$0xf]  ;;  %12754 = vst [vmem:[#allocation30_spill] sm:$0xff] %v8988_v48  ;;  %v7603_v4 = vld [vmem:[%s12738_s25 + $0x38] sm:$0xf0]  ;;  %v9023_v8 = vor.u32 %v8216_v1, %v7331_v2  ;;  %s8396_s2 = sshll.u32 %s13130_s1, 9 }
  0x6a   : > { %v8986_v47 = vor.u32 %v8225_v42, %v7361_v41  ;;  %12759 = vst [vmem:[#allocation35_spill] sm:$0xff] %v9010_v0  ;;  %v7606_v9 = vor.u32 %v8284_v3, %v7603_v4  ;;  %v7377_v10 = vld [vmem:[%s8779_s27 + $0x70] sm:$0xf]  ;;  %v8229_v11 = vld [vmem:[%s8779_s27 + $0x74] sm:$0xf0] }
  0x6b   : > { %12760 = vst [vmem:[#allocation36_spill] sm:$0xff] %v9023_v8  ;;  %v7505_v12 = vld [vmem:[%s8779_s27 + $0x170] sm:$0xf]  ;;  %v8261_v13 = vld [vmem:[%s8779_s27 + $0x174] sm:$0xf0]  ;;  %s7232_s30 = scalar_lea.hbm %s13132_s15, %s8396_s2  ;;  %s8531_s2 = scalar_lea.hbm %s13132_s15, 1536 }
  0x6c   : > { %1243 = vmatpush.bf16.msra.mxu0 %v7578_v49  ;;  %8404 = vmatpush.bf16.msra.mxu2 %v7578_v49  ;;  %v8990_v49 = vor.u32 %v8256_v45, %v7491_v46  ;;  %v8260_v17 = vld [vmem:[%s8779_s27 + $0x174] sm:$0xf]  ;;  %v7507_v18 = vld [vmem:[%s8779_s27 + $0x178] sm:$0xf0]  ;;  %v9034_v20 = vor.u32 %v8261_v13, %v7505_v12  ;;  %v8218_v22 = vld [vmem:[%s8779_s27 + $0x24] sm:$0xf] }
  0x6d   : > { %8412 = vmatpush.bf16.msra.mxu3 %v7642_v53  ;;  %1412 = vmatpush.bf16.msra.mxu1 %v7642_v53  ;;  %v7369_v53 = vld [vmem:[%s8779_s27 + $0x60] sm:$0xf]  ;;  %v9036_v21 = vor.u32 %v8260_v17, %v7507_v18  ;;  %v7339_v23 = vld [vmem:[%s8779_s27 + $0x28] sm:$0xf0]  ;;  %v8231_v29 = vld [vmem:[%s8779_s27 + $0x84] sm:$0xf0] }
  0x6e   : > { %12755 = vst [vmem:[#allocation31_spill] sm:$0xff] %v8990_v49  ;;  %v9043_v24 = vor.u32 %v8218_v22, %v7339_v23  ;;  %v7385_v25 = vld [vmem:[%s8779_s27 + $0x80] sm:$0xf]  ;;  %v8263_v31 = vld [vmem:[%s8779_s27 + $0x184] sm:$0xf0] }
  0x6f   : > { %1244 = vmatmul.bf16.vlgmr.msra.gmra.mxu0 %v8893_v57  ;;  %1324 = vmatmul.bf16.vlgmr.msra.gmra.mxu2 %v8895_v58  ;;  %12762 = vst [vmem:[#allocation38_spill] sm:$0xff] %v9034_v20  ;;  %v7513_v30 = vld [vmem:[%s8779_s27 + $0x180] sm:$0xf]  ;;  %v8262_v32 = vld [vmem:[%s8779_s27 + $0x184] sm:$0xf] }
  0x70   : > { %1574 = vmatpush.bf16.msrb.mxu2 %v7638_v56  ;;  %1493 = vmatmul.bf16.vlgmr.msra.gmra.mxu3 %v8897_v59  ;;  %v8259_v56 = vld [vmem:[%s8779_s27 + $0x164] sm:$0xf0]  ;;  %12763 = vst [vmem:[#allocation39_spill] sm:$0xff] %v9036_v21  ;;  %v7515_v33 = vld [vmem:[%s8779_s27 + $0x188] sm:$0xf0]  ;;  %v9060_v41 = vor.u32 %v8263_v31, %v7513_v30 }
  0x71   : > { %1413 = vmatmul.bf16.vlgmr.msra.gmra.mxu1 %v8997_v52  ;;  %v9008_v63 = vor.u32 %v8259_v56, %v7497_v55  ;;  %12764 = vst [vmem:[#allocation40_spill] sm:$0xff] %v9043_v24  ;;  %v8308_v34 = vld [vmem:[%s12738_s25 + $0xf4] sm:$0xf]  ;;  %v7699_v38 = vld [vmem:[%s12738_s25 + $0xf8] sm:$0xf0]  ;;  %v9067_v44 = vor.u32 %v8262_v32, %v7515_v33 }
  0x72   : > { %v7702_v39 = vor.u32 %v8308_v34, %v7699_v38  ;;  %12766 = vst [vmem:[#allocation42_spill] sm:$0xff] %v9060_v41  ;;  %v750_v42 = vld [vmem:[%s12767_s28] sm:$0x3]  ;;  %v8220_v46 = vld [vmem:[%s8779_s27 + $0x34] sm:$0xf] }
  0x73   : > { %12758 = vst [vmem:[#allocation34_spill] sm:$0xff] %v9008_v63  ;;  %v9069_v45 = vperm.slane %v750_v42, 0  ;;  %v9076_v51 = vor.u32 %v8220_v46, %v7347_v50  ;;  %v7393_v3 = vld [vmem:[%s8779_s27 + $0x90] sm:$0xf]  ;;  %v8233_v4 = vld [vmem:[%s8779_s27 + $0x94] sm:$0xf0] }
  0x74   : > { %1575 = vmatpush.bf16.msrb.mxu2 %v7630_v62  ;;  %v9006_v62 = vor.u32 %v8227_v54, %v7369_v53  ;;  %12768 = vst [vmem:[#allocation43_spill] sm:$0xff] %v9067_v44  ;;  %1743 = vmatpush.bf16.msrb.mxu3 %v7702_v39  ;;  %v8282_v53 = vld [vmem:[%s12738_s25 + $0x24] sm:$0xf]  ;;  %v7595_v54 = vld [vmem:[%s12738_s25 + $0x28] sm:$0xf0]  ;;  %v9095_v22 = vor.u32 %v8233_v4, %v7393_v3 }
  0x75   : > { %12769 = vst [vmem:[#allocation44_spill] sm:$0xff] %v9076_v51  ;;  %v7598_v56 = vor.u32 %v8282_v53, %v7595_v54  ;;  %v7523_v12 = vld [vmem:[%s8779_s27 + $0x198] sm:$0xf0]  ;;  %v8222_v33 = vld [vmem:[%s8779_s27 + $0x44] sm:$0xf] }
  0x76   : > { %12757 = vst [vmem:[#allocation33_spill] sm:$0xff] %v9006_v62  ;;  %v7355_v34 = vld [vmem:[%s8779_s27 + $0x48] sm:$0xf0]  ;;  %v7529_v3 = vld [vmem:[%s8779_s27 + $0x1a0] sm:$0xf] }
  0x77   : > { %12770 = vst [vmem:[#allocation45_spill] sm:$0xff] %v9095_v22  ;;  %v9108_v38 = vor.u32 %v8222_v33, %v7355_v34  ;;  %v8267_v4 = vld [vmem:[%s8779_s27 + $0x1a4] sm:$0xf0] }
  0x78   : > { %1576 = vmatpush.bf16.msrb.mxu2 %v7622_v19  ;;  %v9032_v19 = vor.u32 %v8229_v11, %v7377_v10  ;;  %v8265_v10 = vld [vmem:[%s8779_s27 + $0x194] sm:$0xf0]  ;;  %v8264_v11 = vld [vmem:[%s8779_s27 + $0x194] sm:$0xf] }
  0x79   : > { %12773 = vst [vmem:[#allocation48_spill] sm:$0xff] %v9108_v38 }
  0x7a   : > { %12761 = vst [vmem:[#allocation37_spill] sm:$0xff] %v9032_v19 }
  0x7c   : > { %1577 = vmatpush.bf16.msrb.mxu2 %v7614_v40  ;;  %v9058_v40 = vor.u32 %v8231_v29, %v7385_v25  ;;  %v9101_v29 = vor.u32 %v8264_v11, %v7523_v12  ;;  %v7691_v11 = vld [vmem:[%s12738_s25 + $0xe8] sm:$0xf0] }
  0x7e   : > { %12765 = vst [vmem:[#allocation41_spill] sm:$0xff] %v9058_v40 }
  0x7f   : > { %1249 = vmatmul.bf16.gmra.mxu0 %v8914_v5  ;;  %1329 = vmatmul.bf16.gmra.mxu2 %v8916_v6  ;;  %12772 = vst [vmem:[#allocation47_spill] sm:$0xff] %v9101_v29 }
  0x80   : > { %1498 = vmatmul.bf16.gmra.mxu3 %v8918_v7  ;;  %1578 = vmatpush.bf16.msrb.mxu2 %v7606_v9  ;;  %v7521_v9 = vld [vmem:[%s8779_s27 + $0x190] sm:$0xf]  ;;  %v8276_v7 = vld [vmem:[%s8779_s27 + $0x1f4] sm:$0xf] }
  0x81   : > { %1418 = vmatmul.bf16.gmra.mxu1 %v9023_v8  ;;  %v9097_v23 = vor.u32 %v8265_v10, %v7521_v9  ;;  %v8266_v9 = vld [vmem:[%s8779_s27 + $0x1a4] sm:$0xf]  ;;  %v7531_v10 = vld [vmem:[%s8779_s27 + $0x1a8] sm:$0xf0] }
  0x82   : > { %v9135_v33 = vor.u32 %v8266_v9, %v7531_v10 }
  0x83   : > { %12771 = vst [vmem:[#allocation46_spill] sm:$0xff] %v9097_v23 }
  0x84   : > { %1579 = vmatpush.bf16.msrb.mxu2 %v7598_v56  ;;  %12777 = vst [vmem:[#allocation52_spill] sm:$0xff] %v9135_v33 }
  0x8f   : > { %1254 = vmatmul.bf16.gmra.mxu0 %v8929_v14  ;;  %1334 = vmatmul.bf16.gmra.mxu2 %v8931_v15 }
  0x90   : > { %1503 = vmatmul.bf16.gmra.mxu3 %v8933_v16 }
  0x91   : > { %1423 = vmatmul.bf16.gmra.mxu1 %v9043_v24 }
  0x9f   : > { %1259 = vmatmul.bf16.gmra.mxu0 %v8950_v26  ;;  %1339 = vmatmul.bf16.gmra.mxu2 %v8952_v27 }
  0xa0   : > { %1508 = vmatmul.bf16.gmra.mxu3 %v8954_v28 }
  0xa1   : > { %1428 = vmatmul.bf16.gmra.mxu1 %v9076_v51 }
  0xaf   : > { %1264 = vmatmul.bf16.gmra.mxu0 %v8965_v35  ;;  %1344 = vmatmul.bf16.gmra.mxu2 %v8967_v36 }
  0xb0   : > { %1513 = vmatmul.bf16.gmra.mxu3 %v8969_v37 }
  0xb1   : > { %1433 = vmatmul.bf16.gmra.mxu1 %v9108_v38 }
  0xbf   : > { %1269 = vmatmul.bf16.gmra.mxu0 %v8986_v47  ;;  %1349 = vmatmul.bf16.gmra.mxu2 %v8988_v48 }
  0xc0   : > { %1518 = vmatmul.bf16.gmra.mxu3 %v8990_v49  ;;  %v8319_v49 = vld [vmem:[%s12788_s19 + $0x44] sm:$0xf0] }
  0xcf   : > { %1274 = vmatmul.bf16.gmra.mxu0 %v9006_v62  ;;  %1354 = vmatmul.bf16.gmra.mxu2 %v9008_v63 }
  0xd0   : > { %1523 = vmatmul.bf16.gmra.mxu3 %v9010_v0 }
  0xdf   : > { %1279 = vmatmul.bf16.gmra.mxu0 %v9032_v19  ;;  %1359 = vmatmul.bf16.gmra.mxu2 %v9034_v20 }
  0xe0   : > { %1528 = vmatmul.bf16.gmra.mxu3 %v9036_v21 }
  0xec   : > { %v9065_v43 = vpop.f32.mrf.mxu0 }
  0xef   : > { %1284 = vmatmul.bf16.gmra.mxu0 %v9058_v40  ;;  %1364 = vmatmul.bf16.gmra.mxu2 %v9060_v41  ;;  %v8270_v41 = vld [vmem:[%s8779_s27 + $0x1c4] sm:$0xf] }
  0xf0   : > { %1533 = vmatmul.bf16.gmra.mxu3 %v9067_v44  ;;  %v7545_v44 = vld [vmem:[%s8779_s27 + $0x1c0] sm:$0xf] }
  0xf2   : > { %v1325_v55 = vpop.f32.mrf.mxu2 }
  0xf3   : > { %v1326_v60 = vadd.f32 %v1325_v55, %v9069_v45  ;;  %v1494_v61 = vpop.f32.mrf.mxu3 }
  0xf4   : > { %v9086_v1 = vpop.f32.mrf.mxu0 }
  0xf5   : > { %v1495_v2 = vadd.f32 %v1494_v61, %v1326_v60  ;;  %v7401_v60 = vld [vmem:[%s8779_s27 + $0xa0] sm:$0xf]  ;;  %v8235_v61 = vld [vmem:[%s8779_s27 + $0xa4] sm:$0xf0] }
  0xf7   : > { %v1976_v30 = vmul.f32 0.1, %v1495_v2 }
  0xf9   : > { %v2104_v39 = vmax.f32 %v1495_v2, %v1976_v30  ;;  %v8306_v2 = vld [vmem:[%s12738_s25 + $0xe4] sm:$0xf]  ;;  %v9129_v30 = vor.u32 %v8235_v61, %v7401_v60 }
  0xfa   : > { %v1327_v13 = vpop.f32.mrf.mxu2 }
  0xfb   : > { %v1328_v17 = vadd.f32 %v1327_v13, %v9069_v45  ;;  %v1496_v18 = vpop.f32.mrf.mxu3  ;;  %v7694_v13 = vor.u32 %v8306_v2, %v7691_v11  ;;  %12775 = vst [vmem:[#allocation50_spill] sm:$0xff] %v9129_v30 }
  0xfc   : > { %v9099_v25 = vpop.f32.mrf.mxu0 }
  0xfd   : > { %v1497_v31 = vadd.f32 %v1496_v18, %v1328_v17  ;;  %1744 = vmatpush.bf16.msrb.mxu3 %v7694_v13 }
  0xff   : > { %v1978_v32 = vmul.f32 0.1, %v1497_v31  ;;  %1289 = vmatmul.bf16.gmra.mxu0 %v9095_v22  ;;  %1369 = vmatmul.bf16.gmra.mxu2 %v9097_v23  ;;  %v8239_v23 = vld [vmem:[%s8779_s27 + $0xc4] sm:$0xf0] }
 0x100   : > { %1538 = vmatmul.bf16.gmra.mxu3 %v9101_v29  ;;  %v7417_v29 = vld [vmem:[%s8779_s27 + $0xc0] sm:$0xf] }
 0x101   : > { %v2106_v42 = vmax.f32 %v1497_v31, %v1978_v32  ;;  %v9131_v31 = vor.u32 %v8267_v4, %v7529_v3  ;;  %v8280_v3 = vld [vmem:[%s12738_s25 + $0x14] sm:$0xf]  ;;  %v7587_v4 = vld [vmem:[%s12738_s25 + $0x18] sm:$0xf0] }
 0x102   : > { %v1330_v46 = vpop.f32.mrf.mxu2  ;;  %v7590_v10 = vor.u32 %v8280_v3, %v7587_v4 }
 0x103   : > { %v1331_v50 = vadd.f32 %v1330_v46, %v9069_v45  ;;  %v1499_v53 = vpop.f32.mrf.mxu3  ;;  %v9112_v54 = vpack.c.bf16 %v2106_v42, %v2104_v39  ;;  %12776 = vst [vmem:[#allocation51_spill] sm:$0xff] %v9131_v31  ;;  %v8224_v46 = vld [vmem:[%s8779_s27 + $0x54] sm:$0xf] }
 0x104   : > { %v9114_v55 = vpop.f32.mrf.mxu0  ;;  %1580 = vmatpush.bf16.msrb.mxu2 %v7590_v10 }
 0x105   : > { %12774 = vst [vmem:[#allocation49_spill] sm:$0xff] %v9112_v54  ;;  %v1500_v56 = vadd.f32 %v1499_v53, %v1331_v50  ;;  %v7363_v50 = vld [vmem:[%s8779_s27 + $0x58] sm:$0xf0] }
 0x106   : > { %v9142_v53 = vor.u32 %v8224_v46, %v7363_v50  ;;  %v7539_v46 = vld [vmem:[%s8779_s27 + $0x1b8] sm:$0xf0] }
 0x107   : > { %v1980_v34 = vmul.f32 0.1, %v1500_v56 }
 0x108   : > { %12778 = vst [vmem:[#allocation53_spill] sm:$0xff] %v9142_v53  ;;  %1438 = vmatmul.bf16.gmra.mxu1 %v9142_v53 }
 0x109   : > { %v2108_v60 = vmax.f32 %v1500_v56, %v1980_v34  ;;  %v7537_v34 = vld [vmem:[%s8779_s27 + $0x1b0] sm:$0xf] }
 0x10a   : > { %v1332_v12 = vpop.f32.mrf.mxu2 }
 0x10b   : > { %v1333_v17 = vadd.f32 %v1332_v12, %v9069_v45  ;;  %v1501_v18 = vpop.f32.mrf.mxu3 }
 0x10c   : > { %v9133_v32 = vpop.f32.mrf.mxu0 }
 0x10d   : > { %v1502_v39 = vadd.f32 %v1501_v18, %v1333_v17  ;;  %v7409_v17 = vld [vmem:[%s8779_s27 + $0xb0] sm:$0xf]  ;;  %v8237_v18 = vld [vmem:[%s8779_s27 + $0xb4] sm:$0xf0] }
 0x10f   : > { %v1982_v42 = vmul.f32 0.1, %v1502_v39  ;;  %1294 = vmatmul.bf16.gmra.mxu0 %v9129_v30  ;;  %1374 = vmatmul.bf16.gmra.mxu2 %v9131_v31 }
 0x110   : > { %1543 = vmatmul.bf16.gmra.mxu3 %v9135_v33 }
 0x111   : > { %v2110_v61 = vmax.f32 %v1502_v39, %v1982_v42  ;;  %v8269_v39 = vld [vmem:[%s8779_s27 + $0x1b4] sm:$0xf0]  ;;  %v8268_v42 = vld [vmem:[%s8779_s27 + $0x1b4] sm:$0xf] }
 0x112   : > { %v1335_v9 = vpop.f32.mrf.mxu2  ;;  %v9169_v10 = vor.u32 %v8268_v42, %v7539_v46 }
 0x113   : > { %v1336_v2 = vadd.f32 %v1335_v9, %v9069_v45  ;;  %v1504_v11 = vpop.f32.mrf.mxu3  ;;  %v9152_v56 = vpack.c.bf16 %v2110_v61, %v2108_v60  ;;  %v9163_v9 = vor.u32 %v8237_v18, %v7409_v17  ;;  %v9165_v60 = vor.u32 %v8269_v39, %v7537_v34  ;;  %v7371_v17 = vld [vmem:[%s8779_s27 + $0x68] sm:$0xf0] }
 0x114   : > { %v9154_v12 = vpop.f32.mrf.mxu0  ;;  %12782 = vst [vmem:[#allocation57_spill] sm:$0xff] %v9169_v10 }
 0x115   : > { %12779 = vst [vmem:[#allocation54_spill] sm:$0xff] %v9152_v56  ;;  %v1505_v13 = vadd.f32 %v1504_v11, %v1336_v2  ;;  %v7571_v56 = vld [vmem:[%s8779_s27 + $0x1f8] sm:$0xf0] }
 0x116   : > { %12780 = vst [vmem:[#allocation55_spill] sm:$0xff] %v9163_v9 }
 0x117   : > { %12781 = vst [vmem:[#allocation56_spill] sm:$0xff] %v9165_v60  ;;  %v1984_v2 = vmul.f32 0.1, %v1505_v13 }
 0x119   : > { %v2112_v34 = vmax.f32 %v1505_v13, %v1984_v2  ;;  %v7683_v13 = vld [vmem:[%s12738_s25 + $0xd8] sm:$0xf0] }
 0x11a   : > { %v1337_v50 = vpop.f32.mrf.mxu2 }
 0x11b   : > { %v1338_v3 = vadd.f32 %v1337_v50, %v9069_v45  ;;  %v1506_v4 = vpop.f32.mrf.mxu3  ;;  %v8226_v50 = vld [vmem:[%s8779_s27 + $0x64] sm:$0xf] }
 0x11c   : > { %v9167_v61 = vpop.f32.mrf.mxu0  ;;  %v9176_v18 = vor.u32 %v8226_v50, %v7371_v17  ;;  %v7547_v50 = vld [vmem:[%s8779_s27 + $0x1c8] sm:$0xf0] }
 0x11d   : > { %v1507_v11 = vadd.f32 %v1506_v4, %v1338_v3 }
 0x11e   : > { %12783 = vst [vmem:[#allocation58_spill] sm:$0xff] %v9176_v18  ;;  %1443 = vmatmul.bf16.gmra.mxu1 %v9176_v18 }
 0x11f   : > { %v1986_v33 = vmul.f32 0.1, %v1507_v11  ;;  %1299 = vmatmul.bf16.gmra.mxu0 %v9163_v9  ;;  %1379 = vmatmul.bf16.gmra.mxu2 %v9165_v60 }
 0x120   : > { %1548 = vmatmul.bf16.gmra.mxu3 %v9169_v10  ;;  %v8271_v10 = vld [vmem:[%s8779_s27 + $0x1c4] sm:$0xf0] }
 0x121   : > { %v2114_v39 = vmax.f32 %v1507_v11, %v1986_v33  ;;  %v8304_v33 = vld [vmem:[%s12738_s25 + $0xd4] sm:$0xf] }
 0x122   : > { %v1340_v42 = vpop.f32.mrf.mxu2  ;;  %v7686_v11 = vor.u32 %v8304_v33, %v7683_v13  ;;  %v7761_v33 = vld [vmem:[%s12788_s19 + $0x70] sm:$0xf]  ;;  %v8278_v13 = vld [vmem:[%s12738_s25 + $0x4] sm:$0xf] }
 0x123   : > { %v1341_v46 = vadd.f32 %v1340_v42, %v9069_v45  ;;  %v1509_v3 = vpop.f32.mrf.mxu3  ;;  %v9180_v4 = vpack.c.bf16 %v2114_v39, %v2112_v34  ;;  %v9197_v39 = vor.u32 %v8239_v23, %v7417_v29  ;;  %v9199_v42 = vor.u32 %v8271_v10, %v7545_v44  ;;  %v8325_v44 = vld [vmem:[%s12788_s19 + $0x74] sm:$0xf0]  ;;  %v8228_v23 = vld [vmem:[%s8779_s27 + $0x74] sm:$0xf]  ;;  %v7379_v29 = vld [vmem:[%s8779_s27 + $0x78] sm:$0xf0] }
 0x124   : > { %v9182_v60 = vpop.f32.mrf.mxu0  ;;  %1745 = vmatpush.bf16.msrb.mxu3 %v7686_v11  ;;  %v9222_v11 = vor.u32 %v8228_v23, %v7379_v29  ;;  %v7745_v29 = vld [vmem:[%s12788_s19 + $0x50] sm:$0xf] }
 0x125   : > { %12784 = vst [vmem:[#allocation59_spill] sm:$0xff] %v9180_v4  ;;  %v1510_v31 = vadd.f32 %v1509_v3, %v1341_v46  ;;  %v9203_v3 = vor.u32 %v8270_v41, %v7547_v50  ;;  %v7762_v41 = vor.u32 %v8325_v44, %v7761_v33 }
 0x126   : > { %12785 = vst [vmem:[#allocation60_spill] sm:$0xff] %v9197_v39 }
 0x127   : > { %12786 = vst [vmem:[#allocation61_spill] sm:$0xff] %v9199_v42  ;;  %v1988_v21 = vmul.f32 0.1, %v1510_v31  ;;  %2430 = vmatpush.bf16.msrb.mxu0 %v7762_v41 }
 0x128   : > { %12787 = vst [vmem:[#allocation62_spill] sm:$0xff] %v9203_v3 }
 0x129   : > { %v2116_v10 = vmax.f32 %v1510_v31, %v1988_v21  ;;  %12789 = vst [vmem:[#allocation63_spill] sm:$0xff] %v9222_v11  ;;  %v7753_v21 = vld [vmem:[%s12788_s19 + $0x60] sm:$0xf] }
 0x12a   : > { %v1342_v2 = vpop.f32.mrf.mxu2 }
 0x12b   : > { %v1343_v17 = vadd.f32 %v1342_v2, %v9069_v45  ;;  %v1511_v34 = vpop.f32.mrf.mxu3  ;;  %v7579_v2 = vld [vmem:[%s12738_s25 + $0x8] sm:$0xf0] }
 0x12c   : > { %v9201_v46 = vpop.f32.mrf.mxu0 }
 0x12d   : > { %v1512_v20 = vadd.f32 %v1511_v34, %v1343_v17  ;;  %v7582_v34 = vor.u32 %v8278_v13, %v7579_v2  ;;  %v8321_v13 = vld [vmem:[%s12788_s19 + $0x54] sm:$0xf0]  ;;  %v7425_v2 = vld [vmem:[%s8779_s27 + $0xd0] sm:$0xf] }
 0x12e   : > { %1448 = vmatmul.bf16.gmra.mxu1 %v9222_v11 }
 0x12f   : > { %v1990_v0 = vmul.f32 0.1, %v1512_v20  ;;  %1304 = vmatmul.bf16.gmra.mxu0 %v9197_v39  ;;  %1384 = vmatmul.bf16.gmra.mxu2 %v9199_v42  ;;  %v7553_v42 = vld [vmem:[%s8779_s27 + $0x1d0] sm:$0xf] }
 0x130   : > { %1553 = vmatmul.bf16.gmra.mxu3 %v9203_v3  ;;  %1581 = vmatpush.bf16.msrb.mxu2 %v7582_v34  ;;  %v8241_v3 = vld [vmem:[%s8779_s27 + $0xd4] sm:$0xf0]  ;;  %v8302_v34 = vld [vmem:[%s12738_s25 + $0xc4] sm:$0xf] }
 0x131   : > { %v2118_v50 = vmax.f32 %v1512_v20, %v1990_v0  ;;  %v8323_v0 = vld [vmem:[%s12788_s19 + $0x64] sm:$0xf0] }
 0x132   : > { %v1345_v17 = vpop.f32.mrf.mxu2  ;;  %v7754_v33 = vor.u32 %v8323_v0, %v7753_v21  ;;  %v8273_v21 = vld [vmem:[%s8779_s27 + $0x1d4] sm:$0xf0] }
 0x133   : > { %v1346_v20 = vadd.f32 %v1345_v17, %v9069_v45  ;;  %v1514_v31 = vpop.f32.mrf.mxu3  ;;  %v9232_v44 = vpack.c.bf16 %v2118_v50, %v2116_v10  ;;  %v7746_v17 = vor.u32 %v8321_v13, %v7745_v29  ;;  %v8272_v10 = vld [vmem:[%s8779_s27 + $0x1d4] sm:$0xf]  ;;  %v7555_v50 = vld [vmem:[%s8779_s27 + $0x1d8] sm:$0xf0]  ;;  %v9258_v13 = vor.u32 %v8241_v3, %v7425_v2 }
 0x134   : > { %v9234_v41 = vpop.f32.mrf.mxu0  ;;  %2431 = vmatpush.bf16.msrb.mxu0 %v7754_v33  ;;  %v9260_v63 = vor.u32 %v8273_v21, %v7553_v42  ;;  %v9267_v37 = vor.u32 %v8272_v10, %v7555_v50  ;;  %v9271_v42 = vpop.f32.mrf.mxu1  ;;  %v8300_v2 = vld [vmem:[%s12738_s25 + $0xb4] sm:$0xf]  ;;  %v8317_v10 = vld [vmem:[%s12788_s19 + $0x34] sm:$0xf0]  ;;  %v8230_v50 = vld [vmem:[%s8779_s27 + $0x84] sm:$0xf] }
 0x135   : > { %12790 = vst [vmem:[#allocation64_spill] sm:$0xff] %v9232_v44  ;;  %v1515_v23 = vadd.f32 %v1514_v31, %v1346_v20  ;;  %v7675_v20 = vld [vmem:[%s12738_s25 + $0xc8] sm:$0xf0]  ;;  %v7737_v31 = vld [vmem:[%s12788_s19 + $0x40] sm:$0xf] }
 0x136   : > { %12791 = vst [vmem:[#allocation65_spill] sm:$0xff] %v9258_v13  ;;  %v7738_v36 = vor.u32 %v8319_v49, %v7737_v31  ;;  %v7667_v49 = vld [vmem:[%s12738_s25 + $0xb8] sm:$0xf0]  ;;  %v7387_v31 = vld [vmem:[%s8779_s27 + $0x88] sm:$0xf0] }
 0x137   : > { %12792 = vst [vmem:[#allocation66_spill] sm:$0xff] %v9260_v63  ;;  %v1992_v28 = vmul.f32 0.1, %v1515_v23  ;;  %v7670_v21 = vor.u32 %v8300_v2, %v7667_v49  ;;  %v7659_v2 = vld [vmem:[%s12738_s25 + $0xa8] sm:$0xf0] }
 0x138   : > { %2432 = vmatpush.bf16.msrb.mxu0 %v7746_v17  ;;  %v7678_v17 = vor.u32 %v8302_v34, %v7675_v20  ;;  %12793 = vst [vmem:[#allocation67_spill] sm:$0xff] %v9267_v37  ;;  %v8315_v49 = vld [vmem:[%s12788_s19 + $0x24] sm:$0xf0] }
 0x13a   : > { %v1347_v0 = vpop.f32.mrf.mxu2  ;;  %1746 = vmatpush.bf16.msrb.mxu3 %v7678_v17  ;;  %v8298_v17 = vld [vmem:[%s12738_s25 + $0xa4] sm:$0xf] }
 0x13b   : > { %v1348_v33 = vadd.f32 %v1347_v0, %v9069_v45  ;;  %v1516_v29 = vpop.f32.mrf.mxu3  ;;  %v2120_v0 = vmax.f32 %v1515_v23, %v1992_v28  ;;  %v7721_v28 = vld [vmem:[%s12788_s19 + $0x20] sm:$0xf] }
 0x13c   : > { %v9265_v48 = vpop.f32.mrf.mxu0  ;;  %2433 = vmatpush.bf16.msrb.mxu0 %v7738_v36  ;;  %v7729_v36 = vld [vmem:[%s12788_s19 + $0x30] sm:$0xf] }
 0x13d   : > { %v1517_v44 = vadd.f32 %v1516_v29, %v1348_v33  ;;  %v7730_v20 = vor.u32 %v8317_v10, %v7729_v36  ;;  %v9288_v29 = vor.u32 %v8230_v50, %v7387_v31  ;;  %v7722_v10 = vor.u32 %v8315_v49, %v7721_v28  ;;  %v7651_v31 = vld [vmem:[%s12738_s25 + $0x98] sm:$0xf0]  ;;  %v8243_v28 = vld [vmem:[%s8779_s27 + $0xe4] sm:$0xf0]  ;;  %v8274_v49 = vld [vmem:[%s8779_s27 + $0x1e4] sm:$0xf] }
 0x13e   : > { %1747 = vmatpush.bf16.msrb.mxu3 %v7670_v21 }
 0x13f   : > { %v1994_v3 = vmul.f32 0.1, %v1517_v44  ;;  %1309 = vmatmul.bf16.gmra.mxu0 %v9258_v13  ;;  %1389 = vmatmul.bf16.gmra.mxu2 %v9260_v63  ;;  %12794 = vst [vmem:[#allocation68_spill] sm:$0xff] %v9288_v29 }
 0x140   : > { %1558 = vmatmul.bf16.gmra.mxu3 %v9267_v37  ;;  %2434 = vmatpush.bf16.msrb.mxu0 %v7730_v20  ;;  %v8296_v20 = vld [vmem:[%s12738_s25 + $0x94] sm:$0xf]  ;;  %v7563_v37 = vld [vmem:[%s8779_s27 + $0x1e8] sm:$0xf0] }
 0x141   : > { %v2122_v34 = vmax.f32 %v1517_v44, %v1994_v3  ;;  %v7662_v3 = vor.u32 %v8298_v17, %v7659_v2  ;;  %1453 = vmatmul.bf16.gmra.mxu1 %v9288_v29  ;;  %v7654_v17 = vor.u32 %v8296_v20, %v7651_v31  ;;  %v8313_v2 = vld [vmem:[%s12788_s19 + $0x14] sm:$0xf0] }
 0x142   : > { %v1350_v33 = vpop.f32.mrf.mxu2 }
 0x143   : > { %v1351_v44 = vadd.f32 %v1350_v33, %v9069_v45  ;;  %v1519_v23 = vpop.f32.mrf.mxu3  ;;  %v9303_v21 = vpack.c.bf16 %v2122_v34, %v2120_v0  ;;  %1748 = vmatpush.bf16.msrb.mxu3 %v7662_v3  ;;  %v7713_v0 = vld [vmem:[%s12788_s19 + $0x10] sm:$0xf]  ;;  %v7433_v34 = vld [vmem:[%s8779_s27 + $0xe0] sm:$0xf]  ;;  %v9318_v33 = vpop.f32.mrf.mxu1 }
 0x144   : > { %v9305_v36 = vpop.f32.mrf.mxu0  ;;  %2435 = vmatpush.bf16.msrb.mxu0 %v7722_v10  ;;  %v7714_v3 = vor.u32 %v8313_v2, %v7713_v0  ;;  %v7643_v10 = vld [vmem:[%s12738_s25 + $0x88] sm:$0xf0]  ;;  %v9335_v27 = vor.u32 %v8243_v28, %v7433_v34  ;;  %v8311_v2 = vld [vmem:[%s12788_s19 + $0x4] sm:$0xf0] }
 0x145   : > { %12795 = vst [vmem:[#allocation69_spill] sm:$0xff] %v9303_v21  ;;  %v1520_v50 = vadd.f32 %v1519_v23, %v1351_v44  ;;  %v7561_v44 = vld [vmem:[%s8779_s27 + $0x1e0] sm:$0xf]  ;;  %v8275_v23 = vld [vmem:[%s8779_s27 + $0x1e4] sm:$0xf0] }
 0x146   : > { %v8294_v21 = vld [vmem:[%s12738_s25 + $0x84] sm:$0xf]  ;;  %12796 = vst [vmem:[#allocation70_spill] sm:$0xff] %v9335_v27  ;;  %v9337_v16 = vor.u32 %v8275_v23, %v7561_v44  ;;  %v8232_v23 = vld [vmem:[%s8779_s27 + $0x94] sm:$0xf] }
 0x147   : > { %1749 = vmatpush.bf16.msrb.mxu3 %v7654_v17  ;;  %v7646_v0 = vor.u32 %v8294_v21, %v7643_v10  ;;  %v7705_v17 = vld [vmem:[%s12788_s19] sm:$0xf]  ;;  %v1996_v28 = vmul.f32 0.1, %v1520_v50 }
 0x148   : > { %12797 = vst [vmem:[#allocation71_spill] sm:$0xff] %v9337_v16  ;;  %2436 = vmatpush.bf16.msrb.mxu0 %v7714_v3  ;;  %v7706_v34 = vor.u32 %v8311_v2, %v7705_v17  ;;  %v7395_v3 = vld [vmem:[%s8779_s27 + $0x98] sm:$0xf0] }
 0x149   : > { %v9356_v10 = vor.u32 %v8232_v23, %v7395_v3  ;;  %v8245_v3 = vld [vmem:[%s8779_s27 + $0xf4] sm:$0xf0] }
 0x14a   : > { %v1352_v63 = vpop.f32.mrf.mxu2 }
 0x14b   : > { %v1353_v20 = vadd.f32 %v1352_v63, %v9069_v45  ;;  %v1521_v31 = vpop.f32.mrf.mxu3  ;;  %v9347_v63 = vor.u32 %v8274_v49, %v7563_v37  ;;  %1750 = vmatpush.bf16.msrb.mxu3 %v7646_v0  ;;  %v9351_v21 = vpop.f32.mrf.mxu1  ;;  %12799 = vst [vmem:[#allocation73_spill] sm:$0xff] %v9356_v10  ;;  %v2124_v37 = vmax.f32 %v1520_v50, %v1996_v28  ;;  %v7441_v28 = vld [vmem:[%s8779_s27 + $0xf0] sm:$0xf] }
 0x14c   : > { %v9345_v4 = vpop.f32.mrf.mxu0  ;;  %2437 = vmatpush.bf16.msrb.mxu0 %v7706_v34 }
 0x14d   : > { %12798 = vst [vmem:[#allocation72_spill] sm:$0xff] %v9347_v63  ;;  %v1522_v15 = vadd.f32 %v1521_v31, %v1353_v20  ;;  %v8324_v20 = vld [vmem:[%s12788_s19 + $0x74] sm:$0xf]  ;;  %v7763_v31 = vld [vmem:[%s12788_s19 + $0x78] sm:$0xf0] }
 0x14e   : > { %v7766_v17 = vor.u32 %v8324_v20, %v7763_v31  ;;  %v1246_v20 = vadd.f32 %v9065_v43, %v9069_v45 }
 0x14f   : > { %v1998_v44 = vmul.f32 0.1, %v1522_v15  ;;  %1314 = vmatmul.bf16.gmra.mxu0 %v9335_v27  ;;  %1394 = vmatmul.bf16.gmra.mxu2 %v9337_v16  ;;  %v8277_v16 = vld [vmem:[%s8779_s27 + $0x1f4] sm:$0xf0] }
 0x150   : > { %1563 = vmatmul.bf16.gmra.mxu3 %v9347_v63  ;;  %2768 = vmatpush.bf16.msra.mxu2 %v7766_v17  ;;  %v7569_v63 = vld [vmem:[%s8779_s27 + $0x1f0] sm:$0xf]  ;;  %v9381_v17 = vor.u32 %v8245_v3, %v7441_v28  ;;  %v1415_v54 = vadd.f32 %v9271_v42, %v1246_v20  ;;  %v8234_v28 = vld [vmem:[%s8779_s27 + $0xa4] sm:$0xf]  ;;  %v7403_v3 = vld [vmem:[%s8779_s27 + $0xa8] sm:$0xf0] }
 0x151   : > { %v2126_v49 = vmax.f32 %v1522_v15, %v1998_v44  ;;  %1458 = vmatmul.bf16.gmra.mxu1 %v9356_v10 }
 0x152   : > { %v1355_v0 = vpop.f32.mrf.mxu2  ;;  %12801 = vst [vmem:[#allocation75_spill] sm:$0xff] %v9381_v17 }
 0x153   : > { %v1356_v2 = vadd.f32 %v1355_v0, %v9069_v45  ;;  %v1524_v34 = vpop.f32.mrf.mxu3  ;;  %v9365_v23 = vpack.c.bf16 %v2126_v49, %v2124_v37  ;;  %v1421_v44 = vpop.f32.mrf.mxu1  ;;  %v1248_v37 = vadd.f32 %v9086_v1, %v9069_v45 }
 0x154   : > { %v9367_v50 = vpop.f32.mrf.mxu0 }
 0x155   : > { %12800 = vst [vmem:[#allocation74_spill] sm:$0xff] %v9365_v23  ;;  %v1525_v15 = vadd.f32 %v1524_v34, %v1356_v2  ;;  %v9383_v2 = vor.u32 %v8277_v16, %v7569_v63  ;;  %v9387_v23 = vor.u32 %v8276_v7, %v7571_v56  ;;  %v1417_v1 = vadd.f32 %v9318_v33, %v1248_v37 }
 0x156   : > { %v9396_v16 = vor.u32 %v8234_v28, %v7403_v3 }
 0x157   : > { %12802 = vst [vmem:[#allocation76_spill] sm:$0xff] %v9383_v2  ;;  %v2000_v6 = vmul.f32 0.1, %v1525_v15  ;;  %v1914_v20 = vmul.f32 0.1, %v1417_v1 }
 0x158   : > { %12803 = vst [vmem:[#allocation77_spill] sm:$0xff] %v9387_v23 }
 0x159   : > { %12804 = vst [vmem:[#allocation78_spill] sm:$0xff] %v9396_v16  ;;  %v2128_v7 = vmax.f32 %v1525_v15, %v2000_v6  ;;  %v1253_v6 = vadd.f32 %v9114_v55, %v9069_v45  ;;  %v7411_v55 = vld [vmem:[%s8779_s27 + $0xb8] sm:$0xf0] }
 0x15a   : > { %v1357_v31 = vpop.f32.mrf.mxu2 }
 0x15b   : > { %v1358_v49 = vadd.f32 %v1357_v31, %v9069_v45  ;;  %v1526_v0 = vpop.f32.mrf.mxu3  ;;  %v1424_v31 = vpop.f32.mrf.mxu1 }
 0x15c   : > { %v9385_v34 = vpop.f32.mrf.mxu0 }
 0x15d   : > { %v1527_v59 = vadd.f32 %v1526_v0, %v1358_v49  ;;  %v1912_v49 = vmul.f32 0.1, %v1415_v54 }
 0x15f   : > { %v2002_v43 = vmul.f32 0.1, %v1527_v59  ;;  %1319 = vmatmul.bf16.gmra.mxu0 %v9381_v17  ;;  %1399 = vmatmul.bf16.gmra.mxu2 %v9383_v2  ;;  %v2040_v37 = vmax.f32 %v1415_v54, %v1912_v49  ;;  %v2042_v17 = vmax.f32 %v1417_v1, %v1914_v20 }
 0x160   : > { %1568 = vmatmul.bf16.gmra.mxu3 %v9387_v23 }
 0x161   : > { %v2130_v56 = vmax.f32 %v1527_v59, %v2002_v43  ;;  %1463 = vmatmul.bf16.gmra.mxu1 %v9396_v16  ;;  %v1251_v59 = vadd.f32 %v9099_v25, %v9069_v45  ;;  %v9408_v15 = vpack.c.bf16 %v2042_v17, %v2040_v37  ;;  %v1422_v25 = vadd.f32 %v1421_v44, %v1253_v6 }
 0x162   : > { %v1360_v63 = vpop.f32.mrf.mxu2 }
 0x163   : > { %v1361_v0 = vadd.f32 %v1360_v63, %v9069_v45  ;;  %v1529_v42 = vpop.f32.mrf.mxu3  ;;  %v9399_v58 = vpack.c.bf16 %v2130_v56, %v2128_v7  ;;  %v1426_v23 = vpop.f32.mrf.mxu1  ;;  %12806 = vst [vmem:[#allocation80_spill] sm:$0xff] %v9408_v15  ;;  %v1420_v63 = vadd.f32 %v9351_v21, %v1251_v59  ;;  %v1918_v21 = vmul.f32 0.1, %v1422_v25 }
 0x164   : > { %v9401_v2 = vpop.f32.mrf.mxu0 }
 0x165   : > { %12805 = vst [vmem:[#allocation79_spill] sm:$0xff] %v9399_v58  ;;  %v1530_v33 = vadd.f32 %v1529_v42, %v1361_v0  ;;  %v8236_v0 = vld [vmem:[%s8779_s27 + $0xb4] sm:$0xf] }
 0x166   : > { %v9419_v17 = vor.u32 %v8236_v0, %v7411_v55 }
 0x167   : > { %v2004_v56 = vmul.f32 0.1, %v1530_v33 }
 0x168   : > { %12807 = vst [vmem:[#allocation81_spill] sm:$0xff] %v9419_v17 }
 0x169   : > { %v2132_v42 = vmax.f32 %v1530_v33, %v2004_v56  ;;  %v1256_v33 = vadd.f32 %v9133_v32, %v9069_v45  ;;  %v1258_v56 = vadd.f32 %v9154_v12, %v9069_v45  ;;  %v7419_v12 = vld [vmem:[%s8779_s27 + $0xc8] sm:$0xf0] }
 0x16a   : > { %v1362_v28 = vpop.f32.mrf.mxu2 }
 0x16b   : > { %v1363_v43 = vadd.f32 %v1362_v28, %v9069_v45  ;;  %v1531_v3 = vpop.f32.mrf.mxu3  ;;  %v1429_v49 = vpop.f32.mrf.mxu1  ;;  %v1916_v28 = vmul.f32 0.1, %v1420_v63 }
 0x16c   : > { %v9411_v7 = vpop.f32.mrf.mxu0 }
 0x16d   : > { %v1532_v54 = vadd.f32 %v1531_v3, %v1363_v43  ;;  %v2044_v6 = vmax.f32 %v1420_v63, %v1916_v28  ;;  %v1427_v28 = vadd.f32 %v1426_v23, %v1258_v56 }
 0x16f   : > { %v2006_v1 = vmul.f32 0.1, %v1532_v54  ;;  %1582 = vmatmul.bf16.vlgmr.msrb.gmra.mxu2 %v8893_v57  ;;  %2438 = vmatmul.bf16.vlgmr.msrb.gmra.mxu0 %v9408_v15  ;;  %v2046_v15 = vmax.f32 %v1422_v25, %v1918_v21 }
 0x170   : > { %1751 = vmatmul.bf16.vlgmr.msrb.gmra.mxu3 %v8997_v52 }
 0x171   : > { %v2134_v20 = vmax.f32 %v1532_v54, %v2006_v1  ;;  %1468 = vmatmul.bf16.gmra.mxu1 %v9419_v17  ;;  %v9432_v55 = vpack.c.bf16 %v2046_v15, %v2044_v6 }
 0x172   : > { %v1365_v37 = vpop.f32.mrf.mxu2 }
 0x173   : > { %v1366_v43 = vadd.f32 %v1365_v37, %v9069_v45  ;;  %v1534_v3 = vpop.f32.mrf.mxu3  ;;  %v9422_v59 = vpack.c.bf16 %v2134_v20, %v2132_v42  ;;  %v1431_v52 = vpop.f32.mrf.mxu1  ;;  %12809 = vst [vmem:[#allocation83_spill] sm:$0xff] %v9432_v55  ;;  %v1425_v37 = vadd.f32 %v1424_v31, %v1256_v33  ;;  %v1922_v33 = vmul.f32 0.1, %v1427_v28 }
 0x174   : > { %v9424_v57 = vpop.f32.mrf.mxu0 }
 0x175   : > { %12808 = vst [vmem:[#allocation82_spill] sm:$0xff] %v9422_v59  ;;  %v1535_v44 = vadd.f32 %v1534_v3, %v1366_v43  ;;  %v8238_v43 = vld [vmem:[%s8779_s27 + $0xc4] sm:$0xf] }
 0x176   : > { %v9443_v3 = vor.u32 %v8238_v43, %v7419_v12 }
 0x177   : > { %v2008_v20 = vmul.f32 0.1, %v1535_v44 }
 0x178   : > { %12810 = vst [vmem:[#allocation84_spill] sm:$0xff] %v9443_v3 }
 0x179   : > { %v2136_v15 = vmax.f32 %v1535_v44, %v2008_v20  ;;  %v1261_v44 = vadd.f32 %v9167_v61, %v9069_v45  ;;  %v1263_v20 = vadd.f32 %v9182_v60, %v9069_v45  ;;  %v7427_v60 = vld [vmem:[%s8779_s27 + $0xd8] sm:$0xf0] }
 0x17a   : > { %v1367_v0 = vpop.f32.mrf.mxu2 }
 0x17b   : > { %v1368_v54 = vadd.f32 %v1367_v0, %v9069_v45  ;;  %v1536_v1 = vpop.f32.mrf.mxu3  ;;  %v9438_v32 = vpop.f32.mrf.mxu1  ;;  %v1920_v0 = vmul.f32 0.1, %v1425_v37 }
 0x17c   : > { %v9434_v42 = vpop.f32.mrf.mxu0 }
 0x17d   : > { %v1537_v63 = vadd.f32 %v1536_v1, %v1368_v54  ;;  %v2048_v56 = vmax.f32 %v1425_v37, %v1920_v0  ;;  %v1432_v0 = vadd.f32 %v1431_v52, %v1263_v20 }
 0x17f   : > { %v2010_v25 = vmul.f32 0.1, %v1537_v63  ;;  %1587 = vmatmul.bf16.gmra.mxu2 %v8914_v5  ;;  %2443 = vmatmul.bf16.gmra.mxu0 %v9432_v55  ;;  %v2050_v55 = vmax.f32 %v1427_v28, %v1922_v33 }
 0x180   : > { %1756 = vmatmul.bf16.gmra.mxu3 %v9023_v8 }
 0x181   : > { %v2138_v21 = vmax.f32 %v1537_v63, %v2010_v25  ;;  %1473 = vmatmul.bf16.gmra.mxu1 %v9443_v3  ;;  %v9456_v12 = vpack.c.bf16 %v2050_v55, %v2048_v56  ;;  %v8322_v56 = vld [vmem:[%s12788_s19 + $0x64] sm:$0xf] }
 0x182   : > { %v1370_v6 = vpop.f32.mrf.mxu2 }
 0x183   : > { %v1371_v54 = vadd.f32 %v1370_v6, %v9069_v45  ;;  %v1539_v31 = vpop.f32.mrf.mxu3  ;;  %v9446_v1 = vpack.c.bf16 %v2138_v21, %v2136_v15  ;;  %v1436_v8 = vpop.f32.mrf.mxu1  ;;  %12812 = vst [vmem:[#allocation86_spill] sm:$0xff] %v9456_v12  ;;  %v1430_v6 = vadd.f32 %v1429_v49, %v1261_v44  ;;  %v7755_v49 = vld [vmem:[%s12788_s19 + $0x68] sm:$0xf0] }
 0x184   : > { %v9448_v5 = vpop.f32.mrf.mxu0  ;;  %v7758_v52 = vor.u32 %v8322_v56, %v7755_v49  ;;  %v1266_v56 = vadd.f32 %v9201_v46, %v9069_v45  ;;  %v1268_v49 = vadd.f32 %v9234_v41, %v9069_v45  ;;  %v7435_v41 = vld [vmem:[%s8779_s27 + $0xe8] sm:$0xf0] }
 0x185   : > { %12811 = vst [vmem:[#allocation85_spill] sm:$0xff] %v9446_v1  ;;  %v1540_v23 = vadd.f32 %v1539_v31, %v1371_v54  ;;  %v8240_v54 = vld [vmem:[%s8779_s27 + $0xd4] sm:$0xf]  ;;  %v1924_v44 = vmul.f32 0.1, %v1430_v6 }
 0x186   : > { %v9467_v31 = vor.u32 %v8240_v54, %v7427_v60  ;;  %2769 = vmatpush.bf16.msra.mxu2 %v7758_v52  ;;  %v1437_v46 = vadd.f32 %v1436_v8, %v1268_v49 }
 0x187   : > { %v2012_v21 = vmul.f32 0.1, %v1540_v23 }
 0x188   : > { %12813 = vst [vmem:[#allocation87_spill] sm:$0xff] %v9467_v31 }
 0x189   : > { %v2140_v55 = vmax.f32 %v1540_v23, %v2012_v21  ;;  %v2052_v21 = vmax.f32 %v1430_v6, %v1924_v44  ;;  %v1435_v44 = vadd.f32 %v9438_v32, %v1266_v56  ;;  %v1930_v32 = vmul.f32 0.1, %v1437_v46 }
 0x18a   : > { %v1372_v43 = vpop.f32.mrf.mxu2 }
 0x18b   : > { %v1373_v63 = vadd.f32 %v1372_v43, %v9069_v45  ;;  %v1541_v25 = vpop.f32.mrf.mxu3  ;;  %v9462_v61 = vpop.f32.mrf.mxu1 }
 0x18c   : > { %v9458_v15 = vpop.f32.mrf.mxu0 }
 0x18d   : > { %v1542_v37 = vadd.f32 %v1541_v25, %v1373_v63  ;;  %v1926_v25 = vmul.f32 0.1, %v1432_v0 }
 0x18f   : > { %v2014_v28 = vmul.f32 0.1, %v1542_v37  ;;  %1592 = vmatmul.bf16.gmra.mxu2 %v8929_v14  ;;  %2448 = vmatmul.bf16.gmra.mxu0 %v9456_v12  ;;  %v1928_v12 = vmul.f32 0.1, %v1435_v44 }
 0x190   : > { %1761 = vmatmul.bf16.gmra.mxu3 %v9043_v24 }
 0x191   : > { %v2142_v33 = vmax.f32 %v1542_v37, %v2014_v28  ;;  %1478 = vmatmul.bf16.gmra.mxu1 %v9467_v31  ;;  %v2054_v37 = vmax.f32 %v1432_v0, %v1926_v25  ;;  %v8242_v25 = vld [vmem:[%s8779_s27 + $0xe4] sm:$0xf]  ;;  %v2056_v49 = vmax.f32 %v1435_v44, %v1928_v12 }
 0x192   : > { %v1375_v43 = vpop.f32.mrf.mxu2 }
 0x193   : > { %v1376_v20 = vadd.f32 %v1375_v43, %v9069_v45  ;;  %v1544_v63 = vpop.f32.mrf.mxu3  ;;  %v9476_v24 = vpack.c.bf16 %v2142_v33, %v2140_v55  ;;  %v1441_v28 = vpop.f32.mrf.mxu1  ;;  %v9486_v43 = vpack.c.bf16 %v2054_v37, %v2052_v21 }
 0x194   : > { %v9478_v54 = vpop.f32.mrf.mxu0 }
 0x195   : > { %12814 = vst [vmem:[#allocation88_spill] sm:$0xff] %v9476_v24  ;;  %v1545_v23 = vadd.f32 %v1544_v63, %v1376_v20 }
 0x196   : > { %12815 = vst [vmem:[#allocation89_spill] sm:$0xff] %v9486_v43 }
 0x197   : > { %v2016_v20 = vmul.f32 0.1, %v1545_v23 }
 0x199   : > { %v2144_v21 = vmax.f32 %v1545_v23, %v2016_v20  ;;  %v1271_v20 = vadd.f32 %v9265_v48, %v9069_v45 }
 0x19a   : > { %v1377_v60 = vpop.f32.mrf.mxu2 }
 0x19b   : > { %v1378_v55 = vadd.f32 %v1377_v60, %v9069_v45  ;;  %v1546_v33 = vpop.f32.mrf.mxu3  ;;  %v1444_v63 = vpop.f32.mrf.mxu1  ;;  %v9496_v60 = vor.u32 %v8242_v25, %v7435_v41 }
 0x19c   : > { %v9488_v52 = vpop.f32.mrf.mxu0 }
 0x19d   : > { %v1547_v6 = vadd.f32 %v1546_v33, %v1378_v55  ;;  %12816 = vst [vmem:[#allocation90_spill] sm:$0xff] %v9496_v60 }
 0x19f   : > { %v2018_v0 = vmul.f32 0.1, %v1547_v6  ;;  %1597 = vmatmul.bf16.gmra.mxu2 %v8950_v26  ;;  %2453 = vmatmul.bf16.gmra.mxu0 %v9486_v43  ;;  %v2058_v43 = vmax.f32 %v1437_v46, %v1930_v32  ;;  %v1440_v46 = vadd.f32 %v9462_v61, %v1271_v20 }
 0x1a0   : > { %1766 = vmatmul.bf16.gmra.mxu3 %v9076_v51 }
 0x1a1   : > { %v2146_v37 = vmax.f32 %v1547_v6, %v2018_v0  ;;  %1483 = vmatmul.bf16.gmra.mxu1 %v9496_v60  ;;  %v9509_v41 = vpack.c.bf16 %v2058_v43, %v2056_v49 }
 0x1a2   : > { %v1380_v14 = vpop.f32.mrf.mxu2 }
 0x1a3   : > { %v1381_v55 = vadd.f32 %v1380_v14, %v9069_v45  ;;  %v1549_v33 = vpop.f32.mrf.mxu3  ;;  %v9499_v56 = vpack.c.bf16 %v2146_v37, %v2144_v21  ;;  %v1446_v25 = vpop.f32.mrf.mxu1  ;;  %v1273_v14 = vadd.f32 %v9305_v36, %v9069_v45  ;;  %12818 = vst [vmem:[#allocation92_spill] sm:$0xff] %v9509_v41 }
 0x1a4   : > { %v9501_v26 = vpop.f32.mrf.mxu0 }
 0x1a5   : > { %12817 = vst [vmem:[#allocation91_spill] sm:$0xff] %v9499_v56  ;;  %v1550_v8 = vadd.f32 %v1549_v33, %v1381_v55  ;;  %v1442_v48 = vadd.f32 %v1441_v28, %v1273_v14  ;;  %v8244_v55 = vld [vmem:[%s8779_s27 + $0xf4] sm:$0xf]  ;;  %v7443_v33 = vld [vmem:[%s8779_s27 + $0xf8] sm:$0xf0]  ;;  %s13118_s27 = sld [smem:[#allocation138_spill]] }
 0x1a6   : > { %v9521_v43 = vor.u32 %v8244_v55, %v7443_v33 }
 0x1a7   : > { %v2020_v37 = vmul.f32 0.1, %v1550_v8  ;;  %v1934_v20 = vmul.f32 0.1, %v1442_v48 }
 0x1a8   : > { %12819 = vst [vmem:[#allocation93_spill] sm:$0xff] %v9521_v43 }
 0x1a9   : > { %v2148_v32 = vmax.f32 %v1550_v8, %v2020_v37  ;;  %v1276_v8 = vadd.f32 %v9345_v4, %v9069_v45  ;;  %v1278_v37 = vadd.f32 %v9367_v50, %v9069_v45 }
 0x1aa   : > { %v1382_v23 = vpop.f32.mrf.mxu2 }
 0x1ab   : > { %v1383_v6 = vadd.f32 %v1382_v23, %v9069_v45  ;;  %v1551_v0 = vpop.f32.mrf.mxu3  ;;  %v9519_v36 = vpop.f32.mrf.mxu1 }
 0x1ac   : > { %v9511_v21 = vpop.f32.mrf.mxu0 }
 0x1ad   : > { %v1552_v12 = vadd.f32 %v1551_v0, %v1383_v6  ;;  %v1932_v6 = vmul.f32 0.1, %v1440_v46 }
 0x1af   : > { %v2022_v44 = vmul.f32 0.1, %v1552_v12  ;;  %1602 = vmatmul.bf16.gmra.mxu2 %v8965_v35  ;;  %2458 = vmatmul.bf16.gmra.mxu0 %v9509_v41  ;;  %v2060_v14 = vmax.f32 %v1440_v46, %v1932_v6  ;;  %v1445_v46 = vadd.f32 %v1444_v63, %v1276_v8 }
 0x1b0   : > { %1771 = vmatmul.bf16.gmra.mxu3 %v9108_v38  ;;  %v2062_v38 = vmax.f32 %v1442_v48, %v1934_v20  ;;  %v1447_v48 = vadd.f32 %v1446_v25, %v1278_v37 }
 0x1b1   : > { %v2150_v49 = vmax.f32 %v1552_v12, %v2022_v44  ;;  %1488 = vmatmul.bf16.gmra.mxu1 %v9521_v43 }
 0x1b2   : > { %v1385_v23 = vpop.f32.mrf.mxu2  ;;  %v9534_v33 = vpack.c.bf16 %v2062_v38, %v2060_v14  ;;  %v7825_v38 = vld [vmem:[%s12788_s19 + $0xf0] sm:$0xf]  ;;  %v1936_v14 = vmul.f32 0.1, %v1445_v46  ;;  %v1938_v8 = vmul.f32 0.1, %v1447_v48 }
 0x1b3   : > { %v1386_v0 = vadd.f32 %v1385_v23, %v9069_v45  ;;  %v1554_v61 = vpop.f32.mrf.mxu3  ;;  %v9524_v51 = vpack.c.bf16 %v2150_v49, %v2148_v32  ;;  %v1451_v41 = vpop.f32.mrf.mxu1 }
 0x1b4   : > { %v9526_v35 = vpop.f32.mrf.mxu0 }
 0x1b5   : > { %12820 = vst [vmem:[#allocation94_spill] sm:$0xff] %v9524_v51  ;;  %v1555_v28 = vadd.f32 %v1554_v61, %v1386_v0  ;;  %v8341_v61 = vld [vmem:[%s12788_s19 + $0xf4] sm:$0xf0] }
 0x1b6   : > { %v7826_v20 = vor.u32 %v8341_v61, %v7825_v38 }
 0x1b7   : > { %v2024_v49 = vmul.f32 0.1, %v1555_v28 }
 0x1b8   : > { %2599 = vmatpush.bf16.msrb.mxu1 %v7826_v20 }
 0x1b9   : > { %v2152_v4 = vmax.f32 %v1555_v28, %v2024_v49  ;;  %v2066_v49 = vmax.f32 %v1447_v48, %v1938_v8 }
 0x1ba   : > { %v1387_v55 = vpop.f32.mrf.mxu2 }
 0x1bb   : > { %v1388_v12 = vadd.f32 %v1387_v55, %v9069_v45  ;;  %v1556_v44 = vpop.f32.mrf.mxu3 }
 0x1bc   : > { %v9536_v32 = vpop.f32.mrf.mxu0 }
 0x1bd   : > { %v1557_v23 = vadd.f32 %v1556_v44, %v1388_v12  ;;  %v2064_v44 = vmax.f32 %v1445_v46, %v1936_v14 }
 0x1be   : > { %v9541_v6 = vpop.f32.mrf.mxu1 }
 0x1bf   : > { %v2026_v0 = vmul.f32 0.1, %v1557_v23  ;;  %1607 = vmatmul.bf16.gmra.mxu2 %v8986_v47  ;;  %2463 = vmatmul.bf16.gmra.mxu0 %v9534_v33  ;;  %v9567_v20 = vpack.c.bf16 %v2066_v49, %v2064_v44  ;;  %v7801_v49 = vld [vmem:[%s12788_s19 + $0xc0] sm:$0xf] }
 0x1c0   : > { %1776 = vmatmul.bf16.gmra.mxu3 %v9142_v53 }
 0x1c1   : > { %v2154_v50 = vmax.f32 %v1557_v23, %v2026_v0  ;;  %v7817_v23 = vld [vmem:[%s12788_s19 + $0xe0] sm:$0xf]  ;;  %v8339_v0 = vld [vmem:[%s12788_s19 + $0xe4] sm:$0xf0] }
 0x1c2   : > { %v1390_v63 = vpop.f32.mrf.mxu2  ;;  %v7818_v61 = vor.u32 %v8339_v0, %v7817_v23 }
 0x1c3   : > { %v1391_v55 = vadd.f32 %v1390_v63, %v9069_v45  ;;  %v1559_v25 = vpop.f32.mrf.mxu3  ;;  %v9550_v37 = vpack.c.bf16 %v2154_v50, %v2152_v4  ;;  %v1281_v4 = vadd.f32 %v9385_v34, %v9069_v45  ;;  %v1283_v50 = vadd.f32 %v9401_v2, %v9069_v45 }
 0x1c4   : > { %v9552_v28 = vpop.f32.mrf.mxu0  ;;  %2600 = vmatpush.bf16.msrb.mxu1 %v7818_v61  ;;  %v8335_v61 = vld [vmem:[%s12788_s19 + $0xc4] sm:$0xf0] }
 0x1c5   : > { %12821 = vst [vmem:[#allocation95_spill] sm:$0xff] %v9550_v37  ;;  %v1560_v12 = vadd.f32 %v1559_v25, %v1391_v55  ;;  %v7809_v55 = vld [vmem:[%s12788_s19 + $0xd0] sm:$0xf]  ;;  %v8337_v25 = vld [vmem:[%s12788_s19 + $0xd4] sm:$0xf0]  ;;  %v1450_v0 = vadd.f32 %v9519_v36, %v1281_v4  ;;  %v1452_v44 = vadd.f32 %v1451_v41, %v1283_v50  ;;  %v7802_v4 = vor.u32 %v8335_v61, %v7801_v49 }
 0x1c6   : > { %v9560_v38 = vpop.f32.mrf.mxu1  ;;  %v7810_v23 = vor.u32 %v8337_v25, %v7809_v55  ;;  %v8320_v36 = vld [vmem:[%s12788_s19 + $0x54] sm:$0xf]  ;;  %v7747_v41 = vld [vmem:[%s12788_s19 + $0x58] sm:$0xf0] }
 0x1c7   : > { %v2028_v34 = vmul.f32 0.1, %v1560_v12  ;;  %v7750_v55 = vor.u32 %v8320_v36, %v7747_v41  ;;  %v1940_v25 = vmul.f32 0.1, %v1450_v0  ;;  %v1942_v53 = vmul.f32 0.1, %v1452_v44 }
 0x1c8   : > { %2601 = vmatpush.bf16.msrb.mxu1 %v7810_v23 }
 0x1c9   : > { %2770 = vmatpush.bf16.msra.mxu2 %v7750_v55  ;;  %v2068_v36 = vmax.f32 %v1450_v0, %v1940_v25  ;;  %v2070_v41 = vmax.f32 %v1452_v44, %v1942_v53 }
 0x1ca   : > { %v1392_v63 = vpop.f32.mrf.mxu2 }
 0x1cb   : > { %v1393_v46 = vadd.f32 %v1392_v63, %v9069_v45  ;;  %v1561_v48 = vpop.f32.mrf.mxu3  ;;  %v2156_v63 = vmax.f32 %v1560_v12, %v2028_v34  ;;  %v9617_v44 = vpack.c.bf16 %v2070_v41, %v2068_v36  ;;  %v7769_v41 = vld [vmem:[%s12788_s19 + $0x80] sm:$0xf] }
 0x1cc   : > { %v9569_v14 = vpop.f32.mrf.mxu0  ;;  %2602 = vmatpush.bf16.msrb.mxu1 %v7802_v4 }
 0x1cd   : > { %v1562_v8 = vadd.f32 %v1561_v48, %v1393_v46  ;;  %12823 = vst [vmem:[#allocation97_spill] sm:$0xff] %v9617_v44 }
 0x1ce   : > { %v9587_v48 = vpop.f32.mrf.mxu1 }
 0x1cf   : > { %v2030_v2 = vmul.f32 0.1, %v1562_v8  ;;  %1612 = vmatmul.bf16.gmra.mxu2 %v9006_v62  ;;  %2468 = vmatmul.bf16.gmra.mxu0 %v9567_v20  ;;  %v1286_v62 = vadd.f32 %v9411_v7, %v9069_v45 }
 0x1d0   : > { %1781 = vmatmul.bf16.gmra.mxu3 %v9176_v18 }
 0x1d1   : > { %v2158_v46 = vmax.f32 %v1562_v8, %v2030_v2  ;;  %v7793_v8 = vld [vmem:[%s12788_s19 + $0xb0] sm:$0xf]  ;;  %v8333_v2 = vld [vmem:[%s12788_s19 + $0xb4] sm:$0xf0] }
 0x1d2   : > { %v1395_v50 = vpop.f32.mrf.mxu2  ;;  %v7794_v61 = vor.u32 %v8333_v2, %v7793_v8  ;;  %v8329_v8 = vld [vmem:[%s12788_s19 + $0x94] sm:$0xf0] }
 0x1d3   : > { %v1396_v23 = vadd.f32 %v1395_v50, %v9069_v45  ;;  %v1564_v18 = vpop.f32.mrf.mxu3  ;;  %v9596_v12 = vpack.c.bf16 %v2158_v46, %v2156_v63  ;;  %v7785_v63 = vld [vmem:[%s12788_s19 + $0xa0] sm:$0xf]  ;;  %v8331_v46 = vld [vmem:[%s12788_s19 + $0xa4] sm:$0xf0] }
 0x1d4   : > { %v9598_v34 = vpop.f32.mrf.mxu0  ;;  %2603 = vmatpush.bf16.msrb.mxu1 %v7794_v61  ;;  %v7786_v50 = vor.u32 %v8331_v46, %v7785_v63  ;;  %v1455_v63 = vadd.f32 %v9541_v6, %v1286_v62  ;;  %v8327_v46 = vld [vmem:[%s12788_s19 + $0x84] sm:$0xf0] }
 0x1d5   : > { %12822 = vst [vmem:[#allocation96_spill] sm:$0xff] %v9596_v12  ;;  %v1565_v49 = vadd.f32 %v1564_v18, %v1396_v23  ;;  %v1288_v18 = vadd.f32 %v9424_v57, %v9069_v45  ;;  %v7777_v23 = vld [vmem:[%s12788_s19 + $0x90] sm:$0xf]  ;;  %v7770_v6 = vor.u32 %v8327_v46, %v7769_v41  ;;  %v1291_v46 = vadd.f32 %v9434_v42, %v9069_v45 }
 0x1d6   : > { %v1461_v4 = vpop.f32.mrf.mxu1  ;;  %v7778_v61 = vor.u32 %v8329_v8, %v7777_v23 }
 0x1d7   : > { %v2032_v7 = vmul.f32 0.1, %v1565_v49  ;;  %v1457_v36 = vadd.f32 %v9560_v38, %v1288_v18 }
 0x1d8   : > { %2604 = vmatpush.bf16.msrb.mxu1 %v7786_v50 }
 0x1d9   : > { %v2160_v50 = vmax.f32 %v1565_v49, %v2032_v7  ;;  %v1946_v18 = vmul.f32 0.1, %v1457_v36  ;;  %v8340_v49 = vld [vmem:[%s12788_s19 + $0xf4] sm:$0xf]  ;;  %v7827_v7 = vld [vmem:[%s12788_s19 + $0xf8] sm:$0xf0] }
 0x1da   : > { %v1397_v55 = vpop.f32.mrf.mxu2  ;;  %v7830_v41 = vor.u32 %v8340_v49, %v7827_v7 }
 0x1db   : > { %v1398_v53 = vadd.f32 %v1397_v55, %v9069_v45  ;;  %v1566_v0 = vpop.f32.mrf.mxu3 }
 0x1dc   : > { %v9619_v25 = vpop.f32.mrf.mxu0  ;;  %2605 = vmatpush.bf16.msrb.mxu1 %v7778_v61  ;;  %2937 = vmatpush.bf16.msra.mxu3 %v7830_v41 }
 0x1dd   : > { %v1567_v2 = vadd.f32 %v1566_v0, %v1398_v53  ;;  %v1944_v0 = vmul.f32 0.1, %v1455_v63 }
 0x1de   : > { %v1464_v62 = vpop.f32.mrf.mxu1 }
 0x1df   : > { %v2034_v57 = vmul.f32 0.1, %v1567_v2  ;;  %1617 = vmatmul.bf16.gmra.mxu2 %v9032_v19  ;;  %2473 = vmatmul.bf16.gmra.mxu0 %v9617_v44  ;;  %v2072_v19 = vmax.f32 %v1455_v63, %v1944_v0  ;;  %v2074_v44 = vmax.f32 %v1457_v36, %v1946_v18 }
 0x1e0   : > { %1786 = vmatmul.bf16.gmra.mxu3 %v9222_v11  ;;  %2606 = vmatpush.bf16.msrb.mxu1 %v7770_v6 }
 0x1e1   : > { %v2162_v55 = vmax.f32 %v1567_v2, %v2034_v57 }
 0x1e2   : > { %v1400_v53 = vpop.f32.mrf.mxu2 }
 0x1e3   : > { %v1401_v23 = vadd.f32 %v1400_v53, %v9069_v45  ;;  %v1569_v38 = vpop.f32.mrf.mxu3  ;;  %v9639_v8 = vpack.c.bf16 %v2162_v55, %v2160_v50  ;;  %v1293_v50 = vadd.f32 %v9448_v5, %v9069_v45  ;;  %v9654_v55 = vpack.c.bf16 %v2074_v44, %v2072_v19  ;;  %v8470_v19 = vld [vmem:[%s12767_s28] sm:$0x3] }
 0x1e4   : > { %v9641_v61 = vpop.f32.mrf.mxu0  ;;  %v9665_v44 = vperm.slane %v8470_v19, 1 }
 0x1e5   : > { %12824 = vst [vmem:[#allocation98_spill] sm:$0xff] %v9639_v8  ;;  %v1570_v11 = vadd.f32 %v1569_v38, %v1401_v23  ;;  %v1460_v38 = vadd.f32 %v9587_v48, %v1291_v46  ;;  %v1462_v42 = vadd.f32 %v1461_v4, %v1293_v50 }
 0x1e6   : > { %v1466_v2 = vpop.f32.mrf.mxu1  ;;  %12825 = vst [vmem:[#allocation99_spill] sm:$0xff] %v9654_v55 }
 0x1e7   : > { %v2036_v53 = vmul.f32 0.1, %v1570_v11  ;;  %v1950_v48 = vmul.f32 0.1, %v1462_v42 }
 0x1e9   : > { %v2164_v5 = vmax.f32 %v1570_v11, %v2036_v53  ;;  %v2078_v11 = vmax.f32 %v1462_v42, %v1950_v48 }
 0x1ea   : > { %v1402_v57 = vpop.f32.mrf.mxu2 }
 0x1eb   : > { %v1403_v63 = vadd.f32 %v1402_v57, %v9069_v45  ;;  %v1571_v36 = vpop.f32.mrf.mxu3  ;;  %v1948_v57 = vmul.f32 0.1, %v1460_v38 }
 0x1ec   : > { %v9656_v6 = vpop.f32.mrf.mxu0 }
 0x1ed   : > { %v1572_v0 = vadd.f32 %v1571_v36, %v1403_v63  ;;  %v2076_v50 = vmax.f32 %v1460_v38, %v1948_v57 }
 0x1ee   : > { %v1469_v7 = vpop.f32.mrf.mxu1 }
 0x1ef   : > { %v2038_v23 = vmul.f32 0.1, %v1572_v0  ;;  %1622 = vmatmul.bf16.gmra.mxu2 %v9058_v40  ;;  %2478 = vmatmul.bf16.gmra.mxu0 %v9654_v55  ;;  %v9677_v40 = vpack.c.bf16 %v2078_v11, %v2076_v50 }
 0x1f0   : > { %1791 = vmatmul.bf16.gmra.mxu3 %v9288_v29 }
 0x1f1   : > { %v2166_v18 = vmax.f32 %v1572_v0, %v2038_v23  ;;  %v1296_v0 = vadd.f32 %v9458_v15, %v9069_v45  ;;  %v1298_v23 = vadd.f32 %v9478_v54, %v9069_v45  ;;  %12827 = vst [vmem:[#allocation101_spill] sm:$0xff] %v9677_v40 }
 0x1f2   : > { %v1583_v49 = vpop.f32.mrf.mxu2 }
 0x1f3   : > { %v1752_v41 = vpop.f32.mrf.mxu3  ;;  %v9667_v46 = vpack.c.bf16 %v2166_v18, %v2164_v5  ;;  %v1584_v4 = vadd.f32 %v1583_v49, %v9665_v44  ;;  %v1465_v42 = vadd.f32 %v1464_v62, %v1296_v0  ;;  %v1467_v15 = vadd.f32 %v1466_v2, %v1298_v23 }
 0x1f4   : > { %v9669_v63 = vpop.f32.mrf.mxu0 }
 0x1f5   : > { %12826 = vst [vmem:[#allocation100_spill] sm:$0xff] %v9667_v46  ;;  %v1753_v36 = vadd.f32 %v1752_v41, %v1584_v4  ;;  %v1952_v4 = vmul.f32 0.1, %v1465_v42  ;;  %v1954_v11 = vmul.f32 0.1, %v1467_v15 }
 0x1f6   : > { %v1471_v18 = vpop.f32.mrf.mxu1 }
 0x1f7   : > { %v1913_v55 = vmul.f32 0.1, %v1753_v36  ;;  %v2080_v0 = vmax.f32 %v1465_v42, %v1952_v4 }
 0x1f9   : > { %v2041_v54 = vmax.f32 %v1753_v36, %v1913_v55  ;;  %v1301_v55 = vadd.f32 %v9488_v52, %v9069_v45  ;;  %v1303_v36 = vadd.f32 %v9501_v26, %v9069_v45 }
 0x1fa   : > { %v1585_v53 = vpop.f32.mrf.mxu2 }
 0x1fb   : > { %v1586_v19 = vadd.f32 %v1585_v53, %v9665_v44  ;;  %v1754_v29 = vpop.f32.mrf.mxu3  ;;  %v1470_v42 = vadd.f32 %v1469_v7, %v1301_v55 }
 0x1fc   : > { %v9679_v5 = vpop.f32.mrf.mxu0 }
 0x1fd   : > { %v1755_v49 = vadd.f32 %v1754_v29, %v1586_v19  ;;  %v2082_v19 = vmax.f32 %v1467_v15, %v1954_v11  ;;  %v1472_v15 = vadd.f32 %v1471_v18, %v1303_v36  ;;  %v7739_v11 = vld [vmem:[%s12788_s19 + $0x48] sm:$0xf0] }
 0x1fe   : > { %v1474_v62 = vpop.f32.mrf.mxu1 }
 0x1ff   : > { %v1915_v38 = vmul.f32 0.1, %v1755_v49  ;;  %1627 = vmatmul.bf16.gmra.mxu2 %v9095_v22  ;;  %2483 = vmatmul.bf16.gmra.mxu0 %v9677_v40  ;;  %v1958_v18 = vmul.f32 0.1, %v1472_v15 }
 0x200   : > { %1796 = vmatmul.bf16.gmra.mxu3 %v9356_v10 }
 0x201   : > { %v2043_v57 = vmax.f32 %v1755_v49, %v1915_v38 }
 0x202   : > { %v1588_v41 = vpop.f32.mrf.mxu2 }
 0x203   : > { %v9684_v48 = vpack.c.bf16 %v2043_v57, %v2041_v54  ;;  %v1757_v50 = vpop.f32.mrf.mxu3  ;;  %v1589_v29 = vadd.f32 %v1588_v41, %v9665_v44  ;;  %v9695_v54 = vpack.c.bf16 %v2082_v19, %v2080_v0  ;;  %v1956_v0 = vmul.f32 0.1, %v1470_v42 }
 0x204   : > { %v9686_v53 = vpop.f32.mrf.mxu0 }
 0x205   : > { %2607 = vmatmul.bf16.vlgmr.msrb.gmra.mxu1 %v9684_v48  ;;  %v1758_v2 = vadd.f32 %v1757_v50, %v1589_v29  ;;  %12828 = vst [vmem:[#allocation102_spill] sm:$0xff] %v9695_v54  ;;  %v8318_v50 = vld [vmem:[%s12788_s19 + $0x44] sm:$0xf] }
 0x206   : > { %v1476_v52 = vpop.f32.mrf.mxu1  ;;  %v7742_v7 = vor.u32 %v8318_v50, %v7739_v11 }
 0x207   : > { %v1917_v41 = vmul.f32 0.1, %v1758_v2 }
 0x208   : > { %2771 = vmatpush.bf16.msra.mxu2 %v7742_v7 }
 0x209   : > { %v2045_v26 = vmax.f32 %v1758_v2, %v1917_v41  ;;  %v2086_v2 = vmax.f32 %v1472_v15, %v1958_v18  ;;  %v1306_v41 = vadd.f32 %v9511_v21, %v9069_v45 }
 0x20a   : > { %v1590_v23 = vpop.f32.mrf.mxu2 }
 0x20b   : > { %v1591_v49 = vadd.f32 %v1590_v23, %v9665_v44  ;;  %v1759_v38 = vpop.f32.mrf.mxu3  ;;  %v1475_v15 = vadd.f32 %v1474_v62, %v1306_v41 }
 0x20c   : > { %v9697_v57 = vpop.f32.mrf.mxu0 }
 0x20d   : > { %v1760_v10 = vadd.f32 %v1759_v38, %v1591_v49  ;;  %v1960_v18 = vmul.f32 0.1, %v1475_v15 }
 0x20e   : > { %v1479_v38 = vpop.f32.mrf.mxu1 }
 0x20f   : > { %v1919_v22 = vmul.f32 0.1, %v1760_v10  ;;  %1632 = vmatmul.bf16.gmra.mxu2 %v9129_v30  ;;  %2488 = vmatmul.bf16.gmra.mxu0 %v9695_v54  ;;  %v2088_v41 = vmax.f32 %v1475_v15, %v1960_v18 }
 0x210   : > { %1801 = vmatmul.bf16.gmra.mxu3 %v9396_v16 }
 0x211   : > { %v2047_v4 = vmax.f32 %v1760_v10, %v1919_v22  ;;  %v2084_v10 = vmax.f32 %v1470_v42, %v1956_v0 }
 0x212   : > { %v1593_v29 = vpop.f32.mrf.mxu2 }
 0x213   : > { %v1762_v19 = vpop.f32.mrf.mxu3  ;;  %v9708_v23 = vpack.c.bf16 %v2047_v4, %v2045_v26  ;;  %v1594_v22 = vadd.f32 %v1593_v29, %v9665_v44  ;;  %v1308_v26 = vadd.f32 %v9526_v35, %v9069_v45  ;;  %v9719_v11 = vpack.c.bf16 %v2086_v2, %v2084_v10 }
 0x214   : > { %v9710_v55 = vpop.f32.mrf.mxu0 }
 0x215   : > { %2612 = vmatmul.bf16.gmra.mxu1 %v9708_v23  ;;  %v1763_v36 = vadd.f32 %v1762_v19, %v1594_v22  ;;  %12829 = vst [vmem:[#allocation103_spill] sm:$0xff] %v9719_v11  ;;  %v1477_v0 = vadd.f32 %v1476_v52, %v1308_v26 }
 0x217   : > { %v1921_v29 = vmul.f32 0.1, %v1763_v36  ;;  %v1962_v2 = vmul.f32 0.1, %v1477_v0 }
 0x219   : > { %v2049_v21 = vmax.f32 %v1763_v36, %v1921_v29  ;;  %v7819_v36 = vld [vmem:[%s12788_s19 + $0xe8] sm:$0xf0] }
 0x21a   : > { %v1595_v49 = vpop.f32.mrf.mxu2 }
 0x21b   : > { %v1596_v4 = vadd.f32 %v1595_v49, %v9665_v44  ;;  %v1764_v50 = vpop.f32.mrf.mxu3 }
 0x21c   : > { %v9721_v7 = vpop.f32.mrf.mxu0 }
 0x21d   : > { %v1765_v16 = vadd.f32 %v1764_v50, %v1596_v4  ;;  %v1481_v4 = vpop.f32.mrf.mxu1  ;;  %v2090_v50 = vmax.f32 %v1477_v0, %v1962_v2 }
 0x21f   : > { %v1923_v42 = vmul.f32 0.1, %v1765_v16  ;;  %1637 = vmatmul.bf16.gmra.mxu2 %v9163_v9  ;;  %2493 = vmatmul.bf16.gmra.mxu0 %v9719_v11 }
 0x220   : > { %1806 = vmatmul.bf16.gmra.mxu3 %v9419_v17 }
 0x221   : > { %v2051_v35 = vmax.f32 %v1765_v16, %v1923_v42  ;;  %v8338_v16 = vld [vmem:[%s12788_s19 + $0xe4] sm:$0xf]  ;;  %v1311_v42 = vadd.f32 %v9536_v32, %v9069_v45 }
 0x222   : > { %v1598_v19 = vpop.f32.mrf.mxu2  ;;  %v7822_v29 = vor.u32 %v8338_v16, %v7819_v36 }
 0x223   : > { %v1767_v22 = vpop.f32.mrf.mxu3  ;;  %v9726_v10 = vpack.c.bf16 %v2051_v35, %v2049_v21  ;;  %v1599_v62 = vadd.f32 %v1598_v19, %v9665_v44  ;;  %v1313_v21 = vadd.f32 %v9552_v28, %v9069_v45  ;;  %v9743_v35 = vpack.c.bf16 %v2090_v50, %v2088_v41 }
 0x224   : > { %v9728_v49 = vpop.f32.mrf.mxu0  ;;  %2938 = vmatpush.bf16.msra.mxu3 %v7822_v29  ;;  %v1480_v17 = vadd.f32 %v1479_v38, %v1311_v42 }
 0x225   : > { %2617 = vmatmul.bf16.gmra.mxu1 %v9726_v10  ;;  %v1768_v52 = vadd.f32 %v1767_v22, %v1599_v62  ;;  %12830 = vst [vmem:[#allocation104_spill] sm:$0xff] %v9743_v35  ;;  %v1484_v2 = vpop.f32.mrf.mxu1  ;;  %v1482_v32 = vadd.f32 %v1481_v4, %v1313_v21 }
 0x226   : > { %v1964_v41 = vmul.f32 0.1, %v1480_v17 }
 0x227   : > { %v1925_v18 = vmul.f32 0.1, %v1768_v52  ;;  %v1966_v29 = vmul.f32 0.1, %v1482_v32 }
 0x228   : > { %v2092_v38 = vmax.f32 %v1480_v17, %v1964_v41 }
 0x229   : > { %v2053_v28 = vmax.f32 %v1768_v52, %v1925_v18  ;;  %v2094_v42 = vmax.f32 %v1482_v32, %v1966_v29  ;;  %v1316_v52 = vadd.f32 %v9569_v14, %v9069_v45  ;;  %v1318_v18 = vadd.f32 %v9598_v34, %v9069_v45 }
 0x22a   : > { %v1600_v26 = vpop.f32.mrf.mxu2 }
 0x22b   : > { %v1601_v15 = vadd.f32 %v1600_v26, %v9665_v44  ;;  %v1769_v0 = vpop.f32.mrf.mxu3  ;;  %v1485_v32 = vadd.f32 %v1484_v2, %v1316_v52 }
 0x22c   : > { %v9745_v19 = vpop.f32.mrf.mxu0 }
 0x22d   : > { %v1770_v22 = vadd.f32 %v1769_v0, %v1601_v15  ;;  %v1486_v0 = vpop.f32.mrf.mxu1 }
 0x22e   : > { %v1487_v41 = vadd.f32 %v1486_v0, %v1318_v18 }
 0x22f   : > { %v1927_v62 = vmul.f32 0.1, %v1770_v22  ;;  %1642 = vmatmul.bf16.gmra.mxu2 %v9197_v39  ;;  %2498 = vmatmul.bf16.gmra.mxu0 %v9743_v35 }
 0x230   : > { %1811 = vmatmul.bf16.gmra.mxu3 %v9443_v3 }
 0x231   : > { %v2055_v16 = vmax.f32 %v1770_v22, %v1927_v62 }
 0x232   : > { %v1603_v36 = vpop.f32.mrf.mxu2 }
 0x233   : > { %v1772_v50 = vpop.f32.mrf.mxu3  ;;  %v9750_v26 = vpack.c.bf16 %v2055_v16, %v2053_v28  ;;  %v1604_v15 = vadd.f32 %v1603_v36, %v9665_v44  ;;  %v9761_v28 = vpack.c.bf16 %v2094_v42, %v2092_v38 }
 0x234   : > { %v9752_v9 = vpop.f32.mrf.mxu0 }
 0x235   : > { %2622 = vmatmul.bf16.gmra.mxu1 %v9750_v26  ;;  %v1773_v4 = vadd.f32 %v1772_v50, %v1604_v15  ;;  %12831 = vst [vmem:[#allocation105_spill] sm:$0xff] %v9761_v28  ;;  %v1489_v29 = vpop.f32.mrf.mxu1  ;;  %v1968_v15 = vmul.f32 0.1, %v1485_v32 }
 0x237   : > { %v1929_v36 = vmul.f32 0.1, %v1773_v4  ;;  %v2096_v52 = vmax.f32 %v1485_v32, %v1968_v15  ;;  %v8316_v15 = vld [vmem:[%s12788_s19 + $0x34] sm:$0xf] }
 0x239   : > { %v2057_v14 = vmax.f32 %v1773_v4, %v1929_v36  ;;  %v1323_v4 = vadd.f32 %v9641_v61, %v9069_v45 }
 0x23a   : > { %v1605_v21 = vpop.f32.mrf.mxu2 }
 0x23b   : > { %v1606_v22 = vadd.f32 %v1605_v21, %v9665_v44  ;;  %v1774_v62 = vpop.f32.mrf.mxu3  ;;  %v1970_v21 = vmul.f32 0.1, %v1487_v41 }
 0x23c   : > { %v9763_v16 = vpop.f32.mrf.mxu0 }
 0x23d   : > { %v1775_v3 = vadd.f32 %v1774_v62, %v1606_v22  ;;  %v2098_v22 = vmax.f32 %v1487_v41, %v1970_v21 }
 0x23f   : > { %v1931_v17 = vmul.f32 0.1, %v1775_v3  ;;  %1647 = vmatmul.bf16.gmra.mxu2 %v9258_v13  ;;  %2503 = vmatmul.bf16.gmra.mxu0 %v9761_v28 }
 0x240   : > { %1816 = vmatmul.bf16.gmra.mxu3 %v9467_v31 }
 0x241   : > { %v2059_v34 = vmax.f32 %v1775_v3, %v1931_v17  ;;  %v1321_v3 = vadd.f32 %v9619_v25, %v9069_v45  ;;  %v9779_v17 = vpack.c.bf16 %v2098_v22, %v2096_v52 }
 0x242   : > { %v1608_v50 = vpop.f32.mrf.mxu2 }
 0x243   : > { %v1777_v38 = vpop.f32.mrf.mxu3  ;;  %v9768_v42 = vpack.c.bf16 %v2059_v34, %v2057_v14  ;;  %v1609_v2 = vadd.f32 %v1608_v50, %v9665_v44  ;;  %12832 = vst [vmem:[#allocation106_spill] sm:$0xff] %v9779_v17  ;;  %v1491_v34 = vpop.f32.mrf.mxu1  ;;  %v1490_v41 = vadd.f32 %v1489_v29, %v1321_v3 }
 0x244   : > { %v9770_v39 = vpop.f32.mrf.mxu0  ;;  %v1492_v25 = vadd.f32 %v1491_v34, %v1323_v4 }
 0x245   : > { %2627 = vmatmul.bf16.gmra.mxu1 %v9768_v42  ;;  %v1778_v0 = vadd.f32 %v1777_v38, %v1609_v2  ;;  %v7731_v38 = vld [vmem:[%s12788_s19 + $0x38] sm:$0xf0]  ;;  %v1972_v29 = vmul.f32 0.1, %v1490_v41 }
 0x246   : > { %v7734_v2 = vor.u32 %v8316_v15, %v7731_v38 }
 0x247   : > { %v1933_v50 = vmul.f32 0.1, %v1778_v0 }
 0x248   : > { %2772 = vmatpush.bf16.msra.mxu2 %v7734_v2 }
 0x249   : > { %v2061_v45 = vmax.f32 %v1778_v0, %v1933_v50  ;;  %v2100_v0 = vmax.f32 %v1490_v41, %v1972_v29 }
 0x24a   : > { %v1610_v18 = vpop.f32.mrf.mxu2 }
 0x24b   : > { %v1611_v62 = vadd.f32 %v1610_v18, %v9665_v44  ;;  %v1779_v36 = vpop.f32.mrf.mxu3  ;;  %v1974_v18 = vmul.f32 0.1, %v1492_v25 }
 0x24c   : > { %v9781_v14 = vpop.f32.mrf.mxu0 }
 0x24d   : > { %v1780_v31 = vadd.f32 %v1779_v36, %v1611_v62  ;;  %v2102_v4 = vmax.f32 %v1492_v25, %v1974_v18 }
 0x24f   : > { %v1935_v32 = vmul.f32 0.1, %v1780_v31  ;;  %1652 = vmatmul.bf16.gmra.mxu2 %v9335_v27  ;;  %2508 = vmatmul.bf16.gmra.mxu0 %v9779_v17 }
 0x250   : > { %1821 = vmatmul.bf16.gmra.mxu3 %v9496_v60  ;;  %v12834_v60 = vld [vmem:[#allocation75_spill] sm:$0xff] }
 0x251   : > { %v2063_v61 = vmax.f32 %v1780_v31, %v1935_v32  ;;  %v9799_v32 = vpack.c.bf16 %v2102_v4, %v2100_v0  ;;  %v8336_v0 = vld [vmem:[%s12788_s19 + $0xd4] sm:$0xf]  ;;  %v7811_v4 = vld [vmem:[%s12788_s19 + $0xd8] sm:$0xf0] }
 0x252   : > { %v1613_v21 = vpop.f32.mrf.mxu2 }
 0x253   : > { %v1782_v52 = vpop.f32.mrf.mxu3  ;;  %v9792_v22 = vpack.c.bf16 %v2063_v61, %v2061_v45  ;;  %v1614_v31 = vadd.f32 %v1613_v21, %v9665_v44  ;;  %12833 = vst [vmem:[#allocation107_spill] sm:$0xff] %v9799_v32 }
 0x254   : > { %v9794_v3 = vpop.f32.mrf.mxu0 }
 0x255   : > { %2632 = vmatmul.bf16.gmra.mxu1 %v9792_v22  ;;  %v1783_v62 = vadd.f32 %v1782_v52, %v1614_v31 }
 0x257   : > { %v1937_v45 = vmul.f32 0.1, %v1783_v62 }
 0x259   : > { %v2065_v41 = vmax.f32 %v1783_v62, %v1937_v45 }
 0x25a   : > { %v1615_v36 = vpop.f32.mrf.mxu2 }
 0x25b   : > { %v1616_v34 = vadd.f32 %v1615_v36, %v9665_v44  ;;  %v1784_v50 = vpop.f32.mrf.mxu3  ;;  %v7814_v36 = vor.u32 %v8336_v0, %v7811_v4 }
 0x25c   : > { %v9801_v15 = vpop.f32.mrf.mxu0 }
 0x25d   : > { %v1785_v61 = vadd.f32 %v1784_v50, %v1616_v34  ;;  %2939 = vmatpush.bf16.msra.mxu3 %v7814_v36  ;;  %v2264_v36 = vld [vmem:[%s12838_s0] sm:$0x3] }
 0x25f   : > { %v1939_v38 = vmul.f32 0.1, %v1785_v61  ;;  %1657 = vmatmul.bf16.gmra.mxu2 %v12834_v60  ;;  %2513 = vmatmul.bf16.gmra.mxu0 %v9799_v32 }
 0x260   : > { %1826 = vmatmul.bf16.gmra.mxu3 %v9521_v43 }
 0x261   : > { %v2067_v25 = vmax.f32 %v1785_v61, %v1939_v38 }
 0x262   : > { %v1618_v21 = vpop.f32.mrf.mxu2 }
 0x263   : > { %v1787_v2 = vpop.f32.mrf.mxu3  ;;  %v9806_v29 = vpack.c.bf16 %v2067_v25, %v2065_v41  ;;  %v1619_v18 = vadd.f32 %v1618_v21, %v9665_v44  ;;  %v12835_v25 = vld [vmem:[#allocation16_spill] sm:$0xff]  ;;  %v12836_v21 = vld [vmem:[#allocation49_spill] sm:$0xff] }
 0x264   : > { %v9808_v52 = vpop.f32.mrf.mxu0 }
 0x265   : > { %2637 = vmatmul.bf16.gmra.mxu1 %v9806_v29  ;;  %v1788_v31 = vadd.f32 %v1787_v2, %v1619_v18  ;;  %v12837_v2 = vld [vmem:[#allocation17_spill] sm:$0xff] }
 0x267   : > { %v1941_v61 = vmul.f32 0.1, %v1788_v31 }
 0x269   : > { %v2069_v18 = vmax.f32 %v1788_v31, %v1941_v61  ;;  %v8349_v31 = vld [vmem:[%s12839_s5 + $0x38] sm:$0xff]  ;;  %v9836_v61 = vperm.slane %v2264_v36, 0 }
 0x26a   : > { %v1620_v62 = vpop.f32.mrf.mxu2  ;;  %3494 = vmatpush.bf16.msra.mxu0 %v8349_v31 }
 0x26b   : > { %v1621_v34 = vadd.f32 %v1620_v62, %v9665_v44  ;;  %v1789_v50 = vpop.f32.mrf.mxu3 }
 0x26c   : > { %v9819_v45 = vpop.f32.mrf.mxu0 }
 0x26d   : > { %v1790_v38 = vadd.f32 %v1789_v50, %v1621_v34 }
 0x26f   : > { %v1943_v41 = vmul.f32 0.1, %v1790_v38  ;;  %1662 = vmatmul.bf16.gmra.mxu2 %v12835_v25  ;;  %2518 = vmatmul.bf16.gmra.mxu0 %v12836_v21  ;;  %v12842_v21 = vld [vmem:[#allocation20_spill] sm:$0xff] }
 0x270   : > { %1831 = vmatmul.bf16.gmra.mxu3 %v12837_v2  ;;  %v2440_v2 = vadd.f32 %v9656_v6, %v9836_v61  ;;  %v2442_v6 = vadd.f32 %v9669_v63, %v9836_v61  ;;  %v12844_v63 = vld [vmem:[#allocation22_spill] sm:$0xff] }
 0x271   : > { %v2071_v43 = vmax.f32 %v1790_v38, %v1943_v41 }
 0x272   : > { %v1623_v60 = vpop.f32.mrf.mxu2 }
 0x273   : > { %v1792_v32 = vpop.f32.mrf.mxu3  ;;  %v9824_v0 = vpack.c.bf16 %v2071_v43, %v2069_v18  ;;  %v1624_v62 = vadd.f32 %v1623_v60, %v9665_v44 }
 0x274   : > { %v9826_v4 = vpop.f32.mrf.mxu0 }
 0x275   : > { %2642 = vmatmul.bf16.gmra.mxu1 %v9824_v0  ;;  %v1793_v34 = vadd.f32 %v1792_v32, %v1624_v62  ;;  %v12840_v32 = vld [vmem:[#allocation19_spill] sm:$0xff]  ;;  %v12841_v62 = vld [vmem:[#allocation54_spill] sm:$0xff] }
 0x277   : > { %v1945_v60 = vmul.f32 0.1, %v1793_v34 }
 0x279   : > { %v2073_v36 = vmax.f32 %v1793_v34, %v1945_v60 }
 0x27a   : > { %v1625_v50 = vpop.f32.mrf.mxu2 }
 0x27b   : > { %v1626_v43 = vadd.f32 %v1625_v50, %v9665_v44  ;;  %v1794_v38 = vpop.f32.mrf.mxu3 }
 0x27c   : > { %v9839_v41 = vpop.f32.mrf.mxu0 }
 0x27d   : > { %v1795_v18 = vadd.f32 %v1794_v38, %v1626_v43 }
 0x27f   : > { %v1947_v25 = vmul.f32 0.1, %v1795_v18  ;;  %1667 = vmatmul.bf16.gmra.mxu2 %v12840_v32  ;;  %2523 = vmatmul.bf16.gmra.mxu0 %v12841_v62 }
 0x280   : > { %1836 = vmatmul.bf16.gmra.mxu3 %v12842_v21 }
 0x281   : > { %v2075_v27 = vmax.f32 %v1795_v18, %v1947_v25 }
 0x282   : > { %v1628_v17 = vpop.f32.mrf.mxu2  ;;  %v2608_v50 = vpop.f32.mrf.mxu1 }
 0x283   : > { %v1797_v13 = vpop.f32.mrf.mxu3  ;;  %v2609_v31 = vadd.f32 %v2608_v50, %v2440_v2  ;;  %v9846_v28 = vpack.c.bf16 %v2075_v27, %v2073_v36  ;;  %v1629_v43 = vadd.f32 %v1628_v17, %v9665_v44  ;;  %v2445_v17 = vadd.f32 %v9679_v5, %v9836_v61  ;;  %v7723_v5 = vld [vmem:[%s12788_s19 + $0x28] sm:$0xf0] }
 0x284   : > { %v9848_v35 = vpop.f32.mrf.mxu0 }
 0x285   : > { %12843 = vst [vmem:[#allocation108_spill] sm:$0xff] %v9846_v28  ;;  %2647 = vmatmul.bf16.gmra.mxu1 %v9846_v28  ;;  %v1798_v38 = vadd.f32 %v1797_v13, %v1629_v43  ;;  %v3106_v34 = vmul.f32 0.1, %v2609_v31  ;;  %v12845_v13 = vld [vmem:[#allocation59_spill] sm:$0xff] }
 0x286   : > { %v12846_v43 = vld [vmem:[#allocation23_spill] sm:$0xff] }
 0x287   : > { %v1949_v27 = vmul.f32 0.1, %v1798_v38  ;;  %v3234_v62 = vmax.f32 %v2609_v31, %v3106_v34 }
 0x28a   : > { %v1630_v32 = vpop.f32.mrf.mxu2  ;;  %v2610_v21 = vpop.f32.mrf.mxu1 }
 0x28b   : > { %v1631_v25 = vadd.f32 %v1630_v32, %v9665_v44  ;;  %v1799_v60 = vpop.f32.mrf.mxu3  ;;  %v2611_v18 = vadd.f32 %v2610_v21, %v2442_v6  ;;  %v2077_v32 = vmax.f32 %v1798_v38, %v1949_v27  ;;  %v8314_v6 = vld [vmem:[%s12788_s19 + $0x24] sm:$0xf] }
 0x28c   : > { %v9855_v2 = vpop.f32.mrf.mxu0 }
 0x28d   : > { %v1800_v36 = vadd.f32 %v1799_v60, %v1631_v25  ;;  %v3108_v50 = vmul.f32 0.1, %v2611_v18  ;;  %v7726_v25 = vor.u32 %v8314_v6, %v7723_v5 }
 0x28f   : > { %v1951_v11 = vmul.f32 0.1, %v1800_v36  ;;  %v3236_v30 = vmax.f32 %v2611_v18, %v3108_v50  ;;  %1672 = vmatmul.bf16.gmra.mxu2 %v12844_v63  ;;  %2528 = vmatmul.bf16.gmra.mxu0 %v12845_v13 }
 0x290   : > { %1841 = vmatmul.bf16.gmra.mxu3 %v12846_v43  ;;  %2773 = vmatpush.bf16.msra.mxu2 %v7726_v25 }
 0x291   : > { %v2079_v54 = vmax.f32 %v1800_v36, %v1951_v11  ;;  %v9862_v21 = vpack.c.bf16 %v3236_v30, %v3234_v62  ;;  %v2447_v11 = vadd.f32 %v9686_v53, %v9836_v61  ;;  %v12849_v53 = vld [vmem:[#allocation25_spill] sm:$0xff] }
 0x292   : > { %v1633_v31 = vpop.f32.mrf.mxu2  ;;  %v2613_v34 = vpop.f32.mrf.mxu1 }
 0x293   : > { %12847 = vst [vmem:[#allocation109_spill] sm:$0xff] %v9862_v21  ;;  %v1802_v60 = vpop.f32.mrf.mxu3  ;;  %v2614_v18 = vadd.f32 %v2613_v34, %v2445_v17  ;;  %v9870_v50 = vpack.c.bf16 %v2079_v54, %v2077_v32  ;;  %v1634_v30 = vadd.f32 %v1633_v31, %v9665_v44  ;;  %v2450_v31 = vadd.f32 %v9697_v57, %v9836_v61 }
 0x294   : > { %v9872_v43 = vpop.f32.mrf.mxu0 }
 0x295   : > { %12848 = vst [vmem:[#allocation110_spill] sm:$0xff] %v9870_v50  ;;  %2652 = vmatmul.bf16.gmra.mxu1 %v9870_v50  ;;  %v1803_v62 = vadd.f32 %v1802_v60, %v1634_v30  ;;  %v3110_v36 = vmul.f32 0.1, %v2614_v18  ;;  %v12850_v60 = vld [vmem:[#allocation64_spill] sm:$0xff]  ;;  %v12851_v30 = vld [vmem:[#allocation26_spill] sm:$0xff] }
 0x297   : > { %v1953_v32 = vmul.f32 0.1, %v1803_v62  ;;  %v3238_v21 = vmax.f32 %v2614_v18, %v3110_v36  ;;  %v2452_v36 = vadd.f32 %v9710_v55, %v9836_v61 }
 0x29a   : > { %v1635_v38 = vpop.f32.mrf.mxu2  ;;  %v2615_v27 = vpop.f32.mrf.mxu1 }
 0x29b   : > { %v1636_v6 = vadd.f32 %v1635_v38, %v9665_v44  ;;  %v1804_v5 = vpop.f32.mrf.mxu3  ;;  %v2616_v17 = vadd.f32 %v2615_v27, %v2447_v11  ;;  %v2081_v38 = vmax.f32 %v1803_v62, %v1953_v32 }
 0x29c   : > { %v9879_v54 = vpop.f32.mrf.mxu0 }
 0x29d   : > { %v1805_v34 = vadd.f32 %v1804_v5, %v1636_v6  ;;  %v3112_v25 = vmul.f32 0.1, %v2616_v17 }
 0x29f   : > { %v1955_v63 = vmul.f32 0.1, %v1805_v34  ;;  %v3240_v13 = vmax.f32 %v2616_v17, %v3112_v25  ;;  %1677 = vmatmul.bf16.gmra.mxu2 %v12849_v53  ;;  %2533 = vmatmul.bf16.gmra.mxu0 %v12850_v60  ;;  %v12854_v53 = vld [vmem:[#allocation28_spill] sm:$0xff] }
 0x2a0   : > { %1846 = vmatmul.bf16.gmra.mxu3 %v12851_v30 }
 0x2a1   : > { %v2083_v50 = vmax.f32 %v1805_v34, %v1955_v63  ;;  %v9886_v11 = vpack.c.bf16 %v3240_v13, %v3238_v21  ;;  %v8334_v63 = vld [vmem:[%s12788_s19 + $0xc4] sm:$0xf] }
 0x2a2   : > { %v1638_v27 = vpop.f32.mrf.mxu2  ;;  %v2618_v40 = vpop.f32.mrf.mxu1 }
 0x2a3   : > { %12852 = vst [vmem:[#allocation111_spill] sm:$0xff] %v9886_v11  ;;  %v1807_v6 = vpop.f32.mrf.mxu3  ;;  %v2619_v5 = vadd.f32 %v2618_v40, %v2450_v31  ;;  %v9888_v28 = vpack.c.bf16 %v2083_v50, %v2081_v38  ;;  %v1639_v18 = vadd.f32 %v1638_v27, %v9665_v44  ;;  %v7803_v40 = vld [vmem:[%s12788_s19 + $0xc8] sm:$0xf0] }
 0x2a4   : > { %v9890_v57 = vpop.f32.mrf.mxu0  ;;  %v7806_v50 = vor.u32 %v8334_v63, %v7803_v40  ;;  %v12855_v63 = vld [vmem:[#allocation69_spill] sm:$0xff] }
 0x2a5   : > { %12853 = vst [vmem:[#allocation112_spill] sm:$0xff] %v9888_v28  ;;  %2657 = vmatmul.bf16.gmra.mxu1 %v9888_v28  ;;  %v1808_v17 = vadd.f32 %v1807_v6, %v1639_v18  ;;  %v3114_v62 = vmul.f32 0.1, %v2619_v5  ;;  %v2455_v6 = vadd.f32 %v9721_v7, %v9836_v61  ;;  %v12856_v40 = vld [vmem:[#allocation29_spill] sm:$0xff] }
 0x2a6   : > { %2940 = vmatpush.bf16.msra.mxu3 %v7806_v50 }
 0x2a7   : > { %v1957_v55 = vmul.f32 0.1, %v1808_v17  ;;  %v3242_v18 = vmax.f32 %v2619_v5, %v3114_v62  ;;  %v2457_v62 = vadd.f32 %v9728_v49, %v9836_v61  ;;  %v2460_v49 = vadd.f32 %v9745_v19, %v9836_v61 }
 0x2aa   : > { %v1640_v13 = vpop.f32.mrf.mxu2  ;;  %v2620_v21 = vpop.f32.mrf.mxu1 }
 0x2ab   : > { %v1641_v32 = vadd.f32 %v1640_v13, %v9665_v44  ;;  %v1809_v34 = vpop.f32.mrf.mxu3  ;;  %v2621_v25 = vadd.f32 %v2620_v21, %v2452_v36  ;;  %v2085_v13 = vmax.f32 %v1808_v17, %v1957_v55 }
 0x2ac   : > { %v9903_v31 = vpop.f32.mrf.mxu0 }
 0x2ad   : > { %v1810_v38 = vadd.f32 %v1809_v34, %v1641_v32  ;;  %v3116_v27 = vmul.f32 0.1, %v2621_v25 }
 0x2af   : > { %v1959_v11 = vmul.f32 0.1, %v1810_v38  ;;  %v3244_v30 = vmax.f32 %v2621_v25, %v3116_v27  ;;  %1682 = vmatmul.bf16.gmra.mxu2 %v12854_v53  ;;  %2538 = vmatmul.bf16.gmra.mxu0 %v12855_v63  ;;  %v12860_v53 = vld [vmem:[#allocation31_spill] sm:$0xff] }
 0x2b0   : > { %1851 = vmatmul.bf16.gmra.mxu3 %v12856_v40  ;;  %v12859_v40 = vld [vmem:[#allocation74_spill] sm:$0xff] }
 0x2b1   : > { %v2087_v36 = vmax.f32 %v1810_v38, %v1959_v11  ;;  %v9910_v21 = vpack.c.bf16 %v3244_v30, %v3242_v18  ;;  %v8348_v30 = vld [vmem:[%s12839_s5 + $0x30] sm:$0xff] }
 0x2b2   : > { %v1643_v50 = vpop.f32.mrf.mxu2  ;;  %v2623_v60 = vpop.f32.mrf.mxu1  ;;  %3495 = vmatpush.bf16.msra.mxu0 %v8348_v30  ;;  %v8357_v30 = vld [vmem:[%s12839_s5 + $0x78] sm:$0xff] }
 0x2b3   : > { %12857 = vst [vmem:[#allocation113_spill] sm:$0xff] %v9910_v21  ;;  %v1812_v32 = vpop.f32.mrf.mxu3  ;;  %v2624_v34 = vadd.f32 %v2623_v60, %v2455_v6  ;;  %v9912_v28 = vpack.c.bf16 %v2087_v36, %v2085_v13  ;;  %v1644_v5 = vadd.f32 %v1643_v50, %v9665_v44  ;;  %v12858_v21 = vld [vmem:[#allocation30_spill] sm:$0xff]  ;;  %3663 = vmatpush.bf16.msra.mxu1 %v8357_v30 }
 0x2b4   : > { %v9914_v7 = vpop.f32.mrf.mxu0 }
 0x2b5   : > { %2662 = vmatmul.bf16.gmra.mxu1 %v9912_v28  ;;  %v1813_v25 = vadd.f32 %v1812_v32, %v1644_v5  ;;  %v3118_v55 = vmul.f32 0.1, %v2624_v34 }
 0x2b7   : > { %v1961_v18 = vmul.f32 0.1, %v1813_v25  ;;  %v3246_v50 = vmax.f32 %v2624_v34, %v3118_v55 }
 0x2ba   : > { %v1645_v11 = vpop.f32.mrf.mxu2  ;;  %v2625_v17 = vpop.f32.mrf.mxu1 }
 0x2bb   : > { %v1646_v60 = vadd.f32 %v1645_v11, %v9665_v44  ;;  %v1814_v38 = vpop.f32.mrf.mxu3  ;;  %v2626_v27 = vadd.f32 %v2625_v17, %v2457_v62  ;;  %v2089_v11 = vmax.f32 %v1813_v25, %v1961_v18  ;;  %v2462_v25 = vadd.f32 %v9752_v9, %v9836_v61  ;;  %v12862_v9 = vld [vmem:[#allocation34_spill] sm:$0xff] }
 0x2bc   : > { %v9924_v6 = vpop.f32.mrf.mxu0 }
 0x2bd   : > { %v1815_v13 = vadd.f32 %v1814_v38, %v1646_v60  ;;  %v3120_v36 = vmul.f32 0.1, %v2626_v27 }
 0x2bf   : > { %v1963_v32 = vmul.f32 0.1, %v1815_v13  ;;  %v3248_v5 = vmax.f32 %v2626_v27, %v3120_v36  ;;  %1687 = vmatmul.bf16.gmra.mxu2 %v12858_v21  ;;  %2543 = vmatmul.bf16.gmra.mxu0 %v12859_v40 }
 0x2c0   : > { %1856 = vmatmul.bf16.gmra.mxu3 %v12860_v53 }
 0x2c1   : > { %v2091_v62 = vmax.f32 %v1815_v13, %v1963_v32  ;;  %v9934_v17 = vpack.c.bf16 %v3248_v5, %v3246_v50 }
 0x2c2   : > { %v1648_v60 = vpop.f32.mrf.mxu2  ;;  %v2628_v38 = vpop.f32.mrf.mxu1 }
 0x2c3   : > { %12861 = vst [vmem:[#allocation114_spill] sm:$0xff] %v9934_v17  ;;  %v1817_v19 = vpop.f32.mrf.mxu3  ;;  %v2629_v34 = vadd.f32 %v2628_v38, %v2460_v49  ;;  %v9936_v55 = vpack.c.bf16 %v2091_v62, %v2089_v11  ;;  %v1649_v36 = vadd.f32 %v1648_v60, %v9665_v44  ;;  %v2465_v60 = vadd.f32 %v9763_v16, %v9836_v61 }
 0x2c4   : > { %v9938_v27 = vpop.f32.mrf.mxu0 }
 0x2c5   : > { %2667 = vmatmul.bf16.gmra.mxu1 %v9936_v55  ;;  %v1818_v18 = vadd.f32 %v1817_v19, %v1649_v36  ;;  %v3122_v32 = vmul.f32 0.1, %v2629_v34  ;;  %v12863_v19 = vld [vmem:[#allocation35_spill] sm:$0xff] }
 0x2c7   : > { %v1965_v62 = vmul.f32 0.1, %v1818_v18  ;;  %v3250_v53 = vmax.f32 %v2629_v34, %v3122_v32 }
 0x2c9   : > { %v2093_v36 = vmax.f32 %v1818_v18, %v1965_v62  ;;  %v2467_v18 = vadd.f32 %v9770_v39, %v9836_v61  ;;  %v12866_v39 = vld [vmem:[#allocation38_spill] sm:$0xff] }
 0x2ca   : > { %v1650_v13 = vpop.f32.mrf.mxu2  ;;  %v2630_v50 = vpop.f32.mrf.mxu1 }
 0x2cb   : > { %v1651_v5 = vadd.f32 %v1650_v13, %v9665_v44  ;;  %v1819_v17 = vpop.f32.mrf.mxu3  ;;  %v2631_v49 = vadd.f32 %v2630_v50, %v2462_v25  ;;  %v8312_v25 = vld [vmem:[%s12788_s19 + $0x14] sm:$0xf] }
 0x2cc   : > { %v9945_v11 = vpop.f32.mrf.mxu0 }
 0x2cd   : > { %v1820_v30 = vadd.f32 %v1819_v17, %v1651_v5  ;;  %v3124_v38 = vmul.f32 0.1, %v2631_v49  ;;  %v7715_v17 = vld [vmem:[%s12788_s19 + $0x18] sm:$0xf0] }
 0x2ce   : > { %v7718_v32 = vor.u32 %v8312_v25, %v7715_v17 }
 0x2cf   : > { %v1967_v21 = vmul.f32 0.1, %v1820_v30  ;;  %v3252_v40 = vmax.f32 %v2631_v49, %v3124_v38  ;;  %1692 = vmatmul.bf16.gmra.mxu2 %v12862_v9  ;;  %2548 = vmatmul.bf16.gmra.mxu0 %v9399_v58 }
 0x2d0   : > { %1861 = vmatmul.bf16.gmra.mxu3 %v12863_v19  ;;  %2774 = vmatpush.bf16.msra.mxu2 %v7718_v32 }
 0x2d1   : > { %v2095_v13 = vmax.f32 %v1820_v30, %v1967_v21  ;;  %v9958_v16 = vpack.c.bf16 %v3252_v40, %v3250_v53 }
 0x2d2   : > { %v1653_v34 = vpop.f32.mrf.mxu2  ;;  %v2633_v50 = vpop.f32.mrf.mxu1 }
 0x2d3   : > { %12864 = vst [vmem:[#allocation115_spill] sm:$0xff] %v9958_v16  ;;  %v1822_v5 = vpop.f32.mrf.mxu3  ;;  %v2634_v49 = vadd.f32 %v2633_v50, %v2465_v60  ;;  %v9960_v38 = vpack.c.bf16 %v2095_v13, %v2093_v36  ;;  %v1654_v21 = vadd.f32 %v1653_v34, %v9665_v44  ;;  %v2470_v34 = vadd.f32 %v9781_v14, %v9836_v61 }
 0x2d4   : > { %v9962_v19 = vpop.f32.mrf.mxu0 }
 0x2d5   : > { %12865 = vst [vmem:[#allocation116_spill] sm:$0xff] %v9960_v38  ;;  %2672 = vmatmul.bf16.gmra.mxu1 %v9960_v38  ;;  %v1823_v62 = vadd.f32 %v1822_v5, %v1654_v21  ;;  %v3126_v30 = vmul.f32 0.1, %v2634_v49  ;;  %v12867_v5 = vld [vmem:[#allocation39_spill] sm:$0xff] }
 0x2d7   : > { %v1969_v13 = vmul.f32 0.1, %v1823_v62  ;;  %v3254_v16 = vmax.f32 %v2634_v49, %v3126_v30  ;;  %v2472_v30 = vadd.f32 %v9794_v3, %v9836_v61 }
 0x2d9   : > { %v2097_v21 = vmax.f32 %v1823_v62, %v1969_v13 }
 0x2da   : > { %v1655_v53 = vpop.f32.mrf.mxu2  ;;  %v2635_v40 = vpop.f32.mrf.mxu1 }
 0x2db   : > { %v1656_v25 = vadd.f32 %v1655_v53, %v9665_v44  ;;  %v1824_v17 = vpop.f32.mrf.mxu3  ;;  %v2636_v60 = vadd.f32 %v2635_v40, %v2467_v18 }
 0x2dc   : > { %v9969_v36 = vpop.f32.mrf.mxu0 }
 0x2dd   : > { %v1825_v50 = vadd.f32 %v1824_v17, %v1656_v25  ;;  %v3128_v32 = vmul.f32 0.1, %v2636_v60 }
 0x2df   : > { %v1971_v9 = vmul.f32 0.1, %v1825_v50  ;;  %v3256_v58 = vmax.f32 %v2636_v60, %v3128_v32  ;;  %1697 = vmatmul.bf16.gmra.mxu2 %v12866_v39  ;;  %2553 = vmatmul.bf16.gmra.mxu0 %v9422_v59  ;;  %v12869_v39 = vld [vmem:[#allocation42_spill] sm:$0xff] }
 0x2e0   : > { %1866 = vmatmul.bf16.gmra.mxu3 %v12867_v5 }
 0x2e1   : > { %v2099_v53 = vmax.f32 %v1825_v50, %v1971_v9  ;;  %v9976_v18 = vpack.c.bf16 %v3256_v58, %v3254_v16  ;;  %v8332_v58 = vld [vmem:[%s12788_s19 + $0xb4] sm:$0xf] }
 0x2e2   : > { %v1658_v40 = vpop.f32.mrf.mxu2  ;;  %v2638_v63 = vpop.f32.mrf.mxu1 }
 0x2e3   : > { %12868 = vst [vmem:[#allocation117_spill] sm:$0xff] %v9976_v18  ;;  %v1827_v25 = vpop.f32.mrf.mxu3  ;;  %v2639_v17 = vadd.f32 %v2638_v63, %v2470_v34  ;;  %v9978_v38 = vpack.c.bf16 %v2099_v53, %v2097_v21  ;;  %v1659_v49 = vadd.f32 %v1658_v40, %v9665_v44  ;;  %v7795_v63 = vld [vmem:[%s12788_s19 + $0xb8] sm:$0xf0] }
 0x2e4   : > { %v9980_v14 = vpop.f32.mrf.mxu0  ;;  %v7798_v62 = vor.u32 %v8332_v58, %v7795_v63  ;;  %v12870_v58 = vld [vmem:[#allocation43_spill] sm:$0xff] }
 0x2e5   : > { %2677 = vmatmul.bf16.gmra.mxu1 %v9978_v38  ;;  %v1828_v60 = vadd.f32 %v1827_v25, %v1659_v49  ;;  %v3130_v13 = vmul.f32 0.1, %v2639_v17  ;;  %v2475_v25 = vadd.f32 %v9801_v15, %v9836_v61 }
 0x2e6   : > { %2941 = vmatpush.bf16.msra.mxu3 %v7798_v62 }
 0x2e7   : > { %v1973_v3 = vmul.f32 0.1, %v1828_v60  ;;  %v3258_v49 = vmax.f32 %v2639_v17, %v3130_v13  ;;  %v2477_v13 = vadd.f32 %v9808_v52, %v9836_v61  ;;  %v2480_v52 = vadd.f32 %v9819_v45, %v9836_v61 }
 0x2e9   : > { %v2101_v63 = vmax.f32 %v1828_v60, %v1973_v3 }
 0x2ea   : > { %v1660_v9 = vpop.f32.mrf.mxu2  ;;  %v2640_v16 = vpop.f32.mrf.mxu1 }
 0x2eb   : > { %v1661_v50 = vadd.f32 %v1660_v9, %v9665_v44  ;;  %v1829_v32 = vpop.f32.mrf.mxu3  ;;  %v2641_v34 = vadd.f32 %v2640_v16, %v2472_v30 }
 0x2ec   : > { %v9993_v21 = vpop.f32.mrf.mxu0 }
 0x2ed   : > { %v1830_v53 = vadd.f32 %v1829_v32, %v1661_v50  ;;  %v3132_v40 = vmul.f32 0.1, %v2641_v34 }
 0x2ef   : > { %v1975_v18 = vmul.f32 0.1, %v1830_v53  ;;  %v3260_v5 = vmax.f32 %v2641_v34, %v3132_v40  ;;  %1702 = vmatmul.bf16.gmra.mxu2 %v12869_v39  ;;  %2558 = vmatmul.bf16.gmra.mxu0 %v9446_v1 }
 0x2f0   : > { %1871 = vmatmul.bf16.gmra.mxu3 %v12870_v58  ;;  %v12873_v58 = vld [vmem:[#allocation47_spill] sm:$0xff] }
 0x2f1   : > { %v2103_v30 = vmax.f32 %v1830_v53, %v1975_v18  ;;  %v10000_v9 = vpack.c.bf16 %v3260_v5, %v3258_v49  ;;  %v8347_v5 = vld [vmem:[%s12839_s5 + $0x28] sm:$0xff] }
 0x2f2   : > { %v1663_v16 = vpop.f32.mrf.mxu2  ;;  %v2643_v62 = vpop.f32.mrf.mxu1  ;;  %3496 = vmatpush.bf16.msra.mxu0 %v8347_v5  ;;  %v8356_v5 = vld [vmem:[%s12839_s5 + $0x70] sm:$0xff] }
 0x2f3   : > { %12871 = vst [vmem:[#allocation118_spill] sm:$0xff] %v10000_v9  ;;  %v1832_v50 = vpop.f32.mrf.mxu3  ;;  %v2644_v32 = vadd.f32 %v2643_v62, %v2475_v25  ;;  %v10002_v59 = vpack.c.bf16 %v2103_v30, %v2101_v63  ;;  %v1664_v17 = vadd.f32 %v1663_v16, %v9665_v44  ;;  %v12872_v9 = vld [vmem:[#allocation46_spill] sm:$0xff]  ;;  %3664 = vmatpush.bf16.msra.mxu1 %v8356_v5 }
 0x2f4   : > { %v10004_v15 = vpop.f32.mrf.mxu0 }
 0x2f5   : > { %2682 = vmatmul.bf16.gmra.mxu1 %v10002_v59  ;;  %v1833_v34 = vadd.f32 %v1832_v50, %v1664_v17  ;;  %v3134_v3 = vmul.f32 0.1, %v2644_v32 }
 0x2f7   : > { %v1977_v63 = vmul.f32 0.1, %v1833_v34  ;;  %v3262_v62 = vmax.f32 %v2644_v32, %v3134_v3 }
 0x2fa   : > { %v1665_v18 = vpop.f32.mrf.mxu2  ;;  %v2645_v60 = vpop.f32.mrf.mxu1 }
 0x2fb   : > { %v1666_v53 = vadd.f32 %v1665_v18, %v9665_v44  ;;  %v1834_v40 = vpop.f32.mrf.mxu3  ;;  %v2646_v25 = vadd.f32 %v2645_v60, %v2477_v13  ;;  %v2105_v18 = vmax.f32 %v1833_v34, %v1977_v63  ;;  %v2482_v34 = vadd.f32 %v9826_v4, %v9836_v61  ;;  %v12875_v4 = vld [vmem:[#allocation51_spill] sm:$0xff] }
 0x2fc   : > { %v10014_v49 = vpop.f32.mrf.mxu0 }
 0x2fd   : > { %v1835_v30 = vadd.f32 %v1834_v40, %v1666_v53  ;;  %v3136_v16 = vmul.f32 0.1, %v2646_v25 }
 0x2ff   : > { %v1979_v50 = vmul.f32 0.1, %v1835_v30  ;;  %v3264_v17 = vmax.f32 %v2646_v25, %v3136_v16  ;;  %1707 = vmatmul.bf16.gmra.mxu2 %v12872_v9  ;;  %2563 = vmatmul.bf16.gmra.mxu0 %v9476_v24 }
 0x300   : > { %1876 = vmatmul.bf16.gmra.mxu3 %v12873_v58 }
 0x301   : > { %v2107_v13 = vmax.f32 %v1835_v30, %v1979_v50  ;;  %v10024_v60 = vpack.c.bf16 %v3264_v17, %v3262_v62 }
 0x302   : > { %v1668_v53 = vpop.f32.mrf.mxu2  ;;  %v2648_v40 = vpop.f32.mrf.mxu1 }
 0x303   : > { %12874 = vst [vmem:[#allocation119_spill] sm:$0xff] %v10024_v60  ;;  %v1837_v45 = vpop.f32.mrf.mxu3  ;;  %v2649_v32 = vadd.f32 %v2648_v40, %v2480_v52  ;;  %v10026_v3 = vpack.c.bf16 %v2107_v13, %v2105_v18  ;;  %v1669_v16 = vadd.f32 %v1668_v53, %v9665_v44  ;;  %v2485_v53 = vadd.f32 %v9839_v41, %v9836_v61 }
 0x304   : > { %v10028_v25 = vpop.f32.mrf.mxu0 }
 0x305   : > { %2687 = vmatmul.bf16.gmra.mxu1 %v10026_v3  ;;  %v1838_v63 = vadd.f32 %v1837_v45, %v1669_v16  ;;  %v3138_v50 = vmul.f32 0.1, %v2649_v32  ;;  %v12876_v45 = vld [vmem:[#allocation52_spill] sm:$0xff] }
 0x307   : > { %v1981_v13 = vmul.f32 0.1, %v1838_v63  ;;  %v3266_v58 = vmax.f32 %v2649_v32, %v3138_v50 }
 0x309   : > { %v2109_v16 = vmax.f32 %v1838_v63, %v1981_v13  ;;  %v2487_v63 = vadd.f32 %v9848_v35, %v9836_v61  ;;  %v12878_v35 = vld [vmem:[#allocation56_spill] sm:$0xff] }
 0x30a   : > { %v1670_v30 = vpop.f32.mrf.mxu2  ;;  %v2650_v62 = vpop.f32.mrf.mxu1 }
 0x30b   : > { %v1671_v17 = vadd.f32 %v1670_v30, %v9665_v44  ;;  %v1839_v60 = vpop.f32.mrf.mxu3  ;;  %v2651_v52 = vadd.f32 %v2650_v62, %v2482_v34  ;;  %v8310_v34 = vld [vmem:[%s12788_s19 + $0x4] sm:$0xf] }
 0x30c   : > { %v10035_v18 = vpop.f32.mrf.mxu0 }
 0x30d   : > { %v1840_v5 = vadd.f32 %v1839_v60, %v1671_v17  ;;  %v3140_v40 = vmul.f32 0.1, %v2651_v52  ;;  %v7707_v60 = vld [vmem:[%s12788_s19 + $0x8] sm:$0xf0] }
 0x30e   : > { %v7710_v50 = vor.u32 %v8310_v34, %v7707_v60 }
 0x30f   : > { %v1983_v9 = vmul.f32 0.1, %v1840_v5  ;;  %v3268_v24 = vmax.f32 %v2651_v52, %v3140_v40  ;;  %1712 = vmatmul.bf16.gmra.mxu2 %v12875_v4  ;;  %2568 = vmatmul.bf16.gmra.mxu0 %v9499_v56 }
 0x310   : > { %1881 = vmatmul.bf16.gmra.mxu3 %v12876_v45  ;;  %2775 = vmatpush.bf16.msra.mxu2 %v7710_v50 }
 0x311   : > { %v2111_v30 = vmax.f32 %v1840_v5, %v1983_v9  ;;  %v10048_v41 = vpack.c.bf16 %v3268_v24, %v3266_v58 }
 0x312   : > { %v1673_v32 = vpop.f32.mrf.mxu2  ;;  %v2653_v62 = vpop.f32.mrf.mxu1 }
 0x313   : > { %12877 = vst [vmem:[#allocation120_spill] sm:$0xff] %v10048_v41  ;;  %v1842_v17 = vpop.f32.mrf.mxu3  ;;  %v2654_v52 = vadd.f32 %v2653_v62, %v2485_v53  ;;  %v10050_v40 = vpack.c.bf16 %v2111_v30, %v2109_v16  ;;  %v1674_v9 = vadd.f32 %v1673_v32, %v9665_v44  ;;  %v2490_v32 = vadd.f32 %v9855_v2, %v9836_v61 }
 0x314   : > { %v10052_v45 = vpop.f32.mrf.mxu0 }
 0x315   : > { %2692 = vmatmul.bf16.gmra.mxu1 %v10050_v40  ;;  %v1843_v13 = vadd.f32 %v1842_v17, %v1674_v9  ;;  %v3142_v5 = vmul.f32 0.1, %v2654_v52  ;;  %v12879_v17 = vld [vmem:[#allocation57_spill] sm:$0xff] }
 0x317   : > { %v1985_v30 = vmul.f32 0.1, %v1843_v13  ;;  %v3270_v41 = vmax.f32 %v2654_v52, %v3142_v5  ;;  %v2492_v5 = vadd.f32 %v9872_v43, %v9836_v61 }
 0x319   : > { %v2113_v9 = vmax.f32 %v1843_v13, %v1985_v30 }
 0x31a   : > { %v1675_v24 = vpop.f32.mrf.mxu2  ;;  %v2655_v58 = vpop.f32.mrf.mxu1 }
 0x31b   : > { %v1676_v34 = vadd.f32 %v1675_v24, %v9665_v44  ;;  %v1844_v60 = vpop.f32.mrf.mxu3  ;;  %v2656_v53 = vadd.f32 %v2655_v58, %v2487_v63 }
 0x31c   : > { %v10059_v16 = vpop.f32.mrf.mxu0 }
 0x31d   : > { %v1845_v62 = vadd.f32 %v1844_v60, %v1676_v34  ;;  %v3144_v50 = vmul.f32 0.1, %v2656_v53 }
 0x31f   : > { %v1987_v4 = vmul.f32 0.1, %v1845_v62  ;;  %v3272_v56 = vmax.f32 %v2656_v53, %v3144_v50  ;;  %1717 = vmatmul.bf16.gmra.mxu2 %v12878_v35  ;;  %2573 = vmatmul.bf16.gmra.mxu0 %v9524_v51  ;;  %v12881_v35 = vld [vmem:[#allocation61_spill] sm:$0xff] }
 0x320   : > { %1886 = vmatmul.bf16.gmra.mxu3 %v12879_v17 }
 0x321   : > { %v2115_v24 = vmax.f32 %v1845_v62, %v1987_v4  ;;  %v10066_v63 = vpack.c.bf16 %v3272_v56, %v3270_v41  ;;  %v8330_v56 = vld [vmem:[%s12788_s19 + $0xa4] sm:$0xf] }
 0x322   : > { %v1678_v58 = vpop.f32.mrf.mxu2  ;;  %v2658_v39 = vpop.f32.mrf.mxu1 }
 0x323   : > { %12880 = vst [vmem:[#allocation121_spill] sm:$0xff] %v10066_v63  ;;  %v1847_v34 = vpop.f32.mrf.mxu3  ;;  %v2659_v60 = vadd.f32 %v2658_v39, %v2490_v32  ;;  %v10068_v1 = vpack.c.bf16 %v2115_v24, %v2113_v9  ;;  %v1679_v52 = vadd.f32 %v1678_v58, %v9665_v44  ;;  %v7787_v39 = vld [vmem:[%s12788_s19 + $0xa8] sm:$0xf0] }
 0x324   : > { %v10070_v2 = vpop.f32.mrf.mxu0  ;;  %v7790_v13 = vor.u32 %v8330_v56, %v7787_v39  ;;  %v12882_v56 = vld [vmem:[#allocation62_spill] sm:$0xff] }
 0x325   : > { %2697 = vmatmul.bf16.gmra.mxu1 %v10068_v1  ;;  %v1848_v53 = vadd.f32 %v1847_v34, %v1679_v52  ;;  %v3146_v30 = vmul.f32 0.1, %v2659_v60  ;;  %v2495_v34 = vadd.f32 %v9879_v54, %v9836_v61 }
 0x326   : > { %2942 = vmatpush.bf16.msra.mxu3 %v7790_v13 }
 0x327   : > { %v1989_v43 = vmul.f32 0.1, %v1848_v53  ;;  %v3274_v52 = vmax.f32 %v2659_v60, %v3146_v30  ;;  %v2497_v30 = vadd.f32 %v9890_v57, %v9836_v61  ;;  %v2500_v57 = vadd.f32 %v9903_v31, %v9836_v61 }
 0x329   : > { %v2117_v39 = vmax.f32 %v1848_v53, %v1989_v43 }
 0x32a   : > { %v1680_v4 = vpop.f32.mrf.mxu2  ;;  %v2660_v41 = vpop.f32.mrf.mxu1 }
 0x32b   : > { %v1681_v62 = vadd.f32 %v1680_v4, %v9665_v44  ;;  %v1849_v50 = vpop.f32.mrf.mxu3  ;;  %v2661_v32 = vadd.f32 %v2660_v41, %v2492_v5 }
 0x32c   : > { %v10083_v9 = vpop.f32.mrf.mxu0 }
 0x32d   : > { %v1850_v24 = vadd.f32 %v1849_v50, %v1681_v62  ;;  %v3148_v58 = vmul.f32 0.1, %v2661_v32 }
 0x32f   : > { %v1991_v63 = vmul.f32 0.1, %v1850_v24  ;;  %v3276_v17 = vmax.f32 %v2661_v32, %v3148_v58  ;;  %1722 = vmatmul.bf16.gmra.mxu2 %v12881_v35  ;;  %2578 = vmatmul.bf16.gmra.mxu0 %v9550_v37  ;;  %v12887_v35 = vld [vmem:[#allocation71_spill] sm:$0xff] }
 0x330   : > { %1891 = vmatmul.bf16.gmra.mxu3 %v12882_v56  ;;  %v2505_v56 = vadd.f32 %v9924_v6, %v9836_v61 }
 0x331   : > { %v2119_v5 = vmax.f32 %v1850_v24, %v1991_v63  ;;  %v10090_v4 = vpack.c.bf16 %v3276_v17, %v3274_v52  ;;  %v8346_v17 = vld [vmem:[%s12839_s5 + $0x20] sm:$0xff] }
 0x332   : > { %v1683_v41 = vpop.f32.mrf.mxu2  ;;  %v2663_v13 = vpop.f32.mrf.mxu1  ;;  %3497 = vmatpush.bf16.msra.mxu0 %v8346_v17  ;;  %v12885_v17 = vld [vmem:[#allocation67_spill] sm:$0xff] }
 0x333   : > { %12883 = vst [vmem:[#allocation122_spill] sm:$0xff] %v10090_v4  ;;  %v1852_v62 = vpop.f32.mrf.mxu3  ;;  %v2664_v50 = vadd.f32 %v2663_v13, %v2495_v34  ;;  %v10092_v51 = vpack.c.bf16 %v2119_v5, %v2117_v39  ;;  %v1684_v60 = vadd.f32 %v1683_v41, %v9665_v44  ;;  %v12884_v4 = vld [vmem:[#allocation66_spill] sm:$0xff] }
 0x334   : > { %v10094_v54 = vpop.f32.mrf.mxu0 }
 0x335   : > { %2702 = vmatmul.bf16.gmra.mxu1 %v10092_v51  ;;  %v1853_v32 = vadd.f32 %v1852_v62, %v1684_v60  ;;  %v3150_v43 = vmul.f32 0.1, %v2664_v50 }
 0x337   : > { %v1993_v39 = vmul.f32 0.1, %v1853_v32  ;;  %v3278_v13 = vmax.f32 %v2664_v50, %v3150_v43 }
 0x33a   : > { %v1685_v63 = vpop.f32.mrf.mxu2  ;;  %v2665_v53 = vpop.f32.mrf.mxu1 }
 0x33b   : > { %v1686_v24 = vadd.f32 %v1685_v63, %v9665_v44  ;;  %v1854_v58 = vpop.f32.mrf.mxu3  ;;  %v2666_v34 = vadd.f32 %v2665_v53, %v2497_v30  ;;  %v8345_v30 = vld [vmem:[%s12839_s5 + $0x18] sm:$0xff]  ;;  %v2121_v63 = vmax.f32 %v1853_v32, %v1993_v39 }
 0x33c   : > { %v10104_v52 = vpop.f32.mrf.mxu0  ;;  %3498 = vmatpush.bf16.msra.mxu0 %v8345_v30 }
 0x33d   : > { %v1855_v5 = vadd.f32 %v1854_v58, %v1686_v24  ;;  %v3152_v41 = vmul.f32 0.1, %v2666_v34  ;;  %v8355_v24 = vld [vmem:[%s12839_s5 + $0x68] sm:$0xff] }
 0x33e   : > { %3665 = vmatpush.bf16.msra.mxu1 %v8355_v24  ;;  %v7771_v24 = vld [vmem:[%s12788_s19 + $0x88] sm:$0xf0] }
 0x33f   : > { %v1995_v62 = vmul.f32 0.1, %v1855_v5  ;;  %v3280_v60 = vmax.f32 %v2666_v34, %v3152_v41  ;;  %1727 = vmatmul.bf16.gmra.mxu2 %v12884_v4  ;;  %2583 = vmatmul.bf16.gmra.mxu0 %v9596_v12 }
 0x340   : > { %1896 = vmatmul.bf16.gmra.mxu3 %v12885_v17  ;;  %v8344_v17 = vld [vmem:[%s12839_s5 + $0x10] sm:$0xff] }
 0x341   : > { %v2123_v53 = vmax.f32 %v1855_v5, %v1995_v62  ;;  %v10117_v31 = vpack.c.bf16 %v3280_v60, %v3278_v13  ;;  %3499 = vmatpush.bf16.msra.mxu0 %v8344_v17  ;;  %v8328_v5 = vld [vmem:[%s12788_s19 + $0x94] sm:$0xf]  ;;  %v2502_v13 = vadd.f32 %v9914_v7, %v9836_v61  ;;  %v8343_v60 = vld [vmem:[%s12839_s5 + $0x8] sm:$0xff] }
 0x342   : > { %v1688_v50 = vpop.f32.mrf.mxu2  ;;  %v2668_v43 = vpop.f32.mrf.mxu1 }
 0x343   : > { %12886 = vst [vmem:[#allocation123_spill] sm:$0xff] %v10117_v31  ;;  %v1857_v58 = vpop.f32.mrf.mxu3  ;;  %v2669_v34 = vadd.f32 %v2668_v43, %v2500_v57  ;;  %v10119_v41 = vpack.c.bf16 %v2123_v53, %v2121_v63  ;;  %v1689_v39 = vadd.f32 %v1688_v50, %v9665_v44  ;;  %v7779_v57 = vld [vmem:[%s12788_s19 + $0x98] sm:$0xf0]  ;;  %v8326_v53 = vld [vmem:[%s12788_s19 + $0x84] sm:$0xf] }
 0x344   : > { %v10124_v32 = vpop.f32.mrf.mxu0  ;;  %v7782_v62 = vor.u32 %v8328_v5, %v7779_v57  ;;  %v7774_v57 = vor.u32 %v8326_v53, %v7771_v24  ;;  %v8360_v24 = vld [vmem:[%s12889_s7 + $0x10] sm:$0xff] }
 0x345   : > { %2707 = vmatmul.bf16.gmra.mxu1 %v10119_v41  ;;  %v1858_v30 = vadd.f32 %v1857_v58, %v1689_v39  ;;  %3500 = vmatpush.bf16.msra.mxu0 %v8343_v60  ;;  %v3154_v50 = vmul.f32 0.1, %v2669_v34  ;;  %v8342_v58 = vld [vmem:[%s12839_s5] sm:$0xff] }
 0x346   : > { %2943 = vmatpush.bf16.msra.mxu3 %v7782_v62  ;;  %4122 = vmatpush.bf16.msrb.mxu2 %v8360_v24 }
 0x347   : > { %v1997_v62 = vmul.f32 0.1, %v1858_v30  ;;  %v3282_v4 = vmax.f32 %v2669_v34, %v3154_v50 }
 0x349   : > { %3501 = vmatpush.bf16.msra.mxu0 %v8342_v58 }
 0x34a   : > { %v1690_v17 = vpop.f32.mrf.mxu2  ;;  %v2670_v63 = vpop.f32.mrf.mxu1  ;;  %2944 = vmatpush.bf16.msra.mxu3 %v7774_v57 }
 0x34b   : > { %v1691_v7 = vadd.f32 %v1690_v17, %v9665_v44  ;;  %v1859_v43 = vpop.f32.mrf.mxu3  ;;  %v2671_v5 = vadd.f32 %v2670_v63, %v2502_v13  ;;  %v12888_v13 = vld [vmem:[#allocation72_spill] sm:$0xff]  ;;  %v2125_v63 = vmax.f32 %v1858_v30, %v1997_v62 }
 0x34c   : > { %v10149_v39 = vpop.f32.mrf.mxu0 }
 0x34d   : > { %v1860_v60 = vadd.f32 %v1859_v43, %v1691_v7  ;;  %v3156_v31 = vmul.f32 0.1, %v2671_v5 }
 0x34f   : > { %v1999_v12 = vmul.f32 0.1, %v1860_v60  ;;  %v3284_v17 = vmax.f32 %v2671_v5, %v3156_v31  ;;  %1732 = vmatmul.bf16.gmra.mxu2 %v12887_v35  ;;  %2588 = vmatmul.bf16.gmra.mxu0 %v9639_v8 }
 0x350   : > { %1901 = vmatmul.bf16.gmra.mxu3 %v12888_v13 }
 0x351   : > { %v2127_v53 = vmax.f32 %v1860_v60, %v1999_v12  ;;  %v10159_v7 = vpack.c.bf16 %v3284_v17, %v3282_v4  ;;  %v2507_v12 = vadd.f32 %v9938_v27, %v9836_v61  ;;  %v12891_v27 = vld [vmem:[#allocation76_spill] sm:$0xff] }
 0x352   : > { %v1693_v43 = vpop.f32.mrf.mxu2  ;;  %v2673_v57 = vpop.f32.mrf.mxu1 }
 0x353   : > { %12890 = vst [vmem:[#allocation124_spill] sm:$0xff] %v10159_v7  ;;  %v1862_v6 = vpop.f32.mrf.mxu3  ;;  %v2674_v34 = vadd.f32 %v2673_v57, %v2505_v56  ;;  %v10161_v50 = vpack.c.bf16 %v2127_v53, %v2125_v63  ;;  %v1694_v5 = vadd.f32 %v1693_v43, %v9665_v44  ;;  %v2510_v43 = vadd.f32 %v9945_v11, %v9836_v61 }
 0x354   : > { %v10163_v31 = vpop.f32.mrf.mxu0 }
 0x355   : > { %2712 = vmatmul.bf16.gmra.mxu1 %v10161_v50  ;;  %v1863_v30 = vadd.f32 %v1862_v6, %v1694_v5  ;;  %v3158_v62 = vmul.f32 0.1, %v2674_v34  ;;  %v12892_v6 = vld [vmem:[#allocation77_spill] sm:$0xff] }
 0x357   : > { %v2001_v53 = vmul.f32 0.1, %v1863_v30  ;;  %v3286_v7 = vmax.f32 %v2674_v34, %v3158_v62  ;;  %v2512_v62 = vadd.f32 %v9962_v19, %v9836_v61  ;;  %v12894_v19 = vld [vmem:[#allocation80_spill] sm:$0xff] }
 0x359   : > { %v2129_v5 = vmax.f32 %v1863_v30, %v2001_v53 }
 0x35a   : > { %v1695_v58 = vpop.f32.mrf.mxu2  ;;  %v2675_v4 = vpop.f32.mrf.mxu1 }
 0x35b   : > { %v1696_v60 = vadd.f32 %v1695_v58, %v9665_v44  ;;  %v1864_v17 = vpop.f32.mrf.mxu3  ;;  %v2676_v56 = vadd.f32 %v2675_v4, %v2507_v12 }
 0x35c   : > { %v10170_v63 = vpop.f32.mrf.mxu0 }
 0x35d   : > { %v1865_v24 = vadd.f32 %v1864_v17, %v1696_v60  ;;  %v3160_v57 = vmul.f32 0.1, %v2676_v56 }
 0x35f   : > { %v2003_v13 = vmul.f32 0.1, %v1865_v24  ;;  %v3288_v35 = vmax.f32 %v2676_v56, %v3160_v57  ;;  %1737 = vmatmul.bf16.gmra.mxu2 %v12891_v27  ;;  %2593 = vmatmul.bf16.gmra.mxu0 %v9667_v46 }
 0x360   : > { %1906 = vmatmul.bf16.gmra.mxu3 %v12892_v6 }
 0x361   : > { %v2131_v58 = vmax.f32 %v1865_v24, %v2003_v13  ;;  %v10177_v12 = vpack.c.bf16 %v3288_v35, %v3286_v7 }
 0x362   : > { %v1698_v4 = vpop.f32.mrf.mxu2  ;;  %v2678_v8 = vpop.f32.mrf.mxu1 }
 0x363   : > { %12893 = vst [vmem:[#allocation125_spill] sm:$0xff] %v10177_v12  ;;  %v1867_v60 = vpop.f32.mrf.mxu3  ;;  %v2679_v17 = vadd.f32 %v2678_v8, %v2510_v43  ;;  %v10179_v37 = vpack.c.bf16 %v2131_v58, %v2129_v5  ;;  %v1699_v34 = vadd.f32 %v1698_v4, %v9665_v44  ;;  %v2515_v58 = vadd.f32 %v9969_v36, %v9836_v61 }
 0x364   : > { %v10181_v11 = vpop.f32.mrf.mxu0 }
 0x365   : > { %2717 = vmatmul.bf16.gmra.mxu1 %v10179_v37  ;;  %v1868_v56 = vadd.f32 %v1867_v60, %v1699_v34  ;;  %v3162_v35 = vmul.f32 0.1, %v2679_v17  ;;  %v12895_v60 = vld [vmem:[#allocation15_spill] sm:$0xff] }
 0x367   : > { %v2005_v57 = vmul.f32 0.1, %v1868_v56  ;;  %v3290_v4 = vmax.f32 %v2679_v17, %v3162_v35  ;;  %v2517_v35 = vadd.f32 %v9980_v14, %v9836_v61  ;;  %v2520_v14 = vadd.f32 %v9993_v21, %v9836_v61 }
 0x368   : > { %v2522_v21 = vadd.f32 %v10004_v15, %v9836_v61  ;;  %v2525_v15 = vadd.f32 %v10014_v49, %v9836_v61 }
 0x369   : > { %v2133_v34 = vmax.f32 %v1868_v56, %v2005_v57 }
 0x36a   : > { %v1700_v30 = vpop.f32.mrf.mxu2  ;;  %v2680_v13 = vpop.f32.mrf.mxu1 }
 0x36b   : > { %v1701_v7 = vadd.f32 %v1700_v30, %v9665_v44  ;;  %v1869_v53 = vpop.f32.mrf.mxu3  ;;  %v2681_v24 = vadd.f32 %v2680_v13, %v2512_v62 }
 0x36c   : > { %v10188_v8 = vpop.f32.mrf.mxu0 }
 0x36d   : > { %v1870_v43 = vadd.f32 %v1869_v53, %v1701_v7  ;;  %v3164_v5 = vmul.f32 0.1, %v2681_v24 }
 0x36f   : > { %v2007_v12 = vmul.f32 0.1, %v1870_v43  ;;  %v3292_v6 = vmax.f32 %v2681_v24, %v3164_v5  ;;  %2776 = vmatmul.bf16.vlgmr.msra.gmra.mxu2 %v12894_v19  ;;  %3502 = vmatmul.bf16.vlgmr.msra.gmra.mxu0 %v12895_v60 }
 0x370   : > { %2945 = vmatmul.bf16.vlgmr.msra.gmra.mxu3 %v9684_v48 }
 0x371   : > { %v2135_v30 = vmax.f32 %v1870_v43, %v2007_v12  ;;  %v10195_v62 = vpack.c.bf16 %v3292_v6, %v3290_v4 }
 0x372   : > { %v1703_v13 = vpop.f32.mrf.mxu2  ;;  %v2683_v27 = vpop.f32.mrf.mxu1 }
 0x373   : > { %12896 = vst [vmem:[#allocation80_spill] sm:$0xff] %v10195_v62  ;;  %v1872_v7 = vpop.f32.mrf.mxu3  ;;  %v2684_v53 = vadd.f32 %v2683_v27, %v2515_v58  ;;  %v10197_v46 = vpack.c.bf16 %v2135_v30, %v2133_v34  ;;  %v1704_v17 = vadd.f32 %v1703_v13, %v9665_v44  ;;  %v12897_v30 = vld [vmem:[#allocation83_spill] sm:$0xff]  ;;  %v12898_v13 = vld [vmem:[#allocation18_spill] sm:$0xff] }
 0x374   : > { %v10199_v36 = vpop.f32.mrf.mxu0 }
 0x375   : > { %2722 = vmatmul.bf16.gmra.mxu1 %v10197_v46  ;;  %v1873_v48 = vadd.f32 %v1872_v7, %v1704_v17  ;;  %v3166_v6 = vmul.f32 0.1, %v2684_v53 }
 0x377   : > { %v2009_v5 = vmul.f32 0.1, %v1873_v48  ;;  %v3294_v19 = vmax.f32 %v2684_v53, %v3166_v6 }
 0x379   : > { %v2137_v7 = vmax.f32 %v1873_v48, %v2009_v5 }
 0x37a   : > { %v1705_v56 = vpop.f32.mrf.mxu2  ;;  %v2685_v12 = vpop.f32.mrf.mxu1 }
 0x37b   : > { %v1706_v24 = vadd.f32 %v1705_v56, %v9665_v44  ;;  %v1874_v57 = vpop.f32.mrf.mxu3  ;;  %v2686_v43 = vadd.f32 %v2685_v12, %v2517_v35  ;;  %v8354_v35 = vld [vmem:[%s12839_s5 + $0x60] sm:$0xff] }
 0x37c   : > { %v10206_v27 = vpop.f32.mrf.mxu0  ;;  %3666 = vmatpush.bf16.msra.mxu1 %v8354_v35 }
 0x37d   : > { %v1875_v58 = vadd.f32 %v1874_v57, %v1706_v24  ;;  %v3168_v4 = vmul.f32 0.1, %v2686_v43 }
 0x37f   : > { %v2011_v60 = vmul.f32 0.1, %v1875_v58  ;;  %v3296_v34 = vmax.f32 %v2686_v43, %v3168_v4  ;;  %2781 = vmatmul.bf16.gmra.mxu2 %v12897_v30  ;;  %3507 = vmatmul.bf16.gmra.mxu0 %v12898_v13 }
 0x380   : > { %2950 = vmatmul.bf16.gmra.mxu3 %v9708_v23 }
 0x381   : > { %v2139_v17 = vmax.f32 %v1875_v58, %v2011_v60  ;;  %v10216_v56 = vpack.c.bf16 %v3296_v34, %v3294_v19 }
 0x382   : > { %v1708_v53 = vpop.f32.mrf.mxu2  ;;  %v2688_v12 = vpop.f32.mrf.mxu1 }
 0x383   : > { %12899 = vst [vmem:[#allocation15_spill] sm:$0xff] %v10216_v56  ;;  %v1877_v6 = vpop.f32.mrf.mxu3  ;;  %v2689_v24 = vadd.f32 %v2688_v12, %v2520_v14  ;;  %v10218_v57 = vpack.c.bf16 %v2139_v17, %v2137_v7  ;;  %v1709_v23 = vadd.f32 %v1708_v53, %v9665_v44  ;;  %v12900_v12 = vld [vmem:[#allocation86_spill] sm:$0xff]  ;;  %v12901_v56 = vld [vmem:[#allocation21_spill] sm:$0xff] }
 0x384   : > { %v10220_v43 = vpop.f32.mrf.mxu0 }
 0x385   : > { %2727 = vmatmul.bf16.gmra.mxu1 %v10218_v57  ;;  %v1878_v48 = vadd.f32 %v1877_v6, %v1709_v23  ;;  %v3170_v4 = vmul.f32 0.1, %v2689_v24 }
 0x387   : > { %v2013_v13 = vmul.f32 0.1, %v1878_v48  ;;  %v3298_v17 = vmax.f32 %v2689_v24, %v3170_v4 }
 0x389   : > { %v2141_v6 = vmax.f32 %v1878_v48, %v2013_v13 }
 0x38a   : > { %v1710_v5 = vpop.f32.mrf.mxu2  ;;  %v2690_v58 = vpop.f32.mrf.mxu1 }
 0x38b   : > { %v1711_v19 = vadd.f32 %v1710_v5, %v9665_v44  ;;  %v1879_v60 = vpop.f32.mrf.mxu3  ;;  %v2691_v34 = vadd.f32 %v2690_v58, %v2522_v21 }
 0x38c   : > { %v10227_v30 = vpop.f32.mrf.mxu0 }
 0x38d   : > { %v1880_v14 = vadd.f32 %v1879_v60, %v1711_v19  ;;  %v3172_v7 = vmul.f32 0.1, %v2691_v34 }
 0x38f   : > { %v2015_v35 = vmul.f32 0.1, %v1880_v14  ;;  %v3300_v53 = vmax.f32 %v2691_v34, %v3172_v7  ;;  %2786 = vmatmul.bf16.gmra.mxu2 %v12900_v12  ;;  %3512 = vmatmul.bf16.gmra.mxu0 %v12901_v56 }
 0x390   : > { %2955 = vmatmul.bf16.gmra.mxu3 %v9726_v10  ;;  %v2527_v10 = vadd.f32 %v10028_v25, %v9836_v61  ;;  %v2530_v25 = vadd.f32 %v10035_v18, %v9836_v61 }
 0x391   : > { %v2143_v23 = vmax.f32 %v1880_v14, %v2015_v35  ;;  %v10234_v21 = vpack.c.bf16 %v3300_v53, %v3298_v17 }
 0x392   : > { %v1713_v5 = vpop.f32.mrf.mxu2  ;;  %v2693_v58 = vpop.f32.mrf.mxu1 }
 0x393   : > { %12902 = vst [vmem:[#allocation83_spill] sm:$0xff] %v10234_v21  ;;  %v1882_v19 = vpop.f32.mrf.mxu3  ;;  %v2694_v60 = vadd.f32 %v2693_v58, %v2525_v15  ;;  %v10236_v24 = vpack.c.bf16 %v2143_v23, %v2141_v6  ;;  %v1714_v34 = vadd.f32 %v1713_v5, %v9665_v44  ;;  %v12903_v58 = vld [vmem:[#allocation89_spill] sm:$0xff]  ;;  %v12904_v21 = vld [vmem:[#allocation24_spill] sm:$0xff] }
 0x394   : > { %v10238_v4 = vpop.f32.mrf.mxu0 }
 0x395   : > { %2732 = vmatmul.bf16.gmra.mxu1 %v10236_v24  ;;  %v1883_v49 = vadd.f32 %v1882_v19, %v1714_v34  ;;  %v3174_v13 = vmul.f32 0.1, %v2694_v60 }
 0x397   : > { %v2017_v53 = vmul.f32 0.1, %v1883_v49  ;;  %v3302_v6 = vmax.f32 %v2694_v60, %v3174_v13 }
 0x399   : > { %v2145_v19 = vmax.f32 %v1883_v49, %v2017_v53 }
 0x39a   : > { %v1715_v56 = vpop.f32.mrf.mxu2  ;;  %v2695_v48 = vpop.f32.mrf.mxu1 }
 0x39b   : > { %v1716_v14 = vadd.f32 %v1715_v56, %v9665_v44  ;;  %v1884_v7 = vpop.f32.mrf.mxu3  ;;  %v2696_v17 = vadd.f32 %v2695_v48, %v2527_v10 }
 0x39c   : > { %v10245_v35 = vpop.f32.mrf.mxu0 }
 0x39d   : > { %v1885_v12 = vadd.f32 %v1884_v7, %v1716_v14  ;;  %v3176_v15 = vmul.f32 0.1, %v2696_v17 }
 0x39f   : > { %v2019_v23 = vmul.f32 0.1, %v1885_v12  ;;  %v3304_v5 = vmax.f32 %v2696_v17, %v3176_v15  ;;  %2791 = vmatmul.bf16.gmra.mxu2 %v12903_v58  ;;  %3517 = vmatmul.bf16.gmra.mxu0 %v12904_v21 }
 0x3a0   : > { %2960 = vmatmul.bf16.gmra.mxu3 %v9750_v26  ;;  %v2532_v26 = vadd.f32 %v10052_v45, %v9836_v61  ;;  %v2535_v45 = vadd.f32 %v10059_v16, %v9836_v61 }
 0x3a1   : > { %v2147_v34 = vmax.f32 %v1885_v12, %v2019_v23  ;;  %v10252_v10 = vpack.c.bf16 %v3304_v5, %v3302_v6 }
 0x3a2   : > { %v1718_v56 = vpop.f32.mrf.mxu2  ;;  %v2698_v48 = vpop.f32.mrf.mxu1 }
 0x3a3   : > { %12905 = vst [vmem:[#allocation18_spill] sm:$0xff] %v10252_v10  ;;  %v1887_v14 = vpop.f32.mrf.mxu3  ;;  %v2699_v7 = vadd.f32 %v2698_v48, %v2530_v25  ;;  %v10254_v60 = vpack.c.bf16 %v2147_v34, %v2145_v19  ;;  %v1719_v17 = vadd.f32 %v1718_v56, %v9665_v44  ;;  %v12906_v48 = vld [vmem:[#allocation92_spill] sm:$0xff]  ;;  %v12907_v10 = vld [vmem:[#allocation27_spill] sm:$0xff] }
 0x3a4   : > { %v10256_v13 = vpop.f32.mrf.mxu0 }
 0x3a5   : > { %2737 = vmatmul.bf16.gmra.mxu1 %v10254_v60  ;;  %v1888_v18 = vadd.f32 %v1887_v14, %v1719_v17  ;;  %v3178_v53 = vmul.f32 0.1, %v2699_v7 }
 0x3a7   : > { %v2021_v5 = vmul.f32 0.1, %v1888_v18  ;;  %v3306_v19 = vmax.f32 %v2699_v7, %v3178_v53 }
 0x3a9   : > { %v2149_v14 = vmax.f32 %v1888_v18, %v2021_v5 }
 0x3aa   : > { %v1720_v21 = vpop.f32.mrf.mxu2  ;;  %v2700_v49 = vpop.f32.mrf.mxu1 }
 0x3ab   : > { %v1721_v12 = vadd.f32 %v1720_v21, %v9665_v44  ;;  %v1889_v15 = vpop.f32.mrf.mxu3  ;;  %v2701_v6 = vadd.f32 %v2700_v49, %v2532_v26 }
 0x3ac   : > { %v10263_v23 = vpop.f32.mrf.mxu0 }
 0x3ad   : > { %v1890_v58 = vadd.f32 %v1889_v15, %v1721_v12  ;;  %v3180_v25 = vmul.f32 0.1, %v2701_v6 }
 0x3af   : > { %v2023_v34 = vmul.f32 0.1, %v1890_v58  ;;  %v3308_v56 = vmax.f32 %v2701_v6, %v3180_v25  ;;  %2796 = vmatmul.bf16.gmra.mxu2 %v12906_v48  ;;  %3522 = vmatmul.bf16.gmra.mxu0 %v12907_v10 }
 0x3b0   : > { %2965 = vmatmul.bf16.gmra.mxu3 %v9768_v42  ;;  %v2537_v42 = vadd.f32 %v10070_v2, %v9836_v61  ;;  %v2540_v2 = vadd.f32 %v10083_v9, %v9836_v61  ;;  %v2542_v9 = vadd.f32 %v10094_v54, %v9836_v61  ;;  %v2545_v54 = vadd.f32 %v10104_v52, %v9836_v61 }
 0x3b1   : > { %v2151_v17 = vmax.f32 %v1890_v58, %v2023_v34  ;;  %v10270_v26 = vpack.c.bf16 %v3308_v56, %v3306_v19 }
 0x3b2   : > { %v1723_v21 = vpop.f32.mrf.mxu2  ;;  %v2703_v49 = vpop.f32.mrf.mxu1 }
 0x3b3   : > { %12908 = vst [vmem:[#allocation86_spill] sm:$0xff] %v10270_v26  ;;  %v1892_v12 = vpop.f32.mrf.mxu3  ;;  %v2704_v15 = vadd.f32 %v2703_v49, %v2535_v45  ;;  %v10272_v7 = vpack.c.bf16 %v2151_v17, %v2149_v14  ;;  %v1724_v6 = vadd.f32 %v1723_v21, %v9665_v44 }
 0x3b4   : > { %v10274_v53 = vpop.f32.mrf.mxu0 }
 0x3b5   : > { %2742 = vmatmul.bf16.gmra.mxu1 %v10272_v7  ;;  %v1893_v16 = vadd.f32 %v1892_v12, %v1724_v6  ;;  %v3182_v5 = vmul.f32 0.1, %v2704_v15  ;;  %v8353_v6 = vld [vmem:[%s12839_s5 + $0x58] sm:$0xff] }
 0x3b6   : > { %3667 = vmatpush.bf16.msra.mxu1 %v8353_v6 }
 0x3b7   : > { %v2025_v56 = vmul.f32 0.1, %v1893_v16  ;;  %v3310_v14 = vmax.f32 %v2704_v15, %v3182_v5 }
 0x3b9   : > { %v2153_v49 = vmax.f32 %v1893_v16, %v2025_v56 }
 0x3ba   : > { %v1725_v10 = vpop.f32.mrf.mxu2  ;;  %v2705_v18 = vpop.f32.mrf.mxu1 }
 0x3bb   : > { %v1726_v58 = vadd.f32 %v1725_v10, %v9665_v44  ;;  %v1894_v25 = vpop.f32.mrf.mxu3  ;;  %v2706_v19 = vadd.f32 %v2705_v18, %v2537_v42 }
 0x3bc   : > { %v10281_v34 = vpop.f32.mrf.mxu0 }
 0x3bd   : > { %v1895_v48 = vadd.f32 %v1894_v25, %v1726_v58  ;;  %v3184_v45 = vmul.f32 0.1, %v2706_v19 }
 0x3bf   : > { %v2027_v17 = vmul.f32 0.1, %v1895_v48  ;;  %v3312_v21 = vmax.f32 %v2706_v19, %v3184_v45  ;;  %2801 = vmatmul.bf16.gmra.mxu2 %v9534_v33  ;;  %3527 = vmatmul.bf16.gmra.mxu0 %v8986_v47 }
 0x3c0   : > { %2970 = vmatmul.bf16.gmra.mxu3 %v9792_v22 }
 0x3c1   : > { %v2155_v12 = vmax.f32 %v1895_v48, %v2027_v17  ;;  %v10291_v42 = vpack.c.bf16 %v3312_v21, %v3310_v14 }
 0x3c2   : > { %v1728_v15 = vpop.f32.mrf.mxu2  ;;  %v2708_v10 = vpop.f32.mrf.mxu1 }
 0x3c3   : > { %12909 = vst [vmem:[#allocation21_spill] sm:$0xff] %v10291_v42  ;;  %v1897_v18 = vpop.f32.mrf.mxu3  ;;  %v2709_v5 = vadd.f32 %v2708_v10, %v2540_v2  ;;  %v10293_v33 = vpack.c.bf16 %v2155_v12, %v2153_v49  ;;  %v1729_v22 = vadd.f32 %v1728_v15, %v9665_v44  ;;  %v12910_v15 = vld [vmem:[#allocation33_spill] sm:$0xff] }
 0x3c4   : > { %v10295_v47 = vpop.f32.mrf.mxu0 }
 0x3c5   : > { %2747 = vmatmul.bf16.gmra.mxu1 %v10293_v33  ;;  %v1898_v16 = vadd.f32 %v1897_v18, %v1729_v22  ;;  %v3186_v19 = vmul.f32 0.1, %v2709_v5 }
 0x3c7   : > { %v2029_v17 = vmul.f32 0.1, %v1898_v16  ;;  %v3314_v49 = vmax.f32 %v2709_v5, %v3186_v19 }
 0x3c9   : > { %v2157_v10 = vmax.f32 %v1898_v16, %v2029_v17  ;;  %v8352_v16 = vld [vmem:[%s12839_s5 + $0x50] sm:$0xff] }
 0x3ca   : > { %v1730_v58 = vpop.f32.mrf.mxu2  ;;  %v2710_v25 = vpop.f32.mrf.mxu1  ;;  %3668 = vmatpush.bf16.msra.mxu1 %v8352_v16 }
 0x3cb   : > { %v1731_v56 = vadd.f32 %v1730_v58, %v9665_v44  ;;  %v1899_v48 = vpop.f32.mrf.mxu3  ;;  %v2711_v45 = vadd.f32 %v2710_v25, %v2542_v9 }
 0x3cc   : > { %v10302_v14 = vpop.f32.mrf.mxu0 }
 0x3cd   : > { %v1900_v21 = vadd.f32 %v1899_v48, %v1731_v56  ;;  %v3188_v2 = vmul.f32 0.1, %v2711_v45 }
 0x3cf   : > { %v2031_v12 = vmul.f32 0.1, %v1900_v21  ;;  %v3316_v6 = vmax.f32 %v2711_v45, %v3188_v2  ;;  %2806 = vmatmul.bf16.gmra.mxu2 %v9567_v20  ;;  %3532 = vmatmul.bf16.gmra.mxu0 %v12910_v15 }
 0x3d0   : > { %2975 = vmatmul.bf16.gmra.mxu3 %v9806_v29  ;;  %v2547_v29 = vadd.f32 %v10124_v32, %v9836_v61  ;;  %v8351_v32 = vld [vmem:[%s12839_s5 + $0x48] sm:$0xff] }
 0x3d1   : > { %v2159_v18 = vmax.f32 %v1900_v21, %v2031_v12  ;;  %v10309_v22 = vpack.c.bf16 %v3316_v6, %v3314_v49  ;;  %3669 = vmatpush.bf16.msra.mxu1 %v8351_v32 }
 0x3d2   : > { %v1733_v9 = vpop.f32.mrf.mxu2  ;;  %v2713_v58 = vpop.f32.mrf.mxu1 }
 0x3d3   : > { %12911 = vst [vmem:[#allocation89_spill] sm:$0xff] %v10309_v22  ;;  %v1902_v25 = vpop.f32.mrf.mxu3  ;;  %v2714_v56 = vadd.f32 %v2713_v58, %v2545_v54  ;;  %v10311_v5 = vpack.c.bf16 %v2159_v18, %v2157_v10  ;;  %v1734_v20 = vadd.f32 %v1733_v9, %v9665_v44  ;;  %v12912_v58 = vld [vmem:[#allocation97_spill] sm:$0xff] }
 0x3d4   : > { %v10313_v19 = vpop.f32.mrf.mxu0  ;;  %v12917_v22 = vld [vmem:[#allocation41_spill] sm:$0xff] }
 0x3d5   : > { %2752 = vmatmul.bf16.gmra.mxu1 %v10311_v5  ;;  %v1903_v52 = vadd.f32 %v1902_v25, %v1734_v20  ;;  %v3190_v17 = vmul.f32 0.1, %v2714_v56  ;;  %v12913_v25 = vld [vmem:[#allocation37_spill] sm:$0xff]  ;;  %v2550_v20 = vadd.f32 %v10149_v39, %v9836_v61  ;;  %v2552_v39 = vadd.f32 %v10163_v31, %v9836_v61 }
 0x3d7   : > { %v2033_v6 = vmul.f32 0.1, %v1903_v52  ;;  %v3318_v10 = vmax.f32 %v2714_v56, %v3190_v17 }
 0x3da   : > { %v1735_v48 = vpop.f32.mrf.mxu2  ;;  %v2715_v45 = vpop.f32.mrf.mxu1 }
 0x3db   : > { %v1736_v21 = vadd.f32 %v1735_v48, %v9665_v44  ;;  %v1904_v2 = vpop.f32.mrf.mxu3  ;;  %v2716_v49 = vadd.f32 %v2715_v45, %v2547_v29  ;;  %v2161_v29 = vmax.f32 %v1903_v52, %v2033_v6  ;;  %v8350_v48 = vld [vmem:[%s12839_s5 + $0x40] sm:$0xff]  ;;  %v4536_v6 = vld [vmem:[%s12915_s10 + $0x8] sm:$0xf]  ;;  %s7235_s5 = sshll.u32 %s7232_s30, 4  ;;  %s7236_s5 = int_to_ptr.hbm [resolvable:$true] %s7235_s5 }
 0x3dc   : > { %v10323_v12 = vpop.f32.mrf.mxu0  ;;  %3670 = vmatpush.bf16.msra.mxu1 %v8350_v48 }
 0x3dd   : > { %v1905_v15 = vadd.f32 %v1904_v2, %v1736_v21  ;;  %v3192_v54 = vmul.f32 0.1, %v2716_v49 }
 0x3df   : > { %v2035_v18 = vmul.f32 0.1, %v1905_v15  ;;  %v3320_v9 = vmax.f32 %v2716_v49, %v3192_v54  ;;  %2811 = vmatmul.bf16.gmra.mxu2 %v12912_v58  ;;  %3537 = vmatmul.bf16.gmra.mxu0 %v12913_v25 }
 0x3e0   : > { %2980 = vmatmul.bf16.gmra.mxu3 %v9824_v0 }
 0x3e1   : > { %v2163_v16 = vmax.f32 %v1905_v15, %v2035_v18  ;;  %v10336_v45 = vpack.c.bf16 %v3320_v9, %v3318_v10  ;;  %v4542_v10 = vunpack.c.l.b16 %v4536_v6  ;;  %v12918_v6 = vld [vmem:[#allocation108_spill] sm:$0xff] }
 0x3e2   : > { %v1738_v56 = vpop.f32.mrf.mxu2  ;;  %v2718_v17 = vpop.f32.mrf.mxu1 }
 0x3e3   : > { %12914 = vst [vmem:[#allocation24_spill] sm:$0xff] %v10336_v45  ;;  %v1907_v21 = vpop.f32.mrf.mxu3  ;;  %v2719_v2 = vadd.f32 %v2718_v17, %v2550_v20  ;;  %v10338_v49 = vpack.c.bf16 %v2163_v16, %v2161_v29  ;;  %v1739_v0 = vadd.f32 %v1738_v56, %v9665_v44  ;;  %v4544_v29 = vpack.c.b16 %v4542_v10, %v4542_v10  ;;  %v12916_v45 = vld [vmem:[#allocation99_spill] sm:$0xff] }
 0x3e4   : > { %v10340_v54 = vpop.f32.mrf.mxu0 }
 0x3e5   : > { %2757 = vmatmul.bf16.gmra.mxu1 %v10338_v49  ;;  %v1908_v52 = vadd.f32 %v1907_v21, %v1739_v0  ;;  %v3194_v18 = vmul.f32 0.1, %v2719_v2  ;;  %v4645_v56 = vsel %vm4643_vm0, %v4544_v29, 0 }
 0x3e6   : > { %4653 = vmatpush.bf16.msrb.mxu3 %v4645_v56 }
 0x3e7   : > { %v2037_v16 = vmul.f32 0.1, %v1908_v52  ;;  %v3322_v17 = vmax.f32 %v2719_v2, %v3194_v18 }
 0x3ea   : > { %v1740_v15 = vpop.f32.mrf.mxu2  ;;  %v2720_v32 = vpop.f32.mrf.mxu1 }
 0x3eb   : > { %v1741_v9 = vadd.f32 %v1740_v15, %v9665_v44  ;;  %v1909_v58 = vpop.f32.mrf.mxu3  ;;  %v2721_v25 = vadd.f32 %v2720_v32, %v2552_v39  ;;  %v8471_v44 = vld [vmem:[%s12838_s0] sm:$0x3]  ;;  %v2555_v15 = vadd.f32 %v10170_v63, %v9836_v61  ;;  %v2165_v32 = vmax.f32 %v1908_v52, %v2037_v16  ;;  %s7233_s0 = sshll.u32 %s12233_s23, 4  ;;  %s7234_s0 = int_to_ptr.vmem [resolvable:$true] %s7233_s0 }
 0x3ec   : > { %v10350_v20 = vpop.f32.mrf.mxu0  ;;  %v10357_v39 = vperm.slane %v8471_v44, 1  ;;  %v2557_v63 = vadd.f32 %v10181_v11, %v9836_v61  ;;  %v12922_v11 = vld [vmem:[#allocation110_spill] sm:$0xff] }
 0x3ed   : > { %v1910_v48 = vadd.f32 %v1909_v58, %v1741_v9  ;;  %v3196_v31 = vmul.f32 0.1, %v2721_v25 }
 0x3ef   : > { %v2039_v21 = vmul.f32 0.1, %v1910_v48  ;;  %v3324_v0 = vmax.f32 %v2721_v25, %v3196_v31  ;;  %2816 = vmatmul.bf16.gmra.mxu2 %v12916_v45  ;;  %3542 = vmatmul.bf16.gmra.mxu0 %v12917_v22 }
 0x3f0   : > { %2985 = vmatmul.bf16.gmra.mxu3 %v12918_v6 }
 0x3f1   : > { %v2167_v10 = vmax.f32 %v1910_v48, %v2039_v21  ;;  %v10362_v2 = vpack.c.bf16 %v3324_v0, %v3322_v17 }
 0x3f2   : > { %v2723_v18 = vpop.f32.mrf.mxu1  ;;  %v2777_v45 = vpop.f32.mrf.mxu2 }
 0x3f3   : > { %12919 = vst [vmem:[#allocation92_spill] sm:$0xff] %v10362_v2  ;;  %v2724_v9 = vadd.f32 %v2723_v18, %v2555_v15  ;;  %v2778_v22 = vadd.f32 %v2777_v45, %v10357_v39  ;;  %v2946_v58 = vpop.f32.mrf.mxu3  ;;  %v10365_v25 = vpack.c.bf16 %v2167_v10, %v2165_v32  ;;  %v12920_v45 = vld [vmem:[#allocation101_spill] sm:$0xff] }
 0x3f4   : > { %v10367_v29 = vpop.f32.mrf.mxu0 }
 0x3f5   : > { %v2947_v31 = vadd.f32 %v2946_v58, %v2778_v22  ;;  %2762 = vmatmul.bf16.gmra.mxu1 %v10365_v25  ;;  %v3198_v48 = vmul.f32 0.1, %v2724_v9  ;;  %v12921_v22 = vld [vmem:[#allocation45_spill] sm:$0xff]  ;;  %v2560_v58 = vadd.f32 %v10188_v8, %v9836_v61  ;;  %v12924_v8 = vld [vmem:[#allocation32_spill] sm:$0xff] }
 0x3f7   : > { %v3107_v44 = vmul.f32 0.1, %v2947_v31  ;;  %v3326_v32 = vmax.f32 %v2724_v9, %v3198_v48 }
 0x3fa   : > { %v2725_v52 = vpop.f32.mrf.mxu1  ;;  %v2779_v16 = vpop.f32.mrf.mxu2 }
 0x3fb   : > { %v2726_v56 = vadd.f32 %v2725_v52, %v2557_v63  ;;  %v2780_v17 = vadd.f32 %v2779_v16, %v10357_v39  ;;  %v2948_v21 = vpop.f32.mrf.mxu3  ;;  %v3235_v63 = vmax.f32 %v2947_v31, %v3107_v44  ;;  %v2562_v31 = vadd.f32 %v10199_v36, %v9836_v61  ;;  %v12927_v36 = vld [vmem:[#allocation112_spill] sm:$0xff] }
 0x3fc   : > { %v10373_v0 = vpop.f32.mrf.mxu0 }
 0x3fd   : > { %v3200_v6 = vmul.f32 0.1, %v2726_v56  ;;  %v2949_v15 = vadd.f32 %v2948_v21, %v2780_v17  ;;  %v8359_v17 = vld [vmem:[%s12889_s7 + $0x8] sm:$0xff] }
 0x3fe   : > { %4123 = vmatpush.bf16.msrb.mxu2 %v8359_v17  ;;  %v2565_v17 = vadd.f32 %v10206_v27, %v9836_v61  ;;  %v2567_v27 = vadd.f32 %v10220_v43, %v9836_v61  ;;  %v2570_v43 = vadd.f32 %v10227_v30, %v9836_v61 }
 0x3ff   : > { %v3328_v10 = vmax.f32 %v2726_v56, %v3200_v6  ;;  %v3109_v18 = vmul.f32 0.1, %v2949_v15  ;;  %2821 = vmatmul.bf16.gmra.mxu2 %v12920_v45  ;;  %3547 = vmatmul.bf16.gmra.mxu0 %v12921_v22 }
 0x400   : > { %2990 = vmatmul.bf16.gmra.mxu3 %v12922_v11 }
 0x401   : > { %v3237_v52 = vmax.f32 %v2949_v15, %v3109_v18  ;;  %v10380_v16 = vpack.c.bf16 %v3328_v10, %v3326_v32 }
 0x402   : > { %v2728_v2 = vpop.f32.mrf.mxu1  ;;  %v2782_v42 = vpop.f32.mrf.mxu2 }
 0x403   : > { %12923 = vst [vmem:[#allocation27_spill] sm:$0xff] %v10380_v16  ;;  %v10382_v26 = vpack.c.bf16 %v3237_v52, %v3235_v63  ;;  %v2729_v9 = vadd.f32 %v2728_v2, %v2560_v58  ;;  %v2783_v48 = vadd.f32 %v2782_v42, %v10357_v39  ;;  %v2951_v56 = vpop.f32.mrf.mxu3 }
 0x404   : > { %v10388_v21 = vpop.f32.mrf.mxu0 }
 0x405   : > { %v2952_v6 = vadd.f32 %v2951_v56, %v2783_v48  ;;  %3671 = vmatmul.bf16.vlgmr.msra.gmra.mxu1 %v12924_v8  ;;  %v3202_v32 = vmul.f32 0.1, %v2729_v9  ;;  %v12925_v48 = vld [vmem:[#allocation102_spill] sm:$0xff] }
 0x406   : > { %v12926_v56 = vld [vmem:[#allocation50_spill] sm:$0xff] }
 0x407   : > { %v3111_v45 = vmul.f32 0.1, %v2952_v6  ;;  %v3330_v58 = vmax.f32 %v2729_v9, %v3202_v32 }
 0x409   : > { %v3239_v8 = vmax.f32 %v2952_v6, %v3111_v45 }
 0x40a   : > { %v2730_v44 = vpop.f32.mrf.mxu1  ;;  %v2784_v15 = vpop.f32.mrf.mxu2 }
 0x40b   : > { %v2731_v2 = vadd.f32 %v2730_v44, %v2562_v31  ;;  %v2785_v42 = vadd.f32 %v2784_v15, %v10357_v39  ;;  %v2953_v10 = vpop.f32.mrf.mxu3 }
 0x40c   : > { %v10394_v18 = vpop.f32.mrf.mxu0 }
 0x40d   : > { %v3204_v22 = vmul.f32 0.1, %v2731_v2  ;;  %v2954_v11 = vadd.f32 %v2953_v10, %v2785_v42 }
 0x40f   : > { %v3332_v63 = vmax.f32 %v2731_v2, %v3204_v22  ;;  %v3113_v52 = vmul.f32 0.1, %v2954_v11  ;;  %2826 = vmatmul.bf16.gmra.mxu2 %v12925_v48  ;;  %3552 = vmatmul.bf16.gmra.mxu0 %v12926_v56  ;;  %v12929_v22 = vld [vmem:[#allocation36_spill] sm:$0xff] }
 0x410   : > { %2995 = vmatmul.bf16.gmra.mxu3 %v12927_v36 }
 0x411   : > { %v3241_v31 = vmax.f32 %v2954_v11, %v3113_v52  ;;  %v10401_v44 = vpack.c.bf16 %v3332_v63, %v3330_v58 }
 0x412   : > { %v2733_v15 = vpop.f32.mrf.mxu1  ;;  %v2787_v16 = vpop.f32.mrf.mxu2 }
 0x413   : > { %12928 = vst [vmem:[#allocation33_spill] sm:$0xff] %v10401_v44  ;;  %v10403_v62 = vpack.c.bf16 %v3241_v31, %v3239_v8  ;;  %v2734_v9 = vadd.f32 %v2733_v15, %v2565_v17  ;;  %v2788_v32 = vadd.f32 %v2787_v16, %v10357_v39  ;;  %v2956_v2 = vpop.f32.mrf.mxu3  ;;  %v12930_v15 = vld [vmem:[#allocation103_spill] sm:$0xff] }
 0x414   : > { %v10406_v42 = vpop.f32.mrf.mxu0 }
 0x415   : > { %v2957_v10 = vadd.f32 %v2956_v2, %v2788_v32  ;;  %3676 = vmatmul.bf16.gmra.mxu1 %v12929_v22  ;;  %v3206_v11 = vmul.f32 0.1, %v2734_v9  ;;  %v12931_v32 = vld [vmem:[#allocation55_spill] sm:$0xff] }
 0x417   : > { %v3115_v56 = vmul.f32 0.1, %v2957_v10  ;;  %v3334_v17 = vmax.f32 %v2734_v9, %v3206_v11 }
 0x419   : > { %v3243_v2 = vmax.f32 %v2957_v10, %v3115_v56 }
 0x41a   : > { %v2735_v6 = vpop.f32.mrf.mxu1  ;;  %v2789_v45 = vpop.f32.mrf.mxu2 }
 0x41b   : > { %v2736_v58 = vadd.f32 %v2735_v6, %v2567_v27  ;;  %v2790_v63 = vadd.f32 %v2789_v45, %v10357_v39  ;;  %v2958_v52 = vpop.f32.mrf.mxu3 }
 0x41c   : > { %v10412_v48 = vpop.f32.mrf.mxu0 }
 0x41d   : > { %v3208_v16 = vmul.f32 0.1, %v2736_v58  ;;  %v2959_v36 = vadd.f32 %v2958_v52, %v2790_v63 }
 0x41f   : > { %v3336_v8 = vmax.f32 %v2736_v58, %v3208_v16  ;;  %v3117_v31 = vmul.f32 0.1, %v2959_v36  ;;  %2831 = vmatmul.bf16.gmra.mxu2 %v12930_v15  ;;  %3557 = vmatmul.bf16.gmra.mxu0 %v12931_v32  ;;  %v12933_v16 = vld [vmem:[#allocation40_spill] sm:$0xff] }
 0x420   : > { %3000 = vmatmul.bf16.gmra.mxu3 %v9912_v28  ;;  %v2572_v28 = vadd.f32 %v10238_v4, %v9836_v61  ;;  %v2575_v4 = vadd.f32 %v10245_v35, %v9836_v61 }
 0x421   : > { %v3245_v22 = vmax.f32 %v2959_v36, %v3117_v31  ;;  %v10419_v27 = vpack.c.bf16 %v3336_v8, %v3334_v17 }
 0x422   : > { %v2738_v6 = vpop.f32.mrf.mxu1  ;;  %v2792_v45 = vpop.f32.mrf.mxu2 }
 0x423   : > { %12932 = vst [vmem:[#allocation97_spill] sm:$0xff] %v10419_v27  ;;  %v10421_v44 = vpack.c.bf16 %v3245_v22, %v3243_v2  ;;  %v2739_v9 = vadd.f32 %v2738_v6, %v2570_v43  ;;  %v2793_v11 = vadd.f32 %v2792_v45, %v10357_v39  ;;  %v2961_v58 = vpop.f32.mrf.mxu3  ;;  %v12934_v45 = vld [vmem:[#allocation104_spill] sm:$0xff] }
 0x424   : > { %v10424_v63 = vpop.f32.mrf.mxu0 }
 0x425   : > { %v2962_v52 = vadd.f32 %v2961_v58, %v2793_v11  ;;  %3681 = vmatmul.bf16.gmra.mxu1 %v12933_v16  ;;  %v3210_v56 = vmul.f32 0.1, %v2739_v9  ;;  %v12935_v11 = vld [vmem:[#allocation60_spill] sm:$0xff] }
 0x427   : > { %v3119_v15 = vmul.f32 0.1, %v2962_v52  ;;  %v3338_v2 = vmax.f32 %v2739_v9, %v3210_v56 }
 0x429   : > { %v3247_v58 = vmax.f32 %v2962_v52, %v3119_v15 }
 0x42a   : > { %v2740_v30 = vpop.f32.mrf.mxu1  ;;  %v2794_v10 = vpop.f32.mrf.mxu2 }
 0x42b   : > { %v2741_v36 = vadd.f32 %v2740_v30, %v2572_v28  ;;  %v2795_v17 = vadd.f32 %v2794_v10, %v10357_v39  ;;  %v2963_v8 = vpop.f32.mrf.mxu3 }
 0x42c   : > { %v10430_v31 = vpop.f32.mrf.mxu0 }
 0x42d   : > { %v3212_v32 = vmul.f32 0.1, %v2741_v36  ;;  %v2964_v43 = vadd.f32 %v2963_v8, %v2795_v17 }
 0x42f   : > { %v3340_v22 = vmax.f32 %v2741_v36, %v3212_v32  ;;  %v3121_v6 = vmul.f32 0.1, %v2964_v43  ;;  %2836 = vmatmul.bf16.gmra.mxu2 %v12934_v45  ;;  %3562 = vmatmul.bf16.gmra.mxu0 %v12935_v11  ;;  %v12938_v32 = vld [vmem:[#allocation44_spill] sm:$0xff] }
 0x430   : > { %3005 = vmatmul.bf16.gmra.mxu3 %v9936_v55  ;;  %v2577_v55 = vadd.f32 %v10256_v13, %v9836_v61  ;;  %v12941_v13 = vld [vmem:[#allocation116_spill] sm:$0xff] }
 0x431   : > { %v3249_v16 = vmax.f32 %v2964_v43, %v3121_v6  ;;  %v10437_v28 = vpack.c.bf16 %v3340_v22, %v3338_v2 }
 0x432   : > { %v2743_v30 = vpop.f32.mrf.mxu1  ;;  %v2797_v10 = vpop.f32.mrf.mxu2 }
 0x433   : > { %12936 = vst [vmem:[#allocation37_spill] sm:$0xff] %v10437_v28  ;;  %v10439_v27 = vpack.c.bf16 %v3249_v16, %v3247_v58  ;;  %v2744_v9 = vadd.f32 %v2743_v30, %v2575_v4  ;;  %v2798_v56 = vadd.f32 %v2797_v10, %v10357_v39  ;;  %v2966_v36 = vpop.f32.mrf.mxu3  ;;  %v12939_v10 = vld [vmem:[#allocation105_spill] sm:$0xff] }
 0x434   : > { %v10442_v17 = vpop.f32.mrf.mxu0 }
 0x435   : > { %12937 = vst [vmem:[#allocation99_spill] sm:$0xff] %v10439_v27  ;;  %v2967_v8 = vadd.f32 %v2966_v36, %v2798_v56  ;;  %3686 = vmatmul.bf16.gmra.mxu1 %v12938_v32  ;;  %v3214_v15 = vmul.f32 0.1, %v2744_v9  ;;  %v12940_v56 = vld [vmem:[#allocation65_spill] sm:$0xff]  ;;  %v2580_v36 = vadd.f32 %v10263_v23, %v9836_v61  ;;  %v2582_v23 = vadd.f32 %v10274_v53, %v9836_v61 }
 0x436   : > { %v2585_v53 = vadd.f32 %v10281_v34, %v9836_v61 }
 0x437   : > { %v3123_v45 = vmul.f32 0.1, %v2967_v8  ;;  %v3342_v58 = vmax.f32 %v2744_v9, %v3214_v15 }
 0x439   : > { %v3251_v32 = vmax.f32 %v2967_v8, %v3123_v45 }
 0x43a   : > { %v2745_v35 = vpop.f32.mrf.mxu1  ;;  %v2799_v52 = vpop.f32.mrf.mxu2 }
 0x43b   : > { %v2746_v43 = vadd.f32 %v2745_v35, %v2577_v55  ;;  %v2800_v2 = vadd.f32 %v2799_v52, %v10357_v39  ;;  %v2968_v22 = vpop.f32.mrf.mxu3 }
 0x43c   : > { %v10448_v6 = vpop.f32.mrf.mxu0 }
 0x43d   : > { %v3216_v11 = vmul.f32 0.1, %v2746_v43  ;;  %v2969_v4 = vadd.f32 %v2968_v22, %v2800_v2 }
 0x43f   : > { %v3344_v16 = vmax.f32 %v2746_v43, %v3216_v11  ;;  %v3125_v30 = vmul.f32 0.1, %v2969_v4  ;;  %2841 = vmatmul.bf16.gmra.mxu2 %v12939_v10  ;;  %3567 = vmatmul.bf16.gmra.mxu0 %v12940_v56  ;;  %v12943_v11 = vld [vmem:[#allocation48_spill] sm:$0xff] }
 0x440   : > { %3010 = vmatmul.bf16.gmra.mxu3 %v12941_v13 }
 0x441   : > { %v3253_v55 = vmax.f32 %v2969_v4, %v3125_v30  ;;  %v10455_v35 = vpack.c.bf16 %v3344_v16, %v3342_v58 }
 0x442   : > { %v2748_v52 = vpop.f32.mrf.mxu1  ;;  %v2802_v28 = vpop.f32.mrf.mxu2 }
 0x443   : > { %12942 = vst [vmem:[#allocation41_spill] sm:$0xff] %v10455_v35  ;;  %v10457_v27 = vpack.c.bf16 %v3253_v55, %v3251_v32  ;;  %v2749_v9 = vadd.f32 %v2748_v52, %v2580_v36  ;;  %v2803_v15 = vadd.f32 %v2802_v28, %v10357_v39  ;;  %v2971_v43 = vpop.f32.mrf.mxu3  ;;  %v12944_v52 = vld [vmem:[#allocation106_spill] sm:$0xff] }
 0x444   : > { %v10460_v2 = vpop.f32.mrf.mxu0 }
 0x445   : > { %v2972_v22 = vadd.f32 %v2971_v43, %v2803_v15  ;;  %3691 = vmatmul.bf16.gmra.mxu1 %v12943_v11  ;;  %v3218_v4 = vmul.f32 0.1, %v2749_v9  ;;  %v12945_v15 = vld [vmem:[#allocation70_spill] sm:$0xff] }
 0x447   : > { %v3127_v56 = vmul.f32 0.1, %v2972_v22  ;;  %v3346_v36 = vmax.f32 %v2749_v9, %v3218_v4 }
 0x449   : > { %v3255_v43 = vmax.f32 %v2972_v22, %v3127_v56 }
 0x44a   : > { %v2750_v8 = vpop.f32.mrf.mxu1  ;;  %v2804_v45 = vpop.f32.mrf.mxu2 }
 0x44b   : > { %v2751_v58 = vadd.f32 %v2750_v8, %v2582_v23  ;;  %v2805_v16 = vadd.f32 %v2804_v45, %v10357_v39  ;;  %v2973_v30 = vpop.f32.mrf.mxu3 }
 0x44c   : > { %v10466_v10 = vpop.f32.mrf.mxu0 }
 0x44d   : > { %v3220_v28 = vmul.f32 0.1, %v2751_v58  ;;  %v2974_v13 = vadd.f32 %v2973_v30, %v2805_v16 }
 0x44f   : > { %v3348_v32 = vmax.f32 %v2751_v58, %v3220_v28  ;;  %v3129_v55 = vmul.f32 0.1, %v2974_v13  ;;  %2846 = vmatmul.bf16.gmra.mxu2 %v12944_v52  ;;  %3572 = vmatmul.bf16.gmra.mxu0 %v12945_v15  ;;  %v12947_v28 = vld [vmem:[#allocation53_spill] sm:$0xff] }
 0x450   : > { %3015 = vmatmul.bf16.gmra.mxu3 %v9978_v38  ;;  %v2587_v38 = vadd.f32 %v10295_v47, %v9836_v61  ;;  %v2590_v47 = vadd.f32 %v10302_v14, %v9836_v61 }
 0x451   : > { %v3257_v11 = vmax.f32 %v2974_v13, %v3129_v55  ;;  %v10473_v23 = vpack.c.bf16 %v3348_v32, %v3346_v36 }
 0x452   : > { %v2753_v8 = vpop.f32.mrf.mxu1  ;;  %v2807_v45 = vpop.f32.mrf.mxu2 }
 0x453   : > { %12946 = vst [vmem:[#allocation108_spill] sm:$0xff] %v10473_v23  ;;  %v10475_v35 = vpack.c.bf16 %v3257_v11, %v3255_v43  ;;  %v2754_v9 = vadd.f32 %v2753_v8, %v2585_v53  ;;  %v2808_v4 = vadd.f32 %v2807_v45, %v10357_v39  ;;  %v2976_v58 = vpop.f32.mrf.mxu3  ;;  %v12948_v45 = vld [vmem:[#allocation107_spill] sm:$0xff] }
 0x454   : > { %v10478_v16 = vpop.f32.mrf.mxu0 }
 0x455   : > { %v2977_v30 = vadd.f32 %v2976_v58, %v2808_v4  ;;  %3696 = vmatmul.bf16.gmra.mxu1 %v12947_v28  ;;  %v3222_v56 = vmul.f32 0.1, %v2754_v9  ;;  %v12949_v4 = vld [vmem:[#allocation75_spill] sm:$0xff] }
 0x457   : > { %v3131_v52 = vmul.f32 0.1, %v2977_v30  ;;  %v3350_v43 = vmax.f32 %v2754_v9, %v3222_v56 }
 0x459   : > { %v3259_v58 = vmax.f32 %v2977_v30, %v3131_v52 }
 0x45a   : > { %v2755_v34 = vpop.f32.mrf.mxu1  ;;  %v2809_v22 = vpop.f32.mrf.mxu2 }
 0x45b   : > { %v2756_v13 = vadd.f32 %v2755_v34, %v2587_v38  ;;  %v2810_v36 = vadd.f32 %v2809_v22, %v10357_v39  ;;  %v2978_v32 = vpop.f32.mrf.mxu3 }
 0x45c   : > { %v10484_v55 = vpop.f32.mrf.mxu0 }
 0x45d   : > { %v3224_v15 = vmul.f32 0.1, %v2756_v13  ;;  %v2979_v53 = vadd.f32 %v2978_v32, %v2810_v36 }
 0x45f   : > { %v3352_v11 = vmax.f32 %v2756_v13, %v3224_v15  ;;  %v3133_v8 = vmul.f32 0.1, %v2979_v53  ;;  %2851 = vmatmul.bf16.gmra.mxu2 %v12948_v45  ;;  %3577 = vmatmul.bf16.gmra.mxu0 %v12949_v4  ;;  %v12951_v15 = vld [vmem:[#allocation58_spill] sm:$0xff] }
 0x460   : > { %3020 = vmatmul.bf16.gmra.mxu3 %v10002_v59  ;;  %v2592_v59 = vadd.f32 %v10313_v19, %v9836_v61  ;;  %v2595_v19 = vadd.f32 %v10323_v12, %v9836_v61  ;;  %v8368_v12 = vld [vmem:[%s12956_s9 + $0x38] sm:$0xff] }
 0x461   : > { %v3261_v28 = vmax.f32 %v2979_v53, %v3133_v8  ;;  %v10491_v38 = vpack.c.bf16 %v3352_v11, %v3350_v43  ;;  %4985 = vmatpush.bf16.msrb.mxu0 %v8368_v12 }
 0x462   : > { %v2758_v34 = vpop.f32.mrf.mxu1  ;;  %v2812_v22 = vpop.f32.mrf.mxu2 }
 0x463   : > { %12950 = vst [vmem:[#allocation101_spill] sm:$0xff] %v10491_v38  ;;  %v10493_v23 = vpack.c.bf16 %v3261_v28, %v3259_v58  ;;  %v2759_v9 = vadd.f32 %v2758_v34, %v2590_v47  ;;  %v2813_v56 = vadd.f32 %v2812_v22, %v10357_v39  ;;  %v2981_v13 = vpop.f32.mrf.mxu3  ;;  %v12952_v22 = vld [vmem:[#allocation49_spill] sm:$0xff] }
 0x464   : > { %v10496_v36 = vpop.f32.mrf.mxu0 }
 0x465   : > { %v2982_v32 = vadd.f32 %v2981_v13, %v2813_v56  ;;  %3701 = vmatmul.bf16.gmra.mxu1 %v12951_v15  ;;  %v3226_v52 = vmul.f32 0.1, %v2759_v9  ;;  %v12953_v56 = vld [vmem:[#allocation16_spill] sm:$0xff] }
 0x467   : > { %v3135_v45 = vmul.f32 0.1, %v2982_v32  ;;  %v3354_v58 = vmax.f32 %v2759_v9, %v3226_v52 }
 0x469   : > { %v3263_v13 = vmax.f32 %v2982_v32, %v3135_v45 }
 0x46a   : > { %v2760_v14 = vpop.f32.mrf.mxu1  ;;  %v2814_v30 = vpop.f32.mrf.mxu2 }
 0x46b   : > { %v2761_v53 = vadd.f32 %v2760_v14, %v2592_v59  ;;  %v2815_v43 = vadd.f32 %v2814_v30, %v10357_v39  ;;  %v2983_v11 = vpop.f32.mrf.mxu3 }
 0x46c   : > { %v10502_v8 = vpop.f32.mrf.mxu0 }
 0x46d   : > { %v3228_v4 = vmul.f32 0.1, %v2761_v53  ;;  %v2984_v47 = vadd.f32 %v2983_v11, %v2815_v43 }
 0x46f   : > { %v3356_v28 = vmax.f32 %v2761_v53, %v3228_v4  ;;  %v3137_v34 = vmul.f32 0.1, %v2984_v47  ;;  %2856 = vmatmul.bf16.gmra.mxu2 %v12952_v22  ;;  %3582 = vmatmul.bf16.gmra.mxu0 %v12953_v56  ;;  %v12955_v4 = vld [vmem:[#allocation63_spill] sm:$0xff] }
 0x470   : > { %3025 = vmatmul.bf16.gmra.mxu3 %v10026_v3  ;;  %v2597_v3 = vadd.f32 %v10340_v54, %v9836_v61 }
 0x471   : > { %v3265_v15 = vmax.f32 %v2984_v47, %v3137_v34  ;;  %v10509_v59 = vpack.c.bf16 %v3356_v28, %v3354_v58  ;;  %v10525_v47 = vld [vmem:[%s12957_s6] ss:$0 sm:$0xff] }
 0x472   : > { %v2763_v14 = vpop.f32.mrf.mxu1  ;;  %v2817_v30 = vpop.f32.mrf.mxu2 }
 0x473   : > { %12954 = vst [vmem:[#allocation45_spill] sm:$0xff] %v10509_v59  ;;  %v10511_v38 = vpack.c.bf16 %v3265_v15, %v3263_v13  ;;  %v2764_v9 = vadd.f32 %v2763_v14, %v2595_v19  ;;  %v2818_v52 = vadd.f32 %v2817_v30, %v10357_v39  ;;  %v2986_v53 = vpop.f32.mrf.mxu3  ;;  %v3504_v13 = vadd.f32 %v10525_v47, %v10350_v20 }
 0x474   : > { %v10514_v43 = vpop.f32.mrf.mxu0 }
 0x475   : > { %v2987_v11 = vadd.f32 %v2986_v53, %v2818_v52  ;;  %3706 = vmatmul.bf16.gmra.mxu1 %v12955_v4  ;;  %v3230_v58 = vmul.f32 0.1, %v2764_v9  ;;  %v12958_v52 = vld [vmem:[#allocation54_spill] sm:$0xff]  ;;  %v12959_v53 = vld [vmem:[#allocation19_spill] sm:$0xff] }
 0x477   : > { %v3139_v61 = vmul.f32 0.1, %v2987_v11  ;;  %v3358_v15 = vmax.f32 %v2764_v9, %v3230_v58 }
 0x479   : > { %v3267_v4 = vmax.f32 %v2987_v11, %v3139_v61 }
 0x47a   : > { %v2765_v32 = vpop.f32.mrf.mxu1  ;;  %v2819_v45 = vpop.f32.mrf.mxu2 }
 0x47b   : > { %v2766_v28 = vadd.f32 %v2765_v32, %v2597_v3  ;;  %v2820_v34 = vadd.f32 %v2819_v45, %v10357_v39  ;;  %v2988_v22 = vpop.f32.mrf.mxu3 }
 0x47c   : > { %v10528_v56 = vpop.f32.mrf.mxu0 }
 0x47d   : > { %v3232_v54 = vmul.f32 0.1, %v2766_v28  ;;  %v2989_v19 = vadd.f32 %v2988_v22, %v2820_v34  ;;  %v12961_v22 = vld [vmem:[#allocation68_spill] sm:$0xff] }
 0x47f   : > { %v3360_v14 = vmax.f32 %v2766_v28, %v3232_v54  ;;  %v3141_v30 = vmul.f32 0.1, %v2989_v19  ;;  %2861 = vmatmul.bf16.gmra.mxu2 %v12958_v52  ;;  %3587 = vmatmul.bf16.gmra.mxu0 %v12959_v53 }
 0x480   : > { %3030 = vmatmul.bf16.gmra.mxu3 %v10050_v40  ;;  %v3506_v40 = vadd.f32 %v10525_v47, %v10367_v29  ;;  %v12963_v29 = vld [vmem:[#allocation22_spill] sm:$0xff] }
 0x481   : > { %v3269_v3 = vmax.f32 %v2989_v19, %v3141_v30  ;;  %v10535_v12 = vpack.c.bf16 %v3360_v14, %v3358_v15 }
 0x482   : > { %v2822_v32 = vpop.f32.mrf.mxu2  ;;  %v3672_v45 = vpop.f32.mrf.mxu1 }
 0x483   : > { %12960 = vst [vmem:[#allocation110_spill] sm:$0xff] %v10535_v12  ;;  %v10537_v59 = vpack.c.bf16 %v3269_v3, %v3267_v4  ;;  %v2823_v34 = vadd.f32 %v2822_v32, %v10357_v39  ;;  %v2991_v20 = vpop.f32.mrf.mxu3  ;;  %v3673_v9 = vadd.f32 %v3672_v45, %v3504_v13  ;;  %v3509_v3 = vadd.f32 %v10525_v47, %v10373_v0 }
 0x484   : > { %v10540_v58 = vpop.f32.mrf.mxu0 }
 0x485   : > { %v2992_v28 = vadd.f32 %v2991_v20, %v2823_v34  ;;  %3711 = vmatmul.bf16.gmra.mxu1 %v12961_v22  ;;  %v3832_v11 = vmul.f32 0.1, %v3673_v9  ;;  %v12962_v34 = vld [vmem:[#allocation59_spill] sm:$0xff] }
 0x487   : > { %v3143_v52 = vmul.f32 0.1, %v2992_v28  ;;  %v3896_v53 = vmax.f32 %v3673_v9, %v3832_v11 }
 0x489   : > { %v3271_v20 = vmax.f32 %v2992_v28, %v3143_v52 }
 0x48a   : > { %v2824_v61 = vpop.f32.mrf.mxu2  ;;  %v3674_v54 = vpop.f32.mrf.mxu1 }
 0x48b   : > { %v2825_v19 = vadd.f32 %v2824_v61, %v10357_v39  ;;  %v2993_v15 = vpop.f32.mrf.mxu3  ;;  %v3675_v14 = vadd.f32 %v3674_v54, %v3506_v40 }
 0x48c   : > { %v10546_v30 = vpop.f32.mrf.mxu0 }
 0x48d   : > { %v2994_v13 = vadd.f32 %v2993_v15, %v2825_v19  ;;  %v3833_v4 = vmul.f32 0.1, %v3675_v14 }
 0x48f   : > { %v3145_v32 = vmul.f32 0.1, %v2994_v13  ;;  %v3897_v45 = vmax.f32 %v3675_v14, %v3833_v4  ;;  %2866 = vmatmul.bf16.gmra.mxu2 %v12962_v34  ;;  %3592 = vmatmul.bf16.gmra.mxu0 %v12963_v29  ;;  %v12964_v4 = vld [vmem:[#allocation73_spill] sm:$0xff] }
 0x490   : > { %3035 = vmatmul.bf16.gmra.mxu3 %v10068_v1  ;;  %v3511_v1 = vadd.f32 %v10525_v47, %v10388_v21  ;;  %v12966_v21 = vld [vmem:[#allocation25_spill] sm:$0xff] }
 0x491   : > { %v3273_v22 = vmax.f32 %v2994_v13, %v3145_v32  ;;  %v10553_v40 = vpack.c.bf16 %v3897_v45, %v3896_v53 }
 0x492   : > { %v2827_v61 = vpop.f32.mrf.mxu2  ;;  %v3677_v54 = vpop.f32.mrf.mxu1 }
 0x493   : > { %v10555_v9 = vpack.c.bf16 %v3273_v22, %v3271_v20  ;;  %v2828_v11 = vadd.f32 %v2827_v61, %v10357_v39  ;;  %v2996_v19 = vpop.f32.mrf.mxu3  ;;  %v3678_v0 = vadd.f32 %v3677_v54, %v3509_v3  ;;  %v3514_v61 = vadd.f32 %v10525_v47, %v10394_v18 }
 0x494   : > { %v10558_v15 = vpop.f32.mrf.mxu0 }
 0x495   : > { %v2997_v14 = vadd.f32 %v2996_v19, %v2828_v11  ;;  %3716 = vmatmul.bf16.gmra.mxu1 %v12964_v4  ;;  %v3834_v28 = vmul.f32 0.1, %v3678_v0  ;;  %v12965_v19 = vld [vmem:[#allocation64_spill] sm:$0xff] }
 0x497   : > { %v3147_v29 = vmul.f32 0.1, %v2997_v14  ;;  %v3898_v20 = vmax.f32 %v3678_v0, %v3834_v28 }
 0x499   : > { %v3275_v4 = vmax.f32 %v2997_v14, %v3147_v29  ;;  %v8358_v29 = vld [vmem:[%s12889_s7] sm:$0xff]  ;;  %s8525_s7 = sshra.s32 %s7236_s5, 4  ;;  %s8526_s7 = int_to_ptr.hbm [resolvable:$true] %s8525_s7 }
 0x49a   : > { %v2829_v52 = vpop.f32.mrf.mxu2  ;;  %v3679_v53 = vpop.f32.mrf.mxu1  ;;  %4124 = vmatpush.bf16.msrb.mxu2 %v8358_v29  ;;  %s8527_s1 = scalar_lea.hbm %s8526_s7, 512  ;;  %p8532_p0 = scmp.lt.s32.totalorder %s8526_s7, %s13132_s15 }
 0x49b   : > { %v2830_v13 = vadd.f32 %v2829_v52, %v10357_v39  ;;  %v2998_v32 = vpop.f32.mrf.mxu3  ;;  %v3680_v45 = vadd.f32 %v3679_v53, %v3511_v1  ;;  %p8528_p6 = scmp.ne.s32.totalorder %s8526_s7, %s8527_s1  ;;  %p8533_p2 = scmp.lt.s32.totalorder %s8531_s2, %s8527_s1 }
 0x49c   : > { %v10564_v34 = vpop.f32.mrf.mxu0 }
 0x49d   : > { %v2999_v3 = vadd.f32 %v2998_v32, %v2830_v13  ;;  %v3835_v22 = vmul.f32 0.1, %v3680_v45  ;;  %p8529_p12 = pnand %p8528_p6, %p8737_p10  ;;  %p8534_p3 = por %p8533_p2, %p8532_p0 }
 0x49f   : > { %v3149_v54 = vmul.f32 0.1, %v2999_v3  ;;  %v3899_v11 = vmax.f32 %v3680_v45, %v3835_v22  ;;  %2871 = vmatmul.bf16.gmra.mxu2 %v12965_v19  ;;  %3597 = vmatmul.bf16.gmra.mxu0 %v12966_v21  ;;  %v12968_v22 = vld [vmem:[#allocation78_spill] sm:$0xff]  ;;  %p8530_p13 = pneg %p8529_p12 }
 0x4a0   : > { %3040 = vmatmul.bf16.gmra.mxu3 %v10092_v51  ;;  %v3516_v51 = vadd.f32 %v10525_v47, %v10406_v42  ;;  %v3519_v42 = vadd.f32 %v10525_v47, %v10412_v48 }
 0x4a1   : > { %v3277_v52 = vmax.f32 %v2999_v3, %v3149_v54  ;;  %v10571_v1 = vpack.c.bf16 %v3899_v11, %v3898_v20  ;;  %p8535_p4 = pnand %p8534_p3, %p8530_p13 }
 0x4a2   : > { %v2832_v53 = vpop.f32.mrf.mxu2  ;;  %v3682_v12 = vpop.f32.mrf.mxu1 }
 0x4a3   : > { %v10573_v0 = vpack.c.bf16 %v3277_v52, %v3275_v4  ;;  %v2833_v28 = vadd.f32 %v2832_v53, %v10357_v39  ;;  %v3001_v13 = vpop.f32.mrf.mxu3  ;;  %v3683_v18 = vadd.f32 %v3682_v12, %v3514_v61 }
 0x4a4   : > { %v10576_v32 = vpop.f32.mrf.mxu0 }
 0x4a5   : > { %12967 = vst [vmem:[#allocation32_spill] sm:$0xff] %v10573_v0  ;;  %v3002_v45 = vadd.f32 %v3001_v13, %v2833_v28  ;;  %3721 = vmatmul.bf16.gmra.mxu1 %v12968_v22  ;;  %v3836_v14 = vmul.f32 0.1, %v3683_v18  ;;  %v12969_v13 = vld [vmem:[#allocation69_spill] sm:$0xff]  ;;  %v12970_v22 = vld [vmem:[#allocation28_spill] sm:$0xff] }
 0x4a7   : > { %v3151_v61 = vmul.f32 0.1, %v3002_v45  ;;  %v3900_v21 = vmax.f32 %v3683_v18, %v3836_v14 }
 0x4aa   : > { %v2834_v20 = vpop.f32.mrf.mxu2  ;;  %v3684_v3 = vpop.f32.mrf.mxu1 }
 0x4ab   : > { %v2835_v54 = vadd.f32 %v2834_v20, %v10357_v39  ;;  %v3003_v11 = vpop.f32.mrf.mxu3  ;;  %v3685_v19 = vadd.f32 %v3684_v3, %v3516_v51  ;;  %v3279_v20 = vmax.f32 %v3002_v45, %v3151_v61  ;;  %v8367_v61 = vld [vmem:[%s12956_s9 + $0x30] sm:$0xff] }
 0x4ac   : > { %v10585_v12 = vpop.f32.mrf.mxu0  ;;  %4986 = vmatpush.bf16.msrb.mxu0 %v8367_v61 }
 0x4ad   : > { %v3004_v4 = vadd.f32 %v3003_v11, %v2835_v54  ;;  %v3837_v52 = vmul.f32 0.1, %v3685_v19 }
 0x4af   : > { %v3153_v53 = vmul.f32 0.1, %v3004_v4  ;;  %v3901_v28 = vmax.f32 %v3685_v19, %v3837_v52  ;;  %2876 = vmatmul.bf16.gmra.mxu2 %v12969_v13  ;;  %3602 = vmatmul.bf16.gmra.mxu0 %v12970_v22  ;;  %v12972_v52 = vld [vmem:[#allocation81_spill] sm:$0xff] }
 0x4b0   : > { %3045 = vmatmul.bf16.gmra.mxu3 %v10119_v41  ;;  %v3521_v41 = vadd.f32 %v10525_v47, %v10424_v63  ;;  %v3524_v63 = vadd.f32 %v10525_v47, %v10430_v31 }
 0x4b1   : > { %v3281_v51 = vmax.f32 %v3004_v4, %v3153_v53  ;;  %v10592_v29 = vpack.c.bf16 %v3901_v28, %v3900_v21 }
 0x4b2   : > { %v2837_v3 = vpop.f32.mrf.mxu2  ;;  %v3687_v0 = vpop.f32.mrf.mxu1 }
 0x4b3   : > { %v10594_v18 = vpack.c.bf16 %v3281_v51, %v3279_v20  ;;  %v2838_v14 = vadd.f32 %v2837_v3, %v10357_v39  ;;  %v3006_v54 = vpop.f32.mrf.mxu3  ;;  %v3688_v48 = vadd.f32 %v3687_v0, %v3519_v42 }
 0x4b4   : > { %v10597_v11 = vpop.f32.mrf.mxu0 }
 0x4b5   : > { %12971 = vst [vmem:[#allocation102_spill] sm:$0xff] %v10594_v18  ;;  %v3007_v19 = vadd.f32 %v3006_v54, %v2838_v14  ;;  %3726 = vmatmul.bf16.gmra.mxu1 %v12972_v52  ;;  %v3838_v45 = vmul.f32 0.1, %v3688_v48  ;;  %v12973_v54 = vld [vmem:[#allocation74_spill] sm:$0xff] }
 0x4b6   : > { %v12974_v52 = vld [vmem:[#allocation30_spill] sm:$0xff] }
 0x4b7   : > { %v3155_v42 = vmul.f32 0.1, %v3007_v19  ;;  %v3902_v22 = vmax.f32 %v3688_v48, %v3838_v45 }
 0x4ba   : > { %v2839_v21 = vpop.f32.mrf.mxu2  ;;  %v3689_v4 = vpop.f32.mrf.mxu1 }
 0x4bb   : > { %v2840_v53 = vadd.f32 %v2839_v21, %v10357_v39  ;;  %v3008_v28 = vpop.f32.mrf.mxu3  ;;  %v3690_v13 = vadd.f32 %v3689_v4, %v3521_v41  ;;  %v3283_v21 = vmax.f32 %v3007_v19, %v3155_v42  ;;  %v3526_v19 = vadd.f32 %v10525_v47, %v10442_v17  ;;  %v12978_v17 = vld [vmem:[#allocation34_spill] sm:$0xff] }
 0x4bc   : > { %v10606_v0 = vpop.f32.mrf.mxu0 }
 0x4bd   : > { %v3009_v20 = vadd.f32 %v3008_v28, %v2840_v53  ;;  %v3839_v51 = vmul.f32 0.1, %v3690_v13  ;;  %v8372_v28 = vld [vmem:[%s12956_s9 + $0x58] sm:$0xff] }
 0x4be   : > { %5158 = vmatpush.bf16.msrb.mxu1 %v8372_v28  ;;  %v12977_v28 = vld [vmem:[#allocation79_spill] sm:$0xff] }
 0x4bf   : > { %v3157_v3 = vmul.f32 0.1, %v3009_v20  ;;  %v3903_v14 = vmax.f32 %v3690_v13, %v3839_v51  ;;  %2881 = vmatmul.bf16.gmra.mxu2 %v12973_v54  ;;  %3607 = vmatmul.bf16.gmra.mxu0 %v12974_v52 }
 0x4c0   : > { %3050 = vmatmul.bf16.gmra.mxu3 %v10161_v50  ;;  %v12976_v50 = vld [vmem:[#allocation84_spill] sm:$0xff] }
 0x4c1   : > { %v3285_v41 = vmax.f32 %v3009_v20, %v3157_v3  ;;  %v10613_v61 = vpack.c.bf16 %v3903_v14, %v3902_v22 }
 0x4c2   : > { %v2842_v4 = vpop.f32.mrf.mxu2  ;;  %v3692_v18 = vpop.f32.mrf.mxu1 }
 0x4c3   : > { %v10615_v48 = vpack.c.bf16 %v3285_v41, %v3283_v21  ;;  %v2843_v45 = vadd.f32 %v2842_v4, %v10357_v39  ;;  %v3011_v53 = vpop.f32.mrf.mxu3  ;;  %v3693_v31 = vadd.f32 %v3692_v18, %v3524_v63  ;;  %v3529_v4 = vadd.f32 %v10525_v47, %v10448_v6 }
 0x4c4   : > { %v10621_v13 = vpop.f32.mrf.mxu0 }
 0x4c5   : > { %12975 = vst [vmem:[#allocation50_spill] sm:$0xff] %v10615_v48  ;;  %v3012_v51 = vadd.f32 %v3011_v53, %v2843_v45  ;;  %3731 = vmatmul.bf16.gmra.mxu1 %v12976_v50  ;;  %v3840_v42 = vmul.f32 0.1, %v3693_v31 }
 0x4c7   : > { %v3159_v54 = vmul.f32 0.1, %v3012_v51  ;;  %v3904_v52 = vmax.f32 %v3693_v31, %v3840_v42 }
 0x4c9   : > { %v3287_v50 = vmax.f32 %v3012_v51, %v3159_v54 }
 0x4ca   : > { %v2844_v22 = vpop.f32.mrf.mxu2  ;;  %v3694_v20 = vpop.f32.mrf.mxu1 }
 0x4cb   : > { %v2845_v3 = vadd.f32 %v2844_v22, %v10357_v39  ;;  %v3013_v14 = vpop.f32.mrf.mxu3  ;;  %v3695_v18 = vadd.f32 %v3694_v20, %v3526_v19 }
 0x4cc   : > { %v10627_v63 = vpop.f32.mrf.mxu0 }
 0x4cd   : > { %v3014_v21 = vadd.f32 %v3013_v14, %v2845_v3  ;;  %v3841_v41 = vmul.f32 0.1, %v3695_v18 }
 0x4cf   : > { %v3161_v45 = vmul.f32 0.1, %v3014_v21  ;;  %v3905_v53 = vmax.f32 %v3695_v18, %v3841_v41  ;;  %2886 = vmatmul.bf16.gmra.mxu2 %v12977_v28  ;;  %3612 = vmatmul.bf16.gmra.mxu0 %v12978_v17  ;;  %v12980_v41 = vld [vmem:[#allocation87_spill] sm:$0xff] }
 0x4d0   : > { %3055 = vmatmul.bf16.gmra.mxu3 %v10179_v37  ;;  %v3531_v37 = vadd.f32 %v10525_v47, %v10460_v2  ;;  %v12982_v2 = vld [vmem:[#allocation38_spill] sm:$0xff] }
 0x4d1   : > { %v3289_v22 = vmax.f32 %v3014_v21, %v3161_v45  ;;  %v10634_v19 = vpack.c.bf16 %v3905_v53, %v3904_v52 }
 0x4d2   : > { %v2847_v20 = vpop.f32.mrf.mxu2  ;;  %v3697_v48 = vpop.f32.mrf.mxu1 }
 0x4d3   : > { %v10636_v31 = vpack.c.bf16 %v3289_v22, %v3287_v50  ;;  %v2848_v42 = vadd.f32 %v2847_v20, %v10357_v39  ;;  %v3016_v3 = vpop.f32.mrf.mxu3  ;;  %v3698_v6 = vadd.f32 %v3697_v48, %v3529_v4  ;;  %v3534_v22 = vadd.f32 %v10525_v47, %v10466_v10 }
 0x4d4   : > { %v10639_v14 = vpop.f32.mrf.mxu0 }
 0x4d5   : > { %12979 = vst [vmem:[#allocation112_spill] sm:$0xff] %v10636_v31  ;;  %v3017_v18 = vadd.f32 %v3016_v3, %v2848_v42  ;;  %3736 = vmatmul.bf16.gmra.mxu1 %v12980_v41  ;;  %v3842_v51 = vmul.f32 0.1, %v3698_v6  ;;  %v12981_v3 = vld [vmem:[#allocation82_spill] sm:$0xff] }
 0x4d7   : > { %v3163_v17 = vmul.f32 0.1, %v3017_v18  ;;  %v3906_v50 = vmax.f32 %v3698_v6, %v3842_v51 }
 0x4d9   : > { %v3291_v41 = vmax.f32 %v3017_v18, %v3163_v17  ;;  %v8373_v17 = vld [vmem:[%s12915_s10] sm:$0xff] }
 0x4da   : > { %v2849_v54 = vpop.f32.mrf.mxu2  ;;  %v3699_v52 = vpop.f32.mrf.mxu1  ;;  %4654 = vmatpush.bf16.msrb.mxu3 %v8373_v17 }
 0x4db   : > { %v2850_v21 = vadd.f32 %v2849_v54, %v10357_v39  ;;  %v3018_v45 = vpop.f32.mrf.mxu3  ;;  %v3700_v53 = vadd.f32 %v3699_v52, %v3531_v37 }
 0x4dc   : > { %v10645_v28 = vpop.f32.mrf.mxu0 }
 0x4dd   : > { %v3019_v48 = vadd.f32 %v3018_v45, %v2850_v21  ;;  %v3843_v4 = vmul.f32 0.1, %v3700_v53 }
 0x4df   : > { %v3165_v20 = vmul.f32 0.1, %v3019_v48  ;;  %v3907_v42 = vmax.f32 %v3700_v53, %v3843_v4  ;;  %2891 = vmatmul.bf16.gmra.mxu2 %v12981_v3  ;;  %3617 = vmatmul.bf16.gmra.mxu0 %v12982_v2  ;;  %v12984_v4 = vld [vmem:[#allocation90_spill] sm:$0xff] }
 0x4e0   : > { %3060 = vmatmul.bf16.gmra.mxu3 %v10197_v46  ;;  %v3536_v46 = vadd.f32 %v10525_v47, %v10478_v16  ;;  %v3539_v16 = vadd.f32 %v10525_v47, %v10484_v55 }
 0x4e1   : > { %v3293_v54 = vmax.f32 %v3019_v48, %v3165_v20  ;;  %v10652_v37 = vpack.c.bf16 %v3907_v42, %v3906_v50 }
 0x4e2   : > { %v2852_v52 = vpop.f32.mrf.mxu2  ;;  %v3702_v31 = vpop.f32.mrf.mxu1 }
 0x4e3   : > { %v10654_v6 = vpack.c.bf16 %v3293_v54, %v3291_v41  ;;  %v2853_v51 = vadd.f32 %v2852_v52, %v10357_v39  ;;  %v3021_v21 = vpop.f32.mrf.mxu3  ;;  %v3703_v10 = vadd.f32 %v3702_v31, %v3534_v22 }
 0x4e4   : > { %v10657_v45 = vpop.f32.mrf.mxu0 }
 0x4e5   : > { %12983 = vst [vmem:[#allocation36_spill] sm:$0xff] %v10654_v6  ;;  %v3022_v53 = vadd.f32 %v3021_v21, %v2853_v51  ;;  %3741 = vmatmul.bf16.gmra.mxu1 %v12984_v4  ;;  %v3844_v18 = vmul.f32 0.1, %v3703_v10  ;;  %v12985_v21 = vld [vmem:[#allocation85_spill] sm:$0xff]  ;;  %v12986_v4 = vld [vmem:[#allocation42_spill] sm:$0xff] }
 0x4e7   : > { %v3167_v22 = vmul.f32 0.1, %v3022_v53  ;;  %v3908_v2 = vmax.f32 %v3703_v10, %v3844_v18 }
 0x4ea   : > { %v2854_v50 = vpop.f32.mrf.mxu2  ;;  %v3704_v48 = vpop.f32.mrf.mxu1 }
 0x4eb   : > { %v2855_v20 = vadd.f32 %v2854_v50, %v10357_v39  ;;  %v3023_v42 = vpop.f32.mrf.mxu3  ;;  %v3705_v3 = vadd.f32 %v3704_v48, %v3536_v46  ;;  %v3295_v50 = vmax.f32 %v3022_v53, %v3167_v22  ;;  %v8366_v22 = vld [vmem:[%s12956_s9 + $0x28] sm:$0xff] }
 0x4ec   : > { %v10666_v31 = vpop.f32.mrf.mxu0  ;;  %4987 = vmatpush.bf16.msrb.mxu0 %v8366_v22 }
 0x4ed   : > { %v3024_v41 = vadd.f32 %v3023_v42, %v2855_v20  ;;  %v3845_v54 = vmul.f32 0.1, %v3705_v3 }
 0x4ef   : > { %v3169_v52 = vmul.f32 0.1, %v3024_v41  ;;  %v3909_v51 = vmax.f32 %v3705_v3, %v3845_v54  ;;  %2896 = vmatmul.bf16.gmra.mxu2 %v12985_v21  ;;  %3622 = vmatmul.bf16.gmra.mxu0 %v12986_v4  ;;  %v12988_v54 = vld [vmem:[#allocation93_spill] sm:$0xff] }
 0x4f0   : > { %3065 = vmatmul.bf16.gmra.mxu3 %v10218_v57  ;;  %v3541_v57 = vadd.f32 %v10525_v47, %v10496_v36  ;;  %v3544_v36 = vadd.f32 %v10525_v47, %v10502_v8 }
 0x4f1   : > { %v3297_v46 = vmax.f32 %v3024_v41, %v3169_v52  ;;  %v10673_v17 = vpack.c.bf16 %v3909_v51, %v3908_v2 }
 0x4f2   : > { %v2857_v48 = vpop.f32.mrf.mxu2  ;;  %v3707_v6 = vpop.f32.mrf.mxu1 }
 0x4f3   : > { %v10675_v10 = vpack.c.bf16 %v3297_v46, %v3295_v50  ;;  %v2858_v18 = vadd.f32 %v2857_v48, %v10357_v39  ;;  %v3026_v20 = vpop.f32.mrf.mxu3  ;;  %v3708_v55 = vadd.f32 %v3707_v6, %v3539_v16 }
 0x4f4   : > { %v10678_v42 = vpop.f32.mrf.mxu0 }
 0x4f5   : > { %12987 = vst [vmem:[#allocation103_spill] sm:$0xff] %v10675_v10  ;;  %v3027_v3 = vadd.f32 %v3026_v20, %v2858_v18  ;;  %3746 = vmatmul.bf16.gmra.mxu1 %v12988_v54  ;;  %v3846_v53 = vmul.f32 0.1, %v3708_v55  ;;  %v12989_v20 = vld [vmem:[#allocation88_spill] sm:$0xff]  ;;  %v12990_v54 = vld [vmem:[#allocation46_spill] sm:$0xff] }
 0x4f7   : > { %v3171_v16 = vmul.f32 0.1, %v3027_v3  ;;  %v3910_v4 = vmax.f32 %v3708_v55, %v3846_v53 }
 0x4fa   : > { %v2859_v2 = vpop.f32.mrf.mxu2  ;;  %v3709_v41 = vpop.f32.mrf.mxu1 }
 0x4fb   : > { %v2860_v52 = vadd.f32 %v2859_v2, %v10357_v39  ;;  %v3028_v51 = vpop.f32.mrf.mxu3  ;;  %v3710_v21 = vadd.f32 %v3709_v41, %v3541_v57  ;;  %v3299_v2 = vmax.f32 %v3027_v3, %v3171_v16 }
 0x4fc   : > { %v10687_v6 = vpop.f32.mrf.mxu0 }
 0x4fd   : > { %v3029_v50 = vadd.f32 %v3028_v51, %v2860_v52  ;;  %v3847_v46 = vmul.f32 0.1, %v3710_v21 }
 0x4ff   : > { %v3173_v48 = vmul.f32 0.1, %v3029_v50  ;;  %v3911_v18 = vmax.f32 %v3710_v21, %v3847_v46  ;;  %2901 = vmatmul.bf16.gmra.mxu2 %v12989_v20  ;;  %3627 = vmatmul.bf16.gmra.mxu0 %v12990_v54  ;;  %v12992_v46 = vld [vmem:[#allocation17_spill] sm:$0xff] }
 0x500   : > { %3070 = vmatmul.bf16.gmra.mxu3 %v10236_v24  ;;  %v3546_v24 = vadd.f32 %v10525_v47, %v10514_v43  ;;  %v12994_v43 = vld [vmem:[#allocation51_spill] sm:$0xff] }
 0x501   : > { %v3301_v57 = vmax.f32 %v3029_v50, %v3173_v48  ;;  %v10694_v22 = vpack.c.bf16 %v3911_v18, %v3910_v4 }
 0x502   : > { %v2862_v41 = vpop.f32.mrf.mxu2  ;;  %v3712_v10 = vpop.f32.mrf.mxu1 }
 0x503   : > { %v10696_v55 = vpack.c.bf16 %v3301_v57, %v3299_v2  ;;  %v2863_v53 = vadd.f32 %v2862_v41, %v10357_v39  ;;  %v3031_v52 = vpop.f32.mrf.mxu3  ;;  %v3713_v8 = vadd.f32 %v3712_v10, %v3544_v36  ;;  %v3549_v57 = vadd.f32 %v10525_v47, %v10528_v56 }
 0x504   : > { %v10699_v51 = vpop.f32.mrf.mxu0 }
 0x505   : > { %12991 = vst [vmem:[#allocation55_spill] sm:$0xff] %v10696_v55  ;;  %v3032_v21 = vadd.f32 %v3031_v52, %v2863_v53  ;;  %3751 = vmatmul.bf16.gmra.mxu1 %v12992_v46  ;;  %v3848_v3 = vmul.f32 0.1, %v3713_v8  ;;  %v12993_v52 = vld [vmem:[#allocation91_spill] sm:$0xff] }
 0x507   : > { %v3175_v54 = vmul.f32 0.1, %v3032_v21  ;;  %v3912_v2 = vmax.f32 %v3713_v8, %v3848_v3 }
 0x509   : > { %v3303_v46 = vmax.f32 %v3032_v21, %v3175_v54 }
 0x50a   : > { %v2864_v16 = vpop.f32.mrf.mxu2  ;;  %v3714_v4 = vpop.f32.mrf.mxu1 }
 0x50b   : > { %v2865_v50 = vadd.f32 %v2864_v16, %v10357_v39  ;;  %v3033_v48 = vpop.f32.mrf.mxu3  ;;  %v3715_v18 = vadd.f32 %v3714_v4, %v3546_v24 }
 0x50c   : > { %v10705_v20 = vpop.f32.mrf.mxu0 }
 0x50d   : > { %v3034_v10 = vadd.f32 %v3033_v48, %v2865_v50  ;;  %v3849_v36 = vmul.f32 0.1, %v3715_v18 }
 0x50f   : > { %v3177_v41 = vmul.f32 0.1, %v3034_v10  ;;  %v3913_v53 = vmax.f32 %v3715_v18, %v3849_v36  ;;  %2906 = vmatmul.bf16.gmra.mxu2 %v12993_v52  ;;  %3632 = vmatmul.bf16.gmra.mxu0 %v12994_v43  ;;  %v12996_v36 = vld [vmem:[#allocation20_spill] sm:$0xff] }
 0x510   : > { %3075 = vmatmul.bf16.gmra.mxu3 %v10254_v60  ;;  %v3551_v60 = vadd.f32 %v10525_v47, %v10540_v58  ;;  %v12998_v58 = vld [vmem:[#allocation56_spill] sm:$0xff] }
 0x511   : > { %v3305_v16 = vmax.f32 %v3034_v10, %v3177_v41  ;;  %v10712_v24 = vpack.c.bf16 %v3913_v53, %v3912_v2 }
 0x512   : > { %v2867_v4 = vpop.f32.mrf.mxu2  ;;  %v3717_v55 = vpop.f32.mrf.mxu1 }
 0x513   : > { %v10714_v8 = vpack.c.bf16 %v3305_v16, %v3303_v46  ;;  %v2868_v3 = vadd.f32 %v2867_v4, %v10357_v39  ;;  %v3036_v50 = vpop.f32.mrf.mxu3  ;;  %v3718_v56 = vadd.f32 %v3717_v55, %v3549_v57  ;;  %v3554_v16 = vadd.f32 %v10525_v47, %v10546_v30 }
 0x514   : > { %v10717_v48 = vpop.f32.mrf.mxu0 }
 0x515   : > { %12995 = vst [vmem:[#allocation40_spill] sm:$0xff] %v10714_v8  ;;  %v3037_v18 = vadd.f32 %v3036_v50, %v2868_v3  ;;  %3756 = vmatmul.bf16.gmra.mxu1 %v12996_v36  ;;  %v3850_v21 = vmul.f32 0.1, %v3718_v56  ;;  %v12997_v50 = vld [vmem:[#allocation94_spill] sm:$0xff] }
 0x517   : > { %v3179_v43 = vmul.f32 0.1, %v3037_v18  ;;  %v3914_v46 = vmax.f32 %v3718_v56, %v3850_v21 }
 0x519   : > { %v3307_v36 = vmax.f32 %v3037_v18, %v3179_v43 }
 0x51a   : > { %v2869_v54 = vpop.f32.mrf.mxu2  ;;  %v3719_v2 = vpop.f32.mrf.mxu1 }
 0x51b   : > { %v2870_v10 = vadd.f32 %v2869_v54, %v10357_v39  ;;  %v3038_v41 = vpop.f32.mrf.mxu3  ;;  %v3720_v53 = vadd.f32 %v3719_v2, %v3551_v60 }
 0x51c   : > { %v10723_v52 = vpop.f32.mrf.mxu0 }
 0x51d   : > { %v3039_v55 = vadd.f32 %v3038_v41, %v2870_v10  ;;  %v3851_v57 = vmul.f32 0.1, %v3720_v53 }
 0x51f   : > { %v3181_v4 = vmul.f32 0.1, %v3039_v55  ;;  %v3915_v3 = vmax.f32 %v3720_v53, %v3851_v57  ;;  %2911 = vmatmul.bf16.gmra.mxu2 %v12997_v50  ;;  %3637 = vmatmul.bf16.gmra.mxu0 %v12998_v58  ;;  %v13000_v57 = vld [vmem:[#allocation23_spill] sm:$0xff] }
 0x520   : > { %3080 = vmatmul.bf16.gmra.mxu3 %v10272_v7  ;;  %v3556_v7 = vadd.f32 %v10525_v47, %v10558_v15  ;;  %v13002_v15 = vld [vmem:[#allocation61_spill] sm:$0xff] }
 0x521   : > { %v3309_v54 = vmax.f32 %v3039_v55, %v3181_v4  ;;  %v10730_v60 = vpack.c.bf16 %v3915_v3, %v3914_v46 }
 0x522   : > { %v2872_v2 = vpop.f32.mrf.mxu2  ;;  %v3722_v8 = vpop.f32.mrf.mxu1 }
 0x523   : > { %v10732_v56 = vpack.c.bf16 %v3309_v54, %v3307_v36  ;;  %v2873_v21 = vadd.f32 %v2872_v2, %v10357_v39  ;;  %v3041_v10 = vpop.f32.mrf.mxu3  ;;  %v3723_v30 = vadd.f32 %v3722_v8, %v3554_v16  ;;  %v3559_v54 = vadd.f32 %v10525_v47, %v10564_v34 }
 0x524   : > { %v10735_v41 = vpop.f32.mrf.mxu0 }
 0x525   : > { %12999 = vst [vmem:[#allocation104_spill] sm:$0xff] %v10732_v56  ;;  %v3042_v53 = vadd.f32 %v3041_v10, %v2873_v21  ;;  %3761 = vmatmul.bf16.gmra.mxu1 %v13000_v57  ;;  %v3852_v18 = vmul.f32 0.1, %v3723_v30  ;;  %v13001_v10 = vld [vmem:[#allocation95_spill] sm:$0xff] }
 0x527   : > { %v3183_v58 = vmul.f32 0.1, %v3042_v53  ;;  %v3916_v36 = vmax.f32 %v3723_v30, %v3852_v18 }
 0x529   : > { %v3311_v57 = vmax.f32 %v3042_v53, %v3183_v58  ;;  %v8365_v58 = vld [vmem:[%s12956_s9 + $0x20] sm:$0xff] }
 0x52a   : > { %v2874_v43 = vpop.f32.mrf.mxu2  ;;  %v3724_v46 = vpop.f32.mrf.mxu1  ;;  %4988 = vmatpush.bf16.msrb.mxu0 %v8365_v58 }
 0x52b   : > { %v2875_v55 = vadd.f32 %v2874_v43, %v10357_v39  ;;  %v3043_v4 = vpop.f32.mrf.mxu3  ;;  %v3725_v3 = vadd.f32 %v3724_v46, %v3556_v7 }
 0x52c   : > { %v10741_v50 = vpop.f32.mrf.mxu0 }
 0x52d   : > { %v3044_v8 = vadd.f32 %v3043_v4, %v2875_v55  ;;  %v3853_v16 = vmul.f32 0.1, %v3725_v3 }
 0x52f   : > { %v3185_v2 = vmul.f32 0.1, %v3044_v8  ;;  %v3917_v21 = vmax.f32 %v3725_v3, %v3853_v16  ;;  %2916 = vmatmul.bf16.gmra.mxu2 %v13001_v10  ;;  %3642 = vmatmul.bf16.gmra.mxu0 %v13002_v15  ;;  %v13004_v16 = vld [vmem:[#allocation26_spill] sm:$0xff] }
 0x530   : > { %3085 = vmatmul.bf16.gmra.mxu3 %v10293_v33  ;;  %v3561_v33 = vadd.f32 %v10525_v47, %v10576_v32  ;;  %v3564_v32 = vadd.f32 %v10525_v47, %v10585_v12 }
 0x531   : > { %v3313_v43 = vmax.f32 %v3044_v8, %v3185_v2  ;;  %v10748_v7 = vpack.c.bf16 %v3917_v21, %v3916_v36 }
 0x532   : > { %v2877_v46 = vpop.f32.mrf.mxu2  ;;  %v3727_v56 = vpop.f32.mrf.mxu1 }
 0x533   : > { %v10750_v30 = vpack.c.bf16 %v3313_v43, %v3311_v57  ;;  %v2878_v18 = vadd.f32 %v2877_v46, %v10357_v39  ;;  %v3046_v55 = vpop.f32.mrf.mxu3  ;;  %v3728_v34 = vadd.f32 %v3727_v56, %v3559_v54 }
 0x534   : > { %v10753_v4 = vpop.f32.mrf.mxu0 }
 0x535   : > { %13003 = vst [vmem:[#allocation60_spill] sm:$0xff] %v10750_v30  ;;  %v3047_v3 = vadd.f32 %v3046_v55, %v2878_v18  ;;  %3766 = vmatmul.bf16.gmra.mxu1 %v13004_v16  ;;  %v3854_v53 = vmul.f32 0.1, %v3728_v34  ;;  %v13005_v55 = vld [vmem:[#allocation96_spill] sm:$0xff]  ;;  %v13006_v16 = vld [vmem:[#allocation66_spill] sm:$0xff] }
 0x537   : > { %v3187_v54 = vmul.f32 0.1, %v3047_v3  ;;  %v3918_v15 = vmax.f32 %v3728_v34, %v3854_v53 }
 0x539   : > { %v3315_v58 = vmax.f32 %v3047_v3, %v3187_v54 }
 0x53a   : > { %v2879_v36 = vpop.f32.mrf.mxu2  ;;  %v3729_v8 = vpop.f32.mrf.mxu1 }
 0x53b   : > { %v2880_v2 = vadd.f32 %v2879_v36, %v10357_v39  ;;  %v3048_v21 = vpop.f32.mrf.mxu3  ;;  %v3730_v10 = vadd.f32 %v3729_v8, %v3561_v33  ;;  %v8364_v33 = vld [vmem:[%s12956_s9 + $0x18] sm:$0xff] }
 0x53c   : > { %v10762_v56 = vpop.f32.mrf.mxu0  ;;  %4989 = vmatpush.bf16.msrb.mxu0 %v8364_v33 }
 0x53d   : > { %v3049_v57 = vadd.f32 %v3048_v21, %v2880_v2  ;;  %v3855_v43 = vmul.f32 0.1, %v3730_v10 }
 0x53f   : > { %v3189_v46 = vmul.f32 0.1, %v3049_v57  ;;  %v3919_v18 = vmax.f32 %v3730_v10, %v3855_v43  ;;  %2921 = vmatmul.bf16.gmra.mxu2 %v13005_v55  ;;  %3647 = vmatmul.bf16.gmra.mxu0 %v13006_v16  ;;  %v8371_v43 = vld [vmem:[%s12956_s9 + $0x50] sm:$0xff] }
 0x540   : > { %3090 = vmatmul.bf16.gmra.mxu3 %v10311_v5  ;;  %v8363_v5 = vld [vmem:[%s12956_s9 + $0x10] sm:$0xff]  ;;  %5159 = vmatpush.bf16.msrb.mxu1 %v8371_v43  ;;  %v3569_v43 = vadd.f32 %v10525_v47, %v10606_v0 }
 0x541   : > { %v3317_v36 = vmax.f32 %v3049_v57, %v3189_v46  ;;  %v10772_v34 = vpack.c.bf16 %v3919_v18, %v3918_v15  ;;  %v13008_v15 = vld [vmem:[#allocation29_spill] sm:$0xff]  ;;  %4990 = vmatpush.bf16.msrb.mxu0 %v8363_v5  ;;  %v3566_v57 = vadd.f32 %v10525_v47, %v10597_v11 }
 0x542   : > { %v2882_v53 = vpop.f32.mrf.mxu2  ;;  %v3732_v8 = vpop.f32.mrf.mxu1 }
 0x543   : > { %v10774_v12 = vpack.c.bf16 %v3317_v36, %v3315_v58  ;;  %v2883_v2 = vadd.f32 %v2882_v53, %v10357_v39  ;;  %v3051_v21 = vpop.f32.mrf.mxu3  ;;  %v3733_v10 = vadd.f32 %v3732_v8, %v3564_v32  ;;  %v8362_v32 = vld [vmem:[%s12956_s9 + $0x8] sm:$0xff]  ;;  %v8361_v36 = vld [vmem:[%s12956_s9] sm:$0xff] }
 0x544   : > { %v10783_v3 = vpop.f32.mrf.mxu0 }
 0x545   : > { %13007 = vst [vmem:[#allocation44_spill] sm:$0xff] %v10774_v12  ;;  %v3052_v54 = vadd.f32 %v3051_v21, %v2883_v2  ;;  %3771 = vmatmul.bf16.gmra.mxu1 %v13008_v15  ;;  %v3856_v46 = vmul.f32 0.1, %v3733_v10  ;;  %4991 = vmatpush.bf16.msrb.mxu0 %v8362_v32  ;;  %v13009_v32 = vld [vmem:[#allocation98_spill] sm:$0xff] }
 0x547   : > { %v3191_v8 = vmul.f32 0.1, %v3052_v54  ;;  %v3920_v11 = vmax.f32 %v3733_v10, %v3856_v46 }
 0x549   : > { %4992 = vmatpush.bf16.msrb.mxu0 %v8361_v36 }
 0x54a   : > { %v2884_v18 = vpop.f32.mrf.mxu2  ;;  %v3734_v55 = vpop.f32.mrf.mxu1 }
 0x54b   : > { %v2885_v16 = vadd.f32 %v2884_v18, %v10357_v39  ;;  %v3053_v33 = vpop.f32.mrf.mxu3  ;;  %v3735_v58 = vadd.f32 %v3734_v55, %v3566_v57  ;;  %v13010_v18 = vld [vmem:[#allocation71_spill] sm:$0xff]  ;;  %v3319_v57 = vmax.f32 %v3052_v54, %v3191_v8  ;;  %v3571_v54 = vadd.f32 %v10525_v47, %v10621_v13  ;;  %v13014_v13 = vld [vmem:[#allocation76_spill] sm:$0xff] }
 0x54c   : > { %v10795_v53 = vpop.f32.mrf.mxu0 }
 0x54d   : > { %v3054_v2 = vadd.f32 %v3053_v33, %v2885_v16  ;;  %v3857_v21 = vmul.f32 0.1, %v3735_v58 }
 0x54f   : > { %v3193_v5 = vmul.f32 0.1, %v3054_v2  ;;  %v3921_v15 = vmax.f32 %v3735_v58, %v3857_v21  ;;  %2926 = vmatmul.bf16.gmra.mxu2 %v13009_v32  ;;  %3652 = vmatmul.bf16.gmra.mxu0 %v13010_v18  ;;  %v8381_v58 = vld [vmem:[%s12551_s12 + $0x38] sm:$0xff] }
 0x550   : > { %3095 = vmatmul.bf16.gmra.mxu3 %v10338_v49  ;;  %v13012_v49 = vld [vmem:[#allocation31_spill] sm:$0xff]  ;;  %5619 = vmatpush.bf16.msra.mxu2 %v8381_v58  ;;  %v13013_v58 = vld [vmem:[#allocation100_spill] sm:$0xff] }
 0x551   : > { %v3321_v55 = vmax.f32 %v3054_v2, %v3193_v5  ;;  %v10802_v12 = vpack.c.bf16 %v3921_v15, %v3920_v11 }
 0x552   : > { %v2887_v30 = vpop.f32.mrf.mxu2  ;;  %v3737_v10 = vpop.f32.mrf.mxu1 }
 0x553   : > { %v10804_v46 = vpack.c.bf16 %v3321_v55, %v3319_v57  ;;  %v2888_v16 = vadd.f32 %v2887_v30, %v10357_v39  ;;  %v3056_v33 = vpop.f32.mrf.mxu3  ;;  %v3738_v0 = vadd.f32 %v3737_v10, %v3569_v43  ;;  %v3574_v10 = vadd.f32 %v10525_v47, %v10627_v63 }
 0x554   : > { %v10810_v36 = vpop.f32.mrf.mxu0 }
 0x555   : > { %13011 = vst [vmem:[#allocation105_spill] sm:$0xff] %v10804_v46  ;;  %v3057_v21 = vadd.f32 %v3056_v33, %v2888_v16  ;;  %3776 = vmatmul.bf16.gmra.mxu1 %v13012_v49  ;;  %v3858_v8 = vmul.f32 0.1, %v3738_v0 }
 0x557   : > { %v3195_v32 = vmul.f32 0.1, %v3057_v21  ;;  %v3922_v18 = vmax.f32 %v3738_v0, %v3858_v8 }
 0x559   : > { %v3323_v49 = vmax.f32 %v3057_v21, %v3195_v32 }
 0x55a   : > { %v2889_v11 = vpop.f32.mrf.mxu2  ;;  %v3739_v2 = vpop.f32.mrf.mxu1 }
 0x55b   : > { %v2890_v30 = vadd.f32 %v2889_v11, %v10357_v39  ;;  %v3058_v5 = vpop.f32.mrf.mxu3  ;;  %v3740_v43 = vadd.f32 %v3739_v2, %v3571_v54 }
 0x55c   : > { %v10816_v15 = vpop.f32.mrf.mxu0 }
 0x55d   : > { %v3059_v57 = vadd.f32 %v3058_v5, %v2890_v30  ;;  %v3859_v55 = vmul.f32 0.1, %v3740_v43 }
 0x55f   : > { %v3197_v16 = vmul.f32 0.1, %v3059_v57  ;;  %v3923_v33 = vmax.f32 %v3740_v43, %v3859_v55  ;;  %2931 = vmatmul.bf16.gmra.mxu2 %v13013_v58  ;;  %3657 = vmatmul.bf16.gmra.mxu0 %v13014_v13  ;;  %v13016_v55 = vld [vmem:[#allocation35_spill] sm:$0xff] }
 0x560   : > { %3100 = vmatmul.bf16.gmra.mxu3 %v10365_v25  ;;  %v3576_v25 = vadd.f32 %v10525_v47, %v10639_v14  ;;  %v13017_v14 = vld [vmem:[#allocation109_spill] sm:$0xff] }
 0x561   : > { %v3325_v11 = vmax.f32 %v3059_v57, %v3197_v16  ;;  %v10823_v54 = vpack.c.bf16 %v3923_v33, %v3922_v18 }
 0x562   : > { %v2892_v2 = vpop.f32.mrf.mxu2  ;;  %v3742_v46 = vpop.f32.mrf.mxu1 }
 0x563   : > { %v10825_v0 = vpack.c.bf16 %v3325_v11, %v3323_v49  ;;  %v2893_v8 = vadd.f32 %v2892_v2, %v10357_v39  ;;  %v3061_v30 = vpop.f32.mrf.mxu3  ;;  %v3743_v63 = vadd.f32 %v3742_v46, %v3574_v10  ;;  %v3579_v11 = vadd.f32 %v10525_v47, %v10645_v28 }
 0x564   : > { %v10828_v5 = vpop.f32.mrf.mxu0 }
 0x565   : > { %13015 = vst [vmem:[#allocation65_spill] sm:$0xff] %v10825_v0  ;;  %v3062_v43 = vadd.f32 %v3061_v30, %v2893_v8  ;;  %3781 = vmatmul.bf16.gmra.mxu1 %v13016_v55  ;;  %v3860_v21 = vmul.f32 0.1, %v3743_v63 }
 0x567   : > { %v3199_v13 = vmul.f32 0.1, %v3062_v43  ;;  %v3924_v46 = vmax.f32 %v3743_v63, %v3860_v21 }
 0x569   : > { %v3327_v30 = vmax.f32 %v3062_v43, %v3199_v13 }
 0x56a   : > { %v2894_v32 = vpop.f32.mrf.mxu2  ;;  %v3744_v18 = vpop.f32.mrf.mxu1 }
 0x56b   : > { %v2895_v57 = vadd.f32 %v2894_v32, %v10357_v39  ;;  %v3063_v16 = vpop.f32.mrf.mxu3  ;;  %v3745_v33 = vadd.f32 %v3744_v18, %v3576_v25 }
 0x56c   : > { %v10834_v58 = vpop.f32.mrf.mxu0 }
 0x56d   : > { %v3064_v10 = vadd.f32 %v3063_v16, %v2895_v57  ;;  %v3861_v49 = vmul.f32 0.1, %v3745_v33 }
 0x56f   : > { %v3201_v2 = vmul.f32 0.1, %v3064_v10  ;;  %v3925_v8 = vmax.f32 %v3745_v33, %v3861_v49  ;;  %7907 = vmatmul.msk.bf16.vlgmr.msrb.gmra.mxu2 %vm4020_vm1, %v10553_v40  ;;  %4993 = vmatmul.bf16.vlgmr.msrb.gmra.mxu0 %v13017_v14  ;;  %v13019_v33 = vld [vmem:[#allocation39_spill] sm:$0xff]  ;;  %v3581_v40 = vadd.f32 %v10525_v47, %v10657_v45 }
 0x571   : > { %v3329_v55 = vmax.f32 %v3064_v10, %v3201_v2  ;;  %v10841_v25 = vpack.c.bf16 %v3925_v8, %v3924_v46 }
 0x572   : > { %v2897_v32 = vpop.f32.mrf.mxu2  ;;  %v3747_v18 = vpop.f32.mrf.mxu1 }
 0x573   : > { %v10843_v0 = vpack.c.bf16 %v3329_v55, %v3327_v30  ;;  %v2898_v63 = vadd.f32 %v2897_v32, %v10357_v39  ;;  %v3066_v21 = vpop.f32.mrf.mxu3  ;;  %v3748_v57 = vadd.f32 %v3747_v18, %v3579_v11  ;;  %v10857_v32 = vld [vmem:[%s12957_s6] ss:$0 sm:$0xff]  ;;  %s7221_s6 = scalar_lea.sflag [#allocation4], %s8773_s26 }
 0x574   : > { %v10846_v28 = vpop.f32.mrf.mxu0  ;;  %v3584_v47 = vadd.f32 %v10857_v32, %v10666_v31 }
 0x575   : > { %13018 = vst [vmem:[#allocation116_spill] sm:$0xff] %v10843_v0  ;;  %v3067_v16 = vadd.f32 %v3066_v21, %v2898_v63  ;;  %3786 = vmatmul.bf16.gmra.mxu1 %v13019_v33  ;;  %v3862_v43 = vmul.f32 0.1, %v3748_v57  ;;  %v13020_v63 = vld [vmem:[#allocation111_spill] sm:$0xff] }
 0x577   : > { %v3203_v14 = vmul.f32 0.1, %v3067_v16  ;;  %v3926_v30 = vmax.f32 %v3748_v57, %v3862_v43 }
 0x579   : > { %v3331_v21 = vmax.f32 %v3067_v16, %v3203_v14 }
 0x57a   : > { %v2899_v13 = vpop.f32.mrf.mxu2  ;;  %v3749_v46 = vpop.f32.mrf.mxu1 }
 0x57b   : > { %v2900_v10 = vadd.f32 %v2899_v13, %v10357_v39  ;;  %v3068_v49 = vpop.f32.mrf.mxu3  ;;  %v3750_v2 = vadd.f32 %v3749_v46, %v3581_v40 }
 0x57c   : > { %v10852_v8 = vpop.f32.mrf.mxu0 }
 0x57d   : > { %v3069_v11 = vadd.f32 %v3068_v49, %v2900_v10  ;;  %v3863_v55 = vmul.f32 0.1, %v3750_v2 }
 0x57f   : > { %v3205_v45 = vmul.f32 0.1, %v3069_v11  ;;  %v3927_v18 = vmax.f32 %v3750_v2, %v3863_v55  ;;  %7908 = vmatmul.msk.bf16.gmra.mxu2 %vm4020_vm1, %v10571_v1  ;;  %4998 = vmatmul.bf16.gmra.mxu0 %v13020_v63  ;;  %v13022_v55 = vld [vmem:[#allocation43_spill] sm:$0xff]  ;;  %v3586_v1 = vadd.f32 %v10857_v32, %v10678_v42  ;;  %v13023_v42 = vld [vmem:[#allocation113_spill] sm:$0xff] }
 0x581   : > { %v3333_v33 = vmax.f32 %v3069_v11, %v3205_v45  ;;  %v10864_v57 = vpack.c.bf16 %v3927_v18, %v3926_v30 }
 0x582   : > { %v2902_v40 = vpop.f32.mrf.mxu2  ;;  %v3752_v43 = vpop.f32.mrf.mxu1 }
 0x583   : > { %v10866_v13 = vpack.c.bf16 %v3333_v33, %v3331_v21  ;;  %v2903_v46 = vadd.f32 %v2902_v40, %v10357_v39  ;;  %v3071_v10 = vpop.f32.mrf.mxu3  ;;  %v3753_v49 = vadd.f32 %v3752_v43, %v3584_v47  ;;  %v3589_v43 = vadd.f32 %v10857_v32, %v10687_v6  ;;  %v8380_v6 = vld [vmem:[%s12551_s12 + $0x30] sm:$0xff] }
 0x584   : > { %v10869_v31 = vpop.f32.mrf.mxu0  ;;  %5620 = vmatpush.bf16.msra.mxu2 %v8380_v6 }
 0x585   : > { %13021 = vst [vmem:[#allocation48_spill] sm:$0xff] %v10866_v13  ;;  %v3072_v2 = vadd.f32 %v3071_v10, %v2903_v46  ;;  %3791 = vmatmul.bf16.gmra.mxu1 %v13022_v55  ;;  %v3864_v16 = vmul.f32 0.1, %v3753_v49 }
 0x587   : > { %v3207_v21 = vmul.f32 0.1, %v3072_v2  ;;  %v3928_v33 = vmax.f32 %v3753_v49, %v3864_v16 }
 0x589   : > { %v3335_v55 = vmax.f32 %v3072_v2, %v3207_v21  ;;  %v3591_v2 = vadd.f32 %v10857_v32, %v10699_v51  ;;  %v13026_v51 = vld [vmem:[#allocation114_spill] sm:$0xff] }
 0x58a   : > { %v2904_v14 = vpop.f32.mrf.mxu2  ;;  %v3754_v30 = vpop.f32.mrf.mxu1 }
 0x58b   : > { %v2905_v11 = vadd.f32 %v2904_v14, %v10357_v39  ;;  %v3073_v45 = vpop.f32.mrf.mxu3  ;;  %v3755_v18 = vadd.f32 %v3754_v30, %v3586_v1 }
 0x58c   : > { %v10875_v63 = vpop.f32.mrf.mxu0 }
 0x58d   : > { %v3074_v47 = vadd.f32 %v3073_v45, %v2905_v11  ;;  %v3865_v40 = vmul.f32 0.1, %v3755_v18 }
 0x58f   : > { %v3209_v46 = vmul.f32 0.1, %v3074_v47  ;;  %v3929_v10 = vmax.f32 %v3755_v18, %v3865_v40  ;;  %7909 = vmatmul.msk.bf16.gmra.mxu2 %vm4020_vm1, %v10592_v29  ;;  %5003 = vmatmul.bf16.gmra.mxu0 %v13023_v42  ;;  %v13025_v18 = vld [vmem:[#allocation47_spill] sm:$0xff] }
 0x591   : > { %v3337_v14 = vmax.f32 %v3074_v47, %v3209_v46  ;;  %v10882_v13 = vpack.c.bf16 %v3929_v10, %v3928_v33 }
 0x592   : > { %v2907_v1 = vpop.f32.mrf.mxu2  ;;  %v3757_v30 = vpop.f32.mrf.mxu1 }
 0x593   : > { %v10884_v0 = vpack.c.bf16 %v3337_v14, %v3335_v55  ;;  %v2908_v49 = vadd.f32 %v2907_v1, %v10357_v39  ;;  %v3076_v16 = vpop.f32.mrf.mxu3  ;;  %v3758_v11 = vadd.f32 %v3757_v30, %v3589_v43  ;;  %v3594_v30 = vadd.f32 %v10857_v32, %v10705_v20 }
 0x594   : > { %v10890_v45 = vpop.f32.mrf.mxu0 }
 0x595   : > { %13024 = vst [vmem:[#allocation106_spill] sm:$0xff] %v10884_v0  ;;  %v3077_v29 = vadd.f32 %v3076_v16, %v2908_v49  ;;  %3796 = vmatmul.bf16.gmra.mxu1 %v13025_v18  ;;  %v3866_v21 = vmul.f32 0.1, %v3758_v11 }
 0x597   : > { %v3211_v42 = vmul.f32 0.1, %v3077_v29  ;;  %v3930_v55 = vmax.f32 %v3758_v11, %v3866_v21 }
 0x599   : > { %v3339_v6 = vmax.f32 %v3077_v29, %v3211_v42 }
 0x59a   : > { %v2909_v33 = vpop.f32.mrf.mxu2  ;;  %v3759_v47 = vpop.f32.mrf.mxu1 }
 0x59b   : > { %v2910_v40 = vadd.f32 %v2909_v33, %v10357_v39  ;;  %v3078_v46 = vpop.f32.mrf.mxu3  ;;  %v3760_v43 = vadd.f32 %v3759_v47, %v3591_v2 }
 0x59c   : > { %v10896_v10 = vpop.f32.mrf.mxu0 }
 0x59d   : > { %v3079_v14 = vadd.f32 %v3078_v46, %v2910_v40  ;;  %v3867_v1 = vmul.f32 0.1, %v3760_v43 }
 0x59f   : > { %v3213_v49 = vmul.f32 0.1, %v3079_v14  ;;  %v3931_v16 = vmax.f32 %v3760_v43, %v3867_v1  ;;  %7910 = vmatmul.msk.bf16.gmra.mxu2 %vm4020_vm1, %v10613_v61  ;;  %5008 = vmatmul.bf16.gmra.mxu0 %v13026_v51  ;;  %v13028_v43 = vld [vmem:[#allocation52_spill] sm:$0xff]  ;;  %v3596_v61 = vadd.f32 %v10857_v32, %v10717_v48  ;;  %v13029_v48 = vld [vmem:[#allocation115_spill] sm:$0xff] }
 0x5a1   : > { %v3341_v18 = vmax.f32 %v3079_v14, %v3213_v49  ;;  %v10903_v33 = vpack.c.bf16 %v3931_v16, %v3930_v55 }
 0x5a2   : > { %v2912_v2 = vpop.f32.mrf.mxu2  ;;  %v3762_v47 = vpop.f32.mrf.mxu1 }
 0x5a3   : > { %v10905_v0 = vpack.c.bf16 %v3341_v18, %v3339_v6  ;;  %v2913_v11 = vadd.f32 %v2912_v2, %v10357_v39  ;;  %v3081_v21 = vpop.f32.mrf.mxu3  ;;  %v3763_v40 = vadd.f32 %v3762_v47, %v3594_v30  ;;  %v3599_v2 = vadd.f32 %v10857_v32, %v10723_v52 }
 0x5a4   : > { %v10908_v20 = vpop.f32.mrf.mxu0 }
 0x5a5   : > { %13027 = vst [vmem:[#allocation70_spill] sm:$0xff] %v10905_v0  ;;  %v3082_v46 = vadd.f32 %v3081_v21, %v2913_v11  ;;  %3801 = vmatmul.bf16.gmra.mxu1 %v13028_v43  ;;  %v3868_v29 = vmul.f32 0.1, %v3763_v40 }
 0x5a7   : > { %v3215_v51 = vmul.f32 0.1, %v3082_v46  ;;  %v3932_v6 = vmax.f32 %v3763_v40, %v3868_v29 }
 0x5a9   : > { %v3343_v21 = vmax.f32 %v3082_v46, %v3215_v51 }
 0x5aa   : > { %v2914_v42 = vpop.f32.mrf.mxu2  ;;  %v3764_v55 = vpop.f32.mrf.mxu1 }
 0x5ab   : > { %v2915_v14 = vadd.f32 %v2914_v42, %v10357_v39  ;;  %v3083_v1 = vpop.f32.mrf.mxu3  ;;  %v3765_v49 = vadd.f32 %v3764_v55, %v3596_v61 }
 0x5ac   : > { %v10914_v16 = vpop.f32.mrf.mxu0 }
 0x5ad   : > { %v3084_v30 = vadd.f32 %v3083_v1, %v2915_v14  ;;  %v3869_v18 = vmul.f32 0.1, %v3765_v49 }
 0x5af   : > { %v3217_v47 = vmul.f32 0.1, %v3084_v30  ;;  %v3933_v11 = vmax.f32 %v3765_v49, %v3869_v18  ;;  %7911 = vmatmul.msk.bf16.gmra.mxu2 %vm4020_vm1, %v10634_v19  ;;  %5013 = vmatmul.bf16.gmra.mxu0 %v13029_v48  ;;  %v13031_v49 = vld [vmem:[#allocation57_spill] sm:$0xff]  ;;  %v3601_v19 = vadd.f32 %v10857_v32, %v10735_v41 }
 0x5b0   : > { %v13032_v41 = vld [vmem:[#allocation117_spill] sm:$0xff] }
 0x5b1   : > { %v3345_v43 = vmax.f32 %v3084_v30, %v3217_v47  ;;  %v10921_v42 = vpack.c.bf16 %v3933_v11, %v3932_v6 }
 0x5b2   : > { %v2917_v61 = vpop.f32.mrf.mxu2  ;;  %v3767_v55 = vpop.f32.mrf.mxu1 }
 0x5b3   : > { %v10923_v0 = vpack.c.bf16 %v3345_v43, %v3343_v21  ;;  %v2918_v40 = vadd.f32 %v2917_v61, %v10357_v39  ;;  %v3086_v29 = vpop.f32.mrf.mxu3  ;;  %v3768_v14 = vadd.f32 %v3767_v55, %v3599_v2  ;;  %v3604_v61 = vadd.f32 %v10857_v32, %v10741_v50  ;;  %v8370_v50 = vld [vmem:[%s12956_s9 + $0x48] sm:$0xff] }
 0x5b4   : > { %v10926_v52 = vpop.f32.mrf.mxu0  ;;  %5160 = vmatpush.bf16.msrb.mxu1 %v8370_v50 }
 0x5b5   : > { %13030 = vst [vmem:[#allocation53_spill] sm:$0xff] %v10923_v0  ;;  %v3087_v1 = vadd.f32 %v3086_v29, %v2918_v40  ;;  %3806 = vmatmul.bf16.gmra.mxu1 %v13031_v49  ;;  %v3870_v46 = vmul.f32 0.1, %v3768_v14 }
 0x5b7   : > { %v3219_v48 = vmul.f32 0.1, %v3087_v1  ;;  %v3934_v21 = vmax.f32 %v3768_v14, %v3870_v46 }
 0x5b9   : > { %v3347_v29 = vmax.f32 %v3087_v1, %v3219_v48  ;;  %v3606_v1 = vadd.f32 %v10857_v32, %v10753_v4  ;;  %v13035_v4 = vld [vmem:[#allocation118_spill] sm:$0xff] }
 0x5ba   : > { %v2919_v51 = vpop.f32.mrf.mxu2  ;;  %v3769_v6 = vpop.f32.mrf.mxu1 }
 0x5bb   : > { %v2920_v30 = vadd.f32 %v2919_v51, %v10357_v39  ;;  %v3088_v18 = vpop.f32.mrf.mxu3  ;;  %v3770_v47 = vadd.f32 %v3769_v6, %v3601_v19 }
 0x5bc   : > { %v10932_v11 = vpop.f32.mrf.mxu0 }
 0x5bd   : > { %v3089_v2 = vadd.f32 %v3088_v18, %v2920_v30  ;;  %v3871_v43 = vmul.f32 0.1, %v3770_v47 }
 0x5bf   : > { %v3221_v55 = vmul.f32 0.1, %v3089_v2  ;;  %v3935_v40 = vmax.f32 %v3770_v47, %v3871_v43  ;;  %7912 = vmatmul.msk.bf16.gmra.mxu2 %vm4020_vm1, %v10652_v37  ;;  %5018 = vmatmul.bf16.gmra.mxu0 %v13032_v41  ;;  %v13034_v47 = vld [vmem:[#allocation62_spill] sm:$0xff] }
 0x5c1   : > { %v3349_v49 = vmax.f32 %v3089_v2, %v3221_v55  ;;  %v10939_v51 = vpack.c.bf16 %v3935_v40, %v3934_v21 }
 0x5c2   : > { %v2922_v19 = vpop.f32.mrf.mxu2  ;;  %v3772_v6 = vpop.f32.mrf.mxu1 }
 0x5c3   : > { %v10941_v0 = vpack.c.bf16 %v3349_v49, %v3347_v29  ;;  %v2923_v14 = vadd.f32 %v2922_v19, %v10357_v39  ;;  %v3091_v46 = vpop.f32.mrf.mxu3  ;;  %v3773_v30 = vadd.f32 %v3772_v6, %v3604_v61  ;;  %v3609_v6 = vadd.f32 %v10857_v32, %v10762_v56  ;;  %v8379_v56 = vld [vmem:[%s12551_s12 + $0x28] sm:$0xff] }
 0x5c4   : > { %v10947_v18 = vpop.f32.mrf.mxu0  ;;  %5621 = vmatpush.bf16.msra.mxu2 %v8379_v56 }
 0x5c5   : > { %13033 = vst [vmem:[#allocation107_spill] sm:$0xff] %v10941_v0  ;;  %v3092_v37 = vadd.f32 %v3091_v46, %v2923_v14  ;;  %3811 = vmatmul.bf16.gmra.mxu1 %v13034_v47  ;;  %v3872_v48 = vmul.f32 0.1, %v3773_v30 }
 0x5c7   : > { %v3223_v41 = vmul.f32 0.1, %v3092_v37  ;;  %v3936_v29 = vmax.f32 %v3773_v30, %v3872_v48 }
 0x5c9   : > { %v3351_v50 = vmax.f32 %v3092_v37, %v3223_v41  ;;  %v3611_v37 = vadd.f32 %v10857_v32, %v10783_v3  ;;  %v13037_v3 = vld [vmem:[#allocation119_spill] sm:$0xff] }
 0x5ca   : > { %v2924_v21 = vpop.f32.mrf.mxu2  ;;  %v3774_v2 = vpop.f32.mrf.mxu1 }
 0x5cb   : > { %v2925_v43 = vadd.f32 %v2924_v21, %v10357_v39  ;;  %v3093_v55 = vpop.f32.mrf.mxu3  ;;  %v3775_v61 = vadd.f32 %v3774_v2, %v3606_v1 }
 0x5cc   : > { %v10953_v40 = vpop.f32.mrf.mxu0 }
 0x5cd   : > { %v3094_v49 = vadd.f32 %v3093_v55, %v2925_v43  ;;  %v3873_v19 = vmul.f32 0.1, %v3775_v61 }
 0x5cf   : > { %v3225_v14 = vmul.f32 0.1, %v3094_v49  ;;  %v3937_v46 = vmax.f32 %v3775_v61, %v3873_v19  ;;  %7913 = vmatmul.msk.bf16.gmra.mxu2 %vm4020_vm1, %v10673_v17  ;;  %5023 = vmatmul.bf16.gmra.mxu0 %v13035_v4  ;;  %v13036_v61 = vld [vmem:[#allocation67_spill] sm:$0xff] }
 0x5d1   : > { %v3353_v47 = vmax.f32 %v3094_v49, %v3225_v14  ;;  %v10960_v21 = vpack.c.bf16 %v3937_v46, %v3936_v29 }
 0x5d2   : > { %v2927_v1 = vpop.f32.mrf.mxu2  ;;  %v3777_v2 = vpop.f32.mrf.mxu1 }
 0x5d3   : > { %v10962_v0 = vpack.c.bf16 %v3353_v47, %v3351_v50  ;;  %v2928_v30 = vadd.f32 %v2927_v1, %v10357_v39  ;;  %v3096_v48 = vpop.f32.mrf.mxu3  ;;  %v3778_v43 = vadd.f32 %v3777_v2, %v3609_v6  ;;  %v3614_v2 = vadd.f32 %v10857_v32, %v10795_v53 }
 0x5d4   : > { %v10968_v55 = vpop.f32.mrf.mxu0 }
 0x5d5   : > { %v3097_v17 = vadd.f32 %v3096_v48, %v2928_v30  ;;  %3816 = vmatmul.bf16.gmra.mxu1 %v13036_v61  ;;  %v3874_v41 = vmul.f32 0.1, %v3778_v43 }
 0x5d7   : > { %v3227_v4 = vmul.f32 0.1, %v3097_v17  ;;  %v3938_v50 = vmax.f32 %v3778_v43, %v3874_v41  ;;  %v8369_v43 = vld [vmem:[%s12956_s9 + $0x40] sm:$0xff] }
 0x5d8   : > { %5161 = vmatpush.bf16.msrb.mxu1 %v8369_v43 }
 0x5d9   : > { %v3355_v56 = vmax.f32 %v3097_v17, %v3227_v4  ;;  %v13039_v17 = vld [vmem:[#allocation72_spill] sm:$0xff]  ;;  %v3616_v4 = vadd.f32 %v10857_v32, %v10810_v36  ;;  %v3619_v36 = vadd.f32 %v10857_v32, %v10816_v15  ;;  %v11012_v15 = vld [vmem:[%s13041_s8] ss:$0 sm:$0xff] }
 0x5da   : > { %v2929_v29 = vpop.f32.mrf.mxu2  ;;  %v3779_v49 = vpop.f32.mrf.mxu1 }
 0x5db   : > { %v2930_v19 = vadd.f32 %v2929_v29, %v10357_v39  ;;  %v3098_v14 = vpop.f32.mrf.mxu3  ;;  %v3780_v6 = vadd.f32 %v3779_v49, %v3611_v37 }
 0x5dc   : > { %v10974_v46 = vpop.f32.mrf.mxu0 }
 0x5dd   : > { %v3099_v47 = vadd.f32 %v3098_v14, %v2930_v19  ;;  %v3875_v1 = vmul.f32 0.1, %v3780_v6 }
 0x5df   : > { %v3229_v30 = vmul.f32 0.1, %v3099_v47  ;;  %v3939_v48 = vmax.f32 %v3780_v6, %v3875_v1  ;;  %7914 = vmatmul.msk.bf16.gmra.mxu2 %vm4020_vm1, %v10694_v22  ;;  %5028 = vmatmul.bf16.gmra.mxu0 %v13037_v3 }
 0x5e1   : > { %v3357_v61 = vmax.f32 %v3099_v47, %v3229_v30  ;;  %v10981_v29 = vpack.c.bf16 %v3939_v48, %v3938_v50  ;;  %v8389_v50 = vld [vmem:[%s12553_s14 + $0x38] sm:$0xff] }
 0x5e2   : > { %v2932_v37 = vpop.f32.mrf.mxu2  ;;  %v3782_v41 = vpop.f32.mrf.mxu1  ;;  %6080 = vmatpush.bf16.msra.mxu3 %v8389_v50 }
 0x5e3   : > { %v10986_v49 = vpack.c.bf16 %v3357_v61, %v3355_v56  ;;  %v2933_v53 = vadd.f32 %v2932_v37, %v10357_v39  ;;  %v3101_v19 = vpop.f32.mrf.mxu3  ;;  %v3783_v14 = vadd.f32 %v3782_v41, %v3614_v2 }
 0x5e4   : > { %v10989_v22 = vpop.f32.mrf.mxu0 }
 0x5e5   : > { %13038 = vst [vmem:[#allocation75_spill] sm:$0xff] %v10986_v49  ;;  %v3102_v6 = vadd.f32 %v3101_v19, %v2933_v53  ;;  %3821 = vmatmul.bf16.gmra.mxu1 %v13039_v17  ;;  %v3876_v47 = vmul.f32 0.1, %v3783_v14  ;;  %v13040_v17 = vld [vmem:[#allocation120_spill] sm:$0xff] }
 0x5e7   : > { %v3231_v61 = vmul.f32 0.1, %v3102_v6  ;;  %v3940_v43 = vmax.f32 %v3783_v14, %v3876_v47 }
 0x5e9   : > { %v3359_v50 = vmax.f32 %v3102_v6, %v3231_v61 }
 0x5ea   : > { %v2934_v1 = vpop.f32.mrf.mxu2  ;;  %v3784_v30 = vpop.f32.mrf.mxu1 }
 0x5eb   : > { %v2935_v48 = vadd.f32 %v2934_v1, %v10357_v39  ;;  %v3785_v2 = vadd.f32 %v3784_v30, %v3616_v4  ;;  %v3103_v3 = vpop.f32.mrf.mxu3 }
 0x5ec   : > { %v10998_v56 = vpop.f32.mrf.mxu0 }
 0x5ed   : > { %v3104_v37 = vadd.f32 %v3103_v3, %v2935_v48  ;;  %v3877_v41 = vmul.f32 0.1, %v3785_v2  ;;  %v13042_v48 = vld [vmem:[#allocation77_spill] sm:$0xff] }
 0x5ef   : > { %v3233_v53 = vmul.f32 0.1, %v3104_v37  ;;  %v3941_v19 = vmax.f32 %v3785_v2, %v3877_v41  ;;  %7915 = vmatmul.msk.bf16.gmra.mxu2 %vm4020_vm1, %v10712_v24  ;;  %5033 = vmatmul.bf16.gmra.mxu0 %v13040_v17  ;;  %v3621_v24 = vadd.f32 %v10857_v32, %v10828_v5 }
 0x5f1   : > { %v3361_v39 = vmax.f32 %v3104_v37, %v3233_v53  ;;  %v11005_v4 = vpack.c.bf16 %v3941_v19, %v3940_v43 }
 0x5f2   : > { %v3787_v1 = vpop.f32.mrf.mxu1  ;;  %v4126_v30 = vpop.f32.mrf.mxu2 }
 0x5f3   : > { %v11007_v49 = vpack.c.bf16 %v3361_v39, %v3359_v50  ;;  %v3788_v14 = vadd.f32 %v3787_v1, %v3619_v36  ;;  %v4127_v6 = vadd.f32 %v11012_v15, %v4126_v30  ;;  %v3624_v50 = vadd.f32 %v10857_v32, %v10834_v58  ;;  %v13043_v30 = vld [vmem:[#allocation121_spill] sm:$0xff] }
 0x5f4   : > { %v11014_v47 = vpop.f32.mrf.mxu0 }
 0x5f5   : > { %3826 = vmatmul.bf16.gmra.mxu1 %v13042_v48  ;;  %v3878_v2 = vmul.f32 0.1, %v3788_v14  ;;  %v4286_v43 = vmul.f32 0.1, %v4127_v6 }
 0x5f7   : > { %v3942_v53 = vmax.f32 %v3788_v14, %v3878_v2  ;;  %v4350_v39 = vmax.f32 %v4127_v6, %v4286_v43 }
 0x5fa   : > { %v3789_v3 = vpop.f32.mrf.mxu1  ;;  %v4128_v61 = vpop.f32.mrf.mxu2 }
 0x5fb   : > { %v3790_v37 = vadd.f32 %v3789_v3, %v3621_v24  ;;  %v4129_v41 = vadd.f32 %v11012_v15, %v4128_v61 }
 0x5fc   : > { %v11021_v36 = vpop.f32.mrf.mxu0 }
 0x5fd   : > { %v3879_v19 = vmul.f32 0.1, %v3790_v37  ;;  %v4287_v17 = vmul.f32 0.1, %v4129_v41 }
 0x5ff   : > { %v3943_v1 = vmax.f32 %v3790_v37, %v3879_v19  ;;  %v4351_v5 = vmax.f32 %v4129_v41, %v4287_v17  ;;  %7916 = vmatmul.msk.bf16.gmra.mxu2 %vm4020_vm1, %v10730_v60  ;;  %5038 = vmatmul.bf16.gmra.mxu0 %v13043_v30  ;;  %v3626_v60 = vadd.f32 %v10857_v32, %v10846_v28 }
 0x601   : > { %v11028_v48 = vpack.c.bf16 %v3943_v1, %v3942_v53  ;;  %v4502_v24 = vpack.c.bf16 %v4351_v5, %v4350_v39 }
 0x602   : > { %v3792_v3 = vpop.f32.mrf.mxu1  ;;  %v4131_v61 = vpop.f32.mrf.mxu2 }
 0x603   : > { %v3793_v14 = vadd.f32 %v3792_v3, %v3624_v50  ;;  %7943 = vmatmul.msk.bf16.vlgmr.msrb.gmra.mxu3 %vm4546_vm2, %v4502_v24  ;;  %v4132_v58 = vadd.f32 %v11012_v15, %v4131_v61  ;;  %v13044_v24 = vld [vmem:[#allocation122_spill] sm:$0xff] }
 0x604   : > { %v11031_v2 = vpop.f32.mrf.mxu0 }
 0x605   : > { %8023 = vmatmul.msk.bf16.vlgmr.msrb.gmra.mxu1 %vm4888_vm3, %v10382_v26  ;;  %v3880_v6 = vmul.f32 0.1, %v3793_v14  ;;  %v4288_v41 = vmul.f32 0.1, %v4132_v58  ;;  %v3629_v26 = vadd.f32 %v10857_v32, %v10852_v8 }
 0x607   : > { %v3944_v50 = vmax.f32 %v3793_v14, %v3880_v6  ;;  %v4352_v5 = vmax.f32 %v4132_v58, %v4288_v41  ;;  %v8378_v14 = vld [vmem:[%s12551_s12 + $0x20] sm:$0xff] }
 0x608   : > { %5622 = vmatpush.bf16.msra.mxu2 %v8378_v14 }
 0x60a   : > { %v3794_v43 = vpop.f32.mrf.mxu1  ;;  %v4133_v37 = vpop.f32.mrf.mxu2 }
 0x60b   : > { %v3795_v53 = vadd.f32 %v3794_v43, %v3626_v60  ;;  %v4134_v19 = vadd.f32 %v11012_v15, %v4133_v37 }
 0x60c   : > { %v11039_v17 = vpop.f32.mrf.mxu0 }
 0x60d   : > { %v3881_v39 = vmul.f32 0.1, %v3795_v53  ;;  %v4289_v1 = vmul.f32 0.1, %v4134_v19 }
 0x60f   : > { %v3945_v30 = vmax.f32 %v3795_v53, %v3881_v39  ;;  %v4353_v28 = vmax.f32 %v4134_v19, %v4289_v1  ;;  %7917 = vmatmul.msk.bf16.gmra.mxu2 %vm4020_vm1, %v10748_v7  ;;  %5043 = vmatmul.bf16.gmra.mxu0 %v13044_v24  ;;  %v3631_v7 = vadd.f32 %v10857_v32, %v10869_v31 }
 0x611   : > { %v11046_v3 = vpack.c.bf16 %v3945_v30, %v3944_v50  ;;  %v4503_v61 = vpack.c.bf16 %v4353_v28, %v4352_v5 }
 0x612   : > { %v3797_v60 = vpop.f32.mrf.mxu1  ;;  %v4136_v6 = vpop.f32.mrf.mxu2 }
 0x613   : > { %v3798_v43 = vadd.f32 %v3797_v60, %v3629_v26  ;;  %7944 = vmatmul.msk.bf16.gmra.mxu3 %vm4546_vm2, %v4503_v61  ;;  %v4137_v58 = vadd.f32 %v11012_v15, %v4136_v6  ;;  %v13045_v61 = vld [vmem:[#allocation123_spill] sm:$0xff] }
 0x614   : > { %v11052_v8 = vpop.f32.mrf.mxu0 }
 0x615   : > { %8024 = vmatmul.msk.bf16.gmra.mxu1 %vm4888_vm3, %v10403_v62  ;;  %v3882_v37 = vmul.f32 0.1, %v3798_v43  ;;  %v4290_v19 = vmul.f32 0.1, %v4137_v58  ;;  %v3634_v62 = vadd.f32 %v10857_v32, %v10875_v63  ;;  %v3636_v63 = vadd.f32 %v10857_v32, %v10890_v45 }
 0x616   : > { %v3639_v45 = vadd.f32 %v10857_v32, %v10896_v10  ;;  %v3641_v10 = vadd.f32 %v10857_v32, %v10908_v20 }
 0x617   : > { %v3946_v26 = vmax.f32 %v3798_v43, %v3882_v37  ;;  %v4354_v28 = vmax.f32 %v4137_v58, %v4290_v19  ;;  %v8388_v58 = vld [vmem:[%s12553_s14 + $0x30] sm:$0xff] }
 0x618   : > { %6081 = vmatpush.bf16.msra.mxu3 %v8388_v58 }
 0x61a   : > { %v3799_v41 = vpop.f32.mrf.mxu1  ;;  %v4138_v53 = vpop.f32.mrf.mxu2 }
 0x61b   : > { %v3800_v50 = vadd.f32 %v3799_v41, %v3631_v7  ;;  %v4139_v39 = vadd.f32 %v11012_v15, %v4138_v53 }
 0x61c   : > { %v11060_v1 = vpop.f32.mrf.mxu0 }
 0x61d   : > { %v3883_v5 = vmul.f32 0.1, %v3800_v50  ;;  %v4291_v30 = vmul.f32 0.1, %v4139_v39 }
 0x61f   : > { %v3947_v24 = vmax.f32 %v3800_v50, %v3883_v5  ;;  %v4355_v31 = vmax.f32 %v4139_v39, %v4291_v30  ;;  %7918 = vmatmul.msk.bf16.gmra.mxu2 %vm4020_vm1, %v10772_v34  ;;  %5048 = vmatmul.bf16.gmra.mxu0 %v13045_v61  ;;  %v13046_v61 = vld [vmem:[#allocation124_spill] sm:$0xff] }
 0x621   : > { %v11067_v14 = vpack.c.bf16 %v3947_v24, %v3946_v26  ;;  %v4504_v60 = vpack.c.bf16 %v4355_v31, %v4354_v28 }
 0x622   : > { %v3802_v6 = vpop.f32.mrf.mxu1  ;;  %v4141_v7 = vpop.f32.mrf.mxu2 }
 0x623   : > { %v3803_v41 = vadd.f32 %v3802_v6, %v3634_v62  ;;  %7945 = vmatmul.msk.bf16.gmra.mxu3 %vm4546_vm2, %v4504_v60  ;;  %v4142_v34 = vadd.f32 %v11012_v15, %v4141_v7 }
 0x624   : > { %v11070_v43 = vpop.f32.mrf.mxu0 }
 0x625   : > { %8025 = vmatmul.msk.bf16.gmra.mxu1 %vm4888_vm3, %v10421_v44  ;;  %v3884_v37 = vmul.f32 0.1, %v3803_v41  ;;  %v4292_v50 = vmul.f32 0.1, %v4142_v34 }
 0x627   : > { %v3948_v44 = vmax.f32 %v3803_v41, %v3884_v37  ;;  %v4356_v28 = vmax.f32 %v4142_v34, %v4292_v50  ;;  %v13047_v37 = vld [vmem:[#allocation99_spill] sm:$0xff] }
 0x62a   : > { %v3804_v53 = vpop.f32.mrf.mxu1  ;;  %v4143_v19 = vpop.f32.mrf.mxu2 }
 0x62b   : > { %v3805_v39 = vadd.f32 %v3804_v53, %v3636_v63  ;;  %v4144_v26 = vadd.f32 %v11012_v15, %v4143_v19 }
 0x62c   : > { %v11081_v5 = vpop.f32.mrf.mxu0 }
 0x62d   : > { %v3885_v30 = vmul.f32 0.1, %v3805_v39  ;;  %v4293_v62 = vmul.f32 0.1, %v4144_v26 }
 0x62f   : > { %v3949_v24 = vmax.f32 %v3805_v39, %v3885_v30  ;;  %v4357_v31 = vmax.f32 %v4144_v26, %v4293_v62  ;;  %7919 = vmatmul.msk.bf16.gmra.mxu2 %vm4020_vm1, %v10802_v12  ;;  %5053 = vmatmul.bf16.gmra.mxu0 %v13046_v61  ;;  %v13048_v61 = vld [vmem:[#allocation125_spill] sm:$0xff] }
 0x631   : > { %v11088_v60 = vpack.c.bf16 %v3949_v24, %v3948_v44  ;;  %v4505_v6 = vpack.c.bf16 %v4357_v31, %v4356_v28  ;;  %v3644_v28 = vadd.f32 %v10857_v32, %v10914_v16  ;;  %v3646_v16 = vadd.f32 %v10857_v32, %v10926_v52 }
 0x632   : > { %v3807_v7 = vpop.f32.mrf.mxu1  ;;  %v4146_v63 = vpop.f32.mrf.mxu2 }
 0x633   : > { %v3808_v58 = vadd.f32 %v3807_v7, %v3639_v45  ;;  %7946 = vmatmul.msk.bf16.gmra.mxu3 %vm4546_vm2, %v4505_v6  ;;  %v4147_v12 = vadd.f32 %v11012_v15, %v4146_v63 }
 0x634   : > { %v11091_v41 = vpop.f32.mrf.mxu0 }
 0x635   : > { %8026 = vmatmul.msk.bf16.gmra.mxu1 %vm4888_vm3, %v13047_v37  ;;  %v3886_v34 = vmul.f32 0.1, %v3808_v58  ;;  %v4294_v50 = vmul.f32 0.1, %v4147_v12 }
 0x637   : > { %v3950_v44 = vmax.f32 %v3808_v58, %v3886_v34  ;;  %v4358_v24 = vmax.f32 %v4147_v12, %v4294_v50 }
 0x63a   : > { %v3809_v53 = vpop.f32.mrf.mxu1  ;;  %v4148_v19 = vpop.f32.mrf.mxu2 }
 0x63b   : > { %v3810_v39 = vadd.f32 %v3809_v53, %v3641_v10  ;;  %v4149_v26 = vadd.f32 %v11012_v15, %v4148_v19 }
 0x63c   : > { %v11099_v45 = vpop.f32.mrf.mxu0 }
 0x63d   : > { %v3887_v30 = vmul.f32 0.1, %v3810_v39  ;;  %v4295_v62 = vmul.f32 0.1, %v4149_v26 }
 0x63f   : > { %v3951_v31 = vmax.f32 %v3810_v39, %v3887_v30  ;;  %v4359_v20 = vmax.f32 %v4149_v26, %v4295_v62  ;;  %7920 = vmatmul.msk.bf16.gmra.mxu2 %vm4020_vm1, %v10823_v54  ;;  %5058 = vmatmul.bf16.gmra.mxu0 %v13048_v61 }
 0x641   : > { %v11106_v6 = vpack.c.bf16 %v3951_v31, %v3950_v44  ;;  %v4506_v7 = vpack.c.bf16 %v4359_v20, %v4358_v24  ;;  %v13049_v24 = vld [vmem:[#allocation80_spill] sm:$0xff] }
 0x642   : > { %v3812_v63 = vpop.f32.mrf.mxu1  ;;  %v4151_v58 = vpop.f32.mrf.mxu2 }
 0x643   : > { %v3813_v37 = vadd.f32 %v3812_v63, %v3644_v28  ;;  %7947 = vmatmul.msk.bf16.gmra.mxu3 %vm4546_vm2, %v4506_v7  ;;  %v4152_v10 = vadd.f32 %v11012_v15, %v4151_v58  ;;  %v8377_v7 = vld [vmem:[%s12551_s12 + $0x18] sm:$0xff] }
 0x644   : > { %v11114_v12 = vpop.f32.mrf.mxu0  ;;  %5623 = vmatpush.bf16.msra.mxu2 %v8377_v7 }
 0x645   : > { %8027 = vmatmul.msk.bf16.gmra.mxu1 %vm4888_vm3, %v10457_v27  ;;  %v3888_v54 = vmul.f32 0.1, %v3813_v37  ;;  %v4296_v19 = vmul.f32 0.1, %v4152_v10  ;;  %v3649_v27 = vadd.f32 %v10857_v32, %v10932_v11 }
 0x647   : > { %v3952_v26 = vmax.f32 %v3813_v37, %v3888_v54  ;;  %v4360_v62 = vmax.f32 %v4152_v10, %v4296_v19 }
 0x64a   : > { %v3814_v34 = vpop.f32.mrf.mxu1  ;;  %v4153_v53 = vpop.f32.mrf.mxu2 }
 0x64b   : > { %v3815_v50 = vadd.f32 %v3814_v34, %v3646_v16  ;;  %v4154_v39 = vadd.f32 %v11012_v15, %v4153_v53 }
 0x64c   : > { %v11124_v61 = vpop.f32.mrf.mxu0 }
 0x64d   : > { %v3889_v44 = vmul.f32 0.1, %v3815_v50  ;;  %v4297_v30 = vmul.f32 0.1, %v4154_v39 }
 0x64f   : > { %v3953_v28 = vmax.f32 %v3815_v50, %v3889_v44  ;;  %v4361_v52 = vmax.f32 %v4154_v39, %v4297_v30  ;;  %7921 = vmatmul.msk.bf16.gmra.mxu2 %vm4020_vm1, %v10841_v25  ;;  %5063 = vmatmul.bf16.gmra.mxu0 %v13049_v24  ;;  %v3651_v25 = vadd.f32 %v10857_v32, %v10947_v18 }
 0x651   : > { %v11122_v31 = vpack.c.bf16 %v3953_v28, %v3952_v26  ;;  %v4507_v20 = vpack.c.bf16 %v4361_v52, %v4360_v62  ;;  %v13050_v62 = vld [vmem:[#allocation15_spill] sm:$0xff] }
 0x652   : > { %v3817_v63 = vpop.f32.mrf.mxu1  ;;  %v4156_v58 = vpop.f32.mrf.mxu2 }
 0x653   : > { %v3818_v11 = vadd.f32 %v3817_v63, %v3649_v27  ;;  %7948 = vmatmul.msk.bf16.gmra.mxu3 %vm4546_vm2, %v4507_v20  ;;  %v4157_v37 = vadd.f32 %v11012_v15, %v4156_v58  ;;  %v8387_v58 = vld [vmem:[%s12553_s14 + $0x28] sm:$0xff] }
 0x654   : > { %v11135_v53 = vpop.f32.mrf.mxu0  ;;  %6082 = vmatpush.bf16.msra.mxu3 %v8387_v58 }
 0x655   : > { %8028 = vmatmul.msk.bf16.gmra.mxu1 %vm4888_vm3, %v10475_v35  ;;  %v3890_v16 = vmul.f32 0.1, %v3818_v11  ;;  %v4298_v34 = vmul.f32 0.1, %v4157_v37  ;;  %v3654_v35 = vadd.f32 %v10857_v32, %v10953_v40  ;;  %v3656_v40 = vadd.f32 %v10857_v32, %v10968_v55 }
 0x656   : > { %v3659_v55 = vadd.f32 %v10857_v32, %v10974_v46  ;;  %v3661_v46 = vadd.f32 %v10857_v32, %v10989_v22 }
 0x657   : > { %v3954_v39 = vmax.f32 %v3818_v11, %v3890_v16  ;;  %v4362_v30 = vmax.f32 %v4157_v37, %v4298_v34 }
 0x65a   : > { %v3819_v10 = vpop.f32.mrf.mxu1  ;;  %v4158_v54 = vpop.f32.mrf.mxu2 }
 0x65b   : > { %v3820_v19 = vadd.f32 %v3819_v10, %v3651_v25  ;;  %v4159_v50 = vadd.f32 %v11012_v15, %v4158_v54 }
 0x65c   : > { %v11146_v63 = vpop.f32.mrf.mxu0 }
 0x65d   : > { %v3891_v26 = vmul.f32 0.1, %v3820_v19  ;;  %v4299_v44 = vmul.f32 0.1, %v4159_v50 }
 0x65f   : > { %v3955_v27 = vmax.f32 %v3820_v19, %v3891_v26  ;;  %v4363_v18 = vmax.f32 %v4159_v50, %v4299_v44  ;;  %7922 = vmatmul.msk.bf16.gmra.mxu2 %vm4020_vm1, %v10864_v57  ;;  %5068 = vmatmul.bf16.gmra.mxu0 %v13050_v62 }
 0x661   : > { %v11143_v28 = vpack.c.bf16 %v3955_v27, %v3954_v39  ;;  %v4508_v52 = vpack.c.bf16 %v4363_v18, %v4362_v30 }
 0x662   : > { %v3822_v24 = vpop.f32.mrf.mxu1  ;;  %v4161_v20 = vpop.f32.mrf.mxu2 }
 0x663   : > { %v3823_v7 = vadd.f32 %v3822_v24, %v3654_v35  ;;  %7949 = vmatmul.msk.bf16.gmra.mxu3 %vm4546_vm2, %v4508_v52  ;;  %v4162_v57 = vadd.f32 %v11012_v15, %v4161_v20  ;;  %v13051_v35 = vld [vmem:[#allocation83_spill] sm:$0xff] }
 0x664   : > { %v11159_v39 = vpop.f32.mrf.mxu0 }
 0x665   : > { %8029 = vmatmul.msk.bf16.gmra.mxu1 %vm4888_vm3, %v10493_v23  ;;  %v3892_v11 = vmul.f32 0.1, %v3823_v7  ;;  %v4300_v16 = vmul.f32 0.1, %v4162_v57 }
 0x667   : > { %v3956_v34 = vmax.f32 %v3823_v7, %v3892_v11  ;;  %v4364_v50 = vmax.f32 %v4162_v57, %v4300_v16 }
 0x66a   : > { %v3824_v25 = vpop.f32.mrf.mxu1  ;;  %v4163_v37 = vpop.f32.mrf.mxu2 }
 0x66b   : > { %v3825_v10 = vadd.f32 %v3824_v25, %v3656_v40  ;;  %v4164_v54 = vadd.f32 %v11012_v15, %v4163_v37 }
 0x66c   : > { %v11172_v20 = vpop.f32.mrf.mxu0 }
 0x66d   : > { %v3893_v19 = vmul.f32 0.1, %v3825_v10  ;;  %v4301_v23 = vmul.f32 0.1, %v4164_v54 }
 0x66f   : > { %v3957_v26 = vmax.f32 %v3825_v10, %v3893_v19  ;;  %v4365_v44 = vmax.f32 %v4164_v54, %v4301_v23  ;;  %7923 = vmatmul.msk.bf16.gmra.mxu2 %vm4020_vm1, %v10882_v13  ;;  %5073 = vmatmul.bf16.gmra.mxu0 %v13051_v35  ;;  %v13052_v54 = vld [vmem:[#allocation18_spill] sm:$0xff] }
 0x671   : > { %v11164_v30 = vpack.c.bf16 %v3957_v26, %v3956_v34  ;;  %v4509_v27 = vpack.c.bf16 %v4365_v44, %v4364_v50 }
 0x672   : > { %v3827_v18 = vpop.f32.mrf.mxu1  ;;  %v4166_v62 = vpop.f32.mrf.mxu2 }
 0x673   : > { %v3828_v52 = vadd.f32 %v3827_v18, %v3659_v55  ;;  %7950 = vmatmul.msk.bf16.gmra.mxu3 %vm4546_vm2, %v4509_v27  ;;  %v4167_v24 = vadd.f32 %v11012_v15, %v4166_v62 }
 0x674   : > { %v11183_v50 = vpop.f32.mrf.mxu0 }
 0x675   : > { %8030 = vmatmul.msk.bf16.gmra.mxu1 %vm4888_vm3, %v10511_v38  ;;  %v3894_v13 = vmul.f32 0.1, %v3828_v52  ;;  %v4302_v57 = vmul.f32 0.1, %v4167_v24  ;;  %v8393_v38 = vld [vmem:[%s12555_s16 + $0x18] sm:$0xff] }
 0x676   : > { %6545 = vmatpush.bf16.msra.mxu0 %v8393_v38 }
 0x677   : > { %v3958_v25 = vmax.f32 %v3828_v52, %v3894_v13  ;;  %v4366_v10 = vmax.f32 %v4167_v24, %v4302_v57  ;;  %v13053_v57 = vld [vmem:[#allocation86_spill] sm:$0xff] }
 0x67a   : > { %v3829_v7 = vpop.f32.mrf.mxu1  ;;  %v4168_v40 = vpop.f32.mrf.mxu2 }
 0x67b   : > { %v3830_v58 = vadd.f32 %v3829_v7, %v3661_v46  ;;  %v4169_v11 = vadd.f32 %v11012_v15, %v4168_v40 }
 0x67c   : > { %v11193_v46 = vpop.f32.mrf.mxu0 }
 0x67d   : > { %v3895_v37 = vmul.f32 0.1, %v3830_v58  ;;  %v4303_v16 = vmul.f32 0.1, %v4169_v11 }
 0x67f   : > { %v3959_v32 = vmax.f32 %v3830_v58, %v3895_v37  ;;  %v4367_v22 = vmax.f32 %v4169_v11, %v4303_v16  ;;  %7924 = vmatmul.msk.bf16.gmra.mxu2 %vm4020_vm1, %v10903_v33  ;;  %5078 = vmatmul.bf16.gmra.mxu0 %v13052_v54  ;;  %v8376_v37 = vld [vmem:[%s12551_s12 + $0x10] sm:$0xff] }
 0x680   : > { %5624 = vmatpush.bf16.msra.mxu2 %v8376_v37 }
 0x681   : > { %v11181_v34 = vpack.c.bf16 %v3959_v32, %v3958_v25  ;;  %v4510_v19 = vpack.c.bf16 %v4367_v22, %v4366_v10 }
 0x682   : > { %v4171_v23 = vpop.f32.mrf.mxu2  ;;  %v5163_v55 = vpop.f32.mrf.mxu1 }
 0x683   : > { %7951 = vmatmul.msk.bf16.gmra.mxu3 %vm4546_vm2, %v4510_v19  ;;  %v4172_v44 = vadd.f32 %v11012_v15, %v4171_v23 }
 0x684   : > { %v11207_v16 = vpop.f32.mrf.mxu0 }
 0x685   : > { %8031 = vmatmul.msk.bf16.gmra.mxu1 %vm4888_vm3, %v10537_v59  ;;  %v4304_v62 = vmul.f32 0.1, %v4172_v44 }
 0x686   : > { %v4656_v26 = vpop.f32.mrf.mxu3 }
 0x687   : > { %v4995_v33 = vadd.f32 %v10998_v56, %v4656_v26  ;;  %v4368_v7 = vmax.f32 %v4172_v44, %v4304_v62 }
 0x689   : > { %v11190_v35 = vadd.f32 %v5163_v55, %v4995_v33  ;;  %v13054_v33 = vld [vmem:[#allocation21_spill] sm:$0xff] }
 0x68a   : > { %v4173_v27 = vpop.f32.mrf.mxu2  ;;  %v5165_v18 = vpop.f32.mrf.mxu1 }
 0x68b   : > { %v4174_v52 = vadd.f32 %v11012_v15, %v4173_v27 }
 0x68d   : > { %v4305_v24 = vmul.f32 0.1, %v4174_v52 }
 0x68e   : > { %v4658_v13 = vpop.f32.mrf.mxu3 }
 0x68f   : > { %v4369_v40 = vmax.f32 %v4174_v52, %v4305_v24  ;;  %v4997_v59 = vadd.f32 %v11014_v47, %v4658_v13  ;;  %7925 = vmatmul.msk.bf16.gmra.mxu2 %vm4020_vm1, %v10921_v42  ;;  %5083 = vmatmul.bf16.gmra.mxu0 %v13053_v57  ;;  %v13055_v24 = vld [vmem:[#allocation32_spill] sm:$0xff] }
 0x691   : > { %v4511_v56 = vpack.c.bf16 %v4369_v40, %v4368_v7  ;;  %v11199_v58 = vadd.f32 %v5165_v18, %v4997_v59 }
 0x692   : > { %v4176_v11 = vpop.f32.mrf.mxu2  ;;  %v5168_v25 = vpop.f32.mrf.mxu1 }
 0x693   : > { %7952 = vmatmul.msk.bf16.gmra.mxu3 %vm4546_vm2, %v4511_v56  ;;  %v4177_v42 = vadd.f32 %v11012_v15, %v4176_v11 }
 0x695   : > { %8032 = vmatmul.msk.bf16.gmra.mxu1 %vm4888_vm3, %v10555_v9  ;;  %v4306_v54 = vmul.f32 0.1, %v4177_v42 }
 0x696   : > { %v4661_v47 = vpop.f32.mrf.mxu3 }
 0x697   : > { %v5000_v38 = vadd.f32 %v11021_v36, %v4661_v47  ;;  %v4370_v55 = vmax.f32 %v4177_v42, %v4306_v54  ;;  %v11218_v36 = vpop.f32.mrf.mxu0 }
 0x699   : > { %v11211_v10 = vadd.f32 %v5168_v25, %v5000_v38 }
 0x69a   : > { %v4178_v32 = vpop.f32.mrf.mxu2  ;;  %v5170_v22 = vpop.f32.mrf.mxu1 }
 0x69b   : > { %v4179_v19 = vadd.f32 %v11012_v15, %v4178_v32  ;;  %v13056_v32 = vld [vmem:[#allocation89_spill] sm:$0xff] }
 0x69d   : > { %v4307_v9 = vmul.f32 0.1, %v4179_v19 }
 0x69e   : > { %v4663_v23 = vpop.f32.mrf.mxu3 }
 0x69f   : > { %v4371_v26 = vmax.f32 %v4179_v19, %v4307_v9  ;;  %v5002_v44 = vadd.f32 %v11031_v2, %v4663_v23  ;;  %7926 = vmatmul.msk.bf16.gmra.mxu2 %vm4020_vm1, %v10939_v51  ;;  %5088 = vmatmul.bf16.gmra.mxu0 %v13054_v33  ;;  %v8386_v51 = vld [vmem:[%s12553_s14 + $0x20] sm:$0xff]  ;;  %v11232_v56 = vpop.f32.mrf.mxu0 }
 0x6a0   : > { %6083 = vmatpush.bf16.msra.mxu3 %v8386_v51 }
 0x6a1   : > { %v4512_v27 = vpack.c.bf16 %v4371_v26, %v4370_v55  ;;  %v11220_v18 = vadd.f32 %v5170_v22, %v5002_v44  ;;  %v13057_v55 = vld [vmem:[#allocation102_spill] sm:$0xff] }
 0x6a2   : > { %v4181_v62 = vpop.f32.mrf.mxu2  ;;  %v5173_v52 = vpop.f32.mrf.mxu1 }
 0x6a3   : > { %7953 = vmatmul.msk.bf16.gmra.mxu3 %vm4546_vm2, %v4512_v27  ;;  %v4182_v2 = vadd.f32 %v11012_v15, %v4181_v62 }
 0x6a5   : > { %8033 = vmatmul.msk.bf16.gmra.mxu1 %vm4888_vm3, %v13055_v24  ;;  %v4308_v11 = vmul.f32 0.1, %v4182_v2 }
 0x6a6   : > { %v4666_v13 = vpop.f32.mrf.mxu3 }
 0x6a7   : > { %v5005_v7 = vadd.f32 %v11039_v17, %v4666_v13  ;;  %v4372_v42 = vmax.f32 %v4182_v2, %v4308_v11  ;;  %v11242_v23 = vpop.f32.mrf.mxu0 }
 0x6a9   : > { %v11230_v40 = vadd.f32 %v5173_v52, %v5005_v7 }
 0x6aa   : > { %v4183_v59 = vpop.f32.mrf.mxu2  ;;  %v5175_v57 = vpop.f32.mrf.mxu1 }
 0x6ab   : > { %v4184_v25 = vadd.f32 %v11012_v15, %v4183_v59 }
 0x6ad   : > { %v4309_v37 = vmul.f32 0.1, %v4184_v25 }
 0x6ae   : > { %v4668_v47 = vpop.f32.mrf.mxu3 }
 0x6af   : > { %v4373_v38 = vmax.f32 %v4184_v25, %v4309_v37  ;;  %v5007_v17 = vadd.f32 %v11052_v8, %v4668_v47  ;;  %7927 = vmatmul.msk.bf16.gmra.mxu2 %vm4020_vm1, %v10960_v21  ;;  %5093 = vmatmul.bf16.gmra.mxu0 %v13056_v32  ;;  %v11251_v2 = vpop.f32.mrf.mxu0  ;;  %v13059_v47 = vld [vmem:[#allocation50_spill] sm:$0xff] }
 0x6b1   : > { %v4513_v22 = vpack.c.bf16 %v4373_v38, %v4372_v42  ;;  %v11239_v54 = vadd.f32 %v5175_v57, %v5007_v17  ;;  %v13058_v57 = vld [vmem:[#allocation24_spill] sm:$0xff] }
 0x6b2   : > { %v4186_v19 = vpop.f32.mrf.mxu2  ;;  %v5178_v9 = vpop.f32.mrf.mxu1 }
 0x6b3   : > { %7954 = vmatmul.msk.bf16.gmra.mxu3 %vm4546_vm2, %v4513_v22  ;;  %v4187_v8 = vadd.f32 %v11012_v15, %v4186_v19 }
 0x6b5   : > { %8034 = vmatmul.msk.bf16.gmra.mxu1 %vm4888_vm3, %v13057_v55  ;;  %v4310_v62 = vmul.f32 0.1, %v4187_v8 }
 0x6b6   : > { %v4671_v26 = vpop.f32.mrf.mxu3 }
 0x6b7   : > { %v5010_v44 = vadd.f32 %v11060_v1, %v4671_v26  ;;  %v4374_v7 = vmax.f32 %v4187_v8, %v4310_v62  ;;  %v11264_v17 = vpop.f32.mrf.mxu0 }
 0x6b9   : > { %v11248_v21 = vadd.f32 %v5178_v9, %v5010_v44 }
 0x6ba   : > { %v4188_v33 = vpop.f32.mrf.mxu2  ;;  %v5180_v27 = vpop.f32.mrf.mxu1 }
 0x6bb   : > { %v4189_v52 = vadd.f32 %v11012_v15, %v4188_v33 }
 0x6bd   : > { %v4311_v24 = vmul.f32 0.1, %v4189_v52 }
 0x6be   : > { %v4673_v13 = vpop.f32.mrf.mxu3 }
 0x6bf   : > { %v4375_v51 = vmax.f32 %v4189_v52, %v4311_v24  ;;  %v5012_v59 = vadd.f32 %v11070_v43, %v4673_v13  ;;  %7928 = vmatmul.msk.bf16.gmra.mxu2 %vm4020_vm1, %v10981_v29  ;;  %5098 = vmatmul.bf16.gmra.mxu0 %v13058_v57  ;;  %v11275_v13 = vpop.f32.mrf.mxu0 }
 0x6c1   : > { %v4514_v1 = vpack.c.bf16 %v4375_v51, %v4374_v7  ;;  %v11257_v11 = vadd.f32 %v5180_v27, %v5012_v59  ;;  %v13060_v27 = vld [vmem:[#allocation92_spill] sm:$0xff] }
 0x6c2   : > { %v4191_v25 = vpop.f32.mrf.mxu2  ;;  %v5183_v37 = vpop.f32.mrf.mxu1  ;;  %v13061_v7 = vld [vmem:[#allocation112_spill] sm:$0xff] }
 0x6c3   : > { %7955 = vmatmul.msk.bf16.gmra.mxu3 %vm4546_vm2, %v4514_v1  ;;  %v4192_v38 = vadd.f32 %v11012_v15, %v4191_v25 }
 0x6c5   : > { %8035 = vmatmul.msk.bf16.gmra.mxu1 %vm4888_vm3, %v13059_v47  ;;  %v4312_v19 = vmul.f32 0.1, %v4192_v38 }
 0x6c6   : > { %v4676_v42 = vpop.f32.mrf.mxu3 }
 0x6c7   : > { %v5015_v43 = vadd.f32 %v11081_v5, %v4676_v42  ;;  %v4376_v8 = vmax.f32 %v4192_v38, %v4312_v19  ;;  %v11288_v42 = vpop.f32.mrf.mxu0 }
 0x6c9   : > { %v11266_v29 = vadd.f32 %v5183_v37, %v5015_v43 }
 0x6ca   : > { %v4193_v32 = vpop.f32.mrf.mxu2  ;;  %v5185_v22 = vpop.f32.mrf.mxu1 }
 0x6cb   : > { %v4194_v9 = vadd.f32 %v11012_v15, %v4193_v32 }
 0x6cd   : > { %v4313_v55 = vmul.f32 0.1, %v4194_v9 }
 0x6ce   : > { %v4678_v26 = vpop.f32.mrf.mxu3 }
 0x6cf   : > { %v4377_v44 = vmax.f32 %v4194_v9, %v4313_v55  ;;  %v5017_v33 = vadd.f32 %v11091_v41, %v4678_v26  ;;  %7929 = vmatmul.msk.bf16.gmra.mxu2 %vm4020_vm1, %v11005_v4  ;;  %5103 = vmatmul.bf16.gmra.mxu0 %v13060_v27  ;;  %v8375_v41 = vld [vmem:[%s12551_s12 + $0x8] sm:$0xff]  ;;  %v11299_v27 = vpop.f32.mrf.mxu0 }
 0x6d0   : > { %5625 = vmatpush.bf16.msra.mxu2 %v8375_v41 }
 0x6d1   : > { %v4515_v5 = vpack.c.bf16 %v4377_v44, %v4376_v8  ;;  %v11273_v62 = vadd.f32 %v5185_v22, %v5017_v33  ;;  %v13063_v44 = vld [vmem:[#allocation36_spill] sm:$0xff] }
 0x6d2   : > { %v4196_v52 = vpop.f32.mrf.mxu2  ;;  %v5188_v24 = vpop.f32.mrf.mxu1 }
 0x6d3   : > { %7956 = vmatmul.msk.bf16.gmra.mxu3 %vm4546_vm2, %v4515_v5  ;;  %v4197_v4 = vadd.f32 %v11012_v15, %v4196_v52 }
 0x6d5   : > { %8036 = vmatmul.msk.bf16.gmra.mxu1 %vm4888_vm3, %v13061_v7  ;;  %v4314_v37 = vmul.f32 0.1, %v4197_v4 }
 0x6d6   : > { %v4681_v51 = vpop.f32.mrf.mxu3 }
 0x6d7   : > { %v5020_v59 = vadd.f32 %v11099_v45, %v4681_v51  ;;  %v4378_v32 = vmax.f32 %v4197_v4, %v4314_v37  ;;  %v13062_v45 = vld [vmem:[#allocation27_spill] sm:$0xff] }
 0x6d9   : > { %v11285_v57 = vadd.f32 %v5188_v24, %v5020_v59 }
 0x6da   : > { %v4198_v1 = vpop.f32.mrf.mxu2  ;;  %v5190_v25 = vpop.f32.mrf.mxu1 }
 0x6db   : > { %v4199_v47 = vadd.f32 %v11012_v15, %v4198_v1 }
 0x6dd   : > { %v4315_v38 = vmul.f32 0.1, %v4199_v47 }
 0x6de   : > { %v4683_v43 = vpop.f32.mrf.mxu3 }
 0x6df   : > { %v4379_v22 = vmax.f32 %v4199_v47, %v4315_v38  ;;  %v5022_v19 = vadd.f32 %v11114_v12, %v4683_v43  ;;  %7930 = vmatmul.msk.bf16.gmra.mxu2 %vm4020_vm1, %v11028_v48  ;;  %5108 = vmatmul.bf16.gmra.mxu0 %v13062_v45  ;;  %v8385_v48 = vld [vmem:[%s12553_s14 + $0x18] sm:$0xff]  ;;  %v11313_v47 = vpop.f32.mrf.mxu0 }
 0x6e0   : > { %6084 = vmatpush.bf16.msra.mxu3 %v8385_v48  ;;  %v8392_v48 = vld [vmem:[%s12555_s16 + $0x10] sm:$0xff] }
 0x6e1   : > { %v4516_v9 = vpack.c.bf16 %v4379_v22, %v4378_v32  ;;  %v11294_v55 = vadd.f32 %v5190_v25, %v5022_v19  ;;  %v13065_v19 = vld [vmem:[#allocation103_spill] sm:$0xff]  ;;  %6546 = vmatpush.bf16.msra.mxu0 %v8392_v48 }
 0x6e2   : > { %v4201_v26 = vpop.f32.mrf.mxu2  ;;  %v5193_v8 = vpop.f32.mrf.mxu1 }
 0x6e3   : > { %7957 = vmatmul.msk.bf16.gmra.mxu3 %vm4546_vm2, %v4516_v9  ;;  %v4202_v12 = vadd.f32 %v11012_v15, %v4201_v26 }
 0x6e5   : > { %8037 = vmatmul.msk.bf16.gmra.mxu1 %vm4888_vm3, %v13063_v44  ;;  %v4316_v41 = vmul.f32 0.1, %v4202_v12 }
 0x6e6   : > { %v4686_v33 = vpop.f32.mrf.mxu3 }
 0x6e7   : > { %v5025_v5 = vadd.f32 %v11124_v61, %v4686_v33  ;;  %v4380_v1 = vmax.f32 %v4202_v12, %v4316_v41  ;;  %v13064_v61 = vld [vmem:[#allocation33_spill] sm:$0xff]  ;;  %v11324_v44 = vpop.f32.mrf.mxu0 }
 0x6e9   : > { %v11306_v52 = vadd.f32 %v5193_v8, %v5025_v5 }
 0x6ea   : > { %v4203_v24 = vpop.f32.mrf.mxu2  ;;  %v5195_v7 = vpop.f32.mrf.mxu1 }
 0x6eb   : > { %v4204_v51 = vadd.f32 %v11012_v15, %v4203_v24 }
 0x6ed   : > { %v4317_v4 = vmul.f32 0.1, %v4204_v51 }
 0x6ee   : > { %v4688_v59 = vpop.f32.mrf.mxu3 }
 0x6ef   : > { %v4381_v25 = vmax.f32 %v4204_v51, %v4317_v4  ;;  %v5027_v37 = vadd.f32 %v11135_v53, %v4688_v59  ;;  %7931 = vmatmul.msk.bf16.gmra.mxu2 %vm4020_vm1, %v11046_v3  ;;  %5113 = vmatmul.bf16.gmra.mxu0 %v13064_v61  ;;  %v13067_v61 = vld [vmem:[#allocation55_spill] sm:$0xff] }
 0x6f1   : > { %v4517_v38 = vpack.c.bf16 %v4381_v25, %v4380_v1  ;;  %v11315_v43 = vadd.f32 %v5195_v7, %v5027_v37  ;;  %v11337_v37 = vpop.f32.mrf.mxu0 }
 0x6f2   : > { %v4206_v32 = vpop.f32.mrf.mxu2  ;;  %v5198_v22 = vpop.f32.mrf.mxu1 }
 0x6f3   : > { %7958 = vmatmul.msk.bf16.gmra.mxu3 %vm4546_vm2, %v4517_v38  ;;  %v4207_v53 = vadd.f32 %v11012_v15, %v4206_v32 }
 0x6f5   : > { %8038 = vmatmul.msk.bf16.gmra.mxu1 %vm4888_vm3, %v13065_v19  ;;  %v4318_v33 = vmul.f32 0.1, %v4207_v53 }
 0x6f6   : > { %v4691_v45 = vpop.f32.mrf.mxu3 }
 0x6f7   : > { %v5030_v9 = vadd.f32 %v11146_v63, %v4691_v45  ;;  %v4382_v7 = vmax.f32 %v4207_v53, %v4318_v33  ;;  %v13066_v63 = vld [vmem:[#allocation97_spill] sm:$0xff] }
 0x6f9   : > { %v11322_v3 = vadd.f32 %v5198_v22, %v5030_v9  ;;  %v11349_v33 = vpop.f32.mrf.mxu0 }
 0x6fa   : > { %v4208_v26 = vpop.f32.mrf.mxu2  ;;  %v5200_v8 = vpop.f32.mrf.mxu1 }
 0x6fb   : > { %v4209_v12 = vadd.f32 %v11012_v15, %v4208_v26  ;;  %v8395_v26 = vld [vmem:[%s12557_s18 + $0x8] sm:$0xff] }
 0x6fc   : > { %6993 = vmatpush.bf16.msra.mxu1 %v8395_v26 }
 0x6fd   : > { %v4319_v5 = vmul.f32 0.1, %v4209_v12 }
 0x6fe   : > { %v4693_v24 = vpop.f32.mrf.mxu3 }
 0x6ff   : > { %v4383_v41 = vmax.f32 %v4209_v12, %v4319_v5  ;;  %v5032_v51 = vadd.f32 %v11159_v39, %v4693_v24  ;;  %7932 = vmatmul.msk.bf16.gmra.mxu2 %vm4020_vm1, %v11067_v14  ;;  %5118 = vmatmul.bf16.gmra.mxu0 %v13066_v63  ;;  %v13069_v63 = vld [vmem:[#allocation40_spill] sm:$0xff] }
 0x701   : > { %v4518_v4 = vpack.c.bf16 %v4383_v41, %v4382_v7  ;;  %v11334_v59 = vadd.f32 %v5200_v8, %v5032_v51 }
 0x702   : > { %v4211_v1 = vpop.f32.mrf.mxu2  ;;  %v5203_v25 = vpop.f32.mrf.mxu1 }
 0x703   : > { %7959 = vmatmul.msk.bf16.gmra.mxu3 %vm4546_vm2, %v4518_v4  ;;  %v4212_v39 = vadd.f32 %v11012_v15, %v4211_v1 }
 0x705   : > { %8039 = vmatmul.msk.bf16.gmra.mxu1 %vm4888_vm3, %v13067_v61  ;;  %v4320_v45 = vmul.f32 0.1, %v4212_v39 }
 0x706   : > { %v4696_v38 = vpop.f32.mrf.mxu3 }
 0x707   : > { %v5035_v14 = vadd.f32 %v11172_v20, %v4696_v38  ;;  %v4384_v12 = vmax.f32 %v4212_v39, %v4320_v45  ;;  %v13068_v20 = vld [vmem:[#allocation37_spill] sm:$0xff] }
 0x709   : > { %v11343_v32 = vadd.f32 %v5203_v25, %v5035_v14  ;;  %v11365_v25 = vpop.f32.mrf.mxu0 }
 0x70a   : > { %v4213_v22 = vpop.f32.mrf.mxu2  ;;  %v5205_v19 = vpop.f32.mrf.mxu1 }
 0x70b   : > { %v4214_v53 = vadd.f32 %v11012_v15, %v4213_v22 }
 0x70d   : > { %v4321_v9 = vmul.f32 0.1, %v4214_v53 }
 0x70e   : > { %v4698_v8 = vpop.f32.mrf.mxu3 }
 0x70f   : > { %v4385_v5 = vmax.f32 %v4214_v53, %v4321_v9  ;;  %v5037_v48 = vadd.f32 %v11183_v50, %v4698_v8  ;;  %7933 = vmatmul.msk.bf16.gmra.mxu2 %vm4020_vm1, %v11088_v60  ;;  %5123 = vmatmul.bf16.gmra.mxu0 %v13068_v20  ;;  %v8374_v50 = vld [vmem:[%s12551_s12] sm:$0xff] }
 0x710   : > { %5626 = vmatpush.bf16.msra.mxu2 %v8374_v50 }
 0x711   : > { %v4519_v24 = vpack.c.bf16 %v4385_v5, %v4384_v12  ;;  %v11355_v7 = vadd.f32 %v5205_v19, %v5037_v48  ;;  %v11376_v20 = vpop.f32.mrf.mxu0 }
 0x712   : > { %v4216_v41 = vpop.f32.mrf.mxu2  ;;  %v5208_v51 = vpop.f32.mrf.mxu1 }
 0x713   : > { %7960 = vmatmul.msk.bf16.gmra.mxu3 %vm4546_vm2, %v4519_v24  ;;  %v4217_v60 = vadd.f32 %v11012_v15, %v4216_v41  ;;  %v13071_v24 = vld [vmem:[#allocation104_spill] sm:$0xff] }
 0x715   : > { %8040 = vmatmul.msk.bf16.gmra.mxu1 %vm4888_vm3, %v13069_v63  ;;  %v4322_v14 = vmul.f32 0.1, %v4217_v60 }
 0x716   : > { %v4701_v4 = vpop.f32.mrf.mxu3 }
 0x717   : > { %v5040_v1 = vadd.f32 %v11193_v46, %v4701_v4  ;;  %v4386_v53 = vmax.f32 %v4217_v60, %v4322_v14  ;;  %v13070_v46 = vld [vmem:[#allocation41_spill] sm:$0xff] }
 0x719   : > { %v11367_v61 = vadd.f32 %v5208_v51, %v5040_v1 }
 0x71a   : > { %v4218_v38 = vpop.f32.mrf.mxu2  ;;  %v5210_v39 = vpop.f32.mrf.mxu1 }
 0x71b   : > { %v4219_v22 = vadd.f32 %v11012_v15, %v4218_v38  ;;  %v11389_v38 = vpop.f32.mrf.mxu0 }
 0x71d   : > { %v4323_v19 = vmul.f32 0.1, %v4219_v22 }
 0x71e   : > { %v4703_v45 = vpop.f32.mrf.mxu3 }
 0x71f   : > { %v4387_v9 = vmax.f32 %v4219_v22, %v4323_v19  ;;  %v5042_v26 = vadd.f32 %v11207_v16, %v4703_v45  ;;  %7934 = vmatmul.msk.bf16.gmra.mxu2 %vm4020_vm1, %v11106_v6  ;;  %5128 = vmatmul.bf16.gmra.mxu0 %v13070_v46  ;;  %v8384_v6 = vld [vmem:[%s12553_s14 + $0x10] sm:$0xff]  ;;  %v13072_v45 = vld [vmem:[#allocation108_spill] sm:$0xff] }
 0x720   : > { %6085 = vmatpush.bf16.msra.mxu3 %v8384_v6  ;;  %v11409_v6 = vld [vmem:[%s13041_s8] ss:$0 sm:$0xff] }
 0x721   : > { %v4520_v8 = vpack.c.bf16 %v4387_v9, %v4386_v53  ;;  %v11374_v12 = vadd.f32 %v5210_v39, %v5042_v26 }
 0x722   : > { %v4221_v5 = vpop.f32.mrf.mxu2  ;;  %v5213_v48 = vpop.f32.mrf.mxu1 }
 0x723   : > { %7961 = vmatmul.msk.bf16.gmra.mxu3 %vm4546_vm2, %v4520_v8  ;;  %v4222_v16 = vadd.f32 %v11012_v15, %v4221_v5  ;;  %v13073_v8 = vld [vmem:[#allocation60_spill] sm:$0xff] }
 0x725   : > { %8041 = vmatmul.msk.bf16.gmra.mxu1 %vm4888_vm3, %v13071_v24  ;;  %v4324_v60 = vmul.f32 0.1, %v4222_v16 }
 0x726   : > { %v4706_v41 = vpop.f32.mrf.mxu3 }
 0x727   : > { %v5045_v51 = vadd.f32 %v11218_v36, %v4706_v41  ;;  %v4388_v22 = vmax.f32 %v4222_v16, %v4324_v60 }
 0x729   : > { %v11386_v63 = vadd.f32 %v5213_v48, %v5045_v51  ;;  %v11400_v48 = vpop.f32.mrf.mxu0 }
 0x72a   : > { %v4223_v50 = vpop.f32.mrf.mxu2  ;;  %v5215_v4 = vpop.f32.mrf.mxu1 }
 0x72b   : > { %v4224_v1 = vadd.f32 %v11012_v15, %v4223_v50 }
 0x72d   : > { %v4325_v39 = vmul.f32 0.1, %v4224_v1 }
 0x72e   : > { %v4708_v14 = vpop.f32.mrf.mxu3 }
 0x72f   : > { %v4389_v19 = vmax.f32 %v4224_v1, %v4325_v39  ;;  %v5047_v36 = vadd.f32 %v11232_v56, %v4708_v14  ;;  %7935 = vmatmul.msk.bf16.gmra.mxu2 %vm4020_vm1, %v11122_v31  ;;  %5133 = vmatmul.bf16.gmra.mxu0 %v13072_v45 }
 0x731   : > { %v4521_v53 = vpack.c.bf16 %v4389_v19, %v4388_v22  ;;  %v11395_v9 = vadd.f32 %v5215_v4, %v5047_v36  ;;  %v11416_v14 = vpop.f32.mrf.mxu0 }
 0x732   : > { %v4226_v26 = vpop.f32.mrf.mxu2  ;;  %v5218_v46 = vpop.f32.mrf.mxu1 }
 0x733   : > { %7962 = vmatmul.msk.bf16.gmra.mxu3 %vm4546_vm2, %v4521_v53  ;;  %v4227_v56 = vadd.f32 %v11012_v15, %v4226_v26  ;;  %v13075_v53 = vld [vmem:[#allocation44_spill] sm:$0xff] }
 0x735   : > { %8042 = vmatmul.msk.bf16.gmra.mxu1 %vm4888_vm3, %v13073_v8  ;;  %v4326_v51 = vmul.f32 0.1, %v4227_v56 }
 0x736   : > { %v4711_v5 = vpop.f32.mrf.mxu3 }
 0x737   : > { %v5050_v24 = vadd.f32 %v11242_v23, %v4711_v5  ;;  %v4390_v1 = vmax.f32 %v4227_v56, %v4326_v51  ;;  %v13074_v23 = vld [vmem:[#allocation101_spill] sm:$0xff] }
 0x739   : > { %v11404_v31 = vadd.f32 %v5218_v46, %v5050_v24  ;;  %v11427_v56 = vpop.f32.mrf.mxu0 }
 0x73a   : > { %v4228_v41 = vpop.f32.mrf.mxu2  ;;  %v5220_v16 = vpop.f32.mrf.mxu1 }
 0x73b   : > { %v4229_v50 = vadd.f32 %v11409_v6, %v4228_v41 }
 0x73d   : > { %v4327_v4 = vmul.f32 0.1, %v4229_v50 }
 0x73e   : > { %v4713_v60 = vpop.f32.mrf.mxu3 }
 0x73f   : > { %v4391_v39 = vmax.f32 %v4229_v50, %v4327_v4  ;;  %v5052_v15 = vadd.f32 %v11251_v2, %v4713_v60  ;;  %7936 = vmatmul.msk.bf16.gmra.mxu2 %vm4020_vm1, %v11143_v28  ;;  %5138 = vmatmul.bf16.gmra.mxu0 %v13074_v23 }
 0x741   : > { %v4522_v22 = vpack.c.bf16 %v4391_v39, %v4390_v1  ;;  %v11418_v19 = vadd.f32 %v5220_v16, %v5052_v15  ;;  %v13076_v1 = vld [vmem:[#allocation45_spill] sm:$0xff] }
 0x742   : > { %v4231_v36 = vpop.f32.mrf.mxu2  ;;  %v5223_v45 = vpop.f32.mrf.mxu1 }
 0x743   : > { %7963 = vmatmul.msk.bf16.gmra.mxu3 %vm4546_vm2, %v4522_v22  ;;  %v4232_v2 = vadd.f32 %v11409_v6, %v4231_v36  ;;  %v11437_v22 = vpop.f32.mrf.mxu0  ;;  %v13077_v36 = vld [vmem:[#allocation105_spill] sm:$0xff] }
 0x745   : > { %8043 = vmatmul.msk.bf16.gmra.mxu1 %vm4888_vm3, %v13075_v53  ;;  %v4328_v24 = vmul.f32 0.1, %v4232_v2 }
 0x746   : > { %v4716_v26 = vpop.f32.mrf.mxu3 }
 0x747   : > { %v5055_v46 = vadd.f32 %v11264_v17, %v4716_v26  ;;  %v4392_v50 = vmax.f32 %v4232_v2, %v4328_v24 }
 0x749   : > { %v11425_v28 = vadd.f32 %v5223_v45, %v5055_v46 }
 0x74a   : > { %v4233_v8 = vpop.f32.mrf.mxu2  ;;  %v5225_v5 = vpop.f32.mrf.mxu1 }
 0x74b   : > { %v4234_v41 = vadd.f32 %v11409_v6, %v4233_v8 }
 0x74d   : > { %v4329_v16 = vmul.f32 0.1, %v4234_v41 }
 0x74e   : > { %v4718_v51 = vpop.f32.mrf.mxu3 }
 0x74f   : > { %v4393_v4 = vmax.f32 %v4234_v41, %v4329_v16  ;;  %v5057_v60 = vadd.f32 %v11275_v13, %v4718_v51  ;;  %7937 = vmatmul.msk.bf16.gmra.mxu2 %vm4020_vm1, %v11164_v30  ;;  %5143 = vmatmul.bf16.gmra.mxu0 %v13076_v1  ;;  %v11449_v41 = vld [vmem:[%s12550_s11] ss:$0 sm:$0xff]  ;;  %v11451_v16 = vpop.f32.mrf.mxu0 }
 0x751   : > { %v4523_v17 = vpack.c.bf16 %v4393_v4, %v4392_v50  ;;  %v11434_v39 = vadd.f32 %v5225_v5, %v5057_v60  ;;  %v13078_v4 = vld [vmem:[#allocation110_spill] sm:$0xff]  ;;  %v5328_v60 = vadd.f32 %v11449_v41, %v11199_v58 }
 0x752   : > { %v4236_v15 = vpop.f32.mrf.mxu2  ;;  %v5228_v23 = vpop.f32.mrf.mxu1 }
 0x753   : > { %7964 = vmatmul.msk.bf16.gmra.mxu3 %vm4546_vm2, %v4523_v17  ;;  %v4237_v13 = vadd.f32 %v11409_v6, %v4236_v15 }
 0x755   : > { %8044 = vmatmul.msk.bf16.gmra.mxu1 %vm4888_vm3, %v13077_v36  ;;  %v4330_v46 = vmul.f32 0.1, %v4237_v13  ;;  %v5327_v36 = vadd.f32 %v11449_v41, %v11190_v35 }
 0x756   : > { %v4721_v45 = vpop.f32.mrf.mxu3 }
 0x757   : > { %v5060_v53 = vadd.f32 %v11288_v42, %v4721_v45  ;;  %v4394_v51 = vmax.f32 %v4237_v13, %v4330_v46  ;;  %v5392_v45 = vmul.f32 0.1, %v5328_v60  ;;  %v5391_v13 = vmul.f32 0.1, %v5327_v36 }
 0x759   : > { %v11443_v30 = vadd.f32 %v5228_v23, %v5060_v53 }
 0x75a   : > { %v4238_v26 = vpop.f32.mrf.mxu2  ;;  %v5230_v2 = vpop.f32.mrf.mxu1 }
 0x75b   : > { %v4239_v8 = vadd.f32 %v11409_v6, %v4238_v26  ;;  %v8383_v26 = vld [vmem:[%s12553_s14 + $0x8] sm:$0xff] }
 0x75c   : > { %6086 = vmatpush.bf16.msra.mxu3 %v8383_v26 }
 0x75d   : > { %v4331_v5 = vmul.f32 0.1, %v4239_v8 }
 0x75e   : > { %v4723_v24 = vpop.f32.mrf.mxu3 }
 0x75f   : > { %v4395_v50 = vmax.f32 %v4239_v8, %v4331_v5  ;;  %v5062_v42 = vadd.f32 %v11299_v27, %v4723_v24  ;;  %7938 = vmatmul.msk.bf16.gmra.mxu2 %vm4020_vm1, %v11181_v34  ;;  %5148 = vmatmul.bf16.gmra.mxu0 %v13078_v4  ;;  %v13079_v27 = vld [vmem:[#allocation65_spill] sm:$0xff]  ;;  %v11475_v5 = vmax.f32 %v5327_v36, %v5391_v13 }
 0x761   : > { %v4524_v1 = vpack.c.bf16 %v4395_v50, %v4394_v51  ;;  %v11459_v17 = vadd.f32 %v5230_v2, %v5062_v42  ;;  %v11471_v2 = vmax.f32 %v5328_v60, %v5392_v45 }
 0x762   : > { %v4241_v15 = vpop.f32.mrf.mxu2  ;;  %v5233_v23 = vpop.f32.mrf.mxu1 }
 0x763   : > { %7965 = vmatmul.msk.bf16.gmra.mxu3 %vm4546_vm2, %v4524_v1  ;;  %v4242_v53 = vadd.f32 %v11409_v6, %v4241_v15  ;;  %v5519_v50 = vpack.c.bf16 %v11471_v2, %v11475_v5  ;;  %v5330_v15 = vadd.f32 %v11449_v41, %v11220_v18 }
 0x765   : > { %8045 = vmatmul.msk.bf16.gmra.mxu1 %vm4888_vm3, %v13079_v27  ;;  %v4332_v24 = vmul.f32 0.1, %v4242_v53  ;;  %v5394_v13 = vmul.f32 0.1, %v5330_v15 }
 0x766   : > { %v4726_v34 = vpop.f32.mrf.mxu3 }
 0x767   : > { %v5065_v58 = vadd.f32 %v11313_v47, %v4726_v34  ;;  %v4396_v4 = vmax.f32 %v4242_v53, %v4332_v24  ;;  %v5329_v34 = vadd.f32 %v11449_v41, %v11211_v10 }
 0x769   : > { %v11473_v46 = vadd.f32 %v5233_v23, %v5065_v58  ;;  %v13080_v58 = vld [vmem:[#allocation116_spill] sm:$0xff] }
 0x76a   : > { %v4243_v35 = vpop.f32.mrf.mxu2  ;;  %v5235_v8 = vpop.f32.mrf.mxu1 }
 0x76b   : > { %v4244_v51 = vadd.f32 %v11409_v6, %v4243_v35 }
 0x76d   : > { %v4333_v47 = vmul.f32 0.1, %v4244_v51 }
 0x76e   : > { %v4728_v42 = vpop.f32.mrf.mxu3 }
 0x76f   : > { %v4397_v1 = vmax.f32 %v4244_v51, %v4333_v47  ;;  %v5067_v60 = vadd.f32 %v11324_v44, %v4728_v42  ;;  %5627 = vmatmul.bf16.vlgmr.msra.gmra.mxu2 %v5519_v50  ;;  %v5393_v44 = vmul.f32 0.1, %v5329_v34 }
 0x771   : > { %v4525_v23 = vpack.c.bf16 %v4397_v1, %v4396_v4  ;;  %v11483_v45 = vadd.f32 %v5235_v8, %v5067_v60  ;;  %v11494_v8 = vmax.f32 %v5330_v15, %v5394_v13  ;;  %v11497_v47 = vmax.f32 %v5329_v34, %v5393_v44  ;;  %v8391_v1 = vld [vmem:[%s12555_s16 + $0x8] sm:$0xff] }
 0x772   : > { %v4246_v36 = vpop.f32.mrf.mxu2  ;;  %v5238_v27 = vpop.f32.mrf.mxu1  ;;  %6547 = vmatpush.bf16.msra.mxu0 %v8391_v1 }
 0x773   : > { %7966 = vmatmul.msk.bf16.gmra.mxu3 %vm4546_vm2, %v4525_v23  ;;  %v4247_v26 = vadd.f32 %v11409_v6, %v4246_v36  ;;  %v5520_v4 = vpack.c.bf16 %v11494_v8, %v11497_v47  ;;  %v5332_v36 = vadd.f32 %v11449_v41, %v11239_v54 }
 0x775   : > { %8046 = vmatmul.msk.bf16.gmra.mxu1 %vm4888_vm3, %v13080_v58  ;;  %v4334_v50 = vmul.f32 0.1, %v4247_v26  ;;  %v5396_v44 = vmul.f32 0.1, %v5332_v36 }
 0x776   : > { %v4731_v53 = vpop.f32.mrf.mxu3 }
 0x777   : > { %v5070_v18 = vadd.f32 %v11337_v37, %v4731_v53  ;;  %v4398_v60 = vmax.f32 %v4247_v26, %v4334_v50  ;;  %v5331_v53 = vadd.f32 %v11449_v41, %v11230_v40  ;;  %v13081_v26 = vld [vmem:[#allocation48_spill] sm:$0xff] }
 0x779   : > { %v11492_v35 = vadd.f32 %v5238_v27, %v5070_v18  ;;  %v5395_v18 = vmul.f32 0.1, %v5331_v53 }
 0x77a   : > { %v4248_v24 = vpop.f32.mrf.mxu2  ;;  %v5240_v51 = vpop.f32.mrf.mxu1 }
 0x77b   : > { %v4249_v10 = vadd.f32 %v11409_v6, %v4248_v24  ;;  %v11521_v1 = vmax.f32 %v5331_v53, %v5395_v18  ;;  %v5333_v53 = vadd.f32 %v11449_v41, %v11248_v21  ;;  %v13082_v18 = vld [vmem:[#allocation106_spill] sm:$0xff] }
 0x77d   : > { %v4335_v42 = vmul.f32 0.1, %v4249_v10 }
 0x77e   : > { %v4733_v37 = vpop.f32.mrf.mxu3 }
 0x77f   : > { %v4399_v23 = vmax.f32 %v4249_v10, %v4335_v42  ;;  %v5072_v15 = vadd.f32 %v11349_v33, %v4733_v37  ;;  %5632 = vmatmul.bf16.gmra.mxu2 %v5520_v4 }
 0x781   : > { %v4526_v27 = vpack.c.bf16 %v4399_v23, %v4398_v60  ;;  %v11507_v34 = vadd.f32 %v5240_v51, %v5072_v15  ;;  %v11518_v51 = vmax.f32 %v5332_v36, %v5396_v44  ;;  %v5334_v36 = vadd.f32 %v11449_v41, %v11257_v11 }
 0x782   : > { %v4251_v13 = vpop.f32.mrf.mxu2  ;;  %v5243_v58 = vpop.f32.mrf.mxu1 }
 0x783   : > { %7967 = vmatmul.msk.bf16.gmra.mxu3 %vm4546_vm2, %v4526_v27  ;;  %v4252_v24 = vadd.f32 %v11409_v6, %v4251_v13  ;;  %v5521_v60 = vpack.c.bf16 %v11518_v51, %v11521_v1 }
 0x785   : > { %8047 = vmatmul.msk.bf16.gmra.mxu1 %vm4888_vm3, %v13081_v26  ;;  %v4336_v4 = vmul.f32 0.1, %v4252_v24 }
 0x786   : > { %v4736_v33 = vpop.f32.mrf.mxu3 }
 0x787   : > { %v5075_v54 = vadd.f32 %v11365_v25, %v4736_v33  ;;  %v4400_v15 = vmax.f32 %v4252_v24, %v4336_v4  ;;  %v5398_v33 = vmul.f32 0.1, %v5334_v36 }
 0x789   : > { %v11516_v50 = vadd.f32 %v5243_v58, %v5075_v54  ;;  %v11535_v54 = vpop.f32.mrf.mxu0  ;;  %v11541_v4 = vmax.f32 %v5334_v36, %v5398_v33  ;;  %v5336_v36 = vadd.f32 %v11449_v41, %v11273_v62 }
 0x78a   : > { %v4253_v10 = vpop.f32.mrf.mxu2  ;;  %v5245_v42 = vpop.f32.mrf.mxu1  ;;  %13083 = vst [vmem:[#allocation58_spill] sm:$0xff] %v11535_v54 }
 0x78b   : > { %v4254_v40 = vadd.f32 %v11409_v6, %v4253_v10 }
 0x78d   : > { %v4337_v37 = vmul.f32 0.1, %v4254_v40 }
 0x78e   : > { %v4738_v23 = vpop.f32.mrf.mxu3 }
 0x78f   : > { %v4401_v27 = vmax.f32 %v4254_v40, %v4337_v37  ;;  %v5077_v25 = vadd.f32 %v11376_v20, %v4738_v23  ;;  %5637 = vmatmul.bf16.gmra.mxu2 %v5521_v60  ;;  %v5397_v20 = vmul.f32 0.1, %v5333_v53 }
 0x791   : > { %v4527_v13 = vpack.c.bf16 %v4401_v27, %v4400_v15  ;;  %v11528_v58 = vadd.f32 %v5245_v42, %v5077_v25  ;;  %v11544_v23 = vmax.f32 %v5333_v53, %v5397_v20  ;;  %v5335_v20 = vadd.f32 %v11449_v41, %v11266_v29 }
 0x792   : > { %v4256_v44 = vpop.f32.mrf.mxu2  ;;  %v5248_v26 = vpop.f32.mrf.mxu1 }
 0x793   : > { %7968 = vmatmul.msk.bf16.gmra.mxu3 %vm4546_vm2, %v4527_v13  ;;  %v4257_v11 = vadd.f32 %v11409_v6, %v4256_v44  ;;  %v5522_v27 = vpack.c.bf16 %v11541_v4, %v11544_v23 }
 0x795   : > { %8048 = vmatmul.msk.bf16.gmra.mxu1 %vm4888_vm3, %v13082_v18  ;;  %v4338_v37 = vmul.f32 0.1, %v4257_v11 }
 0x796   : > { %v4741_v24 = vpop.f32.mrf.mxu3 }
 0x797   : > { %v5080_v10 = vadd.f32 %v11389_v38, %v4741_v24  ;;  %v4402_v13 = vmax.f32 %v4257_v11, %v4338_v37  ;;  %v5400_v11 = vmul.f32 0.1, %v5336_v36 }
 0x799   : > { %v11539_v42 = vadd.f32 %v5248_v26, %v5080_v10  ;;  %v11551_v26 = vpop.f32.mrf.mxu0  ;;  %v13084_v10 = vld [vmem:[#allocation70_spill] sm:$0xff] }
 0x79a   : > { %v4258_v40 = vpop.f32.mrf.mxu2  ;;  %v5250_v21 = vpop.f32.mrf.mxu1 }
 0x79b   : > { %v4259_v60 = vadd.f32 %v11409_v6, %v4258_v40  ;;  %v5399_v40 = vmul.f32 0.1, %v5335_v20 }
 0x79d   : > { %v4339_v15 = vmul.f32 0.1, %v4259_v60 }
 0x79e   : > { %v4743_v25 = vpop.f32.mrf.mxu3 }
 0x79f   : > { %v4403_v44 = vmax.f32 %v4259_v60, %v4339_v15  ;;  %v5082_v38 = vadd.f32 %v11400_v48, %v4743_v25  ;;  %5642 = vmatmul.bf16.gmra.mxu2 %v5522_v27  ;;  %v11567_v15 = vmax.f32 %v5336_v36, %v5400_v11  ;;  %v5338_v11 = vadd.f32 %v11449_v41, %v11294_v55 }
 0x7a1   : > { %v4528_v33 = vpack.c.bf16 %v4403_v44, %v4402_v13  ;;  %v11553_v18 = vadd.f32 %v5250_v21, %v5082_v38  ;;  %v8382_v21 = vld [vmem:[%s12553_s14] sm:$0xff]  ;;  %v11569_v27 = vpop.f32.mrf.mxu0  ;;  %v11572_v44 = vmax.f32 %v5335_v20, %v5399_v40  ;;  %v5337_v20 = vadd.f32 %v11449_v41, %v11285_v57 }
 0x7a2   : > { %v4261_v53 = vpop.f32.mrf.mxu2  ;;  %v5253_v24 = vpop.f32.mrf.mxu1  ;;  %6087 = vmatpush.bf16.msra.mxu3 %v8382_v21  ;;  %13085 = vst [vmem:[#allocation49_spill] sm:$0xff] %v11569_v27  ;;  %v5402_v40 = vmul.f32 0.1, %v5338_v11 }
 0x7a3   : > { %7969 = vmatmul.msk.bf16.gmra.mxu3 %vm4546_vm2, %v4528_v33  ;;  %v4262_v62 = vadd.f32 %v11409_v6, %v4261_v53 }
 0x7a5   : > { %8049 = vmatmul.msk.bf16.gmra.mxu1 %vm4888_vm3, %v13084_v10  ;;  %v4340_v25 = vmul.f32 0.1, %v4262_v62 }
 0x7a6   : > { %v4746_v48 = vpop.f32.mrf.mxu3 }
 0x7a7   : > { %v5085_v37 = vadd.f32 %v11416_v14, %v4746_v48  ;;  %v5523_v14 = vpack.c.bf16 %v11567_v15, %v11572_v44  ;;  %v4404_v10 = vmax.f32 %v4262_v62, %v4340_v25  ;;  %v13086_v62 = vld [vmem:[#allocation53_spill] sm:$0xff] }
 0x7a9   : > { %v11565_v60 = vadd.f32 %v5253_v24, %v5085_v37 }
 0x7aa   : > { %v4263_v29 = vpop.f32.mrf.mxu2  ;;  %v5255_v38 = vpop.f32.mrf.mxu1 }
 0x7ab   : > { %v4264_v13 = vadd.f32 %v11409_v6, %v4263_v29  ;;  %v11584_v29 = vpop.f32.mrf.mxu0 }
 0x7ad   : > { %v4341_v33 = vmul.f32 0.1, %v4264_v13 }
 0x7ae   : > { %v4748_v53 = vpop.f32.mrf.mxu3 }
 0x7af   : > { %v4405_v24 = vmax.f32 %v4264_v13, %v4341_v33  ;;  %v5087_v36 = vadd.f32 %v11427_v56, %v4748_v53  ;;  %5647 = vmatmul.bf16.gmra.mxu2 %v5523_v14  ;;  %v5401_v13 = vmul.f32 0.1, %v5337_v20  ;;  %v11592_v14 = vmax.f32 %v5338_v11, %v5402_v40 }
 0x7b0   : > { %v5340_v40 = vadd.f32 %v11449_v41, %v11315_v43 }
 0x7b1   : > { %v4529_v48 = vpack.c.bf16 %v4405_v24, %v4404_v10  ;;  %v11579_v37 = vadd.f32 %v5255_v38, %v5087_v36  ;;  %v11595_v24 = vmax.f32 %v5337_v20, %v5401_v13  ;;  %v5339_v13 = vadd.f32 %v11449_v41, %v11306_v52 }
 0x7b2   : > { %v4266_v21 = vpop.f32.mrf.mxu2  ;;  %v5258_v56 = vpop.f32.mrf.mxu1 }
 0x7b3   : > { %7970 = vmatmul.msk.bf16.gmra.mxu3 %vm4546_vm2, %v4529_v48  ;;  %v4267_v55 = vadd.f32 %v11409_v6, %v4266_v21  ;;  %v5524_v48 = vpack.c.bf16 %v11592_v14, %v11595_v24 }
 0x7b5   : > { %8050 = vmatmul.msk.bf16.gmra.mxu1 %vm4888_vm3, %v13086_v62  ;;  %v4342_v53 = vmul.f32 0.1, %v4267_v55 }
 0x7b6   : > { %v4751_v25 = vpop.f32.mrf.mxu3 }
 0x7b7   : > { %v5090_v38 = vadd.f32 %v11437_v22, %v4751_v25  ;;  %v4406_v27 = vmax.f32 %v4267_v55, %v4342_v53  ;;  %v11600_v22 = vpop.f32.mrf.mxu0  ;;  %v5404_v55 = vmul.f32 0.1, %v5340_v40 }
 0x7b8   : > { %13087 = vst [vmem:[#allocation16_spill] sm:$0xff] %v11600_v22 }
 0x7b9   : > { %v11590_v33 = vadd.f32 %v5258_v56, %v5090_v38  ;;  %v13088_v38 = vld [vmem:[#allocation107_spill] sm:$0xff] }
 0x7ba   : > { %v4268_v57 = vpop.f32.mrf.mxu2  ;;  %v5260_v11 = vpop.f32.mrf.mxu1 }
 0x7bb   : > { %v4269_v10 = vadd.f32 %v11409_v6, %v4268_v57  ;;  %v5403_v57 = vmul.f32 0.1, %v5339_v13 }
 0x7bd   : > { %v4343_v36 = vmul.f32 0.1, %v4269_v10 }
 0x7be   : > { %v4753_v62 = vpop.f32.mrf.mxu3 }
 0x7bf   : > { %v4407_v54 = vmax.f32 %v4269_v10, %v4343_v36  ;;  %v5092_v21 = vadd.f32 %v11451_v16, %v4753_v62  ;;  %5652 = vmatmul.bf16.gmra.mxu2 %v5524_v48  ;;  %v11614_v10 = vmax.f32 %v5340_v40, %v5404_v55  ;;  %v5106_v43 = vpop.f32.mrf.mxu0  ;;  %v11617_v48 = vmax.f32 %v5339_v13, %v5403_v57 }
 0x7c0   : > { %v5342_v40 = vadd.f32 %v11449_v41, %v11334_v59  ;;  %v5341_v13 = vadd.f32 %v11449_v41, %v11322_v3 }
 0x7c1   : > { %v4530_v56 = vpack.c.bf16 %v4407_v54, %v4406_v27  ;;  %v11604_v25 = vadd.f32 %v5260_v11, %v5092_v21  ;;  %v5525_v62 = vpack.c.bf16 %v11614_v10, %v11617_v48 }
 0x7c2   : > { %v4271_v20 = vpop.f32.mrf.mxu2 }
 0x7c3   : > { %7971 = vmatmul.msk.bf16.gmra.mxu3 %vm4546_vm2, %v4530_v56  ;;  %v4272_v53 = vadd.f32 %v11409_v6, %v4271_v20 }
 0x7c5   : > { %8051 = vmatmul.msk.bf16.gmra.mxu1 %vm4888_vm3, %v13088_v38  ;;  %v4344_v27 = vmul.f32 0.1, %v4272_v53 }
 0x7c6   : > { %v11611_v16 = vpop.f32.mrf.mxu3 }
 0x7c7   : > { %v4408_v11 = vmax.f32 %v4272_v53, %v4344_v27  ;;  %v11629_v57 = vpop.f32.mrf.mxu0 }
 0x7c8   : > { %13089 = vst [vmem:[#allocation63_spill] sm:$0xff] %v11629_v57 }
 0x7ca   : > { %v4273_v54 = vpop.f32.mrf.mxu2 }
 0x7cb   : > { %v4274_v36 = vadd.f32 %v11409_v6, %v4273_v54  ;;  %v5406_v54 = vmul.f32 0.1, %v5342_v40 }
 0x7cd   : > { %v4345_v52 = vmul.f32 0.1, %v4274_v36 }
 0x7ce   : > { %v4758_v21 = vpop.f32.mrf.mxu3 }
 0x7cf   : > { %v4409_v56 = vmax.f32 %v4274_v36, %v4345_v52  ;;  %v11622_v38 = vadd.f32 %v11551_v26, %v4758_v21  ;;  %5657 = vmatmul.bf16.gmra.mxu2 %v5525_v62  ;;  %v5405_v26 = vmul.f32 0.1, %v5341_v13  ;;  %v11636_v36 = vmax.f32 %v5342_v40, %v5406_v54 }
 0x7d0   : > { %v5344_v40 = vadd.f32 %v11449_v41, %v11355_v7 }
 0x7d1   : > { %v4531_v20 = vpack.c.bf16 %v4409_v56, %v4408_v11  ;;  %v11639_v3 = vmax.f32 %v5341_v13, %v5405_v26  ;;  %v5111_v56 = vpop.f32.mrf.mxu0  ;;  %v5343_v13 = vadd.f32 %v11449_v41, %v11343_v32 }
 0x7d2   : > { %v4276_v55 = vpop.f32.mrf.mxu2  ;;  %v5408_v26 = vmul.f32 0.1, %v5344_v40 }
 0x7d3   : > { %7972 = vmatmul.msk.bf16.gmra.mxu3 %vm4546_vm2, %v4531_v20  ;;  %v4277_v27 = vadd.f32 %v11409_v6, %v4276_v55  ;;  %v5526_v11 = vpack.c.bf16 %v11636_v36, %v11639_v3 }
 0x7d5   : > { %8052 = vmatmul.msk.bf16.gmra.mxu1 %vm4888_vm3, %v10962_v0  ;;  %v4346_v52 = vmul.f32 0.1, %v4277_v27 }
 0x7d6   : > { %v11633_v53 = vpop.f32.mrf.mxu3 }
 0x7d7   : > { %v4410_v0 = vmax.f32 %v4277_v27, %v4346_v52  ;;  %v5407_v52 = vmul.f32 0.1, %v5343_v13 }
 0x7d9   : > { %v11661_v32 = vmax.f32 %v5343_v13, %v5407_v52  ;;  %v5345_v52 = vadd.f32 %v11449_v41, %v11367_v61 }
 0x7da   : > { %v4278_v59 = vpop.f32.mrf.mxu2 }
 0x7db   : > { %v4279_v62 = vadd.f32 %v11409_v6, %v4278_v59  ;;  %v13091_v59 = vld [vmem:[#allocation75_spill] sm:$0xff] }
 0x7dd   : > { %v4347_v21 = vmul.f32 0.1, %v4279_v62 }
 0x7de   : > { %v4763_v20 = vpop.f32.mrf.mxu3 }
 0x7df   : > { %v4411_v57 = vmax.f32 %v4279_v62, %v4347_v21  ;;  %v11644_v22 = vadd.f32 %v11584_v29, %v4763_v20  ;;  %5662 = vmatmul.bf16.gmra.mxu2 %v5526_v11  ;;  %v11656_v62 = vpop.f32.mrf.mxu0  ;;  %v11658_v21 = vmax.f32 %v5344_v40, %v5408_v26  ;;  %v5346_v40 = vadd.f32 %v11449_v41, %v11374_v12 }
 0x7e0   : > { %13093 = vst [vmem:[#allocation68_spill] sm:$0xff] %v11656_v62 }
 0x7e1   : > { %13090 = vst [vmem:[#allocation54_spill] sm:$0xff] %v11644_v22  ;;  %v4532_v55 = vpack.c.bf16 %v4411_v57, %v4410_v0  ;;  %v5527_v0 = vpack.c.bf16 %v11658_v21, %v11661_v32 }
 0x7e2   : > { %v4281_v54 = vpop.f32.mrf.mxu2 }
 0x7e3   : > { %7973 = vmatmul.msk.bf16.gmra.mxu3 %vm4546_vm2, %v4532_v55  ;;  %v4282_v29 = vadd.f32 %v11409_v6, %v4281_v54 }
 0x7e5   : > { %8053 = vmatmul.msk.bf16.gmra.mxu1 %vm4888_vm3, %v13091_v59  ;;  %v4348_v57 = vmul.f32 0.1, %v4282_v29 }
 0x7e6   : > { %v11653_v27 = vpop.f32.mrf.mxu3 }
 0x7e7   : > { %13092 = vst [vmem:[#allocation19_spill] sm:$0xff] %v11653_v27  ;;  %v4412_v59 = vmax.f32 %v4282_v29, %v4348_v57  ;;  %v5116_v13 = vpop.f32.mrf.mxu0  ;;  %v5410_v29 = vmul.f32 0.1, %v5346_v40 }
 0x7e9   : > { %v11682_v57 = vmax.f32 %v5346_v40, %v5410_v29 }
 0x7ea   : > { %v4283_v7 = vpop.f32.mrf.mxu2 }
 0x7eb   : > { %v4284_v11 = vadd.f32 %v11409_v6, %v4283_v7  ;;  %v11672_v6 = vld [vmem:[%s12552_s13] ss:$0 sm:$0xff] }
 0x7ed   : > { %v4349_v20 = vmul.f32 0.1, %v4284_v11 }
 0x7ee   : > { %v4768_v55 = vpop.f32.mrf.mxu3 }
 0x7ef   : > { %v4413_v27 = vmax.f32 %v4284_v11, %v4349_v20  ;;  %v11665_v22 = vadd.f32 %v5106_v43, %v4768_v55  ;;  %5667 = vmatmul.bf16.gmra.mxu2 %v5527_v0  ;;  %v11687_v61 = vpop.f32.mrf.mxu0 }
 0x7f0   : > { %13095 = vst [vmem:[#allocation22_spill] sm:$0xff] %v11687_v61 }
 0x7f1   : > { %v4533_v54 = vpack.c.bf16 %v4413_v27, %v4412_v59  ;;  %v5409_v27 = vmul.f32 0.1, %v5345_v52 }
 0x7f2   : > { %v5628_v26 = vpop.f32.mrf.mxu2 }
 0x7f3   : > { %7974 = vmatmul.msk.bf16.gmra.mxu3 %vm4546_vm2, %v4533_v54  ;;  %v5629_v43 = vadd.f32 %v11672_v6, %v5628_v26  ;;  %v11685_v0 = vmax.f32 %v5345_v52, %v5409_v27  ;;  %v5348_v52 = vadd.f32 %v11449_v41, %v11395_v9 }
 0x7f5   : > { %8054 = vmatmul.msk.bf16.gmra.mxu1 %vm4888_vm3, %v11007_v49  ;;  %v5788_v7 = vmul.f32 0.1, %v5629_v43  ;;  %v5528_v54 = vpack.c.bf16 %v11682_v57, %v11685_v0  ;;  %v8390_v49 = vld [vmem:[%s12555_s16] sm:$0xff]  ;;  %v5412_v61 = vmul.f32 0.1, %v5348_v52 }
 0x7f6   : > { %v11680_v12 = vpop.f32.mrf.mxu3  ;;  %6548 = vmatpush.bf16.msra.mxu0 %v8390_v49 }
 0x7f7   : > { %13094 = vst [vmem:[#allocation59_spill] sm:$0xff] %v11680_v12  ;;  %v5852_v55 = vmax.f32 %v5629_v43, %v5788_v7  ;;  %v5347_v7 = vadd.f32 %v11449_v41, %v11386_v63  ;;  %v11705_v49 = vmax.f32 %v5348_v52, %v5412_v61  ;;  %v5350_v52 = vadd.f32 %v11449_v41, %v11418_v19 }
 0x7f9   : > { %v5916_v29 = vadd.f32 %v5852_v55, %v11475_v5 }
 0x7fa   : > { %v5630_v11 = vpop.f32.mrf.mxu2 }
 0x7fb   : > { %v5631_v20 = vadd.f32 %v11672_v6, %v5630_v11 }
 0x7fd   : > { %v5789_v59 = vmul.f32 0.1, %v5631_v20 }
 0x7fe   : > { %v4773_v26 = vpop.f32.mrf.mxu3 }
 0x7ff   : > { %v5853_v62 = vmax.f32 %v5631_v20, %v5789_v59  ;;  %v11694_v40 = vadd.f32 %v5111_v56, %v4773_v26  ;;  %5672 = vmatmul.bf16.gmra.mxu2 %v5528_v54  ;;  %v5121_v56 = vpop.f32.mrf.mxu0  ;;  %v5411_v59 = vmul.f32 0.1, %v5347_v7  ;;  %v8394_v26 = vld [vmem:[%s12557_s18] sm:$0xff] }
 0x800   : > { %6994 = vmatpush.bf16.msra.mxu1 %v8394_v26 }
 0x801   : > { %v5917_v43 = vadd.f32 %v5853_v62, %v11471_v2  ;;  %v11708_v2 = vmax.f32 %v5347_v7, %v5411_v59  ;;  %v5349_v59 = vadd.f32 %v11449_v41, %v11404_v31 }
 0x802   : > { %v5633_v27 = vpop.f32.mrf.mxu2 }
 0x803   : > { %v5980_v11 = vpack.c.bf16 %v5917_v43, %v5916_v29  ;;  %v5634_v12 = vadd.f32 %v11672_v6, %v5633_v27  ;;  %v5529_v63 = vpack.c.bf16 %v11705_v49, %v11708_v2 }
 0x805   : > { %6088 = vmatmul.bf16.vlgmr.msra.gmra.mxu3 %v5980_v11  ;;  %v5790_v54 = vmul.f32 0.1, %v5634_v12 }
 0x806   : > { %v11703_v20 = vpop.f32.mrf.mxu3 }
 0x807   : > { %v5854_v62 = vmax.f32 %v5634_v12, %v5790_v54  ;;  %v11717_v61 = vpop.f32.mrf.mxu0 }
 0x809   : > { %v5918_v12 = vadd.f32 %v5854_v62, %v11497_v47 }
 0x80a   : > { %v5635_v9 = vpop.f32.mrf.mxu2 }
 0x80b   : > { %v5636_v5 = vadd.f32 %v11672_v6, %v5635_v9  ;;  %v5414_v9 = vmul.f32 0.1, %v5350_v52 }
 0x80d   : > { %v5791_v55 = vmul.f32 0.1, %v5636_v5  ;;  %v11728_v26 = vmax.f32 %v5350_v52, %v5414_v9  ;;  %v5352_v52 = vadd.f32 %v11449_v41, %v11434_v39 }
 0x80e   : > { %v4778_v29 = vpop.f32.mrf.mxu3 }
 0x80f   : > { %v5855_v43 = vmax.f32 %v5636_v5, %v5791_v55  ;;  %v11715_v27 = vadd.f32 %v5116_v13, %v4778_v29  ;;  %5677 = vmatmul.bf16.gmra.mxu2 %v5529_v63  ;;  %v5413_v55 = vmul.f32 0.1, %v5349_v59  ;;  %v5126_v19 = vpop.f32.mrf.mxu0 }
 0x811   : > { %v5919_v7 = vadd.f32 %v5855_v43, %v11494_v8  ;;  %v11731_v8 = vmax.f32 %v5349_v59, %v5413_v55  ;;  %v5351_v59 = vadd.f32 %v11449_v41, %v11425_v28 }
 0x812   : > { %v5638_v11 = vpop.f32.mrf.mxu2 }
 0x813   : > { %v5981_v54 = vpack.c.bf16 %v5919_v7, %v5918_v12  ;;  %v5639_v13 = vadd.f32 %v11672_v6, %v5638_v11  ;;  %v5530_v31 = vpack.c.bf16 %v11728_v26, %v11731_v8 }
 0x815   : > { %6093 = vmatmul.bf16.gmra.mxu3 %v5981_v54  ;;  %v5792_v63 = vmul.f32 0.1, %v5639_v13 }
 0x816   : > { %v11726_v5 = vpop.f32.mrf.mxu3 }
 0x817   : > { %v5856_v62 = vmax.f32 %v5639_v13, %v5792_v63  ;;  %v11743_v55 = vpop.f32.mrf.mxu0  ;;  %v5416_v63 = vmul.f32 0.1, %v5352_v52 }
 0x818   : > { %13096 = vst [vmem:[#allocation73_spill] sm:$0xff] %v11743_v55 }
 0x819   : > { %v5920_v54 = vadd.f32 %v5856_v62, %v11521_v1  ;;  %v11748_v39 = vmax.f32 %v5352_v52, %v5416_v63  ;;  %v5354_v52 = vadd.f32 %v11449_v41, %v11459_v17 }
 0x81a   : > { %v5640_v29 = vpop.f32.mrf.mxu2 }
 0x81b   : > { %v5641_v47 = vadd.f32 %v11672_v6, %v5640_v29 }
 0x81d   : > { %v5793_v43 = vmul.f32 0.1, %v5641_v47 }
 0x81e   : > { %v4783_v12 = vpop.f32.mrf.mxu3 }
 0x81f   : > { %v5857_v7 = vmax.f32 %v5641_v47, %v5793_v43  ;;  %v11735_v11 = vadd.f32 %v5121_v56, %v4783_v12  ;;  %5682 = vmatmul.bf16.gmra.mxu2 %v5530_v31  ;;  %v5415_v43 = vmul.f32 0.1, %v5351_v59 }
 0x821   : > { %v5921_v9 = vadd.f32 %v5857_v7, %v11518_v51  ;;  %v11751_v62 = vmax.f32 %v5351_v59, %v5415_v43 }
 0x822   : > { %v5643_v29 = vpop.f32.mrf.mxu2 }
 0x823   : > { %v5982_v13 = vpack.c.bf16 %v5921_v9, %v5920_v54  ;;  %v5644_v47 = vadd.f32 %v11672_v6, %v5643_v29  ;;  %v5531_v7 = vpack.c.bf16 %v11748_v39, %v11751_v62  ;;  %v5131_v54 = vpop.f32.mrf.mxu0 }
 0x825   : > { %6098 = vmatmul.bf16.gmra.mxu3 %v5982_v13  ;;  %v5794_v31 = vmul.f32 0.1, %v5644_v47 }
 0x826   : > { %v11746_v56 = vpop.f32.mrf.mxu3 }
 0x827   : > { %v5858_v12 = vmax.f32 %v5644_v47, %v5794_v31  ;;  %v5353_v47 = vadd.f32 %v11449_v41, %v11443_v30  ;;  %v5418_v31 = vmul.f32 0.1, %v5354_v52 }
 0x829   : > { %v5922_v63 = vadd.f32 %v5858_v12, %v11544_v23  ;;  %v11768_v17 = vmax.f32 %v5354_v52, %v5418_v31 }
 0x82a   : > { %v5645_v1 = vpop.f32.mrf.mxu2 }
 0x82b   : > { %v5646_v51 = vadd.f32 %v11672_v6, %v5645_v1 }
 0x82d   : > { %v5795_v28 = vmul.f32 0.1, %v5646_v51 }
 0x82e   : > { %v4788_v9 = vpop.f32.mrf.mxu3 }
 0x82f   : > { %v5859_v29 = vmax.f32 %v5646_v51, %v5795_v28  ;;  %v11755_v13 = vadd.f32 %v5126_v19, %v4788_v9  ;;  %5687 = vmatmul.bf16.gmra.mxu2 %v5531_v7  ;;  %v5417_v19 = vmul.f32 0.1, %v5353_v47  ;;  %v11766_v28 = vpop.f32.mrf.mxu0 }
 0x830   : > { %13097 = vst [vmem:[#allocation64_spill] sm:$0xff] %v11766_v28 }
 0x831   : > { %v5923_v1 = vadd.f32 %v5859_v29, %v11541_v4  ;;  %v11771_v12 = vmax.f32 %v5353_v47, %v5417_v19 }
 0x832   : > { %v5648_v59 = vpop.f32.mrf.mxu2 }
 0x833   : > { %v5983_v43 = vpack.c.bf16 %v5923_v1, %v5922_v63  ;;  %v5649_v55 = vadd.f32 %v11672_v6, %v5648_v59  ;;  %v5532_v29 = vpack.c.bf16 %v11768_v17, %v11771_v12 }
 0x835   : > { %6103 = vmatmul.bf16.gmra.mxu3 %v5983_v43  ;;  %v5796_v7 = vmul.f32 0.1, %v5649_v55  ;;  %v5356_v43 = vadd.f32 %v11449_v41, %v11483_v45 }
 0x836   : > { %v11764_v51 = vpop.f32.mrf.mxu3 }
 0x837   : > { %v5860_v9 = vmax.f32 %v5649_v55, %v5796_v7  ;;  %v5355_v55 = vadd.f32 %v11449_v41, %v11473_v46  ;;  %v5420_v7 = vmul.f32 0.1, %v5356_v43 }
 0x839   : > { %v5924_v52 = vadd.f32 %v5860_v9, %v11572_v44 }
 0x83a   : > { %v5650_v23 = vpop.f32.mrf.mxu2 }
 0x83b   : > { %v5651_v4 = vadd.f32 %v11672_v6, %v5650_v23  ;;  %v5136_v23 = vpop.f32.mrf.mxu0 }
 0x83d   : > { %v5797_v30 = vmul.f32 0.1, %v5651_v4 }
 0x83e   : > { %v4793_v63 = vpop.f32.mrf.mxu3 }
 0x83f   : > { %v5861_v1 = vmax.f32 %v5651_v4, %v5797_v30  ;;  %v11775_v59 = vadd.f32 %v5131_v54, %v4793_v63  ;;  %5692 = vmatmul.bf16.gmra.mxu2 %v5532_v29  ;;  %v5419_v4 = vmul.f32 0.1, %v5355_v55  ;;  %v11786_v29 = vmax.f32 %v5356_v43, %v5420_v7 }
 0x840   : > { %v5358_v43 = vadd.f32 %v11449_v41, %v11507_v34 }
 0x841   : > { %v5925_v31 = vadd.f32 %v5861_v1, %v11567_v15  ;;  %v11789_v15 = vmax.f32 %v5355_v55, %v5419_v4 }
 0x842   : > { %v5653_v47 = vpop.f32.mrf.mxu2 }
 0x843   : > { %v5984_v19 = vpack.c.bf16 %v5925_v31, %v5924_v52  ;;  %v5654_v28 = vadd.f32 %v11672_v6, %v5653_v47  ;;  %v11791_v9 = vpop.f32.mrf.mxu0  ;;  %v5533_v1 = vpack.c.bf16 %v11786_v29, %v11789_v15 }
 0x844   : > { %13098 = vst [vmem:[#allocation25_spill] sm:$0xff] %v11791_v9  ;;  %v11823_v9 = vpop.f32.mrf.mxu1 }
 0x845   : > { %6108 = vmatmul.bf16.gmra.mxu3 %v5984_v19  ;;  %v5798_v30 = vmul.f32 0.1, %v5654_v28 }
 0x846   : > { %v11784_v54 = vpop.f32.mrf.mxu3 }
 0x847   : > { %v5862_v63 = vmax.f32 %v5654_v28, %v5798_v30  ;;  %v5357_v28 = vadd.f32 %v11449_v41, %v11492_v35  ;;  %v5422_v30 = vmul.f32 0.1, %v5358_v43 }
 0x849   : > { %v5926_v19 = vadd.f32 %v5862_v63, %v11595_v24 }
 0x84a   : > { %v5655_v45 = vpop.f32.mrf.mxu2 }
 0x84b   : > { %v5656_v44 = vadd.f32 %v11672_v6, %v5655_v45 }
 0x84d   : > { %v5799_v46 = vmul.f32 0.1, %v5656_v44 }
 0x84e   : > { %v4798_v52 = vpop.f32.mrf.mxu3 }
 0x84f   : > { %v5863_v31 = vmax.f32 %v5656_v44, %v5799_v46  ;;  %v11795_v47 = vadd.f32 %v5136_v23, %v4798_v52  ;;  %5697 = vmatmul.bf16.gmra.mxu2 %v5533_v1  ;;  %v5141_v44 = vpop.f32.mrf.mxu0  ;;  %v5421_v46 = vmul.f32 0.1, %v5357_v28  ;;  %v11806_v52 = vmax.f32 %v5358_v43, %v5422_v30 }
 0x850   : > { %v5360_v43 = vadd.f32 %v11449_v41, %v11528_v58 }
 0x851   : > { %v5927_v55 = vadd.f32 %v5863_v31, %v11592_v14  ;;  %v11809_v14 = vmax.f32 %v5357_v28, %v5421_v46 }
 0x852   : > { %v5658_v7 = vpop.f32.mrf.mxu2 }
 0x853   : > { %v5985_v4 = vpack.c.bf16 %v5927_v55, %v5926_v19  ;;  %v5659_v45 = vadd.f32 %v11672_v6, %v5658_v7  ;;  %v5534_v35 = vpack.c.bf16 %v11806_v52, %v11809_v14 }
 0x855   : > { %6113 = vmatmul.bf16.gmra.mxu3 %v5985_v4  ;;  %v5800_v1 = vmul.f32 0.1, %v5659_v45 }
 0x856   : > { %v11804_v23 = vpop.f32.mrf.mxu3 }
 0x857   : > { %13099 = vst [vmem:[#allocation78_spill] sm:$0xff] %v11804_v23  ;;  %v5864_v63 = vmax.f32 %v5659_v45, %v5800_v1  ;;  %v11815_v4 = vpop.f32.mrf.mxu0  ;;  %v5359_v45 = vadd.f32 %v11449_v41, %v11516_v50 }
 0x858   : > { %13101 = vst [vmem:[#allocation28_spill] sm:$0xff] %v11815_v4 }
 0x859   : > { %v5928_v30 = vadd.f32 %v5864_v63, %v11617_v48 }
 0x85a   : > { %v5660_v34 = vpop.f32.mrf.mxu2 }
 0x85b   : > { %v5661_v24 = vadd.f32 %v11672_v6, %v5660_v34  ;;  %v5424_v34 = vmul.f32 0.1, %v5360_v43 }
 0x85d   : > { %v5801_v31 = vmul.f32 0.1, %v5661_v24  ;;  %v11828_v58 = vmax.f32 %v5360_v43, %v5424_v34  ;;  %v5362_v43 = vadd.f32 %v11449_v41, %v11553_v18 }
 0x85e   : > { %v4803_v19 = vpop.f32.mrf.mxu3 }
 0x85f   : > { %v5865_v55 = vmax.f32 %v5661_v24, %v5801_v31  ;;  %v11813_v7 = vadd.f32 %v5141_v44, %v4803_v19  ;;  %5702 = vmatmul.bf16.gmra.mxu2 %v5534_v35  ;;  %v5423_v31 = vmul.f32 0.1, %v5359_v45  ;;  %v5146_v48 = vpop.f32.mrf.mxu0 }
 0x861   : > { %13100 = vst [vmem:[#allocation69_spill] sm:$0xff] %v11813_v7  ;;  %v5929_v28 = vadd.f32 %v5865_v55, %v11614_v10  ;;  %v11831_v19 = vmax.f32 %v5359_v45, %v5423_v31 }
 0x862   : > { %v5663_v46 = vpop.f32.mrf.mxu2 }
 0x863   : > { %v5986_v1 = vpack.c.bf16 %v5929_v28, %v5928_v30  ;;  %v5664_v44 = vadd.f32 %v11672_v6, %v5663_v46  ;;  %v5535_v30 = vpack.c.bf16 %v11828_v58, %v11831_v19  ;;  %v11835_v46 = vpop.f32.mrf.mxu1 }
 0x865   : > { %6118 = vmatmul.bf16.gmra.mxu3 %v5986_v1  ;;  %v5802_v35 = vmul.f32 0.1, %v5664_v44 }
 0x866   : > { %v11826_v24 = vpop.f32.mrf.mxu3 }
 0x867   : > { %13102 = vst [vmem:[#allocation81_spill] sm:$0xff] %v11826_v24  ;;  %v5866_v50 = vmax.f32 %v5664_v44, %v5802_v35  ;;  %v5361_v44 = vadd.f32 %v11449_v41, %v11539_v42  ;;  %v5426_v24 = vmul.f32 0.1, %v5362_v43 }
 0x869   : > { %v5930_v34 = vadd.f32 %v5866_v50, %v11639_v3  ;;  %v11852_v3 = vmax.f32 %v5362_v43, %v5426_v24  ;;  %v5364_v24 = vadd.f32 %v11449_v41, %v11579_v37  ;;  %v11873_v37 = vld [vmem:[%s13107_s21] ss:$0 sm:$0xff] }
 0x86a   : > { %v5665_v63 = vpop.f32.mrf.mxu2 }
 0x86b   : > { %v5666_v10 = vadd.f32 %v11672_v6, %v5665_v63  ;;  %v11845_v63 = vpop.f32.mrf.mxu0 }
 0x86c   : > { %13104 = vst [vmem:[#allocation30_spill] sm:$0xff] %v11845_v63 }
 0x86d   : > { %v5803_v55 = vmul.f32 0.1, %v5666_v10 }
 0x86e   : > { %v4808_v28 = vpop.f32.mrf.mxu3 }
 0x86f   : > { %v5867_v1 = vmax.f32 %v5666_v10, %v5803_v55  ;;  %v11837_v4 = vadd.f32 %v5146_v48, %v4808_v28  ;;  %5707 = vmatmul.bf16.gmra.mxu2 %v5535_v30  ;;  %v5425_v55 = vmul.f32 0.1, %v5361_v44  ;;  %v11850_v30 = vpop.f32.mrf.mxu1 }
 0x871   : > { %13103 = vst [vmem:[#allocation74_spill] sm:$0xff] %v11837_v4  ;;  %v5931_v45 = vadd.f32 %v5867_v1, %v11636_v36  ;;  %v11855_v28 = vmax.f32 %v5361_v44, %v5425_v55 }
 0x872   : > { %v5668_v31 = vpop.f32.mrf.mxu2 }
 0x873   : > { %v5987_v35 = vpack.c.bf16 %v5931_v45, %v5930_v34  ;;  %v5669_v10 = vadd.f32 %v11672_v6, %v5668_v31  ;;  %v5536_v34 = vpack.c.bf16 %v11852_v3, %v11855_v28  ;;  %v5151_v45 = vpop.f32.mrf.mxu0 }
 0x875   : > { %6123 = vmatmul.bf16.gmra.mxu3 %v5987_v35  ;;  %v5804_v18 = vmul.f32 0.1, %v5669_v10 }
 0x876   : > { %v11848_v48 = vpop.f32.mrf.mxu3 }
 0x877   : > { %13105 = vst [vmem:[#allocation84_spill] sm:$0xff] %v11848_v48  ;;  %v5868_v42 = vmax.f32 %v5669_v10, %v5804_v18  ;;  %v5363_v10 = vadd.f32 %v11449_v41, %v11565_v60  ;;  %v11867_v55 = vpop.f32.mrf.mxu1  ;;  %v5428_v48 = vmul.f32 0.1, %v5364_v24 }
 0x879   : > { %v5932_v43 = vadd.f32 %v5868_v42, %v11661_v32 }
 0x87a   : > { %v5670_v36 = vpop.f32.mrf.mxu2 }
 0x87b   : > { %v5671_v50 = vadd.f32 %v11672_v6, %v5670_v36 }
 0x87d   : > { %v5805_v1 = vmul.f32 0.1, %v5671_v50 }
 0x87e   : > { %v4813_v31 = vpop.f32.mrf.mxu3 }
 0x87f   : > { %v5869_v35 = vmax.f32 %v5671_v50, %v5805_v1  ;;  %v11859_v63 = vadd.f32 %v5151_v45, %v4813_v31  ;;  %5712 = vmatmul.bf16.gmra.mxu2 %v5536_v34  ;;  %v5427_v1 = vmul.f32 0.1, %v5363_v10  ;;  %v11880_v31 = vpop.f32.mrf.mxu1 }
 0x881   : > { %13106 = vst [vmem:[#allocation79_spill] sm:$0xff] %v11859_v63  ;;  %v5933_v36 = vadd.f32 %v5869_v35, %v11658_v21  ;;  %v11875_v21 = vmax.f32 %v5364_v24, %v5428_v48  ;;  %v11878_v42 = vmax.f32 %v5363_v10, %v5427_v1  ;;  %v5366_v48 = vadd.f32 %v11449_v41, %v11604_v25 }
 0x882   : > { %v5673_v44 = vpop.f32.mrf.mxu2 }
 0x883   : > { %v5988_v18 = vpack.c.bf16 %v5933_v36, %v5932_v43  ;;  %v5674_v50 = vadd.f32 %v11672_v6, %v5673_v44  ;;  %v5537_v44 = vpack.c.bf16 %v11875_v21, %v11878_v42  ;;  %v5430_v41 = vmul.f32 0.1, %v5366_v48 }
 0x885   : > { %6128 = vmatmul.bf16.gmra.mxu3 %v5988_v18  ;;  %v5806_v45 = vmul.f32 0.1, %v5674_v50  ;;  %v11901_v7 = vmax.f32 %v5366_v48, %v5430_v41 }
 0x887   : > { %v5870_v35 = vmax.f32 %v5674_v50, %v5806_v45 }
 0x888   : > { %v6089_v34 = vpop.f32.mrf.mxu3 }
 0x889   : > { %v6090_v43 = vadd.f32 %v11873_v37, %v6089_v34  ;;  %v5934_v63 = vadd.f32 %v5870_v35, %v11685_v0  ;;  %v11893_v34 = vld [vmem:[%s12550_s11] ss:$0 sm:$0xff]  ;;  %v11898_v35 = vpop.f32.mrf.mxu1 }
 0x88a   : > { %v5675_v32 = vpop.f32.mrf.mxu2  ;;  %v5365_v45 = vadd.f32 %v11893_v34, %v11590_v33  ;;  %v13108_v33 = vld [vmem:[#allocation58_spill] sm:$0xff] }
 0x88b   : > { %v5676_v60 = vadd.f32 %v11672_v6, %v5675_v32  ;;  %v6249_v32 = vmul.f32 0.1, %v6090_v43 }
 0x88d   : > { %v5807_v36 = vmul.f32 0.1, %v5676_v60  ;;  %v6313_v25 = vmax.f32 %v6090_v43, %v6249_v32 }
 0x88f   : > { %v5871_v18 = vmax.f32 %v5676_v60, %v5807_v36  ;;  %5717 = vmatmul.bf16.gmra.mxu2 %v5537_v44 }
 0x890   : > { %v6091_v24 = vpop.f32.mrf.mxu3 }
 0x891   : > { %v5935_v10 = vadd.f32 %v5871_v18, %v11682_v57  ;;  %v6092_v1 = vadd.f32 %v11873_v37, %v6091_v24  ;;  %v5429_v57 = vmul.f32 0.1, %v5365_v45 }
 0x892   : > { %v5678_v50 = vpop.f32.mrf.mxu2 }
 0x893   : > { %v6250_v60 = vmul.f32 0.1, %v6092_v1  ;;  %v5989_v36 = vpack.c.bf16 %v5935_v10, %v5934_v63  ;;  %v5679_v0 = vadd.f32 %v11672_v6, %v5678_v50  ;;  %v5095_v63 = vadd.f32 %v13108_v33, %v11611_v16 }
 0x894   : > { %v11906_v32 = vmax.f32 %v5365_v45, %v5429_v57  ;;  %v5266_v10 = vadd.f32 %v11835_v46, %v11622_v38 }
 0x895   : > { %v6314_v44 = vmax.f32 %v6092_v1, %v6250_v60  ;;  %6133 = vmatmul.bf16.gmra.mxu3 %v5989_v36  ;;  %v5808_v4 = vmul.f32 0.1, %v5679_v0  ;;  %v5264_v48 = vadd.f32 %v11823_v9, %v5095_v63 }
 0x896   : > { %v5538_v36 = vpack.c.bf16 %v11901_v7, %v11906_v32  ;;  %v5368_v16 = vadd.f32 %v11893_v34, %v5266_v10 }
 0x897   : > { %v6377_v18 = vpack.c.bf16 %v6314_v44, %v6313_v25  ;;  %v5872_v1 = vmax.f32 %v5679_v0, %v5808_v4  ;;  %v5367_v0 = vadd.f32 %v11893_v34, %v5264_v48 }
 0x898   : > { %v6094_v24 = vpop.f32.mrf.mxu3  ;;  %v5432_v9 = vmul.f32 0.1, %v5368_v16 }
 0x899   : > { %8135 = vmatmul.msk.bf16.vlgmr.msra.gmra.mxu0 %vm4888_vm3, %v6377_v18  ;;  %v6095_v50 = vadd.f32 %v11873_v37, %v6094_v24  ;;  %v5936_v45 = vadd.f32 %v5872_v1, %v11708_v2 }
 0x89a   : > { %v5680_v23 = vpop.f32.mrf.mxu2 }
 0x89b   : > { %v5681_v43 = vadd.f32 %v11672_v6, %v5680_v23  ;;  %v11915_v23 = vpop.f32.mrf.mxu1  ;;  %v6251_v44 = vmul.f32 0.1, %v6095_v50 }
 0x89d   : > { %v5809_v60 = vmul.f32 0.1, %v5681_v43  ;;  %v6315_v24 = vmax.f32 %v6095_v50, %v6251_v44 }
 0x89f   : > { %v5873_v41 = vmax.f32 %v5681_v43, %v5809_v60  ;;  %5722 = vmatmul.bf16.gmra.mxu2 %v5538_v36  ;;  %v5431_v43 = vmul.f32 0.1, %v5367_v0  ;;  %v13109_v36 = vld [vmem:[#allocation49_spill] sm:$0xff] }
 0x8a0   : > { %v6096_v25 = vpop.f32.mrf.mxu3  ;;  %v5100_v48 = vadd.f32 %v13109_v36, %v11633_v53 }
 0x8a1   : > { %v5937_v38 = vadd.f32 %v5873_v41, %v11705_v49  ;;  %v6097_v4 = vadd.f32 %v11873_v37, %v6096_v25  ;;  %v11923_v49 = vmax.f32 %v5368_v16, %v5432_v9  ;;  %v11930_v25 = vmax.f32 %v5367_v0, %v5431_v43 }
 0x8a2   : > { %v5683_v46 = vpop.f32.mrf.mxu2 }
 0x8a3   : > { %v6252_v57 = vmul.f32 0.1, %v6097_v4  ;;  %v5990_v18 = vpack.c.bf16 %v5937_v38, %v5936_v45  ;;  %v5684_v63 = vadd.f32 %v11672_v6, %v5683_v46  ;;  %v11927_v41 = vpop.f32.mrf.mxu1  ;;  %v13110_v45 = vld [vmem:[#allocation54_spill] sm:$0xff]  ;;  %v5539_v16 = vpack.c.bf16 %v11923_v49, %v11930_v25 }
 0x8a4   : > { %v5271_v44 = vadd.f32 %v11867_v55, %v13110_v45 }
 0x8a5   : > { %v6316_v33 = vmax.f32 %v6097_v4, %v6252_v57  ;;  %6138 = vmatmul.bf16.gmra.mxu3 %v5990_v18  ;;  %v5810_v2 = vmul.f32 0.1, %v5684_v63  ;;  %v5269_v57 = vadd.f32 %v11850_v30, %v5100_v48 }
 0x8a6   : > { %v5370_v53 = vadd.f32 %v11893_v34, %v5271_v44 }
 0x8a7   : > { %v6378_v10 = vpack.c.bf16 %v6316_v33, %v6315_v24  ;;  %v5874_v38 = vmax.f32 %v5684_v63, %v5810_v2  ;;  %v5369_v43 = vadd.f32 %v11893_v34, %v5269_v57 }
 0x8a8   : > { %v6099_v60 = vpop.f32.mrf.mxu3  ;;  %v5434_v2 = vmul.f32 0.1, %v5370_v53 }
 0x8a9   : > { %8136 = vmatmul.msk.bf16.gmra.mxu0 %vm4888_vm3, %v6378_v10  ;;  %v6100_v4 = vadd.f32 %v11873_v37, %v6099_v60  ;;  %v5938_v0 = vadd.f32 %v5874_v38, %v11731_v8 }
 0x8aa   : > { %v5685_v1 = vpop.f32.mrf.mxu2 }
 0x8ab   : > { %v5686_v50 = vadd.f32 %v11672_v6, %v5685_v1  ;;  %v6253_v24 = vmul.f32 0.1, %v6100_v4  ;;  %v11943_v1 = vpop.f32.mrf.mxu1 }
 0x8ad   : > { %v5811_v46 = vmul.f32 0.1, %v5686_v50  ;;  %v6317_v30 = vmax.f32 %v6100_v4, %v6253_v24  ;;  %v5276_v4 = vadd.f32 %v11898_v35, %v11665_v22 }
 0x8af   : > { %v5875_v18 = vmax.f32 %v5686_v50, %v5811_v46  ;;  %5727 = vmatmul.bf16.gmra.mxu2 %v5539_v16  ;;  %v5433_v50 = vmul.f32 0.1, %v5369_v43  ;;  %v13111_v46 = vld [vmem:[#allocation19_spill] sm:$0xff]  ;;  %v13112_v16 = vld [vmem:[#allocation16_spill] sm:$0xff] }
 0x8b0   : > { %v6101_v9 = vpop.f32.mrf.mxu3  ;;  %v5105_v57 = vadd.f32 %v13112_v16, %v13111_v46 }
 0x8b1   : > { %v5939_v33 = vadd.f32 %v5875_v18, %v11728_v26  ;;  %v6102_v55 = vadd.f32 %v11873_v37, %v6101_v9  ;;  %v11947_v26 = vmax.f32 %v5370_v53, %v5434_v2  ;;  %v11952_v9 = vmax.f32 %v5369_v43, %v5433_v50 }
 0x8b2   : > { %v5688_v63 = vpop.f32.mrf.mxu2  ;;  %v5274_v53 = vadd.f32 %v11880_v31, %v5105_v57 }
 0x8b3   : > { %v6254_v10 = vmul.f32 0.1, %v6102_v55  ;;  %v5991_v60 = vpack.c.bf16 %v5939_v33, %v5938_v0  ;;  %v5689_v48 = vadd.f32 %v11672_v6, %v5688_v63  ;;  %v11960_v63 = vpop.f32.mrf.mxu1 }
 0x8b5   : > { %v6318_v36 = vmax.f32 %v6102_v55, %v6254_v10  ;;  %6143 = vmatmul.bf16.gmra.mxu3 %v5991_v60  ;;  %v5812_v44 = vmul.f32 0.1, %v5689_v48  ;;  %v5540_v55 = vpack.c.bf16 %v11947_v26, %v11952_v9  ;;  %v5372_v60 = vadd.f32 %v11893_v34, %v5276_v4 }
 0x8b7   : > { %v6379_v8 = vpack.c.bf16 %v6318_v36, %v6317_v30  ;;  %v5876_v0 = vmax.f32 %v5689_v48, %v5812_v44  ;;  %v5371_v48 = vadd.f32 %v11893_v34, %v5274_v53  ;;  %v5436_v31 = vmul.f32 0.1, %v5372_v60 }
 0x8b8   : > { %v6104_v45 = vpop.f32.mrf.mxu3 }
 0x8b9   : > { %8137 = vmatmul.msk.bf16.gmra.mxu0 %vm4888_vm3, %v6379_v8  ;;  %v6105_v24 = vadd.f32 %v11873_v37, %v6104_v45  ;;  %v5940_v2 = vadd.f32 %v5876_v0, %v11751_v62  ;;  %v5435_v46 = vmul.f32 0.1, %v5371_v48  ;;  %v13113_v0 = vld [vmem:[#allocation59_spill] sm:$0xff] }
 0x8ba   : > { %v5690_v38 = vpop.f32.mrf.mxu2 }
 0x8bb   : > { %v5691_v18 = vadd.f32 %v11672_v6, %v5690_v38  ;;  %v6255_v30 = vmul.f32 0.1, %v6105_v24  ;;  %v11968_v62 = vpop.f32.mrf.mxu1  ;;  %v11976_v53 = vmax.f32 %v5371_v48, %v5435_v46 }
 0x8bd   : > { %v5813_v33 = vmul.f32 0.1, %v5691_v18  ;;  %v6319_v45 = vmax.f32 %v6105_v24, %v6255_v30 }
 0x8bf   : > { %v5877_v10 = vmax.f32 %v5691_v18, %v5813_v33  ;;  %5732 = vmatmul.bf16.gmra.mxu2 %v5540_v55  ;;  %v13114_v33 = vld [vmem:[#allocation63_spill] sm:$0xff] }
 0x8c0   : > { %v6106_v43 = vpop.f32.mrf.mxu3  ;;  %v5110_v55 = vadd.f32 %v13114_v33, %v13113_v0 }
 0x8c1   : > { %v5941_v22 = vadd.f32 %v5877_v10, %v11748_v39  ;;  %v6107_v35 = vadd.f32 %v11873_v37, %v6106_v43  ;;  %v11971_v39 = vmax.f32 %v5372_v60, %v5436_v31  ;;  %v5281_v10 = vadd.f32 %v11927_v41, %v11694_v40 }
 0x8c2   : > { %v5693_v36 = vpop.f32.mrf.mxu2  ;;  %v5279_v60 = vadd.f32 %v11915_v23, %v5110_v55 }
 0x8c3   : > { %v6256_v50 = vmul.f32 0.1, %v6107_v35  ;;  %v5992_v8 = vpack.c.bf16 %v5941_v22, %v5940_v2  ;;  %v5694_v38 = vadd.f32 %v11672_v6, %v5693_v36  ;;  %v5541_v22 = vpack.c.bf16 %v11971_v39, %v11976_v53 }
 0x8c4   : > { %v5374_v36 = vadd.f32 %v11893_v34, %v5281_v10 }
 0x8c5   : > { %v6320_v44 = vmax.f32 %v6107_v35, %v6256_v50  ;;  %6148 = vmatmul.bf16.gmra.mxu3 %v5992_v8  ;;  %v5814_v18 = vmul.f32 0.1, %v5694_v38 }
 0x8c7   : > { %v6380_v16 = vpack.c.bf16 %v6320_v44, %v6319_v45  ;;  %v5878_v43 = vmax.f32 %v5694_v38, %v5814_v18  ;;  %v5373_v45 = vadd.f32 %v11893_v34, %v5279_v60  ;;  %v5290_v44 = vpop.f32.mrf.mxu1 }
 0x8c8   : > { %v6109_v57 = vpop.f32.mrf.mxu3 }
 0x8c9   : > { %8138 = vmatmul.msk.bf16.gmra.mxu0 %vm4888_vm3, %v6380_v16  ;;  %v6110_v2 = vadd.f32 %v11873_v37, %v6109_v57  ;;  %v5942_v48 = vadd.f32 %v5878_v43, %v11771_v12  ;;  %v5438_v16 = vmul.f32 0.1, %v5374_v36 }
 0x8ca   : > { %v5695_v4 = vpop.f32.mrf.mxu2 }
 0x8cb   : > { %v5696_v24 = vadd.f32 %v11672_v6, %v5695_v4  ;;  %v6257_v8 = vmul.f32 0.1, %v6110_v2  ;;  %v5437_v4 = vmul.f32 0.1, %v5373_v45 }
 0x8cd   : > { %v5815_v30 = vmul.f32 0.1, %v5696_v24  ;;  %v6321_v23 = vmax.f32 %v6110_v2, %v6257_v8  ;;  %v5286_v2 = vadd.f32 %v11960_v63, %v11715_v27 }
 0x8cf   : > { %v5879_v35 = vmax.f32 %v5696_v24, %v5815_v30  ;;  %5737 = vmatmul.bf16.gmra.mxu2 %v5541_v22  ;;  %v13115_v24 = vld [vmem:[#allocation68_spill] sm:$0xff]  ;;  %v11996_v30 = vmax.f32 %v5373_v45, %v5437_v4  ;;  %v12000_v22 = vpop.f32.mrf.mxu1 }
 0x8d0   : > { %v6111_v50 = vpop.f32.mrf.mxu3  ;;  %v5115_v10 = vadd.f32 %v13115_v24, %v11703_v20  ;;  %v5376_v20 = vadd.f32 %v11893_v34, %v5286_v2  ;;  %v13116_v24 = vld [vmem:[#allocation22_spill] sm:$0xff] }
 0x8d1   : > { %v5943_v31 = vadd.f32 %v5879_v35, %v11768_v17  ;;  %v6112_v40 = vadd.f32 %v11873_v37, %v6111_v50  ;;  %v11991_v17 = vmax.f32 %v5374_v36, %v5438_v16 }
 0x8d2   : > { %v5698_v41 = vpop.f32.mrf.mxu2 }
 0x8d3   : > { %v6258_v38 = vmul.f32 0.1, %v6112_v40  ;;  %v5993_v46 = vpack.c.bf16 %v5943_v31, %v5942_v48  ;;  %v5699_v18 = vadd.f32 %v11672_v6, %v5698_v41  ;;  %v5542_v36 = vpack.c.bf16 %v11991_v17, %v11996_v30 }
 0x8d4   : > { %v5284_v48 = vadd.f32 %v11943_v1, %v5115_v10  ;;  %v5120_v10 = vadd.f32 %v13116_v24, %v11726_v5 }
 0x8d5   : > { %v6322_v57 = vmax.f32 %v6112_v40, %v6258_v38  ;;  %6153 = vmatmul.bf16.gmra.mxu3 %v5993_v46  ;;  %v5816_v33 = vmul.f32 0.1, %v5699_v18 }
 0x8d6   : > { %v5375_v38 = vadd.f32 %v11893_v34, %v5284_v48 }
 0x8d7   : > { %v6381_v0 = vpack.c.bf16 %v6322_v57, %v6321_v23  ;;  %v5880_v60 = vmax.f32 %v5699_v18, %v5816_v33  ;;  %v5440_v23 = vmul.f32 0.1, %v5376_v20 }
 0x8d8   : > { %v6114_v12 = vpop.f32.mrf.mxu3  ;;  %v5439_v4 = vmul.f32 0.1, %v5375_v38 }
 0x8d9   : > { %8139 = vmatmul.msk.bf16.gmra.mxu0 %vm4888_vm3, %v6381_v0  ;;  %v6115_v35 = vadd.f32 %v11873_v37, %v6114_v12  ;;  %v5944_v40 = vadd.f32 %v5880_v60, %v11789_v15  ;;  %v5295_v0 = vpop.f32.mrf.mxu1  ;;  %v5291_v60 = vadd.f32 %v5290_v44, %v11735_v11 }
 0x8da   : > { %v5700_v55 = vpop.f32.mrf.mxu2  ;;  %v12018_v2 = vmax.f32 %v5375_v38, %v5439_v4 }
 0x8db   : > { %v5701_v43 = vadd.f32 %v11672_v6, %v5700_v55  ;;  %v6259_v41 = vmul.f32 0.1, %v6115_v35 }
 0x8dd   : > { %v5817_v50 = vmul.f32 0.1, %v5701_v43  ;;  %v6323_v57 = vmax.f32 %v6115_v35, %v6259_v41 }
 0x8df   : > { %v5881_v8 = vmax.f32 %v5701_v43, %v5817_v50  ;;  %5742 = vmatmul.bf16.gmra.mxu2 %v5542_v36 }
 0x8e0   : > { %v6116_v31 = vpop.f32.mrf.mxu3 }
 0x8e1   : > { %v5945_v27 = vadd.f32 %v5881_v8, %v11786_v29  ;;  %v6117_v63 = vadd.f32 %v11873_v37, %v6116_v31  ;;  %v12013_v29 = vmax.f32 %v5376_v20, %v5440_v23  ;;  %v5289_v8 = vadd.f32 %v11968_v62, %v5120_v10 }
 0x8e2   : > { %v5703_v45 = vpop.f32.mrf.mxu2  ;;  %v5378_v31 = vadd.f32 %v11893_v34, %v5291_v60  ;;  %v5296_v10 = vadd.f32 %v5295_v0, %v11755_v13 }
 0x8e3   : > { %v6260_v46 = vmul.f32 0.1, %v6117_v63  ;;  %v5994_v16 = vpack.c.bf16 %v5945_v27, %v5944_v40  ;;  %v5704_v18 = vadd.f32 %v11672_v6, %v5703_v45  ;;  %v5543_v48 = vpack.c.bf16 %v12013_v29, %v12018_v2  ;;  %v12026_v40 = vpop.f32.mrf.mxu1 }
 0x8e4   : > { %v5377_v45 = vadd.f32 %v11893_v34, %v5289_v8  ;;  %v5442_v62 = vmul.f32 0.1, %v5378_v31 }
 0x8e5   : > { %v6324_v1 = vmax.f32 %v6117_v63, %v6260_v46  ;;  %6158 = vmatmul.bf16.gmra.mxu3 %v5994_v16  ;;  %v5818_v33 = vmul.f32 0.1, %v5704_v18 }
 0x8e7   : > { %v6382_v12 = vpack.c.bf16 %v6324_v1, %v6323_v57  ;;  %v5882_v35 = vmax.f32 %v5704_v18, %v5818_v33  ;;  %v5441_v1 = vmul.f32 0.1, %v5377_v45 }
 0x8e8   : > { %v6119_v15 = vpop.f32.mrf.mxu3 }
 0x8e9   : > { %8140 = vmatmul.msk.bf16.gmra.mxu0 %vm4888_vm3, %v6382_v12  ;;  %v6120_v50 = vadd.f32 %v11873_v37, %v6119_v15  ;;  %v5946_v41 = vadd.f32 %v5882_v35, %v11809_v14  ;;  %v5125_v15 = vadd.f32 %v11717_v61, %v11746_v56  ;;  %v12039_v24 = vmax.f32 %v5377_v45, %v5441_v1  ;;  %v12060_v1 = vld [vmem:[%s12552_s13] ss:$0 sm:$0xff] }
 0x8ea   : > { %v5705_v55 = vpop.f32.mrf.mxu2  ;;  %v5380_v61 = vadd.f32 %v11893_v34, %v5296_v10 }
 0x8eb   : > { %v5706_v43 = vadd.f32 %v11672_v6, %v5705_v55  ;;  %v6261_v27 = vmul.f32 0.1, %v6120_v50  ;;  %v5300_v33 = vpop.f32.mrf.mxu1 }
 0x8ed   : > { %v5819_v36 = vmul.f32 0.1, %v5706_v43  ;;  %v6325_v16 = vmax.f32 %v6120_v50, %v6261_v27 }
 0x8ef   : > { %v5883_v20 = vmax.f32 %v5706_v43, %v5819_v36  ;;  %5747 = vmatmul.bf16.gmra.mxu2 %v5543_v48  ;;  %v5294_v36 = vadd.f32 %v12000_v22, %v5125_v15 }
 0x8f0   : > { %v6121_v5 = vpop.f32.mrf.mxu3 }
 0x8f1   : > { %v5947_v11 = vadd.f32 %v5883_v20, %v11806_v52  ;;  %v6122_v44 = vadd.f32 %v11873_v37, %v6121_v5  ;;  %v12034_v52 = vmax.f32 %v5378_v31, %v5442_v62  ;;  %v5379_v5 = vadd.f32 %v11893_v34, %v5294_v36 }
 0x8f2   : > { %v5708_v63 = vpop.f32.mrf.mxu2 }
 0x8f3   : > { %v6262_v38 = vmul.f32 0.1, %v6122_v44  ;;  %v5995_v46 = vpack.c.bf16 %v5947_v11, %v5946_v41  ;;  %v5709_v57 = vadd.f32 %v11672_v6, %v5708_v63  ;;  %v5544_v50 = vpack.c.bf16 %v12034_v52, %v12039_v24 }
 0x8f4   : > { %v5444_v11 = vmul.f32 0.1, %v5380_v61 }
 0x8f5   : > { %v6326_v23 = vmax.f32 %v6122_v44, %v6262_v38  ;;  %6163 = vmatmul.bf16.gmra.mxu3 %v5995_v46  ;;  %v5820_v14 = vmul.f32 0.1, %v5709_v57  ;;  %v5303_v44 = vpop.f32.mrf.mxu1  ;;  %v5443_v38 = vmul.f32 0.1, %v5379_v5 }
 0x8f7   : > { %v6383_v18 = vpack.c.bf16 %v6326_v23, %v6325_v16  ;;  %v5884_v43 = vmax.f32 %v5709_v57, %v5820_v14  ;;  %v13117_v23 = vld [vmem:[#allocation73_spill] sm:$0xff] }
 0x8f8   : > { %v6124_v4 = vpop.f32.mrf.mxu3  ;;  %v5130_v57 = vadd.f32 %v13117_v23, %v11764_v51 }
 0x8f9   : > { %8141 = vmatmul.msk.bf16.gmra.mxu0 %vm4888_vm3, %v6383_v18  ;;  %v6125_v60 = vadd.f32 %v11873_v37, %v6124_v4  ;;  %v5948_v8 = vadd.f32 %v5884_v43, %v11831_v19  ;;  %v12063_v18 = vmax.f32 %v5379_v5, %v5443_v38  ;;  %v5301_v4 = vadd.f32 %v5300_v33, %v11775_v59 }
 0x8fa   : > { %v5710_v12 = vpop.f32.mrf.mxu2  ;;  %v5299_v51 = vadd.f32 %v12026_v40, %v5130_v57 }
 0x8fb   : > { %v5711_v55 = vadd.f32 %v11672_v6, %v5710_v12  ;;  %v6263_v20 = vmul.f32 0.1, %v6125_v60 }
 0x8fd   : > { %v5821_v35 = vmul.f32 0.1, %v5711_v55  ;;  %v6327_v22 = vmax.f32 %v6125_v60, %v6263_v20  ;;  %v5305_v10 = vpop.f32.mrf.mxu1  ;;  %v5382_v60 = vadd.f32 %v11893_v34, %v5301_v4 }
 0x8ff   : > { %v5885_v48 = vmax.f32 %v5711_v55, %v5821_v35  ;;  %5752 = vmatmul.bf16.gmra.mxu2 %v5544_v50  ;;  %v5446_v20 = vmul.f32 0.1, %v5382_v60 }
 0x900   : > { %v6126_v56 = vpop.f32.mrf.mxu3 }
 0x901   : > { %v5949_v31 = vadd.f32 %v5885_v48, %v11828_v58  ;;  %v6127_v13 = vadd.f32 %v11873_v37, %v6126_v56  ;;  %v12053_v58 = vmax.f32 %v5380_v61, %v5444_v11  ;;  %v5381_v61 = vadd.f32 %v11893_v34, %v5299_v51 }
 0x902   : > { %v5713_v0 = vpop.f32.mrf.mxu2 }
 0x903   : > { %v6264_v41 = vmul.f32 0.1, %v6127_v13  ;;  %v5996_v27 = vpack.c.bf16 %v5949_v31, %v5948_v8  ;;  %v5714_v45 = vadd.f32 %v11672_v6, %v5713_v0  ;;  %v5545_v55 = vpack.c.bf16 %v12053_v58, %v12063_v18 }
 0x904   : > { %v5445_v5 = vmul.f32 0.1, %v5381_v61 }
 0x905   : > { %v6328_v63 = vmax.f32 %v6127_v13, %v6264_v41  ;;  %6168 = vmatmul.bf16.gmra.mxu3 %v5996_v27  ;;  %v5822_v62 = vmul.f32 0.1, %v5714_v45  ;;  %v5308_v11 = vpop.f32.mrf.mxu1 }
 0x907   : > { %v6384_v46 = vpack.c.bf16 %v6328_v63, %v6327_v22  ;;  %v5886_v14 = vmax.f32 %v5714_v45, %v5822_v62  ;;  %v12082_v22 = vmax.f32 %v5382_v60, %v5446_v20  ;;  %v13119_v63 = vld [vmem:[#allocation64_spill] sm:$0xff]  ;;  %v12088_v62 = vmax.f32 %v5381_v61, %v5445_v5 }
 0x908   : > { %v6129_v19 = vpop.f32.mrf.mxu3  ;;  %v5135_v45 = vadd.f32 %v13119_v63, %v11784_v54  ;;  %v13121_v63 = vld [vmem:[#allocation25_spill] sm:$0xff] }
 0x909   : > { %8142 = vmatmul.msk.bf16.gmra.mxu0 %vm4888_vm3, %v6384_v46  ;;  %v6130_v12 = vadd.f32 %v11873_v37, %v6129_v19  ;;  %v5950_v50 = vadd.f32 %v5886_v14, %v11855_v28  ;;  %v5546_v4 = vpack.c.bf16 %v12082_v22, %v12088_v62 }
 0x90a   : > { %v5715_v16 = vpop.f32.mrf.mxu2  ;;  %v5304_v14 = vadd.f32 %v5303_v44, %v5135_v45 }
 0x90b   : > { %v5716_v6 = vadd.f32 %v12060_v1, %v5715_v16  ;;  %v6265_v36 = vmul.f32 0.1, %v6130_v12  ;;  %v5306_v16 = vadd.f32 %v5305_v10, %v11795_v47 }
 0x90d   : > { %v5823_v15 = vmul.f32 0.1, %v5716_v6  ;;  %v6329_v31 = vmax.f32 %v6130_v12, %v6265_v36  ;;  %v5384_v51 = vadd.f32 %v11893_v34, %v5306_v16  ;;  %v5383_v36 = vadd.f32 %v11893_v34, %v5304_v14 }
 0x90f   : > { %v5887_v43 = vmax.f32 %v5716_v6, %v5823_v15  ;;  %5757 = vmatmul.bf16.gmra.mxu2 %v5545_v55 }
 0x910   : > { %v6131_v35 = vpop.f32.mrf.mxu3 }
 0x911   : > { %v5951_v59 = vadd.f32 %v5887_v43, %v11852_v3  ;;  %v6132_v33 = vadd.f32 %v11873_v37, %v6131_v35  ;;  %v12079_v3 = vld [vmem:[%s13118_s27] ss:$0 sm:$0xff] }
 0x912   : > { %v5718_v48 = vpop.f32.mrf.mxu2 }
 0x913   : > { %v6266_v56 = vmul.f32 0.1, %v6132_v33  ;;  %v5997_v8 = vpack.c.bf16 %v5951_v59, %v5950_v50  ;;  %v5719_v40 = vadd.f32 %v12060_v1, %v5718_v48  ;;  %v5310_v59 = vpop.f32.mrf.mxu1 }
 0x915   : > { %v6330_v13 = vmax.f32 %v6132_v33, %v6266_v56  ;;  %6173 = vmatmul.bf16.gmra.mxu3 %v5997_v8  ;;  %v5824_v28 = vmul.f32 0.1, %v5719_v40 }
 0x916   : > { %v6550_v0 = vpop.f32.mrf.mxu0 }
 0x917   : > { %v6385_v41 = vpack.c.bf16 %v6330_v13, %v6329_v31  ;;  %v6551_v46 = vadd.f32 %v12079_v3, %v6550_v0  ;;  %v5888_v23 = vmax.f32 %v5719_v40, %v5824_v28  ;;  %v5448_v40 = vmul.f32 0.1, %v5384_v51 }
 0x918   : > { %v6134_v27 = vpop.f32.mrf.mxu3  ;;  %v5447_v13 = vmul.f32 0.1, %v5383_v36 }
 0x919   : > { %8143 = vmatmul.msk.bf16.gmra.mxu0 %vm4888_vm3, %v6385_v41  ;;  %v6135_v57 = vadd.f32 %v11873_v37, %v6134_v27  ;;  %v6710_v15 = vmul.f32 0.1, %v6551_v46  ;;  %v5952_v43 = vadd.f32 %v5888_v23, %v11878_v42  ;;  %v12103_v28 = vmax.f32 %v5384_v51, %v5448_v40  ;;  %v13120_v27 = vld [vmem:[#allocation78_spill] sm:$0xff]  ;;  %v13122_v23 = vld [vmem:[#allocation69_spill] sm:$0xff] }
 0x91a   : > { %v5720_v38 = vpop.f32.mrf.mxu2  ;;  %v5140_v45 = vadd.f32 %v13121_v63, %v13120_v27  ;;  %v12109_v16 = vmax.f32 %v5383_v36, %v5447_v13  ;;  %v13123_v63 = vld [vmem:[#allocation81_spill] sm:$0xff] }
 0x91b   : > { %v5721_v19 = vadd.f32 %v12060_v1, %v5720_v38  ;;  %v6267_v47 = vmul.f32 0.1, %v6135_v57  ;;  %v6774_v33 = vmax.f32 %v6551_v46, %v6710_v15 }
 0x91c   : > { %v5547_v15 = vpack.c.bf16 %v12103_v28, %v12109_v16 }
 0x91d   : > { %v5825_v6 = vmul.f32 0.1, %v5721_v19  ;;  %v6331_v42 = vmax.f32 %v6135_v57, %v6267_v47  ;;  %v5311_v57 = vadd.f32 %v5310_v59, %v13122_v23 }
 0x91e   : > { %v6552_v12 = vpop.f32.mrf.mxu0 }
 0x91f   : > { %v5889_v54 = vmax.f32 %v5721_v19, %v5825_v6  ;;  %v6553_v55 = vadd.f32 %v12079_v3, %v6552_v12  ;;  %5762 = vmatmul.bf16.gmra.mxu2 %v5546_v4  ;;  %v5313_v4 = vpop.f32.mrf.mxu1  ;;  %v5386_v47 = vadd.f32 %v11893_v34, %v5311_v57 }
 0x920   : > { %v6136_v60 = vpop.f32.mrf.mxu3 }
 0x921   : > { %v5953_v10 = vadd.f32 %v5889_v54, %v11875_v21  ;;  %v6711_v35 = vmul.f32 0.1, %v6553_v55  ;;  %v6137_v50 = vadd.f32 %v11873_v37, %v6136_v60  ;;  %v5309_v54 = vadd.f32 %v5308_v11, %v5140_v45  ;;  %v13124_v45 = vld [vmem:[#allocation28_spill] sm:$0xff] }
 0x922   : > { %v5723_v44 = vpop.f32.mrf.mxu2 }
 0x923   : > { %v6775_v48 = vmax.f32 %v6553_v55, %v6711_v35  ;;  %v6268_v61 = vmul.f32 0.1, %v6137_v50  ;;  %v5998_v56 = vpack.c.bf16 %v5953_v10, %v5952_v43  ;;  %v5724_v8 = vadd.f32 %v12060_v1, %v5723_v44 }
 0x925   : > { %v6838_v20 = vpack.c.bf16 %v6775_v48, %v6774_v33  ;;  %v6332_v31 = vmax.f32 %v6137_v50, %v6268_v61  ;;  %6178 = vmatmul.bf16.gmra.mxu3 %v5998_v56  ;;  %v5826_v5 = vmul.f32 0.1, %v5724_v8  ;;  %v5385_v33 = vadd.f32 %v11893_v34, %v5309_v54 }
 0x926   : > { %v6555_v21 = vpop.f32.mrf.mxu0 }
 0x927   : > { %v6386_v0 = vpack.c.bf16 %v6332_v31, %v6331_v42  ;;  %8175 = vmatmul.msk.bf16.vlgmr.msra.gmra.mxu1 %vm6890_vm4, %v6838_v20  ;;  %v6556_v46 = vadd.f32 %v12079_v3, %v6555_v21  ;;  %v5890_v6 = vmax.f32 %v5724_v8, %v5826_v5  ;;  %v5450_v42 = vmul.f32 0.1, %v5386_v47 }
 0x928   : > { %v6139_v41 = vpop.f32.mrf.mxu3  ;;  %v5449_v13 = vmul.f32 0.1, %v5385_v33 }
 0x929   : > { %8144 = vmatmul.msk.bf16.gmra.mxu0 %vm4888_vm3, %v6386_v0  ;;  %v6140_v14 = vadd.f32 %v11873_v37, %v6139_v41  ;;  %v6712_v51 = vmul.f32 0.1, %v6556_v46  ;;  %v5954_v10 = vadd.f32 %v5890_v6, %v11906_v32  ;;  %v12124_v27 = vmax.f32 %v5386_v47, %v5450_v42  ;;  %v13125_v6 = vld [vmem:[#allocation74_spill] sm:$0xff] }
 0x92a   : > { %v5725_v38 = vpop.f32.mrf.mxu2  ;;  %v12130_v57 = vmax.f32 %v5385_v33, %v5449_v13 }
 0x92b   : > { %v5726_v19 = vadd.f32 %v12060_v1, %v5725_v38  ;;  %v6269_v50 = vmul.f32 0.1, %v6140_v14  ;;  %v6776_v48 = vmax.f32 %v6556_v46, %v6712_v51  ;;  %v5145_v38 = vadd.f32 %v13124_v45, %v13123_v63  ;;  %v13126_v63 = vld [vmem:[#allocation84_spill] sm:$0xff]  ;;  %v13127_v45 = vld [vmem:[#allocation30_spill] sm:$0xff] }
 0x92d   : > { %v5827_v12 = vmul.f32 0.1, %v5726_v19  ;;  %v6333_v20 = vmax.f32 %v6140_v14, %v6269_v50  ;;  %v5314_v51 = vadd.f32 %v5313_v4, %v5145_v38  ;;  %v5150_v38 = vadd.f32 %v13127_v45, %v13126_v63 }
 0x92e   : > { %v6557_v55 = vpop.f32.mrf.mxu0 }
 0x92f   : > { %v5891_v43 = vmax.f32 %v5726_v19, %v5827_v12  ;;  %v6558_v60 = vadd.f32 %v12079_v3, %v6557_v55  ;;  %5767 = vmatmul.bf16.gmra.mxu2 %v5547_v15  ;;  %v5548_v55 = vpack.c.bf16 %v12124_v27, %v12130_v57  ;;  %v5387_v4 = vadd.f32 %v11893_v34, %v5314_v51 }
 0x930   : > { %v6141_v35 = vpop.f32.mrf.mxu3 }
 0x931   : > { %v5955_v36 = vadd.f32 %v5891_v43, %v11901_v7  ;;  %v6713_v44 = vmul.f32 0.1, %v6558_v60  ;;  %v6142_v59 = vadd.f32 %v11873_v37, %v6141_v35  ;;  %v5315_v7 = vpop.f32.mrf.mxu1 }
 0x932   : > { %v5728_v11 = vpop.f32.mrf.mxu2  ;;  %v5316_v14 = vadd.f32 %v5315_v7, %v13125_v6  ;;  %v5451_v7 = vmul.f32 0.1, %v5387_v4 }
 0x933   : > { %v6777_v61 = vmax.f32 %v6558_v60, %v6713_v44  ;;  %v6270_v56 = vmul.f32 0.1, %v6142_v59  ;;  %v5999_v8 = vpack.c.bf16 %v5955_v36, %v5954_v10  ;;  %v5729_v40 = vadd.f32 %v12060_v1, %v5728_v11 }
 0x934   : > { %v5388_v35 = vadd.f32 %v11893_v34, %v5316_v14  ;;  %v12151_v14 = vmax.f32 %v5387_v4, %v5451_v7 }
 0x935   : > { %v6839_v31 = vpack.c.bf16 %v6777_v61, %v6776_v48  ;;  %v6334_v32 = vmax.f32 %v6142_v59, %v6270_v56  ;;  %6183 = vmatmul.bf16.gmra.mxu3 %v5999_v8  ;;  %v5828_v5 = vmul.f32 0.1, %v5729_v40 }
 0x936   : > { %v6560_v21 = vpop.f32.mrf.mxu0 }
 0x937   : > { %v6387_v0 = vpack.c.bf16 %v6334_v32, %v6333_v20  ;;  %8176 = vmatmul.msk.bf16.gmra.mxu1 %vm6890_vm4, %v6839_v31  ;;  %v6561_v19 = vadd.f32 %v12079_v3, %v6560_v21  ;;  %v5892_v12 = vmax.f32 %v5729_v40, %v5828_v5  ;;  %v5452_v31 = vmul.f32 0.1, %v5388_v35 }
 0x938   : > { %v6144_v41 = vpop.f32.mrf.mxu3 }
 0x939   : > { %8145 = vmatmul.msk.bf16.gmra.mxu0 %vm4888_vm3, %v6387_v0  ;;  %v6145_v15 = vadd.f32 %v11873_v37, %v6144_v41  ;;  %v6714_v60 = vmul.f32 0.1, %v6561_v19  ;;  %v5956_v50 = vadd.f32 %v5892_v12, %v11930_v25  ;;  %v5318_v44 = vpop.f32.mrf.mxu1  ;;  %v12145_v41 = vmax.f32 %v5388_v35, %v5452_v31  ;;  %v13128_v12 = vld [vmem:[#allocation79_spill] sm:$0xff] }
 0x93a   : > { %v5730_v46 = vpop.f32.mrf.mxu2 }
 0x93b   : > { %v5731_v23 = vadd.f32 %v12060_v1, %v5730_v46  ;;  %v6271_v59 = vmul.f32 0.1, %v6145_v15  ;;  %v6778_v56 = vmax.f32 %v6561_v19, %v6714_v60  ;;  %v5319_v60 = vadd.f32 %v5318_v44, %v5150_v38 }
 0x93d   : > { %v5829_v54 = vmul.f32 0.1, %v5731_v23  ;;  %v6335_v32 = vmax.f32 %v6145_v15, %v6271_v59 }
 0x93e   : > { %v6562_v43 = vpop.f32.mrf.mxu0 }
 0x93f   : > { %v5893_v47 = vmax.f32 %v5731_v23, %v5829_v54  ;;  %v6563_v10 = vadd.f32 %v12079_v3, %v6562_v43  ;;  %5772 = vmatmul.bf16.gmra.mxu2 %v5548_v55  ;;  %v5549_v43 = vpack.c.bf16 %v12145_v41, %v12151_v14 }
 0x940   : > { %v6146_v36 = vpop.f32.mrf.mxu3 }
 0x941   : > { %v5957_v33 = vadd.f32 %v5893_v47, %v11923_v49  ;;  %v6715_v11 = vmul.f32 0.1, %v6563_v10  ;;  %v6147_v48 = vadd.f32 %v11873_v37, %v6146_v36  ;;  %v5320_v19 = vpop.f32.mrf.mxu1 }
 0x942   : > { %v5733_v61 = vpop.f32.mrf.mxu2  ;;  %v5321_v15 = vadd.f32 %v5320_v19, %v13128_v12 }
 0x943   : > { %v6779_v8 = vmax.f32 %v6563_v10, %v6715_v11  ;;  %v6272_v40 = vmul.f32 0.1, %v6147_v48  ;;  %v6000_v42 = vpack.c.bf16 %v5957_v33, %v5956_v50  ;;  %v5734_v20 = vadd.f32 %v12060_v1, %v5733_v61 }
 0x944   : > { %v5390_v36 = vadd.f32 %v11893_v34, %v5321_v15 }
 0x945   : > { %v6840_v25 = vpack.c.bf16 %v6779_v8, %v6778_v56  ;;  %v6336_v21 = vmax.f32 %v6147_v48, %v6272_v40  ;;  %6188 = vmatmul.bf16.gmra.mxu3 %v6000_v42  ;;  %v5830_v0 = vmul.f32 0.1, %v5734_v20  ;;  %v5389_v56 = vadd.f32 %v11893_v34, %v5319_v60 }
 0x946   : > { %v6565_v13 = vpop.f32.mrf.mxu0 }
 0x947   : > { %v6388_v49 = vpack.c.bf16 %v6336_v21, %v6335_v32  ;;  %8177 = vmatmul.msk.bf16.gmra.mxu1 %vm6890_vm4, %v6840_v25  ;;  %v6566_v23 = vadd.f32 %v12079_v3, %v6565_v13  ;;  %v5894_v54 = vmax.f32 %v5734_v20, %v5830_v0  ;;  %v5454_v32 = vmul.f32 0.1, %v5390_v36 }
 0x948   : > { %v6149_v5 = vpop.f32.mrf.mxu3  ;;  %v5453_v7 = vmul.f32 0.1, %v5389_v56 }
 0x949   : > { %8146 = vmatmul.msk.bf16.gmra.mxu0 %vm4888_vm3, %v6388_v49  ;;  %v6150_v55 = vadd.f32 %v11873_v37, %v6149_v5  ;;  %v6716_v10 = vmul.f32 0.1, %v6566_v23  ;;  %v5958_v59 = vadd.f32 %v5894_v54, %v11952_v9  ;;  %v12166_v34 = vmax.f32 %v5390_v36, %v5454_v32 }
 0x94a   : > { %v5735_v46 = vpop.f32.mrf.mxu2  ;;  %v12170_v38 = vmax.f32 %v5389_v56, %v5453_v7 }
 0x94b   : > { %v5736_v6 = vadd.f32 %v12060_v1, %v5735_v46  ;;  %v6273_v11 = vmul.f32 0.1, %v6150_v55  ;;  %v6780_v8 = vmax.f32 %v6566_v23, %v6716_v10 }
 0x94d   : > { %v5831_v51 = vmul.f32 0.1, %v5736_v6  ;;  %v6337_v25 = vmax.f32 %v6150_v55, %v6273_v11 }
 0x94e   : > { %v6567_v47 = vpop.f32.mrf.mxu0 }
 0x94f   : > { %v5895_v35 = vmax.f32 %v5736_v6, %v5831_v51  ;;  %v6568_v50 = vadd.f32 %v12079_v3, %v6567_v47  ;;  %5777 = vmatmul.bf16.gmra.mxu2 %v5549_v43  ;;  %v5550_v6 = vpack.c.bf16 %v12166_v34, %v12170_v38 }
 0x950   : > { %v6151_v33 = vpop.f32.mrf.mxu3 }
 0x951   : > { %v5959_v48 = vadd.f32 %v5895_v35, %v11947_v26  ;;  %v6717_v4 = vmul.f32 0.1, %v6568_v50  ;;  %v6152_v61 = vadd.f32 %v11873_v37, %v6151_v33 }
 0x952   : > { %v5738_v44 = vpop.f32.mrf.mxu2 }
 0x953   : > { %v6781_v40 = vmax.f32 %v6568_v50, %v6717_v4  ;;  %v6274_v42 = vmul.f32 0.1, %v6152_v61  ;;  %v6001_v20 = vpack.c.bf16 %v5959_v48, %v5958_v59  ;;  %v5739_v31 = vadd.f32 %v12060_v1, %v5738_v44 }
 0x955   : > { %v6841_v21 = vpack.c.bf16 %v6781_v40, %v6780_v8  ;;  %v6338_v9 = vmax.f32 %v6152_v61, %v6274_v42  ;;  %6193 = vmatmul.bf16.gmra.mxu3 %v6001_v20  ;;  %v5832_v49 = vmul.f32 0.1, %v5739_v31 }
 0x956   : > { %v6570_v13 = vpop.f32.mrf.mxu0 }
 0x957   : > { %v6389_v26 = vpack.c.bf16 %v6338_v9, %v6337_v25  ;;  %8178 = vmatmul.msk.bf16.gmra.mxu1 %vm6890_vm4, %v6841_v21  ;;  %v6571_v63 = vadd.f32 %v12079_v3, %v6570_v13  ;;  %v5896_v46 = vmax.f32 %v5739_v31, %v5832_v49  ;;  %v12187_v31 = vld [vmem:[%s13107_s21] ss:$0 sm:$0xff] }
 0x958   : > { %v6154_v0 = vpop.f32.mrf.mxu3 }
 0x959   : > { %8147 = vmatmul.msk.bf16.gmra.mxu0 %vm4888_vm3, %v6389_v26  ;;  %v6155_v19 = vadd.f32 %v11873_v37, %v6154_v0  ;;  %v6718_v15 = vmul.f32 0.1, %v6571_v63  ;;  %v5960_v51 = vadd.f32 %v5896_v46, %v11976_v53 }
 0x95a   : > { %v5740_v5 = vpop.f32.mrf.mxu2 }
 0x95b   : > { %v5741_v45 = vadd.f32 %v12060_v1, %v5740_v5  ;;  %v6275_v60 = vmul.f32 0.1, %v6155_v19  ;;  %v6782_v36 = vmax.f32 %v6571_v63, %v6718_v15 }
 0x95d   : > { %v5833_v23 = vmul.f32 0.1, %v5741_v45  ;;  %v6339_v4 = vmax.f32 %v6155_v19, %v6275_v60 }
 0x95e   : > { %v6572_v12 = vpop.f32.mrf.mxu0 }
 0x95f   : > { %v5897_v54 = vmax.f32 %v5741_v45, %v5833_v23  ;;  %v6573_v55 = vadd.f32 %v12079_v3, %v6572_v12  ;;  %5782 = vmatmul.bf16.gmra.mxu2 %v5550_v6 }
 0x960   : > { %v6156_v43 = vpop.f32.mrf.mxu3 }
 0x961   : > { %v5961_v47 = vadd.f32 %v5897_v54, %v11971_v39  ;;  %v6719_v10 = vmul.f32 0.1, %v6573_v55  ;;  %v6157_v35 = vadd.f32 %v11873_v37, %v6156_v43 }
 0x962   : > { %v5743_v50 = vpop.f32.mrf.mxu2 }
 0x963   : > { %v6783_v59 = vmax.f32 %v6573_v55, %v6719_v10  ;;  %v6276_v33 = vmul.f32 0.1, %v6157_v35  ;;  %v6002_v11 = vpack.c.bf16 %v5961_v47, %v5960_v51  ;;  %v5744_v48 = vadd.f32 %v12060_v1, %v5743_v50 }
 0x965   : > { %v6842_v61 = vpack.c.bf16 %v6783_v59, %v6782_v36  ;;  %v6340_v56 = vmax.f32 %v6157_v35, %v6276_v33  ;;  %6198 = vmatmul.bf16.gmra.mxu3 %v6002_v11  ;;  %v5834_v8 = vmul.f32 0.1, %v5744_v48 }
 0x966   : > { %v6575_v44 = vpop.f32.mrf.mxu0 }
 0x967   : > { %v6390_v53 = vpack.c.bf16 %v6340_v56, %v6339_v4  ;;  %8179 = vmatmul.msk.bf16.gmra.mxu1 %vm6890_vm4, %v6842_v61  ;;  %v6576_v40 = vadd.f32 %v12079_v3, %v6575_v44  ;;  %v5898_v20 = vmax.f32 %v5744_v48, %v5834_v8 }
 0x968   : > { %v6159_v39 = vpop.f32.mrf.mxu3 }
 0x969   : > { %8148 = vmatmul.msk.bf16.gmra.mxu0 %vm4888_vm3, %v6390_v53  ;;  %v6160_v32 = vadd.f32 %v12187_v31, %v6159_v39  ;;  %v6720_v9 = vmul.f32 0.1, %v6576_v40  ;;  %v5962_v26 = vadd.f32 %v5898_v20, %v11996_v30 }
 0x96a   : > { %v5745_v37 = vpop.f32.mrf.mxu2 }
 0x96b   : > { %v5746_v42 = vadd.f32 %v12060_v1, %v5745_v37  ;;  %v6277_v0 = vmul.f32 0.1, %v6160_v32  ;;  %v6784_v19 = vmax.f32 %v6576_v40, %v6720_v9 }
 0x96d   : > { %v5835_v25 = vmul.f32 0.1, %v5746_v42  ;;  %v6341_v54 = vmax.f32 %v6160_v32, %v6277_v0 }
 0x96e   : > { %v6577_v21 = vpop.f32.mrf.mxu0 }
 0x96f   : > { %v5899_v13 = vmax.f32 %v5746_v42, %v5835_v25  ;;  %v6578_v7 = vadd.f32 %v12079_v3, %v6577_v21 }
 0x970   : > { %v6161_v49 = vpop.f32.mrf.mxu3 }
 0x971   : > { %v5963_v5 = vadd.f32 %v5899_v13, %v11991_v17  ;;  %v6721_v63 = vmul.f32 0.1, %v6578_v7  ;;  %v6162_v45 = vadd.f32 %v12187_v31, %v6161_v49 }
 0x972   : > { %v5748_v46 = vpop.f32.mrf.mxu2 }
 0x973   : > { %v6785_v23 = vmax.f32 %v6578_v7, %v6721_v63  ;;  %v6278_v6 = vmul.f32 0.1, %v6162_v45  ;;  %v6003_v12 = vpack.c.bf16 %v5963_v5, %v5962_v26  ;;  %v5749_v15 = vadd.f32 %v12060_v1, %v5748_v46 }
 0x975   : > { %v6843_v55 = vpack.c.bf16 %v6785_v23, %v6784_v19  ;;  %v6342_v51 = vmax.f32 %v6162_v45, %v6278_v6  ;;  %6203 = vmatmul.bf16.gmra.mxu3 %v6003_v12  ;;  %v5836_v60 = vmul.f32 0.1, %v5749_v15 }
 0x976   : > { %v6580_v43 = vpop.f32.mrf.mxu0 }
 0x977   : > { %v6391_v30 = vpack.c.bf16 %v6342_v51, %v6341_v54  ;;  %8180 = vmatmul.msk.bf16.gmra.mxu1 %vm6890_vm4, %v6843_v55  ;;  %v6581_v10 = vadd.f32 %v12079_v3, %v6580_v43  ;;  %v5900_v50 = vmax.f32 %v5749_v15, %v5836_v60 }
 0x978   : > { %v6164_v17 = vpop.f32.mrf.mxu3 }
 0x979   : > { %8149 = vmatmul.msk.bf16.gmra.mxu0 %vm4888_vm3, %v6391_v30  ;;  %v6165_v36 = vadd.f32 %v12187_v31, %v6164_v17  ;;  %v6722_v11 = vmul.f32 0.1, %v6581_v10  ;;  %v5964_v61 = vadd.f32 %v5900_v50, %v12018_v2 }
 0x97a   : > { %v5750_v47 = vpop.f32.mrf.mxu2 }
 0x97b   : > { %v5751_v35 = vadd.f32 %v12060_v1, %v5750_v47  ;;  %v6279_v44 = vmul.f32 0.1, %v6165_v36  ;;  %v6786_v40 = vmax.f32 %v6581_v10, %v6722_v11 }
 0x97d   : > { %v5837_v59 = vmul.f32 0.1, %v5751_v35  ;;  %v6343_v21 = vmax.f32 %v6165_v36, %v6279_v44 }
 0x97e   : > { %v6582_v33 = vpop.f32.mrf.mxu0 }
 0x97f   : > { %v5901_v48 = vmax.f32 %v5751_v35, %v5837_v59  ;;  %v6583_v4 = vadd.f32 %v12079_v3, %v6582_v33 }
 0x980   : > { %v6166_v56 = vpop.f32.mrf.mxu3 }
 0x981   : > { %v5965_v53 = vadd.f32 %v5901_v48, %v12013_v29  ;;  %v6723_v8 = vmul.f32 0.1, %v6583_v4  ;;  %v6167_v39 = vadd.f32 %v12187_v31, %v6166_v56 }
 0x982   : > { %v5753_v37 = vpop.f32.mrf.mxu2 }
 0x983   : > { %v6787_v42 = vmax.f32 %v6583_v4, %v6723_v8  ;;  %v6280_v20 = vmul.f32 0.1, %v6167_v39  ;;  %v6004_v32 = vpack.c.bf16 %v5965_v53, %v5964_v61  ;;  %v5754_v25 = vadd.f32 %v12060_v1, %v5753_v37 }
 0x985   : > { %v6844_v9 = vpack.c.bf16 %v6787_v42, %v6786_v40  ;;  %v6344_v13 = vmax.f32 %v6167_v39, %v6280_v20  ;;  %6208 = vmatmul.bf16.gmra.mxu3 %v6004_v32  ;;  %v5838_v26 = vmul.f32 0.1, %v5754_v25 }
 0x986   : > { %v6585_v7 = vpop.f32.mrf.mxu0 }
 0x987   : > { %v6392_v2 = vpack.c.bf16 %v6344_v13, %v6343_v21  ;;  %8181 = vmatmul.msk.bf16.gmra.mxu1 %vm6890_vm4, %v6844_v9  ;;  %v6586_v0 = vadd.f32 %v12079_v3, %v6585_v7  ;;  %v5902_v63 = vmax.f32 %v5754_v25, %v5838_v26  ;;  %v12227_v7 = vld [vmem:[%s13129_s17] ss:$0 sm:$0xff] }
 0x988   : > { %v6169_v29 = vpop.f32.mrf.mxu3 }
 0x989   : > { %8150 = vmatmul.msk.bf16.gmra.mxu0 %vm4888_vm3, %v6392_v2  ;;  %v6170_v45 = vadd.f32 %v12187_v31, %v6169_v29  ;;  %v6724_v23 = vmul.f32 0.1, %v6586_v0  ;;  %v5966_v15 = vadd.f32 %v5902_v63, %v12039_v24 }
 0x98a   : > { %v5755_v49 = vpop.f32.mrf.mxu2 }
 0x98b   : > { %v5756_v5 = vadd.f32 %v12060_v1, %v5755_v49  ;;  %v6281_v55 = vmul.f32 0.1, %v6170_v45  ;;  %v6788_v17 = vmax.f32 %v6586_v0, %v6724_v23 }
 0x98d   : > { %v5839_v46 = vmul.f32 0.1, %v5756_v5  ;;  %v6345_v36 = vmax.f32 %v6170_v45, %v6281_v55 }
 0x98e   : > { %v6587_v19 = vpop.f32.mrf.mxu0 }
 0x98f   : > { %v5903_v6 = vmax.f32 %v5756_v5, %v5839_v46  ;;  %v6588_v12 = vadd.f32 %v12079_v3, %v6587_v19 }
 0x990   : > { %v6171_v54 = vpop.f32.mrf.mxu3 }
 0x991   : > { %v5967_v51 = vadd.f32 %v5903_v6, %v12034_v52  ;;  %v6725_v43 = vmul.f32 0.1, %v6588_v12  ;;  %v6172_v30 = vadd.f32 %v12187_v31, %v6171_v54 }
 0x992   : > { %v5758_v60 = vpop.f32.mrf.mxu2 }
 0x993   : > { %v6789_v47 = vmax.f32 %v6588_v12, %v6725_v43  ;;  %v6282_v10 = vmul.f32 0.1, %v6172_v30  ;;  %v6005_v35 = vpack.c.bf16 %v5967_v51, %v5966_v15  ;;  %v5759_v50 = vadd.f32 %v12060_v1, %v5758_v60 }
 0x995   : > { %v6845_v59 = vpack.c.bf16 %v6789_v47, %v6788_v17  ;;  %v6346_v33 = vmax.f32 %v6172_v30, %v6282_v10  ;;  %6213 = vmatmul.bf16.gmra.mxu3 %v6005_v35  ;;  %v5840_v48 = vmul.f32 0.1, %v5759_v50 }
 0x996   : > { %v6590_v11 = vpop.f32.mrf.mxu0 }
 0x997   : > { %v6393_v24 = vpack.c.bf16 %v6346_v33, %v6345_v36  ;;  %8182 = vmatmul.msk.bf16.gmra.mxu1 %vm6890_vm4, %v6845_v59  ;;  %v6591_v61 = vadd.f32 %v12079_v3, %v6590_v11  ;;  %v5904_v44 = vmax.f32 %v5759_v50, %v5840_v48 }
 0x998   : > { %v6174_v52 = vpop.f32.mrf.mxu3 }
 0x999   : > { %8151 = vmatmul.msk.bf16.gmra.mxu0 %vm4888_vm3, %v6393_v24  ;;  %v6175_v53 = vadd.f32 %v12187_v31, %v6174_v52  ;;  %v6726_v37 = vmul.f32 0.1, %v6591_v61  ;;  %v5968_v20 = vadd.f32 %v5904_v44, %v12063_v18 }
 0x99a   : > { %v5760_v4 = vpop.f32.mrf.mxu2 }
 0x99b   : > { %v5761_v56 = vadd.f32 %v12060_v1, %v5760_v4  ;;  %v6283_v25 = vmul.f32 0.1, %v6175_v53  ;;  %v6790_v26 = vmax.f32 %v6591_v61, %v6726_v37 }
 0x99d   : > { %v5841_v8 = vmul.f32 0.1, %v5761_v56  ;;  %v6347_v63 = vmax.f32 %v6175_v53, %v6283_v25 }
 0x99e   : > { %v6592_v39 = vpop.f32.mrf.mxu0 }
 0x99f   : > { %v5905_v40 = vmax.f32 %v5761_v56, %v5841_v8  ;;  %v6593_v42 = vadd.f32 %v12079_v3, %v6592_v39 }
 0x9a0   : > { %v6176_v32 = vpop.f32.mrf.mxu3 }
 0x9a1   : > { %v5969_v21 = vadd.f32 %v5905_v40, %v12053_v58  ;;  %v6727_v9 = vmul.f32 0.1, %v6593_v42  ;;  %v6177_v13 = vadd.f32 %v12187_v31, %v6176_v32 }
 0x9a2   : > { %v5763_v2 = vpop.f32.mrf.mxu2 }
 0x9a3   : > { %v6791_v29 = vmax.f32 %v6593_v42, %v6727_v9  ;;  %v6284_v49 = vmul.f32 0.1, %v6177_v13  ;;  %v6006_v0 = vpack.c.bf16 %v5969_v21, %v5968_v20  ;;  %v5764_v18 = vadd.f32 %v12060_v1, %v5763_v2 }
 0x9a4   : > { %v6996_v5 = vpop.f32.mrf.mxu1 }
 0x9a5   : > { %v6846_v45 = vpack.c.bf16 %v6791_v29, %v6790_v26  ;;  %v6348_v58 = vmax.f32 %v6177_v13, %v6284_v49  ;;  %v6997_v46 = vadd.f32 %v12227_v7, %v6996_v5  ;;  %6218 = vmatmul.bf16.gmra.mxu3 %v6006_v0  ;;  %v5842_v6 = vmul.f32 0.1, %v5764_v18 }
 0x9a6   : > { %v6595_v19 = vpop.f32.mrf.mxu0 }
 0x9a7   : > { %v6394_v23 = vpack.c.bf16 %v6348_v58, %v6347_v63  ;;  %7156 = vst [vmem:[%s12233_s23] sm:$0xff] %v6997_v46  ;;  %8183 = vmatmul.msk.bf16.gmra.mxu1 %vm6890_vm4, %v6846_v45  ;;  %v6596_v54 = vadd.f32 %v12079_v3, %v6595_v19  ;;  %v5906_v51 = vmax.f32 %v5764_v18, %v5842_v6 }
 0x9a8   : > { %v6179_v12 = vpop.f32.mrf.mxu3 }
 0x9a9   : > { %8152 = vmatmul.msk.bf16.gmra.mxu0 %vm4888_vm3, %v6394_v23  ;;  %v6180_v30 = vadd.f32 %v12187_v31, %v6179_v12  ;;  %v6728_v10 = vmul.f32 0.1, %v6596_v54  ;;  %v5970_v36 = vadd.f32 %v5906_v51, %v12088_v62 }
 0x9aa   : > { %v5765_v15 = vpop.f32.mrf.mxu2 }
 0x9ab   : > { %v5766_v55 = vadd.f32 %v12060_v1, %v5765_v15  ;;  %v6285_v33 = vmul.f32 0.1, %v6180_v30  ;;  %v6792_v4 = vmax.f32 %v6596_v54, %v6728_v10 }
 0x9ac   : > { %v6998_v43 = vpop.f32.mrf.mxu1 }
 0x9ad   : > { %v5843_v60 = vmul.f32 0.1, %v5766_v55  ;;  %v6999_v17 = vadd.f32 %v12227_v7, %v6998_v43  ;;  %v6349_v39 = vmax.f32 %v6180_v30, %v6285_v33 }
 0x9ae   : > { %v6597_v47 = vpop.f32.mrf.mxu0 }
 0x9af   : > { %v5907_v35 = vmax.f32 %v5766_v55, %v5843_v60  ;;  %7157 = vst [vmem:[%s12233_s23 + $0x8] sm:$0xff] %v6999_v17  ;;  %v6598_v50 = vadd.f32 %v12079_v3, %v6597_v47 }
 0x9b0   : > { %v6181_v59 = vpop.f32.mrf.mxu3 }
 0x9b1   : > { %v5971_v11 = vadd.f32 %v5907_v35, %v12082_v22  ;;  %v6729_v24 = vmul.f32 0.1, %v6598_v50  ;;  %v6182_v48 = vadd.f32 %v12187_v31, %v6181_v59 }
 0x9b2   : > { %v5768_v52 = vpop.f32.mrf.mxu2 }
 0x9b3   : > { %v6793_v61 = vmax.f32 %v6598_v50, %v6729_v24  ;;  %v6286_v56 = vmul.f32 0.1, %v6182_v48  ;;  %v6007_v44 = vpack.c.bf16 %v5971_v11, %v5970_v36  ;;  %v5769_v53 = vadd.f32 %v12060_v1, %v5768_v52 }
 0x9b4   : > { %v7001_v8 = vpop.f32.mrf.mxu1 }
 0x9b5   : > { %v6847_v37 = vpack.c.bf16 %v6793_v61, %v6792_v4  ;;  %v6350_v40 = vmax.f32 %v6182_v48, %v6286_v56  ;;  %v7002_v62 = vadd.f32 %v12227_v7, %v7001_v8  ;;  %6223 = vmatmul.bf16.gmra.mxu3 %v6007_v44  ;;  %v5844_v20 = vmul.f32 0.1, %v5769_v53 }
 0x9b6   : > { %v6600_v42 = vpop.f32.mrf.mxu0 }
 0x9b7   : > { %v6395_v22 = vpack.c.bf16 %v6350_v40, %v6349_v39  ;;  %7158 = vst [vmem:[%s12233_s23 + $0x10] sm:$0xff] %v7002_v62  ;;  %8184 = vmatmul.msk.bf16.gmra.mxu1 %vm6890_vm4, %v6847_v37  ;;  %v6601_v21 = vadd.f32 %v12079_v3, %v6600_v42  ;;  %v5908_v13 = vmax.f32 %v5769_v53, %v5844_v20 }
 0x9b8   : > { %v6184_v32 = vpop.f32.mrf.mxu3 }
 0x9b9   : > { %8153 = vmatmul.msk.bf16.gmra.mxu0 %vm4888_vm3, %v6395_v22  ;;  %v6185_v26 = vadd.f32 %v12187_v31, %v6184_v32  ;;  %v6730_v18 = vmul.f32 0.1, %v6601_v21  ;;  %v5972_v45 = vadd.f32 %v5908_v13, %v12109_v16 }
 0x9ba   : > { %v5770_v25 = vpop.f32.mrf.mxu2 }
 0x9bb   : > { %v5771_v9 = vadd.f32 %v12060_v1, %v5770_v25  ;;  %v6287_v46 = vmul.f32 0.1, %v6185_v26  ;;  %v6794_v15 = vmax.f32 %v6601_v21, %v6730_v18 }
 0x9bc   : > { %v7003_v2 = vpop.f32.mrf.mxu1 }
 0x9bd   : > { %v5845_v29 = vmul.f32 0.1, %v5771_v9  ;;  %v7004_v49 = vadd.f32 %v12227_v7, %v7003_v2  ;;  %v6351_v60 = vmax.f32 %v6185_v26, %v6287_v46 }
 0x9be   : > { %v6602_v0 = vpop.f32.mrf.mxu0 }
 0x9bf   : > { %v5909_v5 = vmax.f32 %v5771_v9, %v5845_v29  ;;  %7159 = vst [vmem:[%s12233_s23 + $0x18] sm:$0xff] %v7004_v49  ;;  %v6603_v63 = vadd.f32 %v12079_v3, %v6602_v0 }
 0x9c0   : > { %v6186_v58 = vpop.f32.mrf.mxu3 }
 0x9c1   : > { %v5973_v19 = vadd.f32 %v5909_v5, %v12103_v28  ;;  %v6731_v23 = vmul.f32 0.1, %v6603_v63  ;;  %v6187_v6 = vadd.f32 %v12187_v31, %v6186_v58 }
 0x9c2   : > { %v5773_v12 = vpop.f32.mrf.mxu2 }
 0x9c3   : > { %v6795_v54 = vmax.f32 %v6603_v63, %v6731_v23  ;;  %v6288_v55 = vmul.f32 0.1, %v6187_v6  ;;  %v6008_v51 = vpack.c.bf16 %v5973_v19, %v5972_v45  ;;  %v5774_v43 = vadd.f32 %v12060_v1, %v5773_v12 }
 0x9c4   : > { %v7006_v30 = vpop.f32.mrf.mxu1 }
 0x9c5   : > { %v6848_v17 = vpack.c.bf16 %v6795_v54, %v6794_v15  ;;  %v6352_v47 = vmax.f32 %v6187_v6, %v6288_v55  ;;  %v7007_v16 = vadd.f32 %v12227_v7, %v7006_v30  ;;  %6228 = vmatmul.bf16.gmra.mxu3 %v6008_v51  ;;  %v5846_v35 = vmul.f32 0.1, %v5774_v43 }
 0x9c6   : > { %v6605_v10 = vpop.f32.mrf.mxu0 }
 0x9c7   : > { %v6396_v28 = vpack.c.bf16 %v6352_v47, %v6351_v60  ;;  %7160 = vst [vmem:[%s12233_s23 + $0x20] sm:$0xff] %v7007_v16  ;;  %8185 = vmatmul.msk.bf16.gmra.mxu1 %vm6890_vm4, %v6848_v17  ;;  %v6606_v59 = vadd.f32 %v12079_v3, %v6605_v10  ;;  %v5910_v11 = vmax.f32 %v5774_v43, %v5846_v35 }
 0x9c8   : > { %v6189_v50 = vpop.f32.mrf.mxu3 }
 0x9c9   : > { %8154 = vmatmul.msk.bf16.gmra.mxu0 %vm4888_vm3, %v6396_v28  ;;  %v6190_v48 = vadd.f32 %v12187_v31, %v6189_v50  ;;  %v6732_v56 = vmul.f32 0.1, %v6606_v59  ;;  %v5974_v8 = vadd.f32 %v5910_v11, %v12130_v57  ;;  %v8477_v50 = vld [vmem:[%s12552_s13] ss:$0 sm:$0xff] }
 0x9ca   : > { %v5775_v36 = vpop.f32.mrf.mxu2 }
 0x9cb   : > { %v5776_v33 = vadd.f32 %v12060_v1, %v5775_v36  ;;  %v6289_v37 = vmul.f32 0.1, %v6190_v48  ;;  %v6796_v20 = vmax.f32 %v6606_v59, %v6732_v56 }
 0x9cc   : > { %v7008_v24 = vpop.f32.mrf.mxu1 }
 0x9cd   : > { %v5847_v52 = vmul.f32 0.1, %v5776_v33  ;;  %v7009_v4 = vadd.f32 %v12227_v7, %v7008_v24  ;;  %v6353_v2 = vmax.f32 %v6190_v48, %v6289_v37 }
 0x9ce   : > { %v6607_v61 = vpop.f32.mrf.mxu0 }
 0x9cf   : > { %v5911_v44 = vmax.f32 %v5776_v33, %v5847_v52  ;;  %7161 = vst [vmem:[%s12233_s23 + $0x28] sm:$0xff] %v7009_v4  ;;  %v6608_v53 = vadd.f32 %v12079_v3, %v6607_v61 }
 0x9d0   : > { %v6191_v39 = vpop.f32.mrf.mxu3 }
 0x9d1   : > { %v5975_v40 = vadd.f32 %v5911_v44, %v12124_v27  ;;  %v6733_v62 = vmul.f32 0.1, %v6608_v53  ;;  %v6192_v42 = vadd.f32 %v12187_v31, %v6191_v39 }
 0x9d2   : > { %v5778_v22 = vpop.f32.mrf.mxu2 }
 0x9d3   : > { %v6797_v32 = vmax.f32 %v6608_v53, %v6733_v62  ;;  %v6290_v25 = vmul.f32 0.1, %v6192_v42  ;;  %v6009_v21 = vpack.c.bf16 %v5975_v40, %v5974_v8  ;;  %v5779_v9 = vadd.f32 %v12060_v1, %v5778_v22 }
 0x9d4   : > { %v7011_v13 = vpop.f32.mrf.mxu1 }
 0x9d5   : > { %v6849_v26 = vpack.c.bf16 %v6797_v32, %v6796_v20  ;;  %v6354_v29 = vmax.f32 %v6192_v42, %v6290_v25  ;;  %v7012_v57 = vadd.f32 %v12227_v7, %v7011_v13  ;;  %6233 = vmatmul.bf16.gmra.mxu3 %v6009_v21  ;;  %v5848_v0 = vmul.f32 0.1, %v5779_v9  ;;  %v12303_v20 = vld [vmem:[%s13118_s27] ss:$0 sm:$0xff] }
 0x9d6   : > { %v6610_v49 = vpop.f32.mrf.mxu0 }
 0x9d7   : > { %v6397_v27 = vpack.c.bf16 %v6354_v29, %v6353_v2  ;;  %7162 = vst [vmem:[%s12233_s23 + $0x30] sm:$0xff] %v7012_v57  ;;  %8186 = vmatmul.msk.bf16.gmra.mxu1 %vm6890_vm4, %v6849_v26  ;;  %v6611_v63 = vadd.f32 %v12079_v3, %v6610_v49  ;;  %v5912_v58 = vmax.f32 %v5779_v9, %v5848_v0 }
 0x9d8   : > { %v6194_v18 = vpop.f32.mrf.mxu3 }
 0x9d9   : > { %8155 = vmatmul.msk.bf16.gmra.mxu0 %vm4888_vm3, %v6397_v27  ;;  %v6195_v19 = vadd.f32 %v12187_v31, %v6194_v18  ;;  %v6734_v15 = vmul.f32 0.1, %v6611_v63  ;;  %v5976_v51 = vadd.f32 %v5912_v58, %v12151_v14 }
 0x9da   : > { %v5780_v5 = vpop.f32.mrf.mxu2 }
 0x9db   : > { %v5781_v45 = vadd.f32 %v12060_v1, %v5780_v5  ;;  %v6291_v30 = vmul.f32 0.1, %v6195_v19  ;;  %v6798_v16 = vmax.f32 %v6611_v63, %v6734_v15 }
 0x9dc   : > { %v7013_v46 = vpop.f32.mrf.mxu1 }
 0x9dd   : > { %v5849_v23 = vmul.f32 0.1, %v5781_v45  ;;  %v7014_v6 = vadd.f32 %v12227_v7, %v7013_v46  ;;  %v6355_v14 = vmax.f32 %v6195_v19, %v6291_v30 }
 0x9de   : > { %v6612_v12 = vpop.f32.mrf.mxu0 }
 0x9df   : > { %v5913_v54 = vmax.f32 %v5781_v45, %v5849_v23  ;;  %7163 = vst [vmem:[%s12233_s23 + $0x38] sm:$0xff] %v7014_v6  ;;  %v6613_v55 = vadd.f32 %v12079_v3, %v6612_v12 }
 0x9e0   : > { %v6196_v43 = vpop.f32.mrf.mxu3 }
 0x9e1   : > { %v5977_v60 = vadd.f32 %v5913_v54, %v12145_v41  ;;  %v6735_v1 = vmul.f32 0.1, %v6613_v55  ;;  %v6197_v17 = vadd.f32 %v12187_v31, %v6196_v43 }
 0x9e2   : > { %v5783_v47 = vpop.f32.mrf.mxu2 }
 0x9e3   : > { %v6799_v10 = vmax.f32 %v6613_v55, %v6735_v1  ;;  %v6292_v28 = vmul.f32 0.1, %v6197_v17  ;;  %v6010_v35 = vpack.c.bf16 %v5977_v60, %v5976_v51  ;;  %v5784_v36 = vadd.f32 %v8477_v50, %v5783_v47 }
 0x9e4   : > { %v7016_v59 = vpop.f32.mrf.mxu1 }
 0x9e5   : > { %v6850_v33 = vpack.c.bf16 %v6799_v10, %v6798_v16  ;;  %v6356_v11 = vmax.f32 %v6197_v17, %v6292_v28  ;;  %v7017_v41 = vadd.f32 %v12227_v7, %v7016_v59  ;;  %6238 = vmatmul.bf16.gmra.mxu3 %v6010_v35  ;;  %v5850_v52 = vmul.f32 0.1, %v5784_v36 }
 0x9e6   : > { %v6615_v24 = vpop.f32.mrf.mxu0 }
 0x9e7   : > { %v6398_v48 = vpack.c.bf16 %v6356_v11, %v6355_v14  ;;  %7164 = vst [vmem:[%s12233_s23 + $0x40] sm:$0xff] %v7017_v41  ;;  %8187 = vmatmul.msk.bf16.gmra.mxu1 %vm6890_vm4, %v6850_v33  ;;  %v6616_v56 = vadd.f32 %v12079_v3, %v6615_v24  ;;  %v5914_v53 = vmax.f32 %v5784_v36, %v5850_v52 }
 0x9e8   : > { %v6199_v4 = vpop.f32.mrf.mxu3 }
 0x9e9   : > { %8156 = vmatmul.msk.bf16.gmra.mxu0 %vm4888_vm3, %v6398_v48  ;;  %v6200_v39 = vadd.f32 %v12187_v31, %v6199_v4  ;;  %v6736_v42 = vmul.f32 0.1, %v6616_v56  ;;  %v5978_v3 = vadd.f32 %v5914_v53, %v12170_v38 }
 0x9ea   : > { %v5785_v61 = vpop.f32.mrf.mxu2 }
 0x9eb   : > { %v5786_v44 = vadd.f32 %v8477_v50, %v5785_v61  ;;  %v6293_v21 = vmul.f32 0.1, %v6200_v39  ;;  %v6800_v26 = vmax.f32 %v6616_v56, %v6736_v42 }
 0x9ec   : > { %v7018_v8 = vpop.f32.mrf.mxu1 }
 0x9ed   : > { %v5851_v37 = vmul.f32 0.1, %v5786_v44  ;;  %v7019_v40 = vadd.f32 %v12227_v7, %v7018_v8  ;;  %v6357_v0 = vmax.f32 %v6200_v39, %v6293_v21 }
 0x9ee   : > { %v6617_v62 = vpop.f32.mrf.mxu0 }
 0x9ef   : > { %v5915_v22 = vmax.f32 %v5786_v44, %v5851_v37  ;;  %7165 = vst [vmem:[%s12233_s23 + $0x48] sm:$0xff] %v7019_v40  ;;  %v6618_v32 = vadd.f32 %v12303_v20, %v6617_v62 }
 0x9f0   : > { %v6201_v25 = vpop.f32.mrf.mxu3 }
 0x9f1   : > { %v5979_v9 = vadd.f32 %v5915_v22, %v12166_v34  ;;  %v6737_v13 = vmul.f32 0.1, %v6618_v32  ;;  %v6202_v2 = vadd.f32 %v12187_v31, %v6201_v25 }
 0x9f3   : > { %v6801_v29 = vmax.f32 %v6618_v32, %v6737_v13  ;;  %v6294_v57 = vmul.f32 0.1, %v6202_v2  ;;  %v6011_v49 = vpack.c.bf16 %v5979_v9, %v5978_v3 }
 0x9f4   : > { %v7021_v27 = vpop.f32.mrf.mxu1 }
 0x9f5   : > { %v6851_v18 = vpack.c.bf16 %v6801_v29, %v6800_v26  ;;  %v6358_v5 = vmax.f32 %v6202_v2, %v6294_v57  ;;  %v7022_v63 = vadd.f32 %v12227_v7, %v7021_v27  ;;  %6243 = vmatmul.bf16.gmra.mxu3 %v6011_v49 }
 0x9f6   : > { %v6620_v38 = vpop.f32.mrf.mxu0 }
 0x9f7   : > { %v6399_v45 = vpack.c.bf16 %v6358_v5, %v6357_v0  ;;  %7166 = vst [vmem:[%s12233_s23 + $0x50] sm:$0xff] %v7022_v63  ;;  %8188 = vmatmul.msk.bf16.gmra.mxu1 %vm6890_vm4, %v6851_v18  ;;  %v6621_v58 = vadd.f32 %v12303_v20, %v6620_v38 }
 0x9f8   : > { %v6204_v34 = vpop.f32.mrf.mxu3 }
 0x9f9   : > { %8157 = vmatmul.msk.bf16.gmra.mxu0 %vm4888_vm3, %v6399_v45  ;;  %v6205_v19 = vadd.f32 %v12187_v31, %v6204_v34  ;;  %v6738_v12 = vmul.f32 0.1, %v6621_v58 }
 0x9fb   : > { %v6295_v55 = vmul.f32 0.1, %v6205_v19  ;;  %v6802_v30 = vmax.f32 %v6621_v58, %v6738_v12 }
 0x9fc   : > { %v7023_v46 = vpop.f32.mrf.mxu1 }
 0x9fd   : > { %v7024_v23 = vadd.f32 %v12227_v7, %v7023_v46  ;;  %v6359_v47 = vmax.f32 %v6205_v19, %v6295_v55 }
 0x9fe   : > { %v6622_v6 = vpop.f32.mrf.mxu0 }
 0x9ff   : > { %7167 = vst [vmem:[%s12233_s23 + $0x58] sm:$0xff] %v7024_v23  ;;  %v6623_v15 = vadd.f32 %v12303_v20, %v6622_v6 }
 0xa00   : > { %v6206_v54 = vpop.f32.mrf.mxu3 }
 0xa01   : > { %v6739_v51 = vmul.f32 0.1, %v6623_v15  ;;  %v6207_v43 = vadd.f32 %v12187_v31, %v6206_v54 }
 0xa03   : > { %v6803_v60 = vmax.f32 %v6623_v15, %v6739_v51  ;;  %v6296_v1 = vmul.f32 0.1, %v6207_v43 }
 0xa04   : > { %v7026_v17 = vpop.f32.mrf.mxu1 }
 0xa05   : > { %v6852_v16 = vpack.c.bf16 %v6803_v60, %v6802_v30  ;;  %v6360_v10 = vmax.f32 %v6207_v43, %v6296_v1  ;;  %v7027_v28 = vadd.f32 %v12227_v7, %v7026_v17 }
 0xa06   : > { %v6625_v35 = vpop.f32.mrf.mxu0 }
 0xa07   : > { %v6400_v50 = vpack.c.bf16 %v6360_v10, %v6359_v47  ;;  %7168 = vst [vmem:[%s12233_s23 + $0x60] sm:$0xff] %v7027_v28  ;;  %8189 = vmatmul.msk.bf16.gmra.mxu1 %vm6890_vm4, %v6852_v16  ;;  %v6626_v59 = vadd.f32 %v12303_v20, %v6625_v35 }
 0xa08   : > { %v6209_v36 = vpop.f32.mrf.mxu3 }
 0xa09   : > { %8158 = vmatmul.msk.bf16.gmra.mxu0 %vm4888_vm3, %v6400_v50  ;;  %v6210_v33 = vadd.f32 %v12187_v31, %v6209_v36  ;;  %v6740_v24 = vmul.f32 0.1, %v6626_v59 }
 0xa0b   : > { %v6297_v4 = vmul.f32 0.1, %v6210_v33  ;;  %v6804_v44 = vmax.f32 %v6626_v59, %v6740_v24 }
 0xa0c   : > { %v7028_v14 = vpop.f32.mrf.mxu1 }
 0xa0d   : > { %v7029_v11 = vadd.f32 %v12227_v7, %v7028_v14  ;;  %v6361_v37 = vmax.f32 %v6210_v33, %v6297_v4 }
 0xa0e   : > { %v6627_v41 = vpop.f32.mrf.mxu0 }
 0xa0f   : > { %7169 = vst [vmem:[%s12233_s23 + $0x68] sm:$0xff] %v7029_v11  ;;  %v6628_v48 = vadd.f32 %v12303_v20, %v6627_v41 }
 0xa10   : > { %v6211_v52 = vpop.f32.mrf.mxu3 }
 0xa11   : > { %v6741_v61 = vmul.f32 0.1, %v6628_v48  ;;  %v6212_v56 = vadd.f32 %v12187_v31, %v6211_v52 }
 0xa13   : > { %v6805_v53 = vmax.f32 %v6628_v48, %v6741_v61  ;;  %v6298_v8 = vmul.f32 0.1, %v6212_v56 }
 0xa14   : > { %v7031_v39 = vpop.f32.mrf.mxu1 }
 0xa15   : > { %v6853_v40 = vpack.c.bf16 %v6805_v53, %v6804_v44  ;;  %v6362_v62 = vmax.f32 %v6212_v56, %v6298_v8  ;;  %v7032_v42 = vadd.f32 %v12227_v7, %v7031_v39 }
 0xa16   : > { %v6630_v22 = vpop.f32.mrf.mxu0 }
 0xa17   : > { %v6401_v32 = vpack.c.bf16 %v6362_v62, %v6361_v37  ;;  %7170 = vst [vmem:[%s12233_s23 + $0x70] sm:$0xff] %v7032_v42  ;;  %8190 = vmatmul.msk.bf16.gmra.mxu1 %vm6890_vm4, %v6853_v40  ;;  %v6631_v25 = vadd.f32 %v12303_v20, %v6630_v22 }
 0xa18   : > { %v6214_v3 = vpop.f32.mrf.mxu3 }
 0xa19   : > { %8159 = vmatmul.msk.bf16.gmra.mxu0 %vm4888_vm3, %v6401_v32  ;;  %v6215_v9 = vadd.f32 %v12187_v31, %v6214_v3  ;;  %v6742_v26 = vmul.f32 0.1, %v6631_v25 }
 0xa1b   : > { %v6299_v49 = vmul.f32 0.1, %v6215_v9  ;;  %v6806_v18 = vmax.f32 %v6631_v25, %v6742_v26 }
 0xa1c   : > { %v7033_v21 = vpop.f32.mrf.mxu1 }
 0xa1d   : > { %v7034_v13 = vadd.f32 %v12227_v7, %v7033_v21  ;;  %v6363_v45 = vmax.f32 %v6215_v9, %v6299_v49 }
 0xa1e   : > { %v6632_v2 = vpop.f32.mrf.mxu0 }
 0xa1f   : > { %7171 = vst [vmem:[%s12233_s23 + $0x78] sm:$0xff] %v7034_v13  ;;  %v6633_v29 = vadd.f32 %v12303_v20, %v6632_v2 }
 0xa20   : > { %v6216_v57 = vpop.f32.mrf.mxu3 }
 0xa21   : > { %v6743_v27 = vmul.f32 0.1, %v6633_v29  ;;  %v6217_v0 = vadd.f32 %v12187_v31, %v6216_v57 }
 0xa23   : > { %v6807_v5 = vmax.f32 %v6633_v29, %v6743_v27  ;;  %v6300_v63 = vmul.f32 0.1, %v6217_v0 }
 0xa24   : > { %v7036_v38 = vpop.f32.mrf.mxu1 }
 0xa25   : > { %v6854_v34 = vpack.c.bf16 %v6807_v5, %v6806_v18  ;;  %v6364_v58 = vmax.f32 %v6217_v0, %v6300_v63  ;;  %v7037_v46 = vadd.f32 %v12227_v7, %v7036_v38 }
 0xa26   : > { %v6635_v19 = vpop.f32.mrf.mxu0 }
 0xa27   : > { %v6402_v23 = vpack.c.bf16 %v6364_v58, %v6363_v45  ;;  %7172 = vst [vmem:[%s12233_s23 + $0x80] sm:$0xff] %v7037_v46  ;;  %8191 = vmatmul.msk.bf16.gmra.mxu1 %vm6890_vm4, %v6854_v34  ;;  %v6636_v12 = vadd.f32 %v12303_v20, %v6635_v19 }
 0xa28   : > { %v6219_v6 = vpop.f32.mrf.mxu3 }
 0xa29   : > { %8160 = vmatmul.msk.bf16.gmra.mxu0 %vm4888_vm3, %v6402_v23  ;;  %v6220_v54 = vadd.f32 %v12187_v31, %v6219_v6  ;;  %v6744_v43 = vmul.f32 0.1, %v6636_v12 }
 0xa2b   : > { %v6301_v1 = vmul.f32 0.1, %v6220_v54  ;;  %v6808_v16 = vmax.f32 %v6636_v12, %v6744_v43 }
 0xa2c   : > { %v7038_v15 = vpop.f32.mrf.mxu1 }
 0xa2d   : > { %v7039_v55 = vadd.f32 %v12227_v7, %v7038_v15  ;;  %v6365_v50 = vmax.f32 %v6220_v54, %v6301_v1 }
 0xa2e   : > { %v6637_v51 = vpop.f32.mrf.mxu0 }
 0xa2f   : > { %7173 = vst [vmem:[%s12233_s23 + $0x88] sm:$0xff] %v7039_v55  ;;  %v6638_v30 = vadd.f32 %v12303_v20, %v6637_v51 }
 0xa30   : > { %v6221_v60 = vpop.f32.mrf.mxu3 }
 0xa31   : > { %v6745_v17 = vmul.f32 0.1, %v6638_v30  ;;  %v6222_v47 = vadd.f32 %v12187_v31, %v6221_v60 }
 0xa33   : > { %v6809_v10 = vmax.f32 %v6638_v30, %v6745_v17  ;;  %v6302_v28 = vmul.f32 0.1, %v6222_v47 }
 0xa34   : > { %v7041_v35 = vpop.f32.mrf.mxu1 }
 0xa35   : > { %v6855_v36 = vpack.c.bf16 %v6809_v10, %v6808_v16  ;;  %v6366_v59 = vmax.f32 %v6222_v47, %v6302_v28  ;;  %v7042_v14 = vadd.f32 %v12227_v7, %v7041_v35 }
 0xa36   : > { %v6640_v33 = vpop.f32.mrf.mxu0 }
 0xa37   : > { %v6403_v11 = vpack.c.bf16 %v6366_v59, %v6365_v50  ;;  %7174 = vst [vmem:[%s12233_s23 + $0x90] sm:$0xff] %v7042_v14  ;;  %8192 = vmatmul.msk.bf16.gmra.mxu1 %vm6890_vm4, %v6855_v36  ;;  %v6641_v24 = vadd.f32 %v12303_v20, %v6640_v33 }
 0xa38   : > { %v6224_v41 = vpop.f32.mrf.mxu3 }
 0xa39   : > { %8161 = vmatmul.msk.bf16.gmra.mxu0 %vm4888_vm3, %v6403_v11  ;;  %v6225_v52 = vadd.f32 %v12187_v31, %v6224_v41  ;;  %v6746_v56 = vmul.f32 0.1, %v6641_v24 }
 0xa3b   : > { %v6303_v8 = vmul.f32 0.1, %v6225_v52  ;;  %v6810_v40 = vmax.f32 %v6641_v24, %v6746_v56 }
 0xa3c   : > { %v7043_v48 = vpop.f32.mrf.mxu1 }
 0xa3d   : > { %v7044_v4 = vadd.f32 %v12227_v7, %v7043_v48  ;;  %v6367_v32 = vmax.f32 %v6225_v52, %v6303_v8 }
 0xa3e   : > { %v6642_v61 = vpop.f32.mrf.mxu0 }
 0xa3f   : > { %7175 = vst [vmem:[%s12233_s23 + $0x98] sm:$0xff] %v7044_v4  ;;  %v6643_v44 = vadd.f32 %v12303_v20, %v6642_v61 }
 0xa40   : > { %v6226_v53 = vpop.f32.mrf.mxu3 }
 0xa41   : > { %v6747_v39 = vmul.f32 0.1, %v6643_v44  ;;  %v6227_v37 = vadd.f32 %v12187_v31, %v6226_v53 }
 0xa43   : > { %v6811_v62 = vmax.f32 %v6643_v44, %v6747_v39  ;;  %v6304_v42 = vmul.f32 0.1, %v6227_v37 }
 0xa44   : > { %v7046_v22 = vpop.f32.mrf.mxu1 }
 0xa45   : > { %v6856_v3 = vpack.c.bf16 %v6811_v62, %v6810_v40  ;;  %v6368_v25 = vmax.f32 %v6227_v37, %v6304_v42  ;;  %v7047_v21 = vadd.f32 %v12227_v7, %v7046_v22 }
 0xa46   : > { %v6645_v9 = vpop.f32.mrf.mxu0 }
 0xa47   : > { %v6404_v13 = vpack.c.bf16 %v6368_v25, %v6367_v32  ;;  %7176 = vst [vmem:[%s12233_s23 + $0xa0] sm:$0xff] %v7047_v21  ;;  %8193 = vmatmul.msk.bf16.gmra.mxu1 %vm6890_vm4, %v6856_v3  ;;  %v6646_v26 = vadd.f32 %v12303_v20, %v6645_v9 }
 0xa48   : > { %v6229_v2 = vpop.f32.mrf.mxu3 }
 0xa49   : > { %8162 = vmatmul.msk.bf16.gmra.mxu0 %vm4888_vm3, %v6404_v13  ;;  %v6230_v57 = vadd.f32 %v12187_v31, %v6229_v2  ;;  %v6748_v0 = vmul.f32 0.1, %v6646_v26 }
 0xa4b   : > { %v6305_v63 = vmul.f32 0.1, %v6230_v57  ;;  %v6812_v34 = vmax.f32 %v6646_v26, %v6748_v0 }
 0xa4c   : > { %v7048_v29 = vpop.f32.mrf.mxu1 }
 0xa4d   : > { %v7049_v49 = vadd.f32 %v12227_v7, %v7048_v29  ;;  %v6369_v23 = vmax.f32 %v6230_v57, %v6305_v63 }
 0xa4e   : > { %v6647_v27 = vpop.f32.mrf.mxu0 }
 0xa4f   : > { %7177 = vst [vmem:[%s12233_s23 + $0xa8] sm:$0xff] %v7049_v49  ;;  %v6648_v18 = vadd.f32 %v12303_v20, %v6647_v27 }
 0xa50   : > { %v6231_v5 = vpop.f32.mrf.mxu3 }
 0xa51   : > { %v6749_v38 = vmul.f32 0.1, %v6648_v18  ;;  %v6232_v45 = vadd.f32 %v12187_v31, %v6231_v5 }
 0xa53   : > { %v6813_v58 = vmax.f32 %v6648_v18, %v6749_v38  ;;  %v6306_v46 = vmul.f32 0.1, %v6232_v45  ;;  %v8479_v18 = vld [vmem:[%s13107_s21] ss:$0 sm:$0xff] }
 0xa54   : > { %v7051_v19 = vpop.f32.mrf.mxu1 }
 0xa55   : > { %v6857_v6 = vpack.c.bf16 %v6813_v58, %v6812_v34  ;;  %v6370_v12 = vmax.f32 %v6232_v45, %v6306_v46  ;;  %v7052_v15 = vadd.f32 %v12227_v7, %v7051_v19 }
 0xa56   : > { %v6650_v54 = vpop.f32.mrf.mxu0 }
 0xa57   : > { %v6405_v55 = vpack.c.bf16 %v6370_v12, %v6369_v23  ;;  %7178 = vst [vmem:[%s12233_s23 + $0xb0] sm:$0xff] %v7052_v15  ;;  %8194 = vmatmul.msk.bf16.gmra.mxu1 %vm6890_vm4, %v6857_v6  ;;  %v6651_v43 = vadd.f32 %v12303_v20, %v6650_v54 }
 0xa58   : > { %v6234_v51 = vpop.f32.mrf.mxu3 }
 0xa59   : > { %8163 = vmatmul.msk.bf16.gmra.mxu0 %vm4888_vm3, %v6405_v55  ;;  %v6235_v60 = vadd.f32 %v12187_v31, %v6234_v51  ;;  %v6750_v47 = vmul.f32 0.1, %v6651_v43 }
 0xa5b   : > { %v6307_v28 = vmul.f32 0.1, %v6235_v60  ;;  %v6814_v36 = vmax.f32 %v6651_v43, %v6750_v47 }
 0xa5c   : > { %v7053_v30 = vpop.f32.mrf.mxu1 }
 0xa5d   : > { %v7054_v1 = vadd.f32 %v12227_v7, %v7053_v30  ;;  %v6371_v11 = vmax.f32 %v6235_v60, %v6307_v28 }
 0xa5e   : > { %v6652_v17 = vpop.f32.mrf.mxu0 }
 0xa5f   : > { %7179 = vst [vmem:[%s12233_s23 + $0xb8] sm:$0xff] %v7054_v1  ;;  %v6653_v16 = vadd.f32 %v12303_v20, %v6652_v17 }
 0xa60   : > { %v6236_v10 = vpop.f32.mrf.mxu3 }
 0xa61   : > { %v6751_v35 = vmul.f32 0.1, %v6653_v16  ;;  %v6237_v50 = vadd.f32 %v12187_v31, %v6236_v10 }
 0xa63   : > { %v6815_v59 = vmax.f32 %v6653_v16, %v6751_v35  ;;  %v6308_v14 = vmul.f32 0.1, %v6237_v50 }
 0xa64   : > { %v7056_v33 = vpop.f32.mrf.mxu1 }
 0xa65   : > { %v6858_v41 = vpack.c.bf16 %v6815_v59, %v6814_v36  ;;  %v6372_v24 = vmax.f32 %v6237_v50, %v6308_v14  ;;  %v7057_v48 = vadd.f32 %v12227_v7, %v7056_v33 }
 0xa66   : > { %v6655_v52 = vpop.f32.mrf.mxu0 }
 0xa67   : > { %v6406_v4 = vpack.c.bf16 %v6372_v24, %v6371_v11  ;;  %7180 = vst [vmem:[%s12233_s23 + $0xc0] sm:$0xff] %v7057_v48  ;;  %8195 = vmatmul.msk.bf16.gmra.mxu1 %vm6890_vm4, %v6858_v41  ;;  %v6656_v56 = vadd.f32 %v12303_v20, %v6655_v52 }
 0xa68   : > { %v6239_v61 = vpop.f32.mrf.mxu3 }
 0xa69   : > { %8164 = vmatmul.msk.bf16.gmra.mxu0 %vm4888_vm3, %v6406_v4  ;;  %v6240_v53 = vadd.f32 %v12187_v31, %v6239_v61  ;;  %v6752_v37 = vmul.f32 0.1, %v6656_v56 }
 0xa6b   : > { %v6309_v42 = vmul.f32 0.1, %v6240_v53  ;;  %v6816_v3 = vmax.f32 %v6656_v56, %v6752_v37 }
 0xa6c   : > { %v7058_v44 = vpop.f32.mrf.mxu1 }
 0xa6d   : > { %v7059_v8 = vadd.f32 %v12227_v7, %v7058_v44  ;;  %v6373_v13 = vmax.f32 %v6240_v53, %v6309_v42 }
 0xa6e   : > { %v6657_v39 = vpop.f32.mrf.mxu0 }
 0xa6f   : > { %7181 = vst [vmem:[%s12233_s23 + $0xc8] sm:$0xff] %v7059_v8  ;;  %v6658_v40 = vadd.f32 %v12303_v20, %v6657_v39 }
 0xa70   : > { %v6241_v62 = vpop.f32.mrf.mxu3 }
 0xa71   : > { %v6753_v22 = vmul.f32 0.1, %v6658_v40  ;;  %v6242_v32 = vadd.f32 %v12187_v31, %v6241_v62 }
 0xa73   : > { %v6817_v25 = vmax.f32 %v6658_v40, %v6753_v22  ;;  %v6310_v21 = vmul.f32 0.1, %v6242_v32 }
 0xa74   : > { %v7061_v9 = vpop.f32.mrf.mxu1 }
 0xa75   : > { %v6859_v2 = vpack.c.bf16 %v6817_v25, %v6816_v3  ;;  %v6374_v26 = vmax.f32 %v6242_v32, %v6310_v21  ;;  %v7062_v29 = vadd.f32 %v12227_v7, %v7061_v9 }
 0xa76   : > { %v6660_v57 = vpop.f32.mrf.mxu0 }
 0xa77   : > { %v6407_v49 = vpack.c.bf16 %v6374_v26, %v6373_v13  ;;  %7182 = vst [vmem:[%s12233_s23 + $0xd0] sm:$0xff] %v7062_v29  ;;  %8196 = vmatmul.msk.bf16.gmra.mxu1 %vm6890_vm4, %v6859_v2  ;;  %v6661_v31 = vadd.f32 %v12303_v20, %v6660_v57 }
 0xa78   : > { %v6244_v27 = vpop.f32.mrf.mxu3 }
 0xa79   : > { %8165 = vmatmul.msk.bf16.gmra.mxu0 %vm4888_vm3, %v6407_v49  ;;  %v6245_v5 = vadd.f32 %v8479_v18, %v6244_v27  ;;  %v6754_v45 = vmul.f32 0.1, %v6661_v31 }
 0xa7b   : > { %v6311_v46 = vmul.f32 0.1, %v6245_v5  ;;  %v6818_v6 = vmax.f32 %v6661_v31, %v6754_v45 }
 0xa7c   : > { %v7063_v0 = vpop.f32.mrf.mxu1 }
 0xa7d   : > { %v7064_v63 = vadd.f32 %v12227_v7, %v7063_v0  ;;  %v6375_v55 = vmax.f32 %v6245_v5, %v6311_v46 }
 0xa7e   : > { %v6662_v38 = vpop.f32.mrf.mxu0 }
 0xa7f   : > { %7183 = vst [vmem:[%s12233_s23 + $0xd8] sm:$0xff] %v7064_v63  ;;  %v6663_v34 = vadd.f32 %v12303_v20, %v6662_v38 }
 0xa80   : > { %v6246_v58 = vpop.f32.mrf.mxu3 }
 0xa81   : > { %v6755_v19 = vmul.f32 0.1, %v6663_v34  ;;  %v6247_v23 = vadd.f32 %v8479_v18, %v6246_v58 }
 0xa83   : > { %v6819_v12 = vmax.f32 %v6663_v34, %v6755_v19  ;;  %v6312_v15 = vmul.f32 0.1, %v6247_v23 }
 0xa84   : > { %v7066_v54 = vpop.f32.mrf.mxu1 }
 0xa85   : > { %v6860_v51 = vpack.c.bf16 %v6819_v12, %v6818_v6  ;;  %v6376_v43 = vmax.f32 %v6247_v23, %v6312_v15  ;;  %v7067_v30 = vadd.f32 %v12227_v7, %v7066_v54 }
 0xa86   : > { %v6665_v60 = vpop.f32.mrf.mxu0 }
 0xa87   : > { %v6408_v1 = vpack.c.bf16 %v6376_v43, %v6375_v55  ;;  %7184 = vst [vmem:[%s12233_s23 + $0xe0] sm:$0xff] %v7067_v30  ;;  %8197 = vmatmul.msk.bf16.gmra.mxu1 %vm6890_vm4, %v6860_v51  ;;  %v6666_v17 = vadd.f32 %v12303_v20, %v6665_v60 }
 0xa89   : > { %8166 = vmatmul.msk.bf16.gmra.mxu0 %vm4888_vm3, %v6408_v1  ;;  %v6756_v28 = vmul.f32 0.1, %v6666_v17 }
 0xa8b   : > { %v6820_v36 = vmax.f32 %v6666_v17, %v6756_v28 }
 0xa8c   : > { %v7068_v47 = vpop.f32.mrf.mxu1 }
 0xa8d   : > { %v7069_v16 = vadd.f32 %v12227_v7, %v7068_v47  ;;  %v12439_v47 = vld [vmem:[%s13129_s17] ss:$0 sm:$0xff] }
 0xa8e   : > { %v6667_v10 = vpop.f32.mrf.mxu0 }
 0xa8f   : > { %7185 = vst [vmem:[%s12233_s23 + $0xe8] sm:$0xff] %v7069_v16  ;;  %v6668_v35 = vadd.f32 %v12303_v20, %v6667_v10 }
 0xa91   : > { %v6757_v50 = vmul.f32 0.1, %v6668_v35 }
 0xa93   : > { %v6821_v59 = vmax.f32 %v6668_v35, %v6757_v50 }
 0xa94   : > { %v7071_v14 = vpop.f32.mrf.mxu1 }
 0xa95   : > { %v6861_v33 = vpack.c.bf16 %v6821_v59, %v6820_v36  ;;  %v7072_v11 = vadd.f32 %v12227_v7, %v7071_v14 }
 0xa96   : > { %v6670_v41 = vpop.f32.mrf.mxu0 }
 0xa97   : > { %7186 = vst [vmem:[%s12233_s23 + $0xf0] sm:$0xff] %v7072_v11  ;;  %8198 = vmatmul.msk.bf16.gmra.mxu1 %vm6890_vm4, %v6861_v33  ;;  %v6671_v24 = vadd.f32 %v12303_v20, %v6670_v41 }
 0xa99   : > { %v6758_v61 = vmul.f32 0.1, %v6671_v24 }
 0xa9b   : > { %v6822_v53 = vmax.f32 %v6671_v24, %v6758_v61 }
 0xa9c   : > { %v7073_v48 = vpop.f32.mrf.mxu1 }
 0xa9d   : > { %v7074_v52 = vadd.f32 %v12227_v7, %v7073_v48 }
 0xa9e   : > { %v6672_v4 = vpop.f32.mrf.mxu0 }
 0xa9f   : > { %7187 = vst [vmem:[%s12233_s23 + $0xf8] sm:$0xff] %v7074_v52  ;;  %v6673_v56 = vadd.f32 %v12303_v20, %v6672_v4 }
 0xaa1   : > { %v6759_v44 = vmul.f32 0.1, %v6673_v56 }
 0xaa3   : > { %v6823_v8 = vmax.f32 %v6673_v56, %v6759_v44 }
 0xaa4   : > { %v7076_v39 = vpop.f32.mrf.mxu1 }
 0xaa5   : > { %v6862_v37 = vpack.c.bf16 %v6823_v8, %v6822_v53  ;;  %v7077_v40 = vadd.f32 %v12227_v7, %v7076_v39 }
 0xaa6   : > { %v6675_v62 = vpop.f32.mrf.mxu0 }
 0xaa7   : > { %7188 = vst [vmem:[%s12233_s23 + $0x100] sm:$0xff] %v7077_v40  ;;  %8199 = vmatmul.msk.bf16.gmra.mxu1 %vm6890_vm4, %v6862_v37  ;;  %v6676_v42 = vadd.f32 %v12303_v20, %v6675_v62 }
 0xaa9   : > { %v6760_v25 = vmul.f32 0.1, %v6676_v42 }
 0xaab   : > { %v6824_v13 = vmax.f32 %v6676_v42, %v6760_v25 }
 0xaac   : > { %v7078_v22 = vpop.f32.mrf.mxu1 }
 0xaad   : > { %v7079_v32 = vadd.f32 %v12227_v7, %v7078_v22 }
 0xaae   : > { %v6677_v3 = vpop.f32.mrf.mxu0 }
 0xaaf   : > { %7189 = vst [vmem:[%s12233_s23 + $0x108] sm:$0xff] %v7079_v32  ;;  %v6678_v21 = vadd.f32 %v12303_v20, %v6677_v3 }
 0xab1   : > { %v6761_v9 = vmul.f32 0.1, %v6678_v21 }
 0xab3   : > { %v6825_v2 = vmax.f32 %v6678_v21, %v6761_v9 }
 0xab4   : > { %v7081_v26 = vpop.f32.mrf.mxu1 }
 0xab5   : > { %v6863_v29 = vpack.c.bf16 %v6825_v2, %v6824_v13  ;;  %v7082_v57 = vadd.f32 %v12227_v7, %v7081_v26 }
 0xab6   : > { %v6680_v49 = vpop.f32.mrf.mxu0 }
 0xab7   : > { %7190 = vst [vmem:[%s12233_s23 + $0x110] sm:$0xff] %v7082_v57  ;;  %8200 = vmatmul.msk.bf16.gmra.mxu1 %vm6890_vm4, %v6863_v29  ;;  %v6681_v27 = vadd.f32 %v12303_v20, %v6680_v49 }
 0xab9   : > { %v6762_v5 = vmul.f32 0.1, %v6681_v27 }
 0xabb   : > { %v6826_v45 = vmax.f32 %v6681_v27, %v6762_v5 }
 0xabc   : > { %v7083_v31 = vpop.f32.mrf.mxu1 }
 0xabd   : > { %v7084_v0 = vadd.f32 %v12227_v7, %v7083_v31 }
 0xabe   : > { %v6682_v18 = vpop.f32.mrf.mxu0 }
 0xabf   : > { %7191 = vst [vmem:[%s12233_s23 + $0x118] sm:$0xff] %v7084_v0  ;;  %v6683_v63 = vadd.f32 %v12303_v20, %v6682_v18 }
 0xac1   : > { %v6763_v38 = vmul.f32 0.1, %v6683_v63 }
 0xac3   : > { %v6827_v34 = vmax.f32 %v6683_v63, %v6763_v38 }
 0xac4   : > { %v7086_v58 = vpop.f32.mrf.mxu1 }
 0xac5   : > { %v6864_v46 = vpack.c.bf16 %v6827_v34, %v6826_v45  ;;  %v7087_v19 = vadd.f32 %v12227_v7, %v7086_v58 }
 0xac6   : > { %v6685_v23 = vpop.f32.mrf.mxu0 }
 0xac7   : > { %7192 = vst [vmem:[%s12233_s23 + $0x120] sm:$0xff] %v7087_v19  ;;  %8201 = vmatmul.msk.bf16.gmra.mxu1 %vm6890_vm4, %v6864_v46  ;;  %v6686_v6 = vadd.f32 %v12303_v20, %v6685_v23 }
 0xac9   : > { %v6764_v55 = vmul.f32 0.1, %v6686_v6 }
 0xacb   : > { %v6828_v30 = vmax.f32 %v6686_v6, %v6764_v55 }
 0xacc   : > { %v7088_v12 = vpop.f32.mrf.mxu1 }
 0xacd   : > { %v7089_v15 = vadd.f32 %v12227_v7, %v7088_v12 }
 0xace   : > { %v6687_v54 = vpop.f32.mrf.mxu0 }
 0xacf   : > { %7193 = vst [vmem:[%s12233_s23 + $0x128] sm:$0xff] %v7089_v15  ;;  %v6688_v51 = vadd.f32 %v12303_v20, %v6687_v54 }
 0xad1   : > { %v6765_v43 = vmul.f32 0.1, %v6688_v51 }
 0xad3   : > { %v6829_v60 = vmax.f32 %v6688_v51, %v6765_v43 }
 0xad4   : > { %v7091_v1 = vpop.f32.mrf.mxu1 }
 0xad5   : > { %v6865_v17 = vpack.c.bf16 %v6829_v60, %v6828_v30  ;;  %v7092_v16 = vadd.f32 %v12439_v47, %v7091_v1 }
 0xad6   : > { %v6690_v10 = vpop.f32.mrf.mxu0 }
 0xad7   : > { %7194 = vst [vmem:[%s12233_s23 + $0x130] sm:$0xff] %v7092_v16  ;;  %8202 = vmatmul.msk.bf16.gmra.mxu1 %vm6890_vm4, %v6865_v17  ;;  %v6691_v7 = vadd.f32 %v12303_v20, %v6690_v10 }
 0xad9   : > { %v6766_v36 = vmul.f32 0.1, %v6691_v7 }
 0xadb   : > { %v6830_v33 = vmax.f32 %v6691_v7, %v6766_v36 }
 0xadc   : > { %v7093_v28 = vpop.f32.mrf.mxu1 }
 0xadd   : > { %v7094_v35 = vadd.f32 %v12439_v47, %v7093_v28 }
 0xade   : > { %v6692_v50 = vpop.f32.mrf.mxu0 }
 0xadf   : > { %7195 = vst [vmem:[%s12233_s23 + $0x138] sm:$0xff] %v7094_v35  ;;  %v6693_v59 = vadd.f32 %v12303_v20, %v6692_v50 }
 0xae1   : > { %v6767_v14 = vmul.f32 0.1, %v6693_v59 }
 0xae3   : > { %v6831_v11 = vmax.f32 %v6693_v59, %v6767_v14 }
 0xae4   : > { %v7096_v41 = vpop.f32.mrf.mxu1 }
 0xae5   : > { %v6866_v24 = vpack.c.bf16 %v6831_v11, %v6830_v33  ;;  %v7097_v48 = vadd.f32 %v12439_v47, %v7096_v41 }
 0xae6   : > { %v6695_v52 = vpop.f32.mrf.mxu0 }
 0xae7   : > { %7196 = vst [vmem:[%s12233_s23 + $0x140] sm:$0xff] %v7097_v48  ;;  %8203 = vmatmul.msk.bf16.gmra.mxu1 %vm6890_vm4, %v6866_v24  ;;  %v6696_v4 = vadd.f32 %v12303_v20, %v6695_v52 }
 0xae9   : > { %v6768_v53 = vmul.f32 0.1, %v6696_v4 }
 0xaeb   : > { %v6832_v37 = vmax.f32 %v6696_v4, %v6768_v53 }
 0xaec   : > { %v7098_v61 = vpop.f32.mrf.mxu1 }
 0xaed   : > { %v7099_v56 = vadd.f32 %v12439_v47, %v7098_v61 }
 0xaee   : > { %v6697_v44 = vpop.f32.mrf.mxu0 }
 0xaef   : > { %7197 = vst [vmem:[%s12233_s23 + $0x148] sm:$0xff] %v7099_v56  ;;  %v6698_v8 = vadd.f32 %v12303_v20, %v6697_v44 }
 0xaf1   : > { %v6769_v39 = vmul.f32 0.1, %v6698_v8 }
 0xaf3   : > { %v6833_v40 = vmax.f32 %v6698_v8, %v6769_v39 }
 0xaf4   : > { %v7101_v62 = vpop.f32.mrf.mxu1 }
 0xaf5   : > { %v6867_v42 = vpack.c.bf16 %v6833_v40, %v6832_v37  ;;  %v7102_v22 = vadd.f32 %v12439_v47, %v7101_v62 }
 0xaf6   : > { %v6700_v32 = vpop.f32.mrf.mxu0 }
 0xaf7   : > { %7198 = vst [vmem:[%s12233_s23 + $0x150] sm:$0xff] %v7102_v22  ;;  %8204 = vmatmul.msk.bf16.gmra.mxu1 %vm6890_vm4, %v6867_v42  ;;  %v6701_v3 = vadd.f32 %v12303_v20, %v6700_v32 }
 0xaf9   : > { %v6770_v13 = vmul.f32 0.1, %v6701_v3 }
 0xafb   : > { %v6834_v29 = vmax.f32 %v6701_v3, %v6770_v13 }
 0xafc   : > { %v7103_v25 = vpop.f32.mrf.mxu1 }
 0xafd   : > { %v7104_v21 = vadd.f32 %v12439_v47, %v7103_v25 }
 0xafe   : > { %v6702_v9 = vpop.f32.mrf.mxu0 }
 0xaff   : > { %7199 = vst [vmem:[%s12233_s23 + $0x158] sm:$0xff] %v7104_v21  ;;  %v6703_v2 = vadd.f32 %v12303_v20, %v6702_v9 }
 0xb01   : > { %v6771_v26 = vmul.f32 0.1, %v6703_v2 }
 0xb03   : > { %v6835_v57 = vmax.f32 %v6703_v2, %v6771_v26 }
 0xb04   : > { %v7106_v49 = vpop.f32.mrf.mxu1 }
 0xb05   : > { %v6868_v27 = vpack.c.bf16 %v6835_v57, %v6834_v29  ;;  %v7107_v31 = vadd.f32 %v12439_v47, %v7106_v49 }
 0xb06   : > { %v6705_v0 = vpop.f32.mrf.mxu0 }
 0xb07   : > { %7200 = vst [vmem:[%s12233_s23 + $0x160] sm:$0xff] %v7107_v31  ;;  %8205 = vmatmul.msk.bf16.gmra.mxu1 %vm6890_vm4, %v6868_v27  ;;  %v6706_v18 = vadd.f32 %v12303_v20, %v6705_v0 }
 0xb09   : > { %v6772_v45 = vmul.f32 0.1, %v6706_v18 }
 0xb0b   : > { %v6836_v46 = vmax.f32 %v6706_v18, %v6772_v45 }
 0xb0c   : > { %v7108_v5 = vpop.f32.mrf.mxu1 }
 0xb0d   : > { %v7109_v63 = vadd.f32 %v12439_v47, %v7108_v5 }
 0xb0e   : > { %v6707_v38 = vpop.f32.mrf.mxu0 }
 0xb0f   : > { %7201 = vst [vmem:[%s12233_s23 + $0x168] sm:$0xff] %v7109_v63  ;;  %v6708_v34 = vadd.f32 %v12303_v20, %v6707_v38 }
 0xb11   : > { %v6773_v58 = vmul.f32 0.1, %v6708_v34 }
 0xb13   : > { %v6837_v19 = vmax.f32 %v6708_v34, %v6773_v58 }
 0xb14   : > { %v7111_v23 = vpop.f32.mrf.mxu1 }
 0xb15   : > { %v6869_v6 = vpack.c.bf16 %v6837_v19, %v6836_v46  ;;  %v7112_v12 = vadd.f32 %v12439_v47, %v7111_v23 }
 0xb17   : > { %7202 = vst [vmem:[%s12233_s23 + $0x170] sm:$0xff] %v7112_v12  ;;  %8206 = vmatmul.msk.bf16.gmra.mxu1 %vm6890_vm4, %v6869_v6 }
 0xb1c   : > { %v7113_v15 = vpop.f32.mrf.mxu1 }
 0xb1d   : > { %v7114_v54 = vadd.f32 %v12439_v47, %v7113_v15 }
 0xb1f   : > { %7203 = vst [vmem:[%s12233_s23 + $0x178] sm:$0xff] %v7114_v54 }
 0xb24   : > { %v7116_v55 = vpop.f32.mrf.mxu1 }
 0xb25   : > { %v7117_v20 = vadd.f32 %v12439_v47, %v7116_v55 }
 0xb27   : > { %7204 = vst [vmem:[%s12233_s23 + $0x180] sm:$0xff] %v7117_v20 }
 0xb2c   : > { %v7118_v51 = vpop.f32.mrf.mxu1 }
 0xb2d   : > { %v7119_v43 = vadd.f32 %v12439_v47, %v7118_v51 }
 0xb2f   : > { %7205 = vst [vmem:[%s12233_s23 + $0x188] sm:$0xff] %v7119_v43 }
 0xb34   : > { %v7121_v30 = vpop.f32.mrf.mxu1 }
 0xb35   : > { %v7122_v60 = vadd.f32 %v12439_v47, %v7121_v30 }
 0xb37   : > { %7206 = vst [vmem:[%s12233_s23 + $0x190] sm:$0xff] %v7122_v60 }
 0xb3c   : > { %v7123_v1 = vpop.f32.mrf.mxu1 }
 0xb3d   : > { %v7124_v17 = vadd.f32 %v12439_v47, %v7123_v1 }
 0xb3f   : > { %7207 = vst [vmem:[%s12233_s23 + $0x198] sm:$0xff] %v7124_v17 }
 0xb44   : > { %v7126_v16 = vpop.f32.mrf.mxu1 }
 0xb45   : > { %v7127_v10 = vadd.f32 %v12439_v47, %v7126_v16 }
 0xb47   : > { %7208 = vst [vmem:[%s12233_s23 + $0x1a0] sm:$0xff] %v7127_v10 }
 0xb4c   : > { %v7128_v7 = vpop.f32.mrf.mxu1 }
 0xb4d   : > { %v7129_v28 = vadd.f32 %v12439_v47, %v7128_v7 }
 0xb4f   : > { %7209 = vst [vmem:[%s12233_s23 + $0x1a8] sm:$0xff] %v7129_v28 }
 0xb54   : > { %v7131_v35 = vpop.f32.mrf.mxu1 }
 0xb55   : > { %v7132_v50 = vadd.f32 %v12439_v47, %v7131_v35 }
 0xb57   : > { %7210 = vst [vmem:[%s12233_s23 + $0x1b0] sm:$0xff] %v7132_v50 }
 0xb5c   : > { %v7133_v36 = vpop.f32.mrf.mxu1 }
 0xb5d   : > { %v7134_v59 = vadd.f32 %v12439_v47, %v7133_v36 }
 0xb5f   : > { %7211 = vst [vmem:[%s12233_s23 + $0x1b8] sm:$0xff] %v7134_v59 }
 0xb64   : > { %v7136_v14 = vpop.f32.mrf.mxu1 }
 0xb65   : > { %v7137_v33 = vadd.f32 %v12439_v47, %v7136_v14 }
 0xb67   : > { %7212 = vst [vmem:[%s12233_s23 + $0x1c0] sm:$0xff] %v7137_v33 }
 0xb6c   : > { %v7138_v11 = vpop.f32.mrf.mxu1 }
 0xb6d   : > { %v7139_v41 = vadd.f32 %v12439_v47, %v7138_v11 }
 0xb6f   : > { %7213 = vst [vmem:[%s12233_s23 + $0x1c8] sm:$0xff] %v7139_v41 }
 0xb74   : > { %v7141_v24 = vpop.f32.mrf.mxu1 }
 0xb75   : > { %v7142_v48 = vadd.f32 %v12439_v47, %v7141_v24 }
 0xb77   : > { %7214 = vst [vmem:[%s12233_s23 + $0x1d0] sm:$0xff] %v7142_v48 }
 0xb7c   : > { %v7143_v52 = vpop.f32.mrf.mxu1 }
 0xb7d   : > { %v7144_v4 = vadd.f32 %v12439_v47, %v7143_v52 }
 0xb7f   : > { %7215 = vst [vmem:[%s12233_s23 + $0x1d8] sm:$0xff] %v7144_v4 }
 0xb84   : > { %v7146_v61 = vpop.f32.mrf.mxu1 }
 0xb85   : > { %v7147_v56 = vadd.f32 %v12439_v47, %v7146_v61 }
 0xb87   : > { %7216 = vst [vmem:[%s12233_s23 + $0x1e0] sm:$0xff] %v7147_v56 }
 0xb8c   : > { %v7148_v44 = vpop.f32.mrf.mxu1 }
 0xb8d   : > { %v7149_v53 = vadd.f32 %v12439_v47, %v7148_v44 }
 0xb8f   : > { %7217 = vst [vmem:[%s12233_s23 + $0x1e8] sm:$0xff] %v7149_v53 }
 0xb94   : > { %v7151_v8 = vpop.f32.mrf.mxu1 }
 0xb95   : > { %v7152_v39 = vadd.f32 %v12439_v47, %v7151_v8 }
 0xb97   : > { %7218 = vst [vmem:[%s12233_s23 + $0x1f0] sm:$0xff] %v7152_v39 }
 0xb9c   : > { %v7153_v37 = vpop.f32.mrf.mxu1 }
 0xb9d   : > { %v7154_v40 = vadd.f32 %v12439_v47, %v7153_v37 }
 0xb9f   : > { %7219 = vst [vmem:[%s12233_s23 + $0x1f8] sm:$0xff] %v7154_v40 }
 0xba0   : > { %8538 = shalt.err (!%p8535_p4)
}
 0xba1   : > { %s8581_s26 = smov 128   ;;  %s8582_s23 = smov 8  }
 0xba2   : > { %8415 = dma.vmem_to_hbm [thread:$0]  (%p8737_p10), %s7234_s0, 8192, %s7236_s5, %s7221_s6, %s8581_s26, %s8581_s26, %s8582_s23  }
 0xba3 PF: > { %s13133_s9 = sld [smem:[#allocation8_spill]]  ;;  %p8426_p5 = scmp.ge.s32.totalorder %s8577_s24, 2 }
 0xba5   : > { %p8422_p7 = pnand %p8426_p5, %p8741_p11 }
 0xba7   : > { %p8423_p8 = pneg %p8422_p7 }
 0xba9   : > { %s7250_s8 = sand.u32 1, %s13133_s9  }
 0xbaa   : > { %s7251_s4 = scalar_lea.sflag [#allocation4], %s7250_s8 }
 0xbab   : > { %8560 = dma.done.wait (%p8423_p8), %s7251_s4, 8192  }
 0xbac   : > { %8562 = vsyncadd (%p8423_p8), %s7251_s4, 4294959104  ;;  %s13135_s24 = sld [smem:[#allocation11_spill]]  ;;  %s13138_s1 = smov %s8569_s22 }
 0xbad   : > { %s13136_s7 = sld [smem:[#allocation9_spill]] }
 0xbae   : > { %s13137_s23 = sld [smem:[#allocation12_spill]] }
 0xbb2   : > { %p33_p9 = scmp.ge.s32.totalorder %s13135_s24, 5  }
 0xbb3   : > { %s13139_s22 = smov %s13136_s7 }
 0xbb4   :  { %35 = sbr.rel (!%p33_p9) target bundleno = 21 (0x15), region = 145 }
 0xbb9   :  { %7257 = vsyncpa [#allocation3], 1 }
 0xbba   :  { %7259 = vsyncpa [#allocation3 + $0x1], 1 }
 0xbbb   :  { %7260 = vsyncpa [#allocation4], 1 }
 0xbbc   :  { %7262 = vsyncpa [#allocation4 + $0x1], 1 }

</bundles_post_ra>
